<compile_context>
chip_gen: v7x
topology: tpu7x:2x2x1
jax: 0.10.0
libtpu: 0.0.40
codegen_flags: <defaults>
</compile_context>

<pallas_src>
import numpy as np
import jax
import jax.numpy as jnp
from jax.experimental import pallas as pl
from jax.experimental.pallas import tpu as pltpu

_BN_EPS = 1e-5
_HIGHEST = jax.lax.Precision.HIGHEST


def compute_num_inv(C):
    return 6 * C - 1


# ----------------------------------------------------------------------------
# Fixed Gaussian-RBF derivative stencils (the module's non-learnable conv_weights).
# TODO(synk): `get_rbf('ga')` is an external dependency of the reference module; the
# stencils here are analytic Gaussian derivatives (eps=0.99, 7x7, same coordinate
# convention as make_coord), ordered like self.conv_weights = [dx, dy, dxx, dyy].
def make_gauss_stencils(kernel_size=7, eps=0.99):
    half = kernel_size // 2
    idx = np.arange(kernel_size)
    xs = (idx[None, :] - half).astype(np.float64)   # x varies along columns
    ys = (half - idx[:, None]).astype(np.float64)   # y decreases along rows
    e2 = eps * eps
    phi = np.exp(-e2 * (xs * xs + ys * ys))
    d_dx = -2.0 * e2 * xs * phi
    d_dy = -2.0 * e2 * ys * phi
    d_dxx = (4.0 * e2 * e2 * xs * xs - 2.0 * e2) * phi
    d_dyy = (4.0 * e2 * e2 * ys * ys - 2.0 * e2) * phi
    # conv_weights order in the reference: [diff(0,1), diff(1,0), diff(0,2), diff(2,0)]
    return (d_dy.astype(np.float32), d_dx.astype(np.float32),
            d_dyy.astype(np.float32), d_dxx.astype(np.float32))


# ----------------------------------------------------------------------------
# Precompute (HW, HW) matrices M so that u_flat @ M equals
# F.conv2d(u, stencil, padding=3, groups=C) on the flattened spatial axis.
# This moves the depthwise stencil work onto the otherwise-idle MXU.
def make_deriv_matrices(H, W, stencils):
    HW = H * W
    mats = []
    for k in stencils:
        K = k.shape[0]
        P = K // 2
        S = np.zeros((HW, HW), np.float32)
        for h in range(H):
            for w in range(W):
                p = h * W + w
                for i in range(K):
                    hh = h + i - P
                    if hh < 0 or hh >= H:
                        continue
                    for j in range(K):
                        ww = w + j - P
                        if ww < 0 or ww >= W:
                            continue
                        S[p, hh * W + ww] += float(k[i, j])
        mats.append(jnp.asarray(np.ascontiguousarray(S.T)))   # out = u_flat @ mats[i]
    return mats


# ----------------------------------------------------------------------------
# One fused iteration kernel: derivative convs (MXU) + invariants + normalization
# + residual 1x1-conv block, with an optional fused "lift" or "head" tail.
def _make_iter_kernel(C, step_val, tail):
    def _invariants_and_residual(u_ref, sx_ref, sy_ref, sxx_ref, syy_ref,
                                 w1_ref, b1_ref, w2_ref, b2_ref, inv_sc):
        u = u_ref[0]                                            # (C, HW)

        def dconv(v, s_ref):
            return jnp.dot(v, s_ref[...], preferred_element_type=jnp.float32,
                           precision=_HIGHEST)

        ux = dconv(u, sx_ref)
        uy = dconv(u, sy_ref)
        uxx = dconv(u, sxx_ref)
        uyy = dconv(u, syy_ref)
        uxy = dconv(uy, sx_ref)                                 # uxy = dx(dy(u))

        uxux = ux * ux
        uyuy = uy * uy
        uxuy = ux * uy
        uxuyuxy = uxuy * uxy

        inv2 = uxux + uyuy
        inv3 = uxux * uxx + 2.0 * uxuyuxy + uyuy * uyy
        inv4 = uyuy * uxx - 2.0 * uxuyuxy + uxux * uyy
        inv5 = uxuy * (uyy - uxx) + (uxux - uyuy) * uxy
        inv6 = ux[1:] * ux[:-1] + uy[1:] * uy[:-1]              # (C-1, HW)

        # Per-sample max-abs normalizers; max-of-maxes == max over the concatenation.
        # Exact scalar reciprocal (not approx) to preserve reference numerics.
        r1 = 1.0 / jnp.max(jnp.abs(u))
        r345 = 1.0 / jnp.maximum(jnp.max(jnp.abs(inv3)),
                                 jnp.maximum(jnp.max(jnp.abs(inv4)),
                                             jnp.max(jnp.abs(inv5))))
        r26 = 1.0 / jnp.maximum(jnp.max(jnp.abs(inv2)), jnp.max(jnp.abs(inv6)))

        # Assemble invariants directly into a VMEM scratch (no concatenates, no HBM).
        inv_sc[0:C, :] = u * r1
        inv_sc[C:2 * C, :] = inv3 * r345
        inv_sc[2 * C:3 * C, :] = inv4 * r345
        inv_sc[3 * C:4 * C, :] = inv5 * r345
        inv_sc[4 * C:5 * C, :] = inv2 * r26
        inv_sc[5 * C:6 * C - 1, :] = inv6 * r26

        # Residual PDE step: conv1+BN+ReLU, conv2+BN, u = relu(u + step*o).
        h = jnp.dot(w1_ref[...], inv_sc[...], preferred_element_type=jnp.float32,
                    precision=_HIGHEST) + b1_ref[...]
        h = jnp.maximum(h, 0.0)
        o = jnp.dot(w2_ref[...], h, preferred_element_type=jnp.float32,
                    precision=_HIGHEST) + b2_ref[...]
        return jnp.maximum(u + step_val * o, 0.0)

    if tail == "lift":
        def kernel(u_ref, sx_ref, sy_ref, sxx_ref, syy_ref,
                   w1_ref, b1_ref, w2_ref, b2_ref, wl_ref, bl_ref,
                   out_ref, inv_sc):
            u_new = _invariants_and_residual(u_ref, sx_ref, sy_ref, sxx_ref, syy_ref,
                                             w1_ref, b1_ref, w2_ref, b2_ref, inv_sc)
            # Next iteration's lift 1x1 conv (+folded BN) + ReLU fused here; the 2x2
            # max-pool that follows it is done as cheap XLA glue in the wrapper.
            ul = jnp.dot(wl_ref[...], u_new, preferred_element_type=jnp.float32,
                         precision=_HIGHEST) + bl_ref[...]
            out_ref[0] = jnp.maximum(ul, 0.0)
    elif tail == "head":
        def kernel(u_ref, sx_ref, sy_ref, sxx_ref, syy_ref,
                   w1_ref, b1_ref, w2_ref, b2_ref,
                   f1w_ref, f1b_ref, f2w_ref, f2b_ref,
                   out_ref, inv_sc):
            u_new = _invariants_and_residual(u_ref, sx_ref, sy_ref, sxx_ref, syy_ref,
                                             w1_ref, b1_ref, w2_ref, b2_ref, inv_sc)
            pooled = jnp.max(u_new, axis=-1, keepdims=True)     # global (H,W) max pool
            hh = jnp.dot(f1w_ref[...], pooled, preferred_element_type=jnp.float32,
                         precision=_HIGHEST) + f1b_ref[...]
            hh = jnp.maximum(hh, 0.0)
            logits = jnp.dot(f2w_ref[...], hh, preferred_element_type=jnp.float32,
                             precision=_HIGHEST) + f2b_ref[...]
            m = jnp.max(logits)
            lse = jnp.log(jnp.sum(jnp.exp(logits - m))) + m
            out_ref[0] = logits - lse
    else:
        def kernel(u_ref, sx_ref, sy_ref, sxx_ref, syy_ref,
                   w1_ref, b1_ref, w2_ref, b2_ref, out_ref, inv_sc):
            out_ref[0] = _invariants_and_residual(u_ref, sx_ref, sy_ref, sxx_ref,
                                                  syy_ref, w1_ref, b1_ref,
                                                  w2_ref, b2_ref, inv_sc)
    return kernel


def fused_iteration(u_flat, smats, w1, b1, w2, b2, step_val, tail, tail_w):
    B, C, HW = u_flat.shape
    num_inv = compute_num_inv(C)
    kern = _make_iter_kernel(C, float(step_val), tail)

    def _const(shape):
        nd = len(shape)
        return pl.BlockSpec(shape, lambda b: (0,) * nd)

    inputs = [u_flat, *smats, w1, b1, w2, b2, *tail_w]
    in_specs = ([pl.BlockSpec((1, C, HW), lambda b: (b, 0, 0))]
                + [_const(s.shape) for s in smats]
                + [_const(w1.shape), _const(b1.shape),
                   _const(w2.shape), _const(b2.shape)]
                + [_const(w.shape) for w in tail_w])

    if tail == "lift":
        C_out = tail_w[0].shape[0]
        out_shape = jax.ShapeDtypeStruct((B, C_out, HW), jnp.float32)
        out_spec = pl.BlockSpec((1, C_out, HW), lambda b: (b, 0, 0))
    elif tail == "head":
        num_class = tail_w[2].shape[0]
        out_shape = jax.ShapeDtypeStruct((B, num_class, 1), jnp.float32)
        out_spec = pl.BlockSpec((1, num_class, 1), lambda b: (b, 0, 0))
    else:
        out_shape = jax.ShapeDtypeStruct((B, C, HW), jnp.float32)
        out_spec = pl.BlockSpec((1, C, HW), lambda b: (b, 0, 0))

    return pl.pallas_call(
        kern,
        out_shape=out_shape,
        grid_spec=pltpu.PrefetchScalarGridSpec(
            num_scalar_prefetch=0,
            grid=(B,),
            in_specs=in_specs,
            out_specs=out_spec,
            scratch_shapes=[pltpu.VMEM((num_inv, HW), jnp.float32)],
        ),
        compiler_params=pltpu.CompilerParams(dimension_semantics=("parallel",)),
    )(*inputs)


# ----------------------------------------------------------------------------
# Deterministic parameter construction (mirrors __init__ shapes, BN folded).
def init_params(key, num_class, channel, hidden_channel, iters):
    lift_steps = (iters // 4, 2 * iters // 4, 3 * iters // 4)
    assert len(set(lift_steps)) == 3, "need iters >= 4"
    keys = list(jax.random.split(key, 4 * iters + 16))
    it = iter(keys)

    def winit(shape):
        fan_in = shape[1]
        return (jax.random.normal(next(it), shape, dtype=jnp.float32)
                / np.sqrt(fan_in)).astype(jnp.float32)

    def binit(n):
        return jax.random.normal(next(it), (n, 1), dtype=jnp.float32) * 0.01

    def fold_bn_eval(w, b, n_out):
        # TODO(synk): BatchNorm reproduced in eval mode with freshly-initialized stats
        # (mean=0, var=1, gamma=1, beta=0) folded into the 1x1 conv; training-mode
        # batch statistics are not computed.
        gamma = jnp.ones((n_out,), jnp.float32)
        beta = jnp.zeros((n_out,), jnp.float32)
        mean = jnp.zeros((n_out,), jnp.float32)
        var = jnp.ones((n_out,), jnp.float32)
        scale = gamma / jnp.sqrt(var + _BN_EPS)
        return w * scale[:, None], ((b[:, 0] - mean) * scale + beta)[:, None]

    C = channel
    num_inv = compute_num_inv(C)
    lifts, blocks = [], []
    for t in range(iters):
        if t in lift_steps:
            w, b = winit((2 * C, C)), binit(2 * C)
            C *= 2
            num_inv = compute_num_inv(C)
            lifts.append(fold_bn_eval(w, b, C))
        w1, b1 = fold_bn_eval(winit((hidden_channel, num_inv)),
                              binit(hidden_channel), hidden_channel)
        w2, b2 = fold_bn_eval(winit((C, hidden_channel)), binit(C), C)
        blocks.append((w1, b1, w2, b2))
    fc1_w, fc1_b = winit((64, C)), binit(64)
    fc2_w, fc2_b = winit((num_class, 64)), binit(num_class)
    step = np.full((iters,), 4.0 / iters, dtype=np.float32)    # learnable_step init
    return dict(lift=lifts, blocks=blocks, fc1_w=fc1_w, fc1_b=fc1_b,
                fc2_w=fc2_w, fc2_b=fc2_b, step=step, lift_steps=lift_steps)


# ----------------------------------------------------------------------------
# Forward pass: one fused Pallas kernel per iteration, plain-JAX glue only for the
# channel replication and the 2x2 max-pool after each (fused) lift.
def invar_pdes_net_rs_forward(x, params, stencils, channel, iters):
    x = x.astype(jnp.float32)
    B, data_channel, H, W = x.shape
    C = channel
    u = x[:, np.arange(C) % data_channel, :, :].reshape(B, C, H * W)
    lift_steps = params["lift_steps"]
    lift_i = 0
    smat_cache = {}
    for t in range(iters):
        if t in lift_steps:
            # The lift conv(+BN)+ReLU for this step was fused into the previous
            # iteration's kernel tail; only the 2x2 max-pool runs here as XLA glue.
            # TODO(synk): fold the 2x2 max-pool into the Pallas kernel too (needs
            # strided lane/sublane gathers); kept as glue for robustness.
            C *= 2
            u = u.reshape(B, C, H, W)
            u = u.reshape(B, C, H // 2, 2, W // 2, 2).max(axis=(3, 5))
            H, W = H // 2, W // 2
            u = u.reshape(B, C, H * W)
        if (H, W) not in smat_cache:
            smat_cache[(H, W)] = make_deriv_matrices(H, W, stencils)
        smats = smat_cache[(H, W)]

        w1, b1, w2, b2 = params["blocks"][t]
        is_last = (t == iters - 1)
        next_lift = (not is_last) and ((t + 1) in lift_steps)
        if is_last:
            tail = "head"
            tail_w = (params["fc1_w"], params["fc1_b"],
                      params["fc2_w"], params["fc2_b"])
        elif next_lift:
            tail = "lift"
            tail_w = params["lift"][lift_i]
            lift_i += 1
        else:
            tail = "plain"
            tail_w = ()
        u = fused_iteration(u, smats, w1, b1, w2, b2, params["step"][t],
                            tail, tail_w)
    # Last kernel's fused head produced (B, num_class, 1) log-probabilities.
    return u[:, :, 0]


if __name__ == "__main__":
    num_class, channel, hidden_channel, iters = 10, 4, 8, 4
    B, data_channel, H, W = 2, 1, 16, 16

    key = jax.random.PRNGKey(0)
    kx, kp = jax.random.split(key)
    x = jax.random.normal(kx, (B, data_channel, H, W), dtype=jnp.float32)

    stencils = make_gauss_stencils()
    params = init_params(kp, num_class, channel, hidden_channel, iters)

    out = invar_pdes_net_rs_forward(x, params, stencils, channel, iters)
    out = jax.block_until_ready(out)
    assert out.shape == (B, num_class), out.shape
    print("KERNEL_OK")
</pallas_src>

<mosaic_0001>
module attributes {stable_mosaic.version = 11 : i64} {
  func.func @kernel(%arg0: i32, %arg1: memref<1x4x256xf32, #tpu.memory_space<vmem>>, %arg2: memref<256x256xf32, #tpu.memory_space<vmem>>, %arg3: memref<256x256xf32, #tpu.memory_space<vmem>>, %arg4: memref<256x256xf32, #tpu.memory_space<vmem>>, %arg5: memref<256x256xf32, #tpu.memory_space<vmem>>, %arg6: memref<8x23xf32, #tpu.memory_space<vmem>>, %arg7: memref<8x1xf32, #tpu.memory_space<vmem>>, %arg8: memref<4x8xf32, #tpu.memory_space<vmem>>, %arg9: memref<4x1xf32, #tpu.memory_space<vmem>>, %arg10: memref<8x4xf32, #tpu.memory_space<vmem>>, %arg11: memref<8x1xf32, #tpu.memory_space<vmem>>, %arg12: memref<1x8x256xf32, #tpu.memory_space<vmem>>, %arg13: memref<23x256xf32, #tpu.memory_space<vmem>>) attributes {dimension_semantics = [#tpu.dimension_semantics<parallel>], iteration_bounds = array<i64: 2>, scalar_prefetch = 0 : i64, scratch_operands = 1 : i64, tpu.core_type = #tpu.core_type<tc>, window_params = [{transform_indices = @transform_0, window_bounds = array<i64: 1, 4, 256>}, {pipeline_mode = #tpu.pipeline_mode<synchronous>, transform_indices = @transform_1, window_bounds = array<i64: 256, 256>}, {pipeline_mode = #tpu.pipeline_mode<synchronous>, transform_indices = @transform_2, window_bounds = array<i64: 256, 256>}, {pipeline_mode = #tpu.pipeline_mode<synchronous>, transform_indices = @transform_3, window_bounds = array<i64: 256, 256>}, {pipeline_mode = #tpu.pipeline_mode<synchronous>, transform_indices = @transform_4, window_bounds = array<i64: 256, 256>}, {pipeline_mode = #tpu.pipeline_mode<synchronous>, transform_indices = @transform_5, window_bounds = array<i64: 8, 23>}, {pipeline_mode = #tpu.pipeline_mode<synchronous>, transform_indices = @transform_6, window_bounds = array<i64: 8, 1>}, {pipeline_mode = #tpu.pipeline_mode<synchronous>, transform_indices = @transform_7, window_bounds = array<i64: 4, 8>}, {pipeline_mode = #tpu.pipeline_mode<synchronous>, transform_indices = @transform_8, window_bounds = array<i64: 4, 1>}, {pipeline_mode = #tpu.pipeline_mode<synchronous>, transform_indices = @transform_9, window_bounds = array<i64: 8, 4>}, {pipeline_mode = #tpu.pipeline_mode<synchronous>, transform_indices = @transform_10, window_bounds = array<i64: 8, 1>}, {transform_indices = @transform_11, window_bounds = array<i64: 1, 8, 256>}]} {
    %c0 = arith.constant 0 : index
    %c0_0 = arith.constant 0 : index
    %c0_1 = arith.constant 0 : index
    %0 = vector.load %arg1[%c0, %c0_0, %c0_1] : memref<1x4x256xf32, #tpu.memory_space<vmem>>, vector<1x4x256xf32>
    %1 = vector.shape_cast %0 : vector<1x4x256xf32> to vector<4x256xf32>
    %c0_2 = arith.constant 0 : index
    %c0_3 = arith.constant 0 : index
    %2 = vector.load %arg2[%c0_2, %c0_3] : memref<256x256xf32, #tpu.memory_space<vmem>>, vector<256x256xf32>
    %cst = arith.constant dense<0.000000e+00> : vector<4x256xf32>
    %3 = tpu.matmul %1, %2, %cst {dimension_numbers = #tpu.dot_dimension_numbers<[1], [0], [0], [1], [0, 0, 1, 1], [], []>, precision = #tpu.contract_precision<fp32>} : vector<4x256xf32>, vector<256x256xf32>, vector<4x256xf32> -> vector<4x256xf32>
    %c0_4 = arith.constant 0 : index
    %c0_5 = arith.constant 0 : index
    %4 = vector.load %arg3[%c0_4, %c0_5] : memref<256x256xf32, #tpu.memory_space<vmem>>, vector<256x256xf32>
    %cst_6 = arith.constant dense<0.000000e+00> : vector<4x256xf32>
    %5 = tpu.matmul %1, %4, %cst_6 {dimension_numbers = #tpu.dot_dimension_numbers<[1], [0], [0], [1], [0, 0, 1, 1], [], []>, precision = #tpu.contract_precision<fp32>} : vector<4x256xf32>, vector<256x256xf32>, vector<4x256xf32> -> vector<4x256xf32>
    %c0_7 = arith.constant 0 : index
    %c0_8 = arith.constant 0 : index
    %6 = vector.load %arg4[%c0_7, %c0_8] : memref<256x256xf32, #tpu.memory_space<vmem>>, vector<256x256xf32>
    %cst_9 = arith.constant dense<0.000000e+00> : vector<4x256xf32>
    %7 = tpu.matmul %1, %6, %cst_9 {dimension_numbers = #tpu.dot_dimension_numbers<[1], [0], [0], [1], [0, 0, 1, 1], [], []>, precision = #tpu.contract_precision<fp32>} : vector<4x256xf32>, vector<256x256xf32>, vector<4x256xf32> -> vector<4x256xf32>
    %c0_10 = arith.constant 0 : index
    %c0_11 = arith.constant 0 : index
    %8 = vector.load %arg5[%c0_10, %c0_11] : memref<256x256xf32, #tpu.memory_space<vmem>>, vector<256x256xf32>
    %cst_12 = arith.constant dense<0.000000e+00> : vector<4x256xf32>
    %9 = tpu.matmul %1, %8, %cst_12 {dimension_numbers = #tpu.dot_dimension_numbers<[1], [0], [0], [1], [0, 0, 1, 1], [], []>, precision = #tpu.contract_precision<fp32>} : vector<4x256xf32>, vector<256x256xf32>, vector<4x256xf32> -> vector<4x256xf32>
    %c0_13 = arith.constant 0 : index
    %c0_14 = arith.constant 0 : index
    %10 = vector.load %arg2[%c0_13, %c0_14] : memref<256x256xf32, #tpu.memory_space<vmem>>, vector<256x256xf32>
    %cst_15 = arith.constant dense<0.000000e+00> : vector<4x256xf32>
    %11 = tpu.matmul %5, %10, %cst_15 {dimension_numbers = #tpu.dot_dimension_numbers<[1], [0], [0], [1], [0, 0, 1, 1], [], []>, precision = #tpu.contract_precision<fp32>} : vector<4x256xf32>, vector<256x256xf32>, vector<4x256xf32> -> vector<4x256xf32>
    %12 = arith.mulf %3, %3 : vector<4x256xf32>
    %13 = arith.mulf %5, %5 : vector<4x256xf32>
    %14 = arith.mulf %3, %5 : vector<4x256xf32>
    %15 = arith.mulf %14, %11 : vector<4x256xf32>
    %16 = arith.addf %12, %13 : vector<4x256xf32>
    %17 = arith.mulf %12, %7 : vector<4x256xf32>
    %cst_16 = arith.constant 2.000000e+00 : f32
    %18 = vector.broadcast %cst_16 : f32 to vector<4x256xf32>
    %19 = arith.mulf %18, %15 : vector<4x256xf32>
    %20 = arith.addf %17, %19 : vector<4x256xf32>
    %21 = arith.mulf %13, %9 : vector<4x256xf32>
    %22 = arith.addf %20, %21 : vector<4x256xf32>
    %23 = arith.mulf %13, %7 : vector<4x256xf32>
    %cst_17 = arith.constant 2.000000e+00 : f32
    %24 = vector.broadcast %cst_17 : f32 to vector<4x256xf32>
    %25 = arith.mulf %24, %15 : vector<4x256xf32>
    %26 = arith.subf %23, %25 : vector<4x256xf32>
    %27 = arith.mulf %12, %9 : vector<4x256xf32>
    %28 = arith.addf %26, %27 : vector<4x256xf32>
    %29 = arith.subf %9, %7 : vector<4x256xf32>
    %30 = arith.mulf %14, %29 : vector<4x256xf32>
    %31 = arith.subf %12, %13 : vector<4x256xf32>
    %32 = arith.mulf %31, %11 : vector<4x256xf32>
    %33 = arith.addf %30, %32 : vector<4x256xf32>
    %34 = vector.extract_strided_slice %3 {offsets = [1, 0], sizes = [3, 256], strides = [1, 1]} : vector<4x256xf32> to vector<3x256xf32>
    %35 = vector.extract_strided_slice %3 {offsets = [0, 0], sizes = [3, 256], strides = [1, 1]} : vector<4x256xf32> to vector<3x256xf32>
    %36 = arith.mulf %34, %35 : vector<3x256xf32>
    %37 = vector.extract_strided_slice %5 {offsets = [1, 0], sizes = [3, 256], strides = [1, 1]} : vector<4x256xf32> to vector<3x256xf32>
    %38 = vector.extract_strided_slice %5 {offsets = [0, 0], sizes = [3, 256], strides = [1, 1]} : vector<4x256xf32> to vector<3x256xf32>
    %39 = arith.mulf %37, %38 : vector<3x256xf32>
    %40 = arith.addf %36, %39 : vector<3x256xf32>
    %41 = math.absf %1 : vector<4x256xf32>
    %42 = vector.shape_cast %41 : vector<4x256xf32> to vector<1x4x256xf32>
    %cst_18 = arith.constant dense<0xFF800000> : vector<1xf32>
    %43 = vector.multi_reduction <maximumf>, %42, %cst_18 [1, 2] : vector<1x4x256xf32> to vector<1xf32>
    %44 = vector.shape_cast %43 : vector<1xf32> to vector<1x1x1xf32>
    %45 = vector.extract %44[0, 0, 0] : f32 from vector<1x1x1xf32>
    %cst_19 = arith.constant 1.000000e+00 : f32
    %46 = arith.divf %cst_19, %45 : f32
    %47 = math.absf %22 : vector<4x256xf32>
    %48 = vector.shape_cast %47 : vector<4x256xf32> to vector<1x4x256xf32>
    %cst_20 = arith.constant dense<0xFF800000> : vector<1xf32>
    %49 = vector.multi_reduction <maximumf>, %48, %cst_20 [1, 2] : vector<1x4x256xf32> to vector<1xf32>
    %50 = vector.shape_cast %49 : vector<1xf32> to vector<1x1x1xf32>
    %51 = vector.extract %50[0, 0, 0] : f32 from vector<1x1x1xf32>
    %52 = math.absf %28 : vector<4x256xf32>
    %53 = vector.shape_cast %52 : vector<4x256xf32> to vector<1x4x256xf32>
    %cst_21 = arith.constant dense<0xFF800000> : vector<1xf32>
    %54 = vector.multi_reduction <maximumf>, %53, %cst_21 [1, 2] : vector<1x4x256xf32> to vector<1xf32>
    %55 = vector.shape_cast %54 : vector<1xf32> to vector<1x1x1xf32>
    %56 = vector.extract %55[0, 0, 0] : f32 from vector<1x1x1xf32>
    %57 = math.absf %33 : vector<4x256xf32>
    %58 = vector.shape_cast %57 : vector<4x256xf32> to vector<1x4x256xf32>
    %cst_22 = arith.constant dense<0xFF800000> : vector<1xf32>
    %59 = vector.multi_reduction <maximumf>, %58, %cst_22 [1, 2] : vector<1x4x256xf32> to vector<1xf32>
    %60 = vector.shape_cast %59 : vector<1xf32> to vector<1x1x1xf32>
    %61 = vector.extract %60[0, 0, 0] : f32 from vector<1x1x1xf32>
    %62 = arith.maximumf %56, %61 : f32
    %63 = arith.maximumf %51, %62 : f32
    %cst_23 = arith.constant 1.000000e+00 : f32
    %64 = arith.divf %cst_23, %63 : f32
    %65 = math.absf %16 : vector<4x256xf32>
    %66 = vector.shape_cast %65 : vector<4x256xf32> to vector<1x4x256xf32>
    %cst_24 = arith.constant dense<0xFF800000> : vector<1xf32>
    %67 = vector.multi_reduction <maximumf>, %66, %cst_24 [1, 2] : vector<1x4x256xf32> to vector<1xf32>
    %68 = vector.shape_cast %67 : vector<1xf32> to vector<1x1x1xf32>
    %69 = vector.extract %68[0, 0, 0] : f32 from vector<1x1x1xf32>
    %70 = math.absf %40 : vector<3x256xf32>
    %71 = vector.shape_cast %70 : vector<3x256xf32> to vector<1x3x256xf32>
    %cst_25 = arith.constant dense<0xFF800000> : vector<1xf32>
    %72 = vector.multi_reduction <maximumf>, %71, %cst_25 [1, 2] : vector<1x3x256xf32> to vector<1xf32>
    %73 = vector.shape_cast %72 : vector<1xf32> to vector<1x1x1xf32>
    %74 = vector.extract %73[0, 0, 0] : f32 from vector<1x1x1xf32>
    %75 = arith.maximumf %69, %74 : f32
    %cst_26 = arith.constant 1.000000e+00 : f32
    %76 = arith.divf %cst_26, %75 : f32
    %77 = vector.broadcast %46 : f32 to vector<4x256xf32>
    %78 = arith.mulf %1, %77 : vector<4x256xf32>
    %c0_27 = arith.constant 0 : index
    %c0_28 = arith.constant 0 : index
    %79 = vector.load %arg13[%c0_27, %c0_28] : memref<23x256xf32, #tpu.memory_space<vmem>>, vector<4x256xf32>
    tpu.vector_store %arg13[%c0_27, %c0_28], %78 {strides = array<i32>} : memref<23x256xf32, #tpu.memory_space<vmem>>, vector<4x256xf32>,
    %80 = vector.broadcast %64 : f32 to vector<4x256xf32>
    %81 = arith.mulf %22, %80 : vector<4x256xf32>
    %c4 = arith.constant 4 : index
    %c0_29 = arith.constant 0 : index
    %82 = vector.load %arg13[%c4, %c0_29] : memref<23x256xf32, #tpu.memory_space<vmem>>, vector<4x256xf32>
    tpu.vector_store %arg13[%c4, %c0_29], %81 {strides = array<i32>} : memref<23x256xf32, #tpu.memory_space<vmem>>, vector<4x256xf32>,
    %83 = vector.broadcast %64 : f32 to vector<4x256xf32>
    %84 = arith.mulf %28, %83 : vector<4x256xf32>
    %c8 = arith.constant 8 : index
    %c0_30 = arith.constant 0 : index
    %85 = vector.load %arg13[%c8, %c0_30] : memref<23x256xf32, #tpu.memory_space<vmem>>, vector<4x256xf32>
    tpu.vector_store %arg13[%c8, %c0_30], %84 {strides = array<i32>} : memref<23x256xf32, #tpu.memory_space<vmem>>, vector<4x256xf32>,
    %86 = vector.broadcast %64 : f32 to vector<4x256xf32>
    %87 = arith.mulf %33, %86 : vector<4x256xf32>
    %c12 = arith.constant 12 : index
    %c0_31 = arith.constant 0 : index
    %88 = vector.load %arg13[%c12, %c0_31] : memref<23x256xf32, #tpu.memory_space<vmem>>, vector<4x256xf32>
    tpu.vector_store %arg13[%c12, %c0_31], %87 {strides = array<i32>} : memref<23x256xf32, #tpu.memory_space<vmem>>, vector<4x256xf32>,
    %89 = vector.broadcast %76 : f32 to vector<4x256xf32>
    %90 = arith.mulf %16, %89 : vector<4x256xf32>
    %c16 = arith.constant 16 : index
    %c0_32 = arith.constant 0 : index
    %91 = vector.load %arg13[%c16, %c0_32] : memref<23x256xf32, #tpu.memory_space<vmem>>, vector<4x256xf32>
    tpu.vector_store %arg13[%c16, %c0_32], %90 {strides = array<i32>} : memref<23x256xf32, #tpu.memory_space<vmem>>, vector<4x256xf32>,
    %92 = vector.broadcast %76 : f32 to vector<3x256xf32>
    %93 = arith.mulf %40, %92 : vector<3x256xf32>
    %c20 = arith.constant 20 : index
    %c0_33 = arith.constant 0 : index
    %94 = vector.load %arg13[%c20, %c0_33] : memref<23x256xf32, #tpu.memory_space<vmem>>, vector<3x256xf32>
    tpu.vector_store %arg13[%c20, %c0_33], %93 {strides = array<i32>} : memref<23x256xf32, #tpu.memory_space<vmem>>, vector<3x256xf32>,
    %c0_34 = arith.constant 0 : index
    %c0_35 = arith.constant 0 : index
    %95 = vector.load %arg6[%c0_34, %c0_35] : memref<8x23xf32, #tpu.memory_space<vmem>>, vector<8x23xf32>
    %c0_36 = arith.constant 0 : index
    %c0_37 = arith.constant 0 : index
    %96 = vector.load %arg13[%c0_36, %c0_37] : memref<23x256xf32, #tpu.memory_space<vmem>>, vector<23x256xf32>
    %cst_38 = arith.constant dense<0.000000e+00> : vector<8x256xf32>
    %97 = tpu.matmul %95, %96, %cst_38 {dimension_numbers = #tpu.dot_dimension_numbers<[1], [0], [0], [1], [0, 0, 1, 1], [], []>, precision = #tpu.contract_precision<fp32>} : vector<8x23xf32>, vector<23x256xf32>, vector<8x256xf32> -> vector<8x256xf32>
    %c0_39 = arith.constant 0 : index
    %c0_40 = arith.constant 0 : index
    %98 = vector.load %arg7[%c0_39, %c0_40] : memref<8x1xf32, #tpu.memory_space<vmem>>, vector<8x1xf32>
    %99 = vector.broadcast %98 : vector<8x1xf32> to vector<8x256xf32>
    %100 = arith.addf %97, %99 : vector<8x256xf32>
    %cst_41 = arith.constant 0.000000e+00 : f32
    %101 = vector.broadcast %cst_41 : f32 to vector<8x256xf32>
    %102 = arith.maximumf %100, %101 : vector<8x256xf32>
    %c0_42 = arith.constant 0 : index
    %c0_43 = arith.constant 0 : index
    %103 = vector.load %arg8[%c0_42, %c0_43] : memref<4x8xf32, #tpu.memory_space<vmem>>, vector<4x8xf32>
    %cst_44 = arith.constant dense<0.000000e+00> : vector<4x256xf32>
    %104 = tpu.matmul %103, %102, %cst_44 {dimension_numbers = #tpu.dot_dimension_numbers<[1], [0], [0], [1], [0, 0, 1, 1], [], []>, precision = #tpu.contract_precision<fp32>} : vector<4x8xf32>, vector<8x256xf32>, vector<4x256xf32> -> vector<4x256xf32>
    %c0_45 = arith.constant 0 : index
    %c0_46 = arith.constant 0 : index
    %105 = vector.load %arg9[%c0_45, %c0_46] : memref<4x1xf32, #tpu.memory_space<vmem>>, vector<4x1xf32>
    %106 = vector.broadcast %105 : vector<4x1xf32> to vector<4x256xf32>
    %107 = arith.addf %104, %106 : vector<4x256xf32>
    %cst_47 = arith.constant 1.000000e+00 : f32
    %108 = vector.broadcast %cst_47 : f32 to vector<4x256xf32>
    %109 = arith.mulf %108, %107 : vector<4x256xf32>
    %110 = arith.addf %1, %109 : vector<4x256xf32>
    %cst_48 = arith.constant 0.000000e+00 : f32
    %111 = vector.broadcast %cst_48 : f32 to vector<4x256xf32>
    %112 = arith.maximumf %110, %111 : vector<4x256xf32>
    %c0_49 = arith.constant 0 : index
    %c0_50 = arith.constant 0 : index
    %113 = vector.load %arg10[%c0_49, %c0_50] : memref<8x4xf32, #tpu.memory_space<vmem>>, vector<8x4xf32>
    %cst_51 = arith.constant dense<0.000000e+00> : vector<8x256xf32>
    %114 = tpu.matmul %113, %112, %cst_51 {dimension_numbers = #tpu.dot_dimension_numbers<[1], [0], [0], [1], [0, 0, 1, 1], [], []>, precision = #tpu.contract_precision<fp32>} : vector<8x4xf32>, vector<4x256xf32>, vector<8x256xf32> -> vector<8x256xf32>
    %c0_52 = arith.constant 0 : index
    %c0_53 = arith.constant 0 : index
    %115 = vector.load %arg11[%c0_52, %c0_53] : memref<8x1xf32, #tpu.memory_space<vmem>>, vector<8x1xf32>
    %116 = vector.broadcast %115 : vector<8x1xf32> to vector<8x256xf32>
    %117 = arith.addf %114, %116 : vector<8x256xf32>
    %cst_54 = arith.constant 0.000000e+00 : f32
    %118 = vector.broadcast %cst_54 : f32 to vector<8x256xf32>
    %119 = arith.maximumf %117, %118 : vector<8x256xf32>
    %c0_55 = arith.constant 0 : index
    %c0_56 = arith.constant 0 : index
    %c0_57 = arith.constant 0 : index
    %120 = vector.load %arg12[%c0_55, %c0_56, %c0_57] : memref<1x8x256xf32, #tpu.memory_space<vmem>>, vector<1x8x256xf32>
    %121 = vector.shape_cast %120 : vector<1x8x256xf32> to vector<8x256xf32>
    %122 = vector.shape_cast %119 : vector<8x256xf32> to vector<1x8x256xf32>
    tpu.vector_store %arg12[%c0_55, %c0_56, %c0_57], %122 {strides = array<i32>} : memref<1x8x256xf32, #tpu.memory_space<vmem>>, vector<1x8x256xf32>,
    return
  }
  func.func @transform_0(%arg0: i32) -> (i32, i32, i32) {
    %c0_i32 = arith.constant 0 : i32
    %c0_i32_0 = arith.constant 0 : i32
    %c0_i32_1 = arith.constant 0 : i32
    return %arg0, %c0_i32, %c0_i32_0 : i32, i32, i32
  }
  func.func @transform_1(%arg0: i32) -> (i32, i32) {
    %c0_i32 = arith.constant 0 : i32
    %c0_i32_0 = arith.constant 0 : i32
    %c0_i32_1 = arith.constant 0 : i32
    return %c0_i32, %c0_i32_0 : i32, i32
  }
  func.func @transform_2(%arg0: i32) -> (i32, i32) {
    %c0_i32 = arith.constant 0 : i32
    %c0_i32_0 = arith.constant 0 : i32
    %c0_i32_1 = arith.constant 0 : i32
    return %c0_i32, %c0_i32_0 : i32, i32
  }
  func.func @transform_3(%arg0: i32) -> (i32, i32) {
    %c0_i32 = arith.constant 0 : i32
    %c0_i32_0 = arith.constant 0 : i32
    %c0_i32_1 = arith.constant 0 : i32
    return %c0_i32, %c0_i32_0 : i32, i32
  }
  func.func @transform_4(%arg0: i32) -> (i32, i32) {
    %c0_i32 = arith.constant 0 : i32
    %c0_i32_0 = arith.constant 0 : i32
    %c0_i32_1 = arith.constant 0 : i32
    return %c0_i32, %c0_i32_0 : i32, i32
  }
  func.func @transform_5(%arg0: i32) -> (i32, i32) {
    %c0_i32 = arith.constant 0 : i32
    %c0_i32_0 = arith.constant 0 : i32
    %c0_i32_1 = arith.constant 0 : i32
    return %c0_i32, %c0_i32_0 : i32, i32
  }
  func.func @transform_6(%arg0: i32) -> (i32, i32) {
    %c0_i32 = arith.constant 0 : i32
    %c0_i32_0 = arith.constant 0 : i32
    %c0_i32_1 = arith.constant 0 : i32
    return %c0_i32, %c0_i32_0 : i32, i32
  }
  func.func @transform_7(%arg0: i32) -> (i32, i32) {
    %c0_i32 = arith.constant 0 : i32
    %c0_i32_0 = arith.constant 0 : i32
    %c0_i32_1 = arith.constant 0 : i32
    return %c0_i32, %c0_i32_0 : i32, i32
  }
  func.func @transform_8(%arg0: i32) -> (i32, i32) {
    %c0_i32 = arith.constant 0 : i32
    %c0_i32_0 = arith.constant 0 : i32
    %c0_i32_1 = arith.constant 0 : i32
    return %c0_i32, %c0_i32_0 : i32, i32
  }
  func.func @transform_9(%arg0: i32) -> (i32, i32) {
    %c0_i32 = arith.constant 0 : i32
    %c0_i32_0 = arith.constant 0 : i32
    %c0_i32_1 = arith.constant 0 : i32
    return %c0_i32, %c0_i32_0 : i32, i32
  }
  func.func @transform_10(%arg0: i32) -> (i32, i32) {
    %c0_i32 = arith.constant 0 : i32
    %c0_i32_0 = arith.constant 0 : i32
    %c0_i32_1 = arith.constant 0 : i32
    return %c0_i32, %c0_i32_0 : i32, i32
  }
  func.func @transform_11(%arg0: i32) -> (i32, i32, i32) {
    %c0_i32 = arith.constant 0 : i32
    %c0_i32_0 = arith.constant 0 : i32
    %c0_i32_1 = arith.constant 0 : i32
    return %arg0, %c0_i32, %c0_i32_0 : i32, i32, i32
  }
}

</mosaic_0001>

<bundles_post_ra>
// kernel: tpu_custom_call.1
= control target key start
LH: loop header
LB: loop body
LE: loop exit
PB: predicated region body
PF: predicated region fallthrough
CT: control target
= control target key end

     0   :  { %s16672_s0 = inlined_call_operand.vmem [shape: f32[2,4,256], index: 0, kind: input, shape index: {}]   ;;  %s16673_s1 = inlined_call_operand.hbm [shape: f32[256,256], index: 1, kind: input, shape index: {}]   ;;  %s16674_s2 = inlined_call_operand.hbm [shape: f32[256,256], index: 2, kind: input, shape index: {}]   ;;  %s16675_s3 = inlined_call_operand.hbm [shape: f32[256,256], index: 3, kind: input, shape index: {}]   ;;  %s16676_s4 = inlined_call_operand.hbm [shape: f32[256,256], index: 4, kind: input, shape index: {}]   ;;  %s16677_s5 = inlined_call_operand.vmem [shape: f32[8,23], index: 5, kind: input, shape index: {}]   ;;  %s16678_s6 = inlined_call_operand.vmem [shape: f32[8,1], index: 6, kind: input, shape index: {}]   ;;  %s16679_s7 = inlined_call_operand.vmem [shape: f32[4,8], index: 7, kind: input, shape index: {}]   ;;  %s16680_s8 = inlined_call_operand.vmem [shape: f32[4,1], index: 8, kind: input, shape index: {}]   ;;  %s16681_s9 = inlined_call_operand.vmem [shape: f32[8,4], index: 9, kind: input, shape index: {}]   ;;  %s16682_s10 = inlined_call_operand.vmem [shape: f32[8,1], index: 10, kind: input, shape index: {}]   ;;  %s16683_s11 = inlined_call_operand.hbm [shape: f32[2,8,256], index: 11, kind: output, shape index: {}]  }
   0x1   :  { %17513 = sst [smem:[#allocation345_spill]] %s16683_s11 }
   0x2   :  { %16 = vsyncpa [#allocation4], 0 }
   0x3   :  { %17 = vsyncpa [#allocation7], 0 }
   0x4   :  { %18 = vsyncpa [#allocation10], 0 }
   0x5   :  { %19 = vsyncpa [#allocation5], 0 }
   0x6   :  { %21 = vsyncpa [#allocation5 + $0x1], 0  ;;  %s11374_s17 = smov 0   ;;  %s11376_s18 = smov 0  }
   0x7   :  { %s11378_s19 = smov 0   ;;  %s11380_s20 = smov 0  }
   0x8 LB: > { %17514 = sst [smem:[#allocation16_spill]] %s11291_s17  ;;  %s11395_s21 = sadd.s32 4294967295, %s11303_s20   ;;  %s11303_s20 = sphi %s11380_s20, %s19597_s20   ;;  %s11299_s19 = sphi %s11378_s19, %s19599_s19   ;;  %s11295_s18 = sphi %s11376_s18, %s19601_s18   ;;  %s11291_s17 = sphi %s11374_s17, %s19600_s17  }
   0x9   : > { %17515 = sst [smem:[#allocation17_spill]] %s11299_s19  ;;  %s8953_s22 = sadd.s32 4294967294, %s11303_s20  }
   0xa   : > { %17516 = sst [smem:[#allocation18_spill]] %s11303_s20  ;;  %s11399_s23 = sadd.s32 1, %s11303_s20  }
   0xb   : > { %17517 = sst [smem:[#allocation19_spill]] %s11399_s23  ;;  %s270_s24 = sadd.s32 1, %s11299_s19 }
   0xc   : > { %s267_s25 = ssub.s32 %s11303_s20, %s11399_s23  ;;  %p280_p0 = scmp.ne.s32.totalorder %s11299_s19, %s11295_s18 }
   0xd   : > { %p268_p1 = scmp.eq.s32.totalorder %s267_s25, 0  ;;  %p281_p2 = scmp.eq.s32.totalorder %s11395_s21, 1 }
   0xe   : > { %p286_p3 = scmp.ne.s32.totalorder %s11295_s18, %s11291_s17  ;;  %p287_p4 = scmp.eq.s32.totalorder %s8953_s22, 1 }
   0xf   : > { %s11410_s26 = scalar_select %p268_p1, %s11299_s19, %s270_s24  }
  0x10   : > { %p11412_p5 = por %p281_p2, %p280_p0  ;;  %p11416_p6 = por %p287_p4, %p286_p3 }
  0x11   : > { %17518 = sst [smem:[#allocation20_spill]] %s11410_s26  ;;  %p8954_p7 = scmp.ge.s32.totalorder %s11303_s20, 1 }
  0x12   : > { %s17519_s27 = scalar_select %p11412_p5, 1, 0 }
  0x13   : > { %s17520_s28 = scalar_select %p11416_p6, 1, 0 }
  0x14   : > { %p294_p8 = scmp.lt.s32.totalorder %s11303_s20, 3  ;;  %p16687_p9 = scmp.eq.s32.totalorder %s11395_s21, 0 }
  0x15   : > { %17521 = sst [smem:[#allocation21_spill]] %s17520_s28  ;;  %s11305_s30 = smov [#allocation6]  }
  0x16   : > { %p11423_p10 = pnand %p8954_p7, %p294_p8  ;;  %s319_s12 = sshll.u32 %s11305_s30, 4  ;;  %s11429_s12 = int_to_ptr.vmem [resolvable:$true] %s319_s12 }
  0x17   : > { %s11306_s14 = smov [#allocation3]   ;;  %s11307_s16 = smov [#allocation8]  }
  0x18   : > { %s17522_s29 = scalar_select %p11423_p10, 1, 0 }
  0x19   : > { %p11041_p11 = pneg %p11423_p10  ;;  %s306_s15 = sshll.u32 %s11306_s14, 4  ;;  %s11437_s15 = int_to_ptr.vmem [resolvable:$true] %s306_s15 }
  0x1a   : > { %s11439_s22 = sshll.u32 %s11307_s16, 4  ;;  %s11117_s26 = scalar_lea.hbm %s16674_s2, 8192  ;;  %s333_s22 = int_to_ptr.vmem [resolvable:$true] %s11439_s22 }
  0x1b   : > { %p11433_p12 = pnand %p16687_p9, %p11041_p11  ;;  %p11118_p13 = scmp.ne.s32.totalorder %s16674_s2, %s11117_s26 }
  0x1c   : > { %p11124_p3 = scmp.lt.u32.totalorder %s11117_s26, %s16674_s2 }
  0x1d   : > { %p11449_p0 = pneg %p11433_p12 }
  0x1f   : > { %p11120_p1 = pnand %p11449_p0, %p11118_p13 }
  0x21   : > { %p11121_p2 = pneg %p11120_p1 }
  0x23   : > { %p11126_p4 = pnand %p11124_p3, %p11121_p2 }
  0x25   : > { %11129 = shalt.err (!%p11126_p4)
}
  0x26   : > { %s11130_s19 = scalar_lea.vmem %s11429_s12, 8192  ;;  %p11138_p9 = scmp.lt.s32.totalorder %s11429_s12, %s11429_s12 }
  0x27   : > { %p11131_p7 = scmp.ne.s32.totalorder %s11429_s12, %s11130_s19  ;;  %p11139_p6 = scmp.lt.s32.totalorder %s11130_s19, %s11130_s19 }
  0x29   : > { %p11133_p8 = pnand %p11131_p7, %p11449_p0  ;;  %p11140_p13 = por %p11139_p6, %p11138_p9 }
  0x2b   : > { %p11134_p11 = pneg %p11133_p8 }
  0x2d   : > { %p11141_p1 = pnand %p11140_p13, %p11134_p11 }
  0x2f   : > { %11144 = shalt.err (!%p11141_p1)
}
  0x30   : > { %s11308_s24 = smov 256   ;;  %s11309_s26 = smov 16  }
  0x31   : > { %11047 = dma.hbm_to_vmem [thread:$0]  (!%p11433_p12), %s16674_s2, 8192, %s11429_s12, [#allocation7], %s11308_s24, %s11308_s24, %s11309_s26  }
  0x32   : > { %s11145_s19 = scalar_lea.hbm %s16673_s1, 8192 }
  0x33   : > { %p11146_p6 = scmp.ne.s32.totalorder %s16673_s1, %s11145_s19  ;;  %p11152_p3 = scmp.lt.u32.totalorder %s11145_s19, %s16673_s1 }
  0x35   : > { %p11148_p9 = pnand %p11146_p6, %p11449_p0 }
  0x37   : > { %p11149_p2 = pneg %p11148_p9 }
  0x39   : > { %p11154_p4 = pnand %p11152_p3, %p11149_p2 }
  0x3b   : > { %11157 = shalt.err (!%p11154_p4)
}
  0x3c   : > { %s11158_s12 = scalar_lea.vmem %s11437_s15, 8192  ;;  %p11166_p13 = scmp.lt.s32.totalorder %s11437_s15, %s11437_s15 }
  0x3d   : > { %p11159_p7 = scmp.ne.s32.totalorder %s11437_s15, %s11158_s12  ;;  %p11167_p1 = scmp.lt.s32.totalorder %s11158_s12, %s11158_s12 }
  0x3f   : > { %p11161_p8 = pnand %p11159_p7, %p11449_p0  ;;  %p11168_p6 = por %p11167_p1, %p11166_p13 }
  0x41   : > { %p11162_p11 = pneg %p11161_p8 }
  0x43   : > { %p11169_p9 = pnand %p11168_p6, %p11162_p11 }
  0x45   : > { %11172 = shalt.err (!%p11169_p9)
}
  0x46   : > { %11044 = dma.hbm_to_vmem [thread:$0]  (!%p11433_p12), %s16673_s1, 8192, %s11437_s15, [#allocation4], %s11308_s24, %s11308_s24, %s11309_s26  }
  0x47   : > { %s11173_s25 = scalar_lea.hbm %s16675_s3, 8192 }
  0x48   : > { %p11174_p2 = scmp.ne.s32.totalorder %s16675_s3, %s11173_s25  ;;  %p11180_p7 = scmp.lt.u32.totalorder %s11173_s25, %s16675_s3 }
  0x4a   : > { %p11176_p3 = pnand %p11174_p2, %p11449_p0 }
  0x4c   : > { %p11177_p4 = pneg %p11176_p3 }
  0x4e   : > { %p11182_p8 = pnand %p11180_p7, %p11177_p4 }
  0x50   : > { %11185 = shalt.err (!%p11182_p8)
}
  0x51   : > { %s11186_s12 = scalar_lea.vmem %s333_s22, 8192  ;;  %p11194_p6 = scmp.lt.s32.totalorder %s333_s22, %s333_s22 }
  0x52   : > { %p11187_p11 = scmp.ne.s32.totalorder %s333_s22, %s11186_s12  ;;  %p11195_p9 = scmp.lt.s32.totalorder %s11186_s12, %s11186_s12 }
  0x54   : > { %p11189_p13 = pnand %p11187_p11, %p11449_p0  ;;  %p11196_p5 = por %p11195_p9, %p11194_p6 }
  0x56   : > { %p11190_p1 = pneg %p11189_p13 }
  0x58   : > { %p11197_p10 = pnand %p11196_p5, %p11190_p1 }
  0x5a   : > { %11200 = shalt.err (!%p11197_p10)
}
  0x5b   : > { %11050 = dma.hbm_to_vmem [thread:$0]  (!%p11433_p12), %s16675_s3, 8192, %s333_s22, [#allocation7], %s11308_s24, %s11308_s24, %s11309_s26  }
  0x5c   : > { %s11310_s17 = smov [#allocation9]   ;;  %s11201_s30 = scalar_lea.hbm %s16676_s4, 8192 }
  0x5d   : > { %s345_s20 = sshll.u32 %s11310_s17, 4  ;;  %p11202_p5 = scmp.ne.s32.totalorder %s16676_s4, %s11201_s30  ;;  %s346_s20 = int_to_ptr.vmem [resolvable:$true] %s345_s20 }
  0x5e   : > { %p11208_p3 = scmp.lt.u32.totalorder %s11201_s30, %s16676_s4 }
  0x5f   : > { %p11204_p10 = pnand %p11202_p5, %p11449_p0 }
  0x61   : > { %p11205_p2 = pneg %p11204_p10 }
  0x63   : > { %p11210_p4 = pnand %p11208_p3, %p11205_p2 }
  0x65   : > { %11213 = shalt.err (!%p11210_p4)
}
  0x66   : > { %s11214_s22 = scalar_lea.vmem %s346_s20, 8192  ;;  %p11222_p13 = scmp.lt.s32.totalorder %s346_s20, %s346_s20 }
  0x67   : > { %p11215_p7 = scmp.ne.s32.totalorder %s346_s20, %s11214_s22  ;;  %p11223_p1 = scmp.lt.s32.totalorder %s11214_s22, %s11214_s22 }
  0x69   : > { %p11217_p8 = pnand %p11215_p7, %p11449_p0  ;;  %p11224_p6 = por %p11223_p1, %p11222_p13 }
  0x6b   : > { %p11218_p11 = pneg %p11217_p8 }
  0x6d   : > { %p11225_p9 = pnand %p11224_p6, %p11218_p11 }
  0x6f   : > { %11228 = shalt.err (!%p11225_p9)
}
  0x70   : > { %11053 = dma.hbm_to_vmem [thread:$0]  (!%p11433_p12), %s16676_s4, 8192, %s346_s20, [#allocation10], %s11308_s24, %s11308_s24, %s11309_s26  }
  0x71   : > { %p17525_p5 = scmp.ne.s32.totalorder %s17522_s29, 0 }
  0x73   : > { %387 = sbr.rel (%p17525_p5) target bundleno = 2615 (0xa37), region = 64 }
  0x7a   : > { %p17526_p0 = scmp.eq.s32.totalorder %s11395_s21, 0 }
  0x7c   : > { %11274 = dma.done.wait (%p17526_p0), [#allocation4], 8192   ;;  %p17527_p10 = pmov %p17526_p0 }
  0x7d   : > { %p17528_p2 = pmov %p17526_p0 }
  0x7e   : > { %11276 = vsyncadd (%p17527_p10), [#allocation4], 4294959104 }
  0x7f   : > { %11278 = dma.done.wait (%p17528_p2), [#allocation7], 16384   ;;  %p17529_p3 = pmov %p17526_p0 }
  0x80   : > { %p17530_p4 = pmov %p17526_p0 }
  0x81   : > { %11280 = vsyncadd (%p17529_p3), [#allocation7], 4294950912 }
  0x82   : > { %11282 = dma.done.wait (%p17530_p4), [#allocation10], 8192   ;;  %p17531_p12 = pmov %p17526_p0 }
  0x83   : > { %v446_v0 = vld [vmem:[#allocation3 + $0x8] sm:$0xff]  ;;  %v448_v1 = vld [vmem:[#allocation3 + $0x18] sm:$0xff]  ;;  %v445_v2 = vld [vmem:[#allocation3] sm:$0xff]  ;;  %p439_p7 = scmp.lt.s32.totalorder %s11395_s21, 1  ;;  %vm7184_vm0 = vcmask 1043456   ;;  %vm7263_vm1 = vcmask 1043457  }
  0x84   : > { %11284 = vsyncadd (%p17531_p12), [#allocation10], 4294959104  ;;  %v512_v3 = vand.u32 4294901760, %v446_v0  ;;  %v516_v4 = vand.u32 4294901760, %v448_v1  ;;  %v447_v5 = vld [vmem:[#allocation3 + $0x10] sm:$0xff]  ;;  %v514_v6 = vand.u32 4294901760, %v445_v2 }
  0x85   : > { %v450_v7 = vld [vmem:[#allocation3 + $0x28] sm:$0xff]  ;;  %v452_v8 = vld [vmem:[#allocation3 + $0x38] sm:$0xff]  ;;  %v518_v9 = vand.u32 4294901760, %v447_v5  ;;  %v449_v12 = vld [vmem:[#allocation3 + $0x20] sm:$0xff]  ;;  %s11796_s23 = scalar_select %p439_p7, %s11395_s21, 1  ;;  %vm7340_vm2 = vcmask 187392  }
  0x86   : > { %v520_v10 = vand.u32 4294901760, %v450_v7  ;;  %v524_v11 = vand.u32 4294901760, %v452_v8  ;;  %v451_v13 = vld [vmem:[#allocation3 + $0x30] sm:$0xff]  ;;  %v11556_v14 = vpack.c.bf16 %v516_v4, %v512_v3  ;;  %v11558_v15 = vsub.f32 %v446_v0, %v512_v3  ;;  %v454_v22 = vld [vmem:[#allocation3 + $0x48] sm:$0xff]  ;;  %v456_v23 = vld [vmem:[#allocation3 + $0x58] sm:$0xff]  ;;  %s436_s19 = sand.u32 1, %s11295_s18  }
  0x87   : > { %v11560_v16 = vsub.f32 %v448_v1, %v516_v4  ;;  %v11562_v17 = vsub.f32 %v445_v2, %v514_v6  ;;  %v11564_v18 = vpack.c.bf16 %v518_v9, %v514_v6  ;;  %v11566_v19 = vsub.f32 %v447_v5, %v518_v9  ;;  %v453_v27 = vld [vmem:[#allocation3 + $0x40] sm:$0xff]  ;;  %v455_v28 = vld [vmem:[#allocation3 + $0x50] sm:$0xff]  ;;  %v458_v29 = vld [vmem:[#allocation3 + $0x68] sm:$0xff]  ;;  %s8973_s29 = sshll.u32 %s11796_s23, 3  ;;  %s8965_s12 = sshll.u32 %s436_s19, 4 }
  0x88   : > { %17532 = vst [vmem:[#allocation22_spill] sm:$0xff] %v11556_v14  ;;  %v11568_v20 = vpack.c.bf16 %v524_v11, %v520_v10  ;;  %v522_v21 = vand.u32 4294901760, %v449_v12  ;;  %8976 = vmatprep.subr.bf16.mxu1 %v11556_v14  ;;  %v526_v25 = vand.u32 4294901760, %v451_v13  ;;  %v11575_v26 = vsub.f32 %v450_v7, %v520_v10  ;;  %v460_v37 = vld [vmem:[#allocation3 + $0x78] sm:$0xff]  ;;  %v457_v42 = vld [vmem:[#allocation3 + $0x60] sm:$0xff]  ;;  %v459_v43 = vld [vmem:[#allocation3 + $0x70] sm:$0xff]  ;;  %s11861_s26 = scalar_lea.vmem %s16672_s0, %s8973_s29 }
  0x89   : > { %17533 = vst [vmem:[#allocation23_spill] sm:$0xff] %v11560_v16  ;;  %17534 = vst [vmem:[#allocation24_spill] sm:$0xff] %v11562_v17  ;;  %v11573_v24 = vpack.c.bf16 %v11560_v16, %v11558_v15  ;;  %8978 = vmatpush1.bf16.msra.mxu1 %v11564_v18  ;;  %v11580_v30 = vpack.c.bf16 %v11566_v19, %v11562_v17  ;;  %v11582_v31 = vsub.f32 %v452_v8, %v524_v11  ;;  %v462_v48 = vld [vmem:[#allocation3 + $0x88] sm:$0xff]  ;;  %v464_v53 = vld [vmem:[#allocation3 + $0x98] sm:$0xff]  ;;  %vm7344_vm3 = vcmask 1046528   ;;  %s19591_s13 = sld [smem:[#allocation345_spill]] }
  0x8a   : > { %17535 = vst [vmem:[#allocation25_spill] sm:$0xff] %v11564_v18  ;;  %17536 = vst [vmem:[#allocation26_spill] sm:$0xff] %v11566_v19  ;;  %v11584_v32 = vsub.f32 %v449_v12, %v522_v21  ;;  %8980 = vmatprep.subr.bf16.mxu1 %v11568_v20  ;;  %v11588_v33 = vpack.c.bf16 %v526_v25, %v522_v21  ;;  %v11590_v34 = vsub.f32 %v451_v13, %v526_v25  ;;  %v461_v58 = vld [vmem:[#allocation3 + $0x80] sm:$0xff]  ;;  %v463_v59 = vld [vmem:[#allocation3 + $0x90] sm:$0xff]  ;;  %vm7877_vm4 = vcmask 64512   ;;  %p19592_p11 = scmp.ne.s32.totalorder %s17519_s27, 0 }
  0x8b   : > { %17537 = vst [vmem:[#allocation27_spill] sm:$0xff] %v11568_v20  ;;  %17538 = vst [vmem:[#allocation28_spill] sm:$0xff] %v11573_v24  ;;  %9104 = vmatprep.subr.bf16.mxu0 %v11573_v24  ;;  %v528_v35 = vand.u32 4294901760, %v454_v22  ;;  %v532_v36 = vand.u32 4294901760, %v456_v23  ;;  %v11595_v38 = vpack.c.bf16 %v11582_v31, %v11575_v26  ;;  %v530_v39 = vand.u32 4294901760, %v453_v27  ;;  %v466_v0 = vld [vmem:[#allocation3 + $0xa8] sm:$0xff] }
  0x8c   : > { %17539 = vst [vmem:[#allocation29_spill] sm:$0xff] %v11580_v30  ;;  %17540 = vst [vmem:[#allocation30_spill] sm:$0xff] %v11588_v33  ;;  %9106 = vmatpush1.bf16.msra.mxu0 %v11580_v30  ;;  %v534_v40 = vand.u32 4294901760, %v455_v28  ;;  %v536_v41 = vand.u32 4294901760, %v458_v29  ;;  %v11599_v44 = vpack.c.bf16 %v11590_v34, %v11584_v32  ;;  %v540_v52 = vand.u32 4294901760, %v460_v37  ;;  %v468_v5 = vld [vmem:[#allocation3 + $0xb8] sm:$0xff] }
  0x8d   : > { %17541 = vst [vmem:[#allocation31_spill] sm:$0xff] %v11595_v38  ;;  %v11601_v45 = vpack.c.bf16 %v532_v36, %v528_v35  ;;  %v11603_v46 = vsub.f32 %v454_v22, %v528_v35  ;;  %v11605_v47 = vsub.f32 %v456_v23, %v532_v36  ;;  %8982 = vmatpush1.bf16.msra.mxu1 %v11588_v33  ;;  %v538_v55 = vand.u32 4294901760, %v457_v42  ;;  %v465_v10 = vld [vmem:[#allocation3 + $0xa0] sm:$0xff]  ;;  %v467_v11 = vld [vmem:[#allocation3 + $0xb0] sm:$0xff]  ;;  %v470_v22 = vld [vmem:[#allocation3 + $0xc8] sm:$0xff] }
  0x8e   : > { %17542 = vst [vmem:[#allocation32_spill] sm:$0xff] %v11599_v44  ;;  %9108 = vmatprep.subr.bf16.mxu0 %v11595_v38  ;;  %v11609_v49 = vpack.c.bf16 %v534_v40, %v530_v39  ;;  %v11611_v50 = vsub.f32 %v453_v27, %v530_v39  ;;  %v11613_v51 = vsub.f32 %v455_v28, %v534_v40  ;;  %v542_v56 = vand.u32 4294901760, %v459_v43  ;;  %v469_v40 = vld [vmem:[#allocation3 + $0xc0] sm:$0xff] }
  0x8f   : > { %17543 = vst [vmem:[#allocation33_spill] sm:$0xff] %v11601_v45  ;;  %8984 = vmatprep.subr.bf16.mxu1 %v11601_v45  ;;  %v11618_v54 = vpack.c.bf16 %v11605_v47, %v11603_v46  ;;  %v11620_v57 = vsub.f32 %v458_v29, %v536_v41  ;;  %v11627_v61 = vpack.c.bf16 %v540_v52, %v536_v41  ;;  %v544_v63 = vand.u32 4294901760, %v462_v48  ;;  %v472_v29 = vld [vmem:[#allocation3 + $0xd8] sm:$0xff]  ;;  %v471_v41 = vld [vmem:[#allocation3 + $0xd0] sm:$0xff]  ;;  %v477_v24 = vld [vmem:[#allocation3 + $0x100] sm:$0xff] }
  0x90   : > { %17544 = vst [vmem:[#allocation34_spill] sm:$0xff] %v11609_v49  ;;  %9110 = vmatpush1.bf16.msra.mxu0 %v11599_v44  ;;  %v11625_v60 = vpack.c.bf16 %v11613_v51, %v11611_v50  ;;  %v11629_v62 = vsub.f32 %v460_v37, %v540_v52  ;;  %v11632_v1 = vpack.c.bf16 %v542_v56, %v538_v55  ;;  %v548_v4 = vand.u32 4294901760, %v464_v53  ;;  %v474_v52 = vld [vmem:[#allocation3 + $0xe8] sm:$0xff] }
  0x91   : > { %17545 = vst [vmem:[#allocation35_spill] sm:$0xff] %v11618_v54  ;;  %17547 = vst [vmem:[#allocation37_spill] sm:$0xff] %v11627_v61  ;;  %9112 = vmatprep.subr.bf16.mxu0 %v11618_v54  ;;  %v11634_v2 = vsub.f32 %v457_v42, %v538_v55  ;;  %v11636_v3 = vsub.f32 %v459_v43, %v542_v56  ;;  %8986 = vmatpush1.bf16.msra.mxu1 %v11609_v49  ;;  %v546_v7 = vand.u32 4294901760, %v461_v58  ;;  %vm8361_vm5 = vcmask 31744  }
  0x92   : > { %17546 = vst [vmem:[#allocation36_spill] sm:$0xff] %v11625_v60  ;;  %17548 = vst [vmem:[#allocation38_spill] sm:$0xff] %v11632_v1  ;;  %v11641_v6 = vpack.c.bf16 %v11629_v62, %v11620_v57  ;;  %v550_v8 = vand.u32 4294901760, %v463_v59  ;;  %v11643_v9 = vsub.f32 %v462_v48, %v544_v63  ;;  %8988 = vmatprep.subr.bf16.mxu1 %v11627_v61  ;;  %v552_v21 = vand.u32 4294901760, %v466_v0 }
  0x93   : > { %v11646_v12 = vpack.c.bf16 %v548_v4, %v544_v63  ;;  %v11648_v13 = vsub.f32 %v464_v53, %v548_v4  ;;  %v11653_v23 = vpack.c.bf16 %v11636_v3, %v11634_v2  ;;  %v11655_v25 = vsub.f32 %v461_v58, %v546_v7 }
  0x94   : > { %17549 = vst [vmem:[#allocation39_spill] sm:$0xff] %v11641_v6  ;;  %9114 = vmatpush1.bf16.msra.mxu0 %v11625_v60  ;;  %v11657_v27 = vsub.f32 %v463_v59, %v550_v8  ;;  %v556_v28 = vand.u32 4294901760, %v468_v5  ;;  %v554_v36 = vand.u32 4294901760, %v465_v10  ;;  %v558_v37 = vand.u32 4294901760, %v467_v11  ;;  %v476_v59 = vld [vmem:[#allocation3 + $0xf8] sm:$0xff] }
  0x95   : > { %17550 = vst [vmem:[#allocation40_spill] sm:$0xff] %v11646_v12  ;;  %17551 = vst [vmem:[#allocation41_spill] sm:$0xff] %v11653_v23  ;;  %9116 = vmatprep.subr.bf16.mxu0 %v11641_v6  ;;  %v11662_v35 = vpack.c.bf16 %v11648_v13, %v11643_v9  ;;  %v11664_v39 = vsub.f32 %v466_v0, %v552_v21  ;;  %8990 = vmatpush1.bf16.msra.mxu1 %v11632_v1  ;;  %v560_v48 = vand.u32 4294901760, %v470_v22  ;;  %v478_v6 = vld [vmem:[#allocation3 + $0x108] sm:$0xff]  ;;  %v480_v60 = vld [vmem:[#allocation3 + $0x118] sm:$0xff] }
  0x96   : > { %v11667_v42 = vpack.c.bf16 %v550_v8, %v546_v7  ;;  %v11669_v43 = vsub.f32 %v468_v5, %v556_v28  ;;  %8992 = vmatprep.subr.bf16.mxu1 %v11646_v12  ;;  %v11672_v53 = vpack.c.bf16 %v556_v28, %v552_v21  ;;  %v11674_v55 = vsub.f32 %v465_v10, %v554_v36  ;;  %v473_v5 = vld [vmem:[#allocation3 + $0xe0] sm:$0xff]  ;;  %v475_v7 = vld [vmem:[#allocation3 + $0xf0] sm:$0xff]  ;;  %v488_v1 = vld [vmem:[#allocation3 + $0x158] sm:$0xff] }
  0x97   : > { %17552 = vst [vmem:[#allocation42_spill] sm:$0xff] %v11662_v35  ;;  %v11676_v56 = vsub.f32 %v467_v11, %v558_v37  ;;  %v564_v58 = vand.u32 4294901760, %v472_v29  ;;  %v11681_v63 = vpack.c.bf16 %v11657_v27, %v11655_v25  ;;  %v562_v0 = vand.u32 4294901760, %v469_v40  ;;  %v11728_v12 = vld [vmem:[#allocation3 + $0x130] sm:$0xff] }
  0x98   : > { %17553 = vst [vmem:[#allocation43_spill] sm:$0xff] %v11667_v42  ;;  %17554 = vst [vmem:[#allocation44_spill] sm:$0xff] %v11672_v53  ;;  %9118 = vmatpush1.bf16.msra.mxu0 %v11653_v23  ;;  %v566_v4 = vand.u32 4294901760, %v471_v41  ;;  %v11686_v8 = vpack.c.bf16 %v11669_v43, %v11664_v39  ;;  %v11688_v10 = vsub.f32 %v470_v22, %v560_v48  ;;  %v568_v21 = vand.u32 4294901760, %v474_v52 }
  0x99   : > { %17555 = vst [vmem:[#allocation45_spill] sm:$0xff] %v11674_v55  ;;  %17556 = vst [vmem:[#allocation46_spill] sm:$0xff] %v11676_v56  ;;  %9120 = vmatprep.subr.bf16.mxu0 %v11662_v35  ;;  %v11690_v11 = vsub.f32 %v472_v29, %v564_v58  ;;  %8994 = vmatpush1.bf16.msra.mxu1 %v11667_v42  ;;  %v11693_v28 = vpack.c.bf16 %v558_v37, %v554_v36  ;;  %v572_v23 = vand.u32 4294901760, %v476_v59  ;;  %v11726_v42 = vld [vmem:[#allocation3 + $0x120] sm:$0xff] }
  0x9a   : > { %17557 = vst [vmem:[#allocation47_spill] sm:$0xff] %v11681_v63  ;;  %17558 = vst [vmem:[#allocation48_spill] sm:$0xff] %v11686_v8  ;;  %8996 = vmatprep.subr.bf16.mxu1 %v11672_v53  ;;  %v11698_v35 = vpack.c.bf16 %v11676_v56, %v11674_v55  ;;  %v11700_v54 = vpack.c.bf16 %v564_v58, %v560_v48  ;;  %v570_v22 = vand.u32 4294901760, %v473_v5  ;;  %v574_v44 = vand.u32 4294901760, %v475_v7  ;;  %v479_v53 = vld [vmem:[#allocation3 + $0x110] sm:$0xff] }
  0x9b   : > { %17559 = vst [vmem:[#allocation49_spill] sm:$0xff] %v11688_v10  ;;  %17560 = vst [vmem:[#allocation50_spill] sm:$0xff] %v11690_v11  ;;  %v11703_v29 = vsub.f32 %v469_v40, %v562_v0  ;;  %v11705_v38 = vsub.f32 %v471_v41, %v566_v4  ;;  %v11707_v36 = vsub.f32 %v474_v52, %v568_v21  ;;  %v576_v48 = vand.u32 4294901760, %v478_v6  ;;  %v482_v41 = vld [vmem:[#allocation3 + $0x128] sm:$0xff]  ;;  %v444_v55 = vld [vmem:[%s11861_s26] sm:$0xff] }
  0x9c   : > { %17561 = vst [vmem:[#allocation51_spill] sm:$0xff] %v11693_v28  ;;  %17562 = vst [vmem:[#allocation52_spill] sm:$0xff] %v11698_v35  ;;  %9122 = vmatpush1.bf16.msra.mxu0 %v11681_v63  ;;  %v11709_v37 = vsub.f32 %v476_v59, %v572_v23  ;;  %v11714_v30 = vpack.c.bf16 %v11690_v11, %v11688_v10  ;;  %v580_v58 = vand.u32 4294901760, %v480_v60  ;;  %v484_v63 = vld [vmem:[#allocation3 + $0x138] sm:$0xff]  ;;  %v586_v49 = vand.u32 4294901760, %v11726_v42  ;;  %v498_v10 = vld [vmem:[#allocation3 + $0x1a8] sm:$0xff] }
  0x9d   : > { %17563 = vst [vmem:[#allocation53_spill] sm:$0xff] %v11700_v54  ;;  %17564 = vst [vmem:[#allocation54_spill] sm:$0xff] %v11703_v29  ;;  %9124 = vmatprep.subr.bf16.mxu0 %v11686_v8  ;;  %8998 = vmatpush1.bf16.msra.mxu1 %v11693_v28  ;;  %v11717_v40 = vpack.c.bf16 %v566_v4, %v562_v0  ;;  %v11720_v52 = vpack.c.bf16 %v572_v23, %v568_v21  ;;  %v578_v23 = vand.u32 4294901760, %v477_v24 }
  0x9e   : > { %17565 = vst [vmem:[#allocation55_spill] sm:$0xff] %v11705_v38  ;;  %17566 = vst [vmem:[#allocation56_spill] sm:$0xff] %v11707_v36  ;;  %9000 = vmatprep.subr.bf16.mxu1 %v11700_v54  ;;  %v11722_v59 = vsub.f32 %v473_v5, %v570_v22  ;;  %v11724_v8 = vsub.f32 %v475_v7, %v574_v44  ;;  %v11733_v0 = vpack.c.bf16 %v11705_v38, %v11703_v29  ;;  %v487_v38 = vld [vmem:[#allocation3 + $0x150] sm:$0xff] }
  0x9f   : > { %17567 = vst [vmem:[#allocation57_spill] sm:$0xff] %v11709_v37  ;;  %17568 = vst [vmem:[#allocation58_spill] sm:$0xff] %v11714_v30  ;;  %v11737_v4 = vpack.c.bf16 %v11709_v37, %v11707_v36  ;;  %v582_v5 = vand.u32 4294901760, %v479_v53  ;;  %v11740_v7 = vsub.f32 %v478_v6, %v576_v48  ;;  %v11742_v21 = vsub.f32 %v480_v60, %v580_v58  ;;  %v485_v36 = vld [vmem:[#allocation3 + $0x140] sm:$0xff] }
  0xa0   : > { %17569 = vst [vmem:[#allocation59_spill] sm:$0xff] %v11717_v40  ;;  %17570 = vst [vmem:[#allocation60_spill] sm:$0xff] %v11720_v52  ;;  %9126 = vmatpush1.bf16.msra.mxu0 %v11698_v35  ;;  %v584_v54 = vand.u32 4294901760, %v482_v41  ;;  %v588_v28 = vand.u32 4294901760, %v484_v63  ;;  %v486_v35 = vld [vmem:[#allocation3 + $0x148] sm:$0xff]  ;;  %v11745_v61 = vpack.c.bf16 %v574_v44, %v570_v22  ;;  %v590_v37 = vand.u32 4294901760, %v11728_v12 }
  0xa1   : > { %17571 = vst [vmem:[#allocation61_spill] sm:$0xff] %v11722_v59  ;;  %17572 = vst [vmem:[#allocation62_spill] sm:$0xff] %v11724_v8  ;;  %9128 = vmatprep.subr.bf16.mxu0 %v11714_v30  ;;  %9002 = vmatpush1.bf16.msra.mxu1 %v11717_v40  ;;  %v11752_v6 = vpack.c.bf16 %v11724_v8, %v11722_v59  ;;  %v11754_v60 = vpack.c.bf16 %v580_v58, %v576_v48  ;;  %v592_v44 = vand.u32 4294901760, %v486_v35  ;;  %v490_v58 = vld [vmem:[#allocation3 + $0x168] sm:$0xff]  ;;  %v495_v59 = vld [vmem:[#allocation3 + $0x190] sm:$0xff] }
  0xa2   : > { %17573 = vst [vmem:[#allocation63_spill] sm:$0xff] %v11733_v0  ;;  %17574 = vst [vmem:[#allocation64_spill] sm:$0xff] %v11737_v4  ;;  %9004 = vmatprep.subr.bf16.mxu1 %v11720_v52  ;;  %v11758_v30 = vsub.f32 %v477_v24, %v578_v23  ;;  %v11760_v40 = vsub.f32 %v479_v53, %v582_v5  ;;  %v596_v22 = vand.u32 4294901760, %v488_v1  ;;  %v614_v11 = vand.u32 4294901760, %v495_v59 }
  0xa3   : > { %17575 = vst [vmem:[#allocation65_spill] sm:$0xff] %v11740_v7  ;;  %17576 = vst [vmem:[#allocation66_spill] sm:$0xff] %v11742_v21  ;;  %v11765_v52 = vpack.c.bf16 %v11742_v21, %v11740_v7  ;;  %v11767_v8 = vsub.f32 %v482_v41, %v584_v54  ;;  %v11769_v48 = vsub.f32 %v484_v63, %v588_v28  ;;  %v492_v21 = vld [vmem:[#allocation3 + $0x178] sm:$0xff]  ;;  %v11781_v41 = vld [vmem:[#allocation3 + $0x160] sm:$0xff] }
  0xa4   : > { %17577 = vst [vmem:[#allocation67_spill] sm:$0xff] %v11745_v61  ;;  %17578 = vst [vmem:[#allocation68_spill] sm:$0xff] %v11752_v6  ;;  %9130 = vmatpush1.bf16.msra.mxu0 %v11733_v0  ;;  %v11773_v53 = vpack.c.bf16 %v582_v5, %v578_v23  ;;  %v11776_v0 = vsub.f32 %v11726_v42, %v586_v49  ;;  %v11783_v63 = vld [vmem:[#allocation3 + $0x170] sm:$0xff]  ;;  %v11787_v24 = vpack.c.bf16 %v588_v28, %v584_v54  ;;  %v11789_v5 = vld [vmem:[#allocation3 + $0x188] sm:$0xff] }
  0xa5   : > { %17579 = vst [vmem:[#allocation69_spill] sm:$0xff] %v11754_v60  ;;  %17580 = vst [vmem:[#allocation70_spill] sm:$0xff] %v11758_v30  ;;  %9132 = vmatprep.subr.bf16.mxu0 %v11737_v4  ;;  %9006 = vmatpush1.bf16.msra.mxu1 %v11745_v61  ;;  %v11779_v4 = vsub.f32 %v11728_v12, %v590_v37  ;;  %v594_v61 = vand.u32 4294901760, %v485_v36  ;;  %v598_v23 = vand.u32 4294901760, %v487_v38  ;;  %v11791_v42 = vld [vmem:[#allocation3 + $0x198] sm:$0xff]  ;;  %v600_v54 = vand.u32 4294901760, %v490_v58 }
  0xa6   : > { %17581 = vst [vmem:[#allocation71_spill] sm:$0xff] %v11760_v40  ;;  %17582 = vst [vmem:[#allocation72_spill] sm:$0xff] %v11765_v52  ;;  %9008 = vmatprep.subr.bf16.mxu1 %v11754_v60  ;;  %v11801_v12 = vpack.c.bf16 %v11760_v40, %v11758_v30  ;;  %v11803_v7 = vsub.f32 %v486_v35, %v592_v44  ;;  %v11805_v60 = vsub.f32 %v488_v1, %v596_v22  ;;  %v493_v28 = vld [vmem:[#allocation3 + $0x180] sm:$0xff] }
  0xa7   : > { %17583 = vst [vmem:[#allocation73_spill] sm:$0xff] %v11767_v8  ;;  %17584 = vst [vmem:[#allocation74_spill] sm:$0xff] %v11769_v48  ;;  %v11810_v29 = vpack.c.bf16 %v11769_v48, %v11767_v8  ;;  %v604_v45 = vand.u32 4294901760, %v492_v21  ;;  %v606_v40 = vand.u32 4294901760, %v11783_v63  ;;  %v11815_v35 = vpack.c.bf16 %v590_v37, %v586_v49 }
  0xa8   : > { %17585 = vst [vmem:[#allocation75_spill] sm:$0xff] %v11773_v53  ;;  %17586 = vst [vmem:[#allocation76_spill] sm:$0xff] %v11776_v0  ;;  %9134 = vmatpush1.bf16.msra.mxu0 %v11752_v6  ;;  %v602_v6 = vand.u32 4294901760, %v11781_v41  ;;  %v11819_v1 = vpack.c.bf16 %v11779_v4, %v11776_v0  ;;  %v612_v30 = vand.u32 4294901760, %v11791_v42  ;;  %v11824_v48 = vpack.c.bf16 %v596_v22, %v592_v44  ;;  %v497_v44 = vld [vmem:[#allocation3 + $0x1a0] sm:$0xff]  ;;  %v499_v22 = vld [vmem:[#allocation3 + $0x1b0] sm:$0xff] }
  0xa9   : > { %17587 = vst [vmem:[#allocation77_spill] sm:$0xff] %v11779_v4  ;;  %17588 = vst [vmem:[#allocation78_spill] sm:$0xff] %v11787_v24  ;;  %9136 = vmatprep.subr.bf16.mxu0 %v11765_v52  ;;  %9010 = vmatpush1.bf16.msra.mxu1 %v11773_v53  ;;  %v608_v52 = vand.u32 4294901760, %v11789_v5  ;;  %v11826_v8 = vpack.c.bf16 %v598_v23, %v594_v61  ;;  %v610_v33 = vand.u32 4294901760, %v493_v28  ;;  %v500_v53 = vld [vmem:[#allocation3 + $0x1b8] sm:$0xff] }
  0xaa   : > { %17589 = vst [vmem:[#allocation79_spill] sm:$0xff] %v11801_v12  ;;  %17590 = vst [vmem:[#allocation80_spill] sm:$0xff] %v11803_v7  ;;  %9012 = vmatprep.subr.bf16.mxu1 %v11787_v24  ;;  %v11832_v49 = vpack.c.bf16 %v11805_v60, %v11803_v7  ;;  %v11834_v37 = vsub.f32 %v485_v36, %v594_v61  ;;  %v11836_v4 = vsub.f32 %v487_v38, %v598_v23  ;;  %v502_v61 = vld [vmem:[#allocation3 + $0x1c8] sm:$0xff]  ;;  %v504_v36 = vld [vmem:[#allocation3 + $0x1d8] sm:$0xff] }
  0xab   : > { %17591 = vst [vmem:[#allocation81_spill] sm:$0xff] %v11805_v60  ;;  %17592 = vst [vmem:[#allocation82_spill] sm:$0xff] %v11810_v29  ;;  %v11838_v24 = vsub.f32 %v490_v58, %v600_v54  ;;  %v11841_v0 = vpack.c.bf16 %v604_v45, %v600_v54  ;;  %v11843_v20 = vsub.f32 %v492_v21, %v604_v45  ;;  %v616_v23 = vand.u32 4294901760, %v498_v10  ;;  %v501_v45 = vld [vmem:[#allocation3 + $0x1c0] sm:$0xff]  ;;  %v503_v21 = vld [vmem:[#allocation3 + $0x1d0] sm:$0xff] }
  0xac   : > { %17593 = vst [vmem:[#allocation83_spill] sm:$0xff] %v11815_v35  ;;  %17594 = vst [vmem:[#allocation84_spill] sm:$0xff] %v11819_v1  ;;  %9138 = vmatpush1.bf16.msra.mxu0 %v11801_v12  ;;  %v11846_v12 = vsub.f32 %v11781_v41, %v602_v6  ;;  %v11849_v60 = vsub.f32 %v11783_v63, %v606_v40  ;;  %v11853_v38 = vsub.f32 %v11789_v5, %v608_v52 }
  0xad   : > { %17595 = vst [vmem:[#allocation85_spill] sm:$0xff] %v11824_v48  ;;  %17596 = vst [vmem:[#allocation86_spill] sm:$0xff] %v11826_v8  ;;  %9140 = vmatprep.subr.bf16.mxu0 %v11810_v29  ;;  %9014 = vmatpush1.bf16.msra.mxu1 %v11815_v35  ;;  %v11856_v58 = vsub.f32 %v11791_v42, %v612_v30  ;;  %v620_v54 = vand.u32 4294901760, %v500_v53  ;;  %v11864_v41 = vsub.f32 %v493_v28, %v610_v33 }
  0xae   : > { %17597 = vst [vmem:[#allocation87_spill] sm:$0xff] %v11832_v49  ;;  %17598 = vst [vmem:[#allocation88_spill] sm:$0xff] %v11834_v37  ;;  %9016 = vmatprep.subr.bf16.mxu1 %v11824_v48  ;;  %v11866_v63 = vsub.f32 %v495_v59, %v614_v11  ;;  %v618_v5 = vand.u32 4294901760, %v497_v44  ;;  %v622_v29 = vand.u32 4294901760, %v499_v22  ;;  %v11871_v42 = vpack.c.bf16 %v11836_v4, %v11834_v37  ;;  %v506_v37 = vld [vmem:[#allocation3 + $0x1e8] sm:$0xff] }
  0xaf   : > { %17599 = vst [vmem:[#allocation89_spill] sm:$0xff] %v11836_v4  ;;  %17600 = vst [vmem:[#allocation90_spill] sm:$0xff] %v11838_v24  ;;  %v11873_v35 = vpack.c.bf16 %v606_v40, %v602_v6  ;;  %v624_v7 = vand.u32 4294901760, %v502_v61  ;;  %v628_v56 = vand.u32 4294901760, %v504_v36  ;;  %v11878_v28 = vpack.c.bf16 %v11843_v20, %v11838_v24 }
  0xb0   : > { %17601 = vst [vmem:[#allocation91_spill] sm:$0xff] %v11841_v0  ;;  %17602 = vst [vmem:[#allocation92_spill] sm:$0xff] %v11846_v12  ;;  %9142 = vmatpush1.bf16.msra.mxu0 %v11819_v1  ;;  %v11882_v59 = vpack.c.bf16 %v11849_v60, %v11846_v12  ;;  %v626_v48 = vand.u32 4294901760, %v501_v45  ;;  %v630_v1 = vand.u32 4294901760, %v503_v21  ;;  %v11886_v4 = vpack.c.bf16 %v612_v30, %v608_v52 }
  0xb1   : > { %17603 = vst [vmem:[#allocation93_spill] sm:$0xff] %v11849_v60  ;;  %17604 = vst [vmem:[#allocation94_spill] sm:$0xff] %v11853_v38  ;;  %9144 = vmatprep.subr.bf16.mxu0 %v11832_v49  ;;  %9018 = vmatpush1.bf16.msra.mxu1 %v11826_v8  ;;  %v11888_v40 = vpack.c.bf16 %v614_v11, %v610_v33  ;;  %v11890_v6 = vsub.f32 %v498_v10, %v616_v23  ;;  %v508_v33 = vld [vmem:[#allocation3 + $0x1f8] sm:$0xff] }
  0xb2   : > { %17605 = vst [vmem:[#allocation95_spill] sm:$0xff] %v11856_v58  ;;  %17606 = vst [vmem:[#allocation96_spill] sm:$0xff] %v11864_v41  ;;  %v11892_v49 = vsub.f32 %v500_v53, %v620_v54  ;;  %9020 = vmatprep.subr.bf16.mxu1 %v11841_v0  ;;  %v11897_v60 = vpack.c.bf16 %v11856_v58, %v11853_v38  ;;  %v11901_v12 = vpack.c.bf16 %v11866_v63, %v11864_v41 }
  0xb3   : > { %17607 = vst [vmem:[#allocation97_spill] sm:$0xff] %v11866_v63  ;;  %17608 = vst [vmem:[#allocation98_spill] sm:$0xff] %v11871_v42  ;;  %v11903_v8 = vsub.f32 %v497_v44, %v618_v5  ;;  %v11905_v30 = vsub.f32 %v499_v22, %v622_v29  ;;  %v11908_v10 = vpack.c.bf16 %v620_v54, %v616_v23  ;;  %v632_v44 = vand.u32 4294901760, %v506_v37  ;;  %v505_v23 = vld [vmem:[#allocation3 + $0x1e0] sm:$0xff]  ;;  %v507_v54 = vld [vmem:[#allocation3 + $0x1f0] sm:$0xff] }
  0xb4   : > { %17609 = vst [vmem:[#allocation99_spill] sm:$0xff] %v11873_v35  ;;  %17610 = vst [vmem:[#allocation100_spill] sm:$0xff] %v11878_v28  ;;  %9146 = vmatpush1.bf16.msra.mxu0 %v11871_v42  ;;  %v11910_v11 = vsub.f32 %v502_v61, %v624_v7  ;;  %v11912_v52 = vsub.f32 %v504_v36, %v628_v56  ;;  %v510_v53 = vcombine.high %v444_v55, %v444_v55 }
  0xb5   : > { %17611 = vst [vmem:[#allocation101_spill] sm:$0xff] %v11882_v59  ;;  %17612 = vst [vmem:[#allocation102_spill] sm:$0xff] %v11886_v4  ;;  %9148 = vmatprep.subr.bf16.mxu0 %v11878_v28  ;;  %v11915_v0 = vsub.f32 %v501_v45, %v626_v48  ;;  %v11917_v63 = vsub.f32 %v503_v21, %v630_v1  ;;  %v11919_v41 = vand.u32 4294901760, %v444_v55  ;;  %9022 = vmatpush1.bf16.msra.mxu1 %v11873_v35 }
  0xb6   : > { %17613 = vst [vmem:[#allocation103_spill] sm:$0xff] %v11888_v40  ;;  %17614 = vst [vmem:[#allocation104_spill] sm:$0xff] %v11890_v6  ;;  %v11922_v22 = vpack.c.bf16 %v622_v29, %v618_v5  ;;  %v11926_v61 = vpack.c.bf16 %v11892_v49, %v11890_v6  ;;  %v636_v36 = vand.u32 4294901760, %v508_v33  ;;  %v11928_v42 = vand.u32 4294901760, %v510_v53  ;;  %9024 = vmatprep.subr.bf16.mxu1 %v11886_v4 }
  0xb7   : > { %17615 = vst [vmem:[#allocation105_spill] sm:$0xff] %v11892_v49  ;;  %17616 = vst [vmem:[#allocation106_spill] sm:$0xff] %v11897_v60  ;;  %v11933_v45 = vpack.c.bf16 %v11905_v30, %v11903_v8  ;;  %v11935_v21 = vpack.c.bf16 %v628_v56, %v624_v7  ;;  %v11940_v28 = vpack.c.bf16 %v630_v1, %v626_v48  ;;  %v634_v7 = vand.u32 4294901760, %v505_v23 }
  0xb8   : > { %17617 = vst [vmem:[#allocation107_spill] sm:$0xff] %v11901_v12  ;;  %17618 = vst [vmem:[#allocation108_spill] sm:$0xff] %v11905_v30  ;;  %9150 = vmatpush1.bf16.msra.mxu0 %v11882_v59  ;;  %v11944_v35 = vpack.c.bf16 %v11912_v52, %v11910_v11  ;;  %v11947_v4 = vsub.f32 %v510_v53, %v11928_v42  ;;  %v11950_v30 = vsub.f32 %v444_v55, %v11919_v41 }
  0xb9   : > { %17619 = vst [vmem:[#allocation109_spill] sm:$0xff] %v11908_v10  ;;  %17620 = vst [vmem:[#allocation110_spill] sm:$0xff] %v11917_v63  ;;  %9152 = vmatprep.subr.bf16.mxu0 %v11897_v60  ;;  %v11955_v56 = vpack.c.bf16 %v11917_v63, %v11915_v0  ;;  %v638_v5 = vand.u32 4294901760, %v507_v54  ;;  %v11957_v48 = vsub.f32 %v506_v37, %v632_v44  ;;  %9026 = vmatpush1.bf16.msra.mxu1 %v11888_v40 }
  0xba   : > { %17621 = vst [vmem:[#allocation111_spill] sm:$0xff] %v11919_v41  ;;  %17622 = vst [vmem:[#allocation112_spill] sm:$0xff] %v11922_v22  ;;  %v11960_v1 = vpack.c.bf16 %v636_v36, %v632_v44  ;;  %v11963_v53 = vand.u32 4294901760, %v11947_v4  ;;  %v17634_v55 = vand.u32 4294901760, %v11562_v17  ;;  %v17635_v60 = vand.u32 4294901760, %v11566_v19  ;;  %1244 = vmatprep.mubr.f32.mxu0 %v11947_v4  ;;  %9028 = vmatprep.subr.bf16.mxu1 %v11908_v10 }
  0xbb   : > { %17623 = vst [vmem:[#allocation113_spill] sm:$0xff] %v11926_v61  ;;  %17624 = vst [vmem:[#allocation114_spill] sm:$0xff] %v11928_v42  ;;  %v17636_v37 = vand.u32 4294901760, %v11558_v15  ;;  %v17637_v41 = vand.u32 4294901760, %v11560_v16  ;;  %v11994_v63 = vsub.f32 %v507_v54, %v638_v5 }
  0xbc   : > { %17625 = vst [vmem:[#allocation115_spill] sm:$0xff] %v11933_v45  ;;  %17626 = vst [vmem:[#allocation116_spill] sm:$0xff] %v11935_v21  ;;  %v666_v29 = vsub.f32 %v11562_v17, %v17634_v55  ;;  %v678_v59 = vsub.f32 %v11566_v19, %v17635_v60  ;;  %9154 = vmatpush1.bf16.msra.mxu0 %v11901_v12  ;;  %v643_v60 = vsub.f32 %v11947_v4, %v11963_v53 }
  0xbd   : > { %17627 = vst [vmem:[#allocation117_spill] sm:$0xff] %v11940_v28  ;;  %17628 = vst [vmem:[#allocation118_spill] sm:$0xff] %v11944_v35  ;;  %v660_v44 = vsub.f32 %v11558_v15, %v17636_v37  ;;  %v672_v40 = vsub.f32 %v11560_v16, %v17637_v41  ;;  %v11985_v19 = vand.u32 4294901760, %v11950_v30  ;;  %9156 = vmatprep.subr.bf16.mxu0 %v11926_v61  ;;  %v16840_v55 = vand.u32 4294901760, %v11603_v46 }
  0xbe   : > { %17629 = vst [vmem:[#allocation119_spill] sm:$0xff] %v11947_v4  ;;  %17630 = vst [vmem:[#allocation120_spill] sm:$0xff] %v11950_v30  ;;  %v11990_v17 = vsub.f32 %v508_v33, %v636_v36  ;;  %v11992_v41 = vsub.f32 %v505_v23, %v634_v7  ;;  %9030 = vmatpush1.bf16.msra.mxu1 %v11922_v22  ;;  %v11998_v12 = vand.u32 4294901760, %v643_v60  ;;  %v667_v4 = vand.u32 4294901760, %v666_v29 }
  0xbf   : > { %17631 = vst [vmem:[#allocation121_spill] sm:$0xff] %v11955_v56  ;;  %17632 = vst [vmem:[#allocation122_spill] sm:$0xff] %v11960_v1  ;;  %v679_v16 = vand.u32 4294901760, %v678_v59  ;;  %9032 = vmatprep.subr.bf16.mxu1 %v11935_v21  ;;  %v661_v37 = vand.u32 4294901760, %v660_v44  ;;  %v673_v61 = vand.u32 4294901760, %v672_v40  ;;  %v17640_v33 = vand.u32 4294901760, %v11575_v26 }
  0xc0   : > { %17633 = vst [vmem:[#allocation123_spill] sm:$0xff] %v11963_v53  ;;  %17638 = vst [vmem:[#allocation124_spill] sm:$0xff] %v11985_v19  ;;  %v17641_v23 = vand.u32 4294901760, %v11582_v31  ;;  %9158 = vmatpush1.bf16.msra.mxu0 %v11933_v45  ;;  %645 = vmatprep.mubr.f32.mxu1 %v11998_v12  ;;  %v649_v59 = vsub.f32 %v11950_v30, %v11985_v19  ;;  %v17642_v29 = vand.u32 4294901760, %v11584_v32  ;;  %v17643_v40 = vand.u32 4294901760, %v11590_v34 }
  0xc1   : > { %17639 = vst [vmem:[#allocation125_spill] sm:$0xff] %v11998_v12  ;;  %v684_v36 = vsub.f32 %v11575_v26, %v17640_v33  ;;  %9160 = vmatprep.subr.bf16.mxu0 %v11944_v35  ;;  %v708_v10 = vsub.f32 %v11603_v46, %v16840_v55  ;;  %v17645_v45 = vand.u32 4294901760, %v11605_v47  ;;  %v12036_v33 = vpack.c.bf16 %v11994_v63, %v11992_v41 }
  0xc2   : > { %v696_v54 = vsub.f32 %v11582_v31, %v17641_v23  ;;  %v690_v44 = vsub.f32 %v11584_v32, %v17642_v29  ;;  %v702_v60 = vsub.f32 %v11590_v34, %v17643_v40  ;;  %v12022_v23 = vpack.c.bf16 %v11990_v17, %v11957_v48  ;;  %9034 = vmatpush1.bf16.msra.mxu1 %v11940_v28 }
  0xc3   : > { %v720_v29 = vsub.f32 %v11605_v47, %v17645_v45  ;;  %v12032_v40 = vpack.c.bf16 %v638_v5, %v634_v7  ;;  %17647 = vst [vmem:[#allocation128_spill] sm:$0xff] %v12036_v33  ;;  %9036 = vmatprep.subr.bf16.mxu1 %v11960_v1  ;;  %v12041_v55 = vpack.c.bf16 %v673_v61, %v661_v37  ;;  %v685_v45 = vand.u32 4294901760, %v684_v36 }
  0xc4   : > { %17644 = vst [vmem:[#allocation126_spill] sm:$0xff] %v12022_v23  ;;  %v12043_v21 = vpack.c.bf16 %v679_v16, %v667_v4  ;;  %v697_v19 = vand.u32 4294901760, %v696_v54  ;;  %9162 = vmatpush1.bf16.msra.mxu0 %v11955_v56  ;;  %v12046_v5 = vand.u32 4294901760, %v649_v59  ;;  %v691_v7 = vand.u32 4294901760, %v690_v44  ;;  %v17665_v56 = vld [vmem:[#allocation46_spill] sm:$0xff] }
  0xc5   : > { %17646 = vst [vmem:[#allocation127_spill] sm:$0xff] %v12032_v40  ;;  %17648 = vst [vmem:[#allocation129_spill] sm:$0xff] %v12041_v55  ;;  %v703_v28 = vand.u32 4294901760, %v702_v60  ;;  %v17651_v22 = vand.u32 4294901760, %v11611_v50  ;;  %9164 = vmatprep.subr.bf16.mxu0 %v12022_v23  ;;  %v709_v12 = vand.u32 4294901760, %v708_v10  ;;  %v721_v1 = vand.u32 4294901760, %v720_v29 }
  0xc6   : > { %17649 = vst [vmem:[#allocation130_spill] sm:$0xff] %v12043_v21  ;;  %17650 = vst [vmem:[#allocation131_spill] sm:$0xff] %v12046_v5  ;;  %v17652_v61 = vand.u32 4294901760, %v11613_v51  ;;  %v16850_v4 = vand.u32 4294901760, %v11634_v2  ;;  %9038 = vmatpush1.bf16.msra.mxu1 %v12032_v40  ;;  %v17653_v37 = vand.u32 4294901760, %v11620_v57  ;;  %v17654_v54 = vand.u32 4294901760, %v11629_v62 }
  0xc7   : > { %v714_v35 = vsub.f32 %v11611_v50, %v17651_v22  ;;  %v16849_v10 = vand.u32 4294901760, %v11643_v9  ;;  %9040 = vmatprep.subr.bf16.mxu1 %v12041_v55  ;;  %v12066_v44 = vpack.c.bf16 %v697_v19, %v685_v45  ;;  %v12078_v19 = vpack.c.bf16 %v721_v1, %v709_v12  ;;  %v17664_v23 = vld [vmem:[#allocation45_spill] sm:$0xff] }
  0xc8   : > { %v726_v16 = vsub.f32 %v11613_v51, %v17652_v61  ;;  %v732_v36 = vsub.f32 %v11620_v57, %v17653_v37  ;;  %v744_v22 = vsub.f32 %v11629_v62, %v17654_v54  ;;  %9166 = vmatpush1.bf16.msra.mxu0 %v12036_v33  ;;  %v12072_v37 = vpack.c.bf16 %v703_v28, %v691_v7 }
  0xc9   : > { %17655 = vst [vmem:[#allocation132_spill] sm:$0xff] %v12066_v44  ;;  %651 = vmatmul.mubr.f32.vlgmr.msra.gmra.mrb[0].mxu1 %v12046_v5  ;;  %9168 = vmatprep.subr.bf16.mxu0 %v11556_v14  ;;  %17657 = vst [vmem:[#allocation134_spill] sm:$0xff] %v12078_v19  ;;  %v715_v45 = vand.u32 4294901760, %v714_v35  ;;  %v738_v61 = vsub.f32 %v11634_v2, %v16850_v4  ;;  %v17658_v54 = vand.u32 4294901760, %v11636_v3  ;;  %v17659_v12 = vand.u32 4294901760, %v11648_v13  ;;  %v17670_v14 = vld [vmem:[#allocation50_spill] sm:$0xff] }
  0xca   : > { %17656 = vst [vmem:[#allocation133_spill] sm:$0xff] %v12072_v37  ;;  %v727_v60 = vand.u32 4294901760, %v726_v16  ;;  %9042 = vmatpush1.bf16.msra.mxu1 %v12043_v21  ;;  %v733_v28 = vand.u32 4294901760, %v732_v36  ;;  %v745_v7 = vand.u32 4294901760, %v744_v22  ;;  %v756_v29 = vsub.f32 %v11643_v9, %v16849_v10  ;;  %1042 = vmatprep.mubr.f32.mxu1 %v11928_v42  ;;  %v17671_v42 = vld [vmem:[#allocation30_spill] sm:$0xff] }
  0xcb   : > { %v750_v59 = vsub.f32 %v11636_v3, %v17658_v54  ;;  %1247 = vmatmul.mubr.f32.vlgmr.msra.gmra.mrb[0].mxu0 %v11950_v30  ;;  %9044 = vmatprep.subr.bf16.mxu1 %v12066_v44  ;;  %v768_v35 = vsub.f32 %v11648_v13, %v17659_v12  ;;  %v17660_v1 = vand.u32 4294901760, %v11655_v25  ;;  %v17661_v36 = vand.u32 4294901760, %v11657_v27 }
  0xcc   : > { %9170 = vmatpush1.bf16.msra.mxu0 %v11564_v18  ;;  %v17662_v54 = vand.u32 4294901760, %v11664_v39  ;;  %v17663_v4 = vand.u32 4294901760, %v11669_v43  ;;  %1384 = vmatprep.mubr.f32.mxu0 %v11963_v53  ;;  %v12113_v21 = vpack.c.bf16 %v727_v60, %v715_v45  ;;  %v12117_v30 = vpack.c.bf16 %v745_v7, %v733_v28 }
  0xcd   : > { %v762_v16 = vsub.f32 %v11655_v25, %v17660_v1  ;;  %v774_v22 = vsub.f32 %v11657_v27, %v17661_v36  ;;  %v17666_v1 = vld [vmem:[#allocation27_spill] sm:$0xff]  ;;  %v17668_v36 = vld [vmem:[#allocation49_spill] sm:$0xff]  ;;  %v751_v18 = vand.u32 4294901760, %v750_v59  ;;  %v757_v12 = vand.u32 4294901760, %v756_v29 }
  0xce   : > { %v780_v10 = vsub.f32 %v11664_v39, %v17662_v54  ;;  %v792_v33 = vsub.f32 %v11669_v43, %v17663_v4  ;;  %9172 = vmatprep.subr.bf16.mxu0 %v17666_v1  ;;  %17667 = vst [vmem:[#allocation45_spill] sm:$0xff] %v12113_v21  ;;  %9046 = vmatpush1.bf16.msra.mxu1 %v12072_v37  ;;  %17669 = vst [vmem:[#allocation135_spill] sm:$0xff] %v12117_v30  ;;  %v739_v54 = vand.u32 4294901760, %v738_v61  ;;  %v17674_v61 = vld [vmem:[#allocation33_spill] sm:$0xff] }
  0xcf   : > { %9048 = vmatprep.subr.bf16.mxu1 %v12078_v19  ;;  %v769_v44 = vand.u32 4294901760, %v768_v35  ;;  %v763_v5 = vand.u32 4294901760, %v762_v16  ;;  %v775_v53 = vand.u32 4294901760, %v774_v22  ;;  %v17672_v55 = vand.u32 4294901760, %v17664_v23  ;;  %v17676_v35 = vld [vmem:[#allocation54_spill] sm:$0xff]  ;;  %v17677_v22 = vld [vmem:[#allocation55_spill] sm:$0xff] }
  0xd0   : > { %9174 = vmatpush1.bf16.msra.mxu0 %v17671_v42  ;;  %v781_v60 = vand.u32 4294901760, %v780_v10  ;;  %v793_v45 = vand.u32 4294901760, %v792_v33  ;;  %v17673_v28 = vand.u32 4294901760, %v17665_v56  ;;  %v17675_v7 = vand.u32 4294901760, %v17668_v36  ;;  %v17680_v19 = vld [vmem:[#allocation56_spill] sm:$0xff]  ;;  %v17681_v42 = vld [vmem:[#allocation57_spill] sm:$0xff] }
  0xd1   : > { %v786_v37 = vsub.f32 %v17664_v23, %v17672_v55  ;;  %9176 = vmatprep.subr.bf16.mxu0 %v17674_v61  ;;  %v12135_v33 = vpack.c.bf16 %v751_v18, %v739_v54  ;;  %v17679_v55 = vand.u32 4294901760, %v17670_v14  ;;  %v12143_v1 = vpack.c.bf16 %v769_v44, %v757_v12  ;;  %v17689_v12 = vld [vmem:[#allocation61_spill] sm:$0xff] }
  0xd2   : > { %v798_v59 = vsub.f32 %v17665_v56, %v17673_v28  ;;  %v804_v29 = vsub.f32 %v17668_v36, %v17675_v7  ;;  %9050 = vmatpush1.bf16.msra.mxu1 %v12113_v21  ;;  %v17683_v7 = vld [vmem:[#allocation34_spill] sm:$0xff]  ;;  %v12146_v16 = vpack.c.bf16 %v775_v53, %v763_v5  ;;  %v12148_v4 = vpack.c.bf16 %v793_v45, %v781_v60  ;;  %v17686_v21 = vld [vmem:[#allocation37_spill] sm:$0xff]  ;;  %v17700_v56 = vld [vmem:[#allocation40_spill] sm:$0xff] }
  0xd3   : > { %17678 = vst [vmem:[#allocation136_spill] sm:$0xff] %v12135_v33  ;;  %v816_v10 = vsub.f32 %v17670_v14, %v17679_v55  ;;  %9052 = vmatprep.subr.bf16.mxu1 %v12117_v30  ;;  %17682 = vst [vmem:[#allocation137_spill] sm:$0xff] %v12143_v1  ;;  %v787_v18 = vand.u32 4294901760, %v786_v37  ;;  %v17687_v55 = vand.u32 4294901760, %v17676_v35  ;;  %v17688_v61 = vand.u32 4294901760, %v17677_v22  ;;  %v17695_v30 = vld [vmem:[#allocation70_spill] sm:$0xff] }
  0xd4   : > { %9178 = vmatpush1.bf16.msra.mxu0 %v17683_v7  ;;  %17684 = vst [vmem:[#allocation138_spill] sm:$0xff] %v12146_v16  ;;  %17685 = vst [vmem:[#allocation139_spill] sm:$0xff] %v12148_v4  ;;  %v799_v54 = vand.u32 4294901760, %v798_v59  ;;  %v805_v40 = vand.u32 4294901760, %v804_v29  ;;  %v17690_v5 = vand.u32 4294901760, %v17680_v19  ;;  %v17691_v60 = vand.u32 4294901760, %v17681_v42 }
  0xd5   : > { %9180 = vmatprep.subr.bf16.mxu0 %v17686_v21  ;;  %v810_v28 = vsub.f32 %v17676_v35, %v17687_v55  ;;  %v822_v44 = vsub.f32 %v17677_v22, %v17688_v61  ;;  %v817_v53 = vand.u32 4294901760, %v816_v10  ;;  %v17692_v59 = vld [vmem:[#allocation62_spill] sm:$0xff]  ;;  %v17693_v55 = vld [vmem:[#allocation65_spill] sm:$0xff]  ;;  %v17702_v21 = vand.u32 4294901760, %v17689_v12 }
  0xd6   : > { %9054 = vmatpush1.bf16.msra.mxu1 %v12135_v33  ;;  %v828_v37 = vsub.f32 %v17680_v19, %v17690_v5  ;;  %v840_v45 = vsub.f32 %v17681_v42, %v17691_v60  ;;  %v17694_v61 = vld [vmem:[#allocation66_spill] sm:$0xff]  ;;  %v17696_v33 = vld [vmem:[#allocation71_spill] sm:$0xff]  ;;  %v17698_v14 = vld [vmem:[#allocation73_spill] sm:$0xff]  ;;  %v12175_v60 = vpack.c.bf16 %v799_v54, %v787_v18  ;;  %v17704_v5 = vand.u32 4294901760, %v17692_v59 }
  0xd7   : > { %9056 = vmatprep.subr.bf16.mxu1 %v12143_v1  ;;  %v17697_v35 = vld [vmem:[#allocation38_spill] sm:$0xff]  ;;  %v811_v29 = vand.u32 4294901760, %v810_v28  ;;  %v823_v1 = vand.u32 4294901760, %v822_v44  ;;  %v834_v7 = vsub.f32 %v17689_v12, %v17702_v21  ;;  %v12181_v22 = vpack.c.bf16 %v817_v53, %v805_v40  ;;  %v17719_v42 = vld [vmem:[#allocation51_spill] sm:$0xff] }
  0xd8   : > { %9182 = vmatpush1.bf16.msra.mxu0 %v17697_v35  ;;  %v17699_v19 = vld [vmem:[#allocation74_spill] sm:$0xff]  ;;  %17701 = vst [vmem:[#allocation140_spill] sm:$0xff] %v12175_v60  ;;  %v829_v10 = vand.u32 4294901760, %v828_v37  ;;  %v841_v35 = vand.u32 4294901760, %v840_v45  ;;  %v846_v36 = vsub.f32 %v17692_v59, %v17704_v5  ;;  %v17705_v18 = vand.u32 4294901760, %v17693_v55  ;;  %v17709_v45 = vld [vmem:[#allocation43_spill] sm:$0xff] }
  0xd9   : > { %9184 = vmatprep.subr.bf16.mxu0 %v17700_v56  ;;  %17703 = vst [vmem:[#allocation141_spill] sm:$0xff] %v12181_v22  ;;  %v17706_v54 = vand.u32 4294901760, %v17694_v61  ;;  %v17707_v44 = vand.u32 4294901760, %v17695_v30  ;;  %v17708_v53 = vand.u32 4294901760, %v17696_v33  ;;  %v17710_v5 = vand.u32 4294901760, %v17698_v14  ;;  %v17712_v56 = vld [vmem:[#allocation76_spill] sm:$0xff] }
  0xda   : > { %9058 = vmatpush1.bf16.msra.mxu1 %v12146_v16  ;;  %v852_v28 = vsub.f32 %v17693_v55, %v17705_v18  ;;  %v17711_v18 = vand.u32 4294901760, %v17699_v19  ;;  %v17714_v59 = vld [vmem:[#allocation44_spill] sm:$0xff] }
  0xdb   : > { %9060 = vmatprep.subr.bf16.mxu1 %v12148_v4  ;;  %v864_v21 = vsub.f32 %v17694_v61, %v17706_v54  ;;  %v858_v40 = vsub.f32 %v17695_v30, %v17707_v44  ;;  %v870_v37 = vsub.f32 %v17696_v33, %v17708_v53  ;;  %v876_v4 = vsub.f32 %v17698_v14, %v17710_v5  ;;  %v17713_v61 = vld [vmem:[#allocation77_spill] sm:$0xff]  ;;  %v17716_v30 = vld [vmem:[#allocation80_spill] sm:$0xff] }
  0xdc   : > { %9186 = vmatpush1.bf16.msra.mxu0 %v17709_v45  ;;  %v888_v16 = vsub.f32 %v17699_v19, %v17711_v18  ;;  %v12209_v44 = vpack.c.bf16 %v823_v1, %v811_v29  ;;  %v12213_v45 = vpack.c.bf16 %v841_v35, %v829_v10  ;;  %v835_v33 = vand.u32 4294901760, %v834_v7  ;;  %v17718_v14 = vld [vmem:[#allocation81_spill] sm:$0xff] }
  0xdd   : > { %9188 = vmatprep.subr.bf16.mxu0 %v17714_v59  ;;  %v847_v5 = vand.u32 4294901760, %v846_v36  ;;  %v853_v18 = vand.u32 4294901760, %v852_v28  ;;  %v865_v54 = vand.u32 4294901760, %v864_v21  ;;  %v859_v19 = vand.u32 4294901760, %v858_v40  ;;  %v17722_v7 = vld [vmem:[#allocation53_spill] sm:$0xff]  ;;  %v17724_v21 = vld [vmem:[#allocation88_spill] sm:$0xff] }
  0xde   : > { %17715 = vst [vmem:[#allocation76_spill] sm:$0xff] %v12209_v44  ;;  %9062 = vmatpush1.bf16.msra.mxu1 %v12175_v60  ;;  %17717 = vst [vmem:[#allocation77_spill] sm:$0xff] %v12213_v45  ;;  %v871_v55 = vand.u32 4294901760, %v870_v37  ;;  %v877_v1 = vand.u32 4294901760, %v876_v4  ;;  %v889_v29 = vand.u32 4294901760, %v888_v16  ;;  %v17720_v53 = vand.u32 4294901760, %v17712_v56 }
  0xdf   : > { %9064 = vmatprep.subr.bf16.mxu1 %v12181_v22  ;;  %v17721_v35 = vand.u32 4294901760, %v17713_v61  ;;  %v17723_v10 = vand.u32 4294901760, %v17716_v30  ;;  %v17725_v37 = vld [vmem:[#allocation89_spill] sm:$0xff]  ;;  %v12231_v4 = vpack.c.bf16 %v847_v5, %v835_v33  ;;  %v17727_v16 = vand.u32 4294901760, %v17718_v14 }
  0xe0   : > { %9190 = vmatpush1.bf16.msra.mxu0 %v17719_v42  ;;  %v882_v60 = vsub.f32 %v17712_v56, %v17720_v53  ;;  %v12242_v40 = vpack.c.bf16 %v871_v55, %v859_v19  ;;  %v12244_v12 = vpack.c.bf16 %v889_v29, %v877_v1  ;;  %v17734_v22 = vand.u32 4294901760, %v17725_v37 }
  0xe1   : > { %v894_v36 = vsub.f32 %v17713_v61, %v17721_v35  ;;  %9192 = vmatprep.subr.bf16.mxu0 %v17722_v7  ;;  %v900_v28 = vsub.f32 %v17716_v30, %v17723_v10  ;;  %17726 = vst [vmem:[#allocation80_spill] sm:$0xff] %v12231_v4  ;;  %v912_v53 = vsub.f32 %v17718_v14, %v17727_v16  ;;  %v17729_v10 = vld [vmem:[#allocation59_spill] sm:$0xff]  ;;  %v17733_v16 = vand.u32 4294901760, %v17724_v21 }
  0xe2   : > { %9066 = vmatpush1.bf16.msra.mxu1 %v12209_v44  ;;  %v12239_v7 = vpack.c.bf16 %v865_v54, %v853_v18  ;;  %17730 = vst [vmem:[#allocation88_spill] sm:$0xff] %v12242_v40  ;;  %17731 = vst [vmem:[#allocation89_spill] sm:$0xff] %v12244_v12  ;;  %v883_v33 = vand.u32 4294901760, %v882_v60  ;;  %v17732_v44 = vld [vmem:[#allocation60_spill] sm:$0xff]  ;;  %v918_v54 = vsub.f32 %v17725_v37, %v17734_v22  ;;  %v17736_v55 = vand.u32 4294901760, %v11838_v24 }
  0xe3   : > { %9068 = vmatprep.subr.bf16.mxu1 %v12213_v45  ;;  %v895_v5 = vand.u32 4294901760, %v894_v36  ;;  %v901_v42 = vand.u32 4294901760, %v900_v28  ;;  %v906_v35 = vsub.f32 %v17724_v21, %v17733_v16  ;;  %v17735_v18 = vld [vmem:[#allocation92_spill] sm:$0xff]  ;;  %v913_v19 = vand.u32 4294901760, %v912_v53  ;;  %v17738_v36 = vld [vmem:[#allocation93_spill] sm:$0xff] }
  0xe4   : > { %17728 = vst [vmem:[#allocation81_spill] sm:$0xff] %v12239_v7  ;;  %9194 = vmatpush1.bf16.msra.mxu0 %v17729_v10  ;;  %v924_v60 = vsub.f32 %v11838_v24, %v17736_v55  ;;  %v17737_v1 = vand.u32 4294901760, %v11843_v20  ;;  %v17739_v45 = vld [vmem:[#allocation96_spill] sm:$0xff]  ;;  %v17741_v10 = vld [vmem:[#allocation67_spill] sm:$0xff]  ;;  %v17742_v24 = vld [vmem:[#allocation69_spill] sm:$0xff]  ;;  %v17744_v16 = vand.u32 4294901760, %v17735_v18 }
  0xe5   : > { %9196 = vmatprep.subr.bf16.mxu0 %v17732_v44  ;;  %v907_v28 = vand.u32 4294901760, %v906_v35  ;;  %v12277_v44 = vpack.c.bf16 %v913_v19, %v901_v42  ;;  %v17746_v55 = vand.u32 4294901760, %v17738_v36 }
  0xe6   : > { %9070 = vmatpush1.bf16.msra.mxu1 %v12231_v4  ;;  %v936_v29 = vsub.f32 %v11843_v20, %v17737_v1  ;;  %v17740_v4 = vld [vmem:[#allocation97_spill] sm:$0xff]  ;;  %v12271_v1 = vpack.c.bf16 %v895_v5, %v883_v33  ;;  %v930_v22 = vsub.f32 %v17735_v18, %v17744_v16  ;;  %v925_v53 = vand.u32 4294901760, %v924_v60 }
  0xe7   : > { %9072 = vmatprep.subr.bf16.mxu1 %v12239_v7  ;;  %v919_v7 = vand.u32 4294901760, %v918_v54  ;;  %17745 = vst [vmem:[#allocation93_spill] sm:$0xff] %v12277_v44  ;;  %v942_v59 = vsub.f32 %v17738_v36, %v17746_v55  ;;  %v17747_v33 = vand.u32 4294901760, %v11853_v38  ;;  %v17748_v5 = vand.u32 4294901760, %v11856_v58 }
  0xe8   : > { %9198 = vmatpush1.bf16.msra.mxu0 %v17741_v10  ;;  %17743 = vst [vmem:[#allocation92_spill] sm:$0xff] %v12271_v1  ;;  %v937_v10 = vand.u32 4294901760, %v936_v29  ;;  %v17749_v16 = vand.u32 4294901760, %v17739_v45  ;;  %v17750_v19 = vand.u32 4294901760, %v17740_v4  ;;  %v17751_v29 = vld [vmem:[#allocation75_spill] sm:$0xff]  ;;  %v17752_v55 = vand.u32 4294901760, %v11890_v6 }
  0xe9   : > { %9200 = vmatprep.subr.bf16.mxu0 %v17742_v24  ;;  %v948_v35 = vsub.f32 %v11853_v38, %v17747_v33  ;;  %v960_v54 = vsub.f32 %v11856_v58, %v17748_v5  ;;  %v17753_v33 = vand.u32 4294901760, %v11892_v49  ;;  %v17754_v24 = vld [vmem:[#allocation108_spill] sm:$0xff]  ;;  %v17755_v38 = vld [vmem:[#allocation78_spill] sm:$0xff] }
  0xea   : > { %9074 = vmatpush1.bf16.msra.mxu1 %v12242_v40  ;;  %v954_v42 = vsub.f32 %v17739_v45, %v17749_v16  ;;  %v966_v60 = vsub.f32 %v17740_v4, %v17750_v19  ;;  %v12305_v16 = vpack.c.bf16 %v919_v7, %v907_v28  ;;  %v931_v45 = vand.u32 4294901760, %v930_v22  ;;  %v17758_v4 = vld [vmem:[#allocation83_spill] sm:$0xff] }
  0xeb   : > { %9076 = vmatprep.subr.bf16.mxu1 %v12244_v12  ;;  %v972_v12 = vsub.f32 %v11890_v6, %v17752_v55  ;;  %v984_v40 = vsub.f32 %v11892_v49, %v17753_v33  ;;  %v12308_v19 = vpack.c.bf16 %v937_v10, %v925_v53  ;;  %v949_v33 = vand.u32 4294901760, %v948_v35  ;;  %v17761_v55 = vld [vmem:[#allocation85_spill] sm:$0xff]  ;;  %v17762_v35 = vld [vmem:[#allocation110_spill] sm:$0xff] }
  0xec   : > { %9202 = vmatpush1.bf16.msra.mxu0 %v17751_v29  ;;  %17756 = vst [vmem:[#allocation108_spill] sm:$0xff] %v12305_v16  ;;  %v943_v29 = vand.u32 4294901760, %v942_v59  ;;  %v961_v5 = vand.u32 4294901760, %v960_v54  ;;  %v955_v49 = vand.u32 4294901760, %v954_v42  ;;  %v967_v58 = vand.u32 4294901760, %v966_v60  ;;  %v17764_v60 = vld [vmem:[#allocation23_spill] sm:$0xff] }
  0xed   : > { %9204 = vmatprep.subr.bf16.mxu0 %v17755_v38  ;;  %17757 = vst [vmem:[#allocation142_spill] sm:$0xff] %v12308_v19  ;;  %v973_v7 = vand.u32 4294901760, %v972_v12  ;;  %v985_v28 = vand.u32 4294901760, %v984_v40  ;;  %v17759_v22 = vand.u32 4294901760, %v11903_v8  ;;  %v17760_v59 = vand.u32 4294901760, %v17754_v24 }
  0xee   : > { %9078 = vmatpush1.bf16.msra.mxu1 %v12271_v1  ;;  %v17763_v42 = vand.u32 4294901760, %v11558_v15  ;;  %v12330_v40 = vpack.c.bf16 %v943_v29, %v931_v45  ;;  %v17769_v1 = vand.u32 4294901760, %v11912_v52  ;;  %v16912_v45 = vand.u32 4294901760, %v11957_v48 }
  0xef   : > { %9080 = vmatprep.subr.bf16.mxu1 %v12277_v44  ;;  %v978_v10 = vsub.f32 %v11903_v8, %v17759_v22  ;;  %v990_v53 = vsub.f32 %v17754_v24, %v17760_v59  ;;  %v17765_v44 = vand.u32 4294901760, %v17764_v60  ;;  %v17768_v22 = vand.u32 4294901760, %v11910_v11 }
  0xf0   : > { %9206 = vmatpush1.bf16.msra.mxu0 %v17758_v4  ;;  %17767 = vst [vmem:[#allocation23_spill] sm:$0xff] %v12330_v40  ;;  %v1008_v6 = vsub.f32 %v11912_v52, %v17769_v1  ;;  %v17772_v4 = vld [vmem:[#allocation26_spill] sm:$0xff]  ;;  %v12350_v60 = vpack.c.bf16 %v967_v58, %v955_v49  ;;  %v17783_v29 = vand.u32 4294901760, %v11582_v31  ;;  %v17785_v58 = vand.u32 4294901760, %v11584_v32 }
  0xf1   : > { %9208 = vmatprep.subr.bf16.mxu0 %v17761_v55  ;;  %v12327_v12 = vpack.c.bf16 %v17765_v44, %v17763_v42  ;;  %v996_v59 = vsub.f32 %v11910_v11, %v17768_v22  ;;  %v17770_v55 = vld [vmem:[#allocation24_spill] sm:$0xff]  ;;  %v17773_v15 = vand.u32 4294901760, %v17772_v4  ;;  %v12345_v44 = vpack.c.bf16 %v961_v5, %v949_v33  ;;  %v17776_v42 = vld [vmem:[#allocation86_spill] sm:$0xff] }
  0xf2   : > { %9082 = vmatpush1.bf16.msra.mxu1 %v12305_v16  ;;  %v17771_v54 = vand.u32 4294901760, %v17770_v55  ;;  %17777 = vst [vmem:[#allocation143_spill] sm:$0xff] %v12350_v60  ;;  %v12352_v22 = vpack.c.bf16 %v985_v28, %v973_v7  ;;  %v979_v1 = vand.u32 4294901760, %v978_v10  ;;  %v991_v55 = vand.u32 4294901760, %v990_v53  ;;  %v17779_v16 = vld [vmem:[#allocation91_spill] sm:$0xff] }
  0xf3   : > { %17766 = vst [vmem:[#allocation110_spill] sm:$0xff] %v12327_v12  ;;  %9084 = vmatprep.subr.bf16.mxu1 %v12308_v19  ;;  %17775 = vst [vmem:[#allocation26_spill] sm:$0xff] %v12345_v44  ;;  %v17780_v4 = vand.u32 4294901760, %v11915_v0  ;;  %v17781_v5 = vand.u32 4294901760, %v17762_v35  ;;  %v17786_v7 = vand.u32 4294901760, %v11590_v34  ;;  %v997_v10 = vand.u32 4294901760, %v996_v59 }
  0xf4   : > { %v12342_v38 = vpack.c.bf16 %v17773_v15, %v17771_v54  ;;  %9210 = vmatpush1.bf16.msra.mxu0 %v17776_v42  ;;  %17778 = vst [vmem:[#allocation144_spill] sm:$0xff] %v12352_v22  ;;  %v17782_v15 = vand.u32 4294901760, %v11575_v26  ;;  %v1009_v53 = vand.u32 4294901760, %v1008_v6  ;;  %v1020_v26 = vsub.f32 %v11957_v48, %v16912_v45  ;;  %v12500_v19 = vld [vmem:[#allocation6 + $0x48] sm:$0xff] }
  0xf5   : > { %9212 = vmatprep.subr.bf16.mxu0 %v17779_v16  ;;  %v1002_v54 = vsub.f32 %v11915_v0, %v17780_v4  ;;  %v1014_v33 = vsub.f32 %v17762_v35, %v17781_v5  ;;  %v12371_v28 = vpack.c.bf16 %v17786_v7, %v17785_v58  ;;  %v17788_v31 = vand.u32 4294901760, %v11990_v17  ;;  %v17795_v7 = vld [vmem:[#allocation99_spill] sm:$0xff]  ;;  %v17796_v5 = vld [vmem:[#allocation102_spill] sm:$0xff] }
  0xf6   : > { %17774 = vst [vmem:[#allocation24_spill] sm:$0xff] %v12342_v38  ;;  %v12365_v49 = vpack.c.bf16 %v17783_v29, %v17782_v15  ;;  %9086 = vmatpush1.bf16.msra.mxu1 %v12330_v40  ;;  %v17789_v34 = vand.u32 4294901760, %v11603_v46  ;;  %v17790_v29 = vand.u32 4294901760, %v11605_v47  ;;  %v17792_v6 = vand.u32 4294901760, %v11611_v50  ;;  %v17839_v40 = vld [vmem:[#allocation117_spill] sm:$0xff]  ;;  %v17869_v42 = vld [vmem:[#allocation71_spill] sm:$0xff] }
  0xf7   : > { %17787 = vst [vmem:[#allocation146_spill] sm:$0xff] %v12371_v28  ;;  %9088 = vmatprep.subr.bf16.mxu1 %v12345_v44  ;;  %v1032_v32 = vsub.f32 %v11990_v17, %v17788_v31  ;;  %v17793_v15 = vand.u32 4294901760, %v11613_v51  ;;  %v12397_v45 = vpack.c.bf16 %v991_v55, %v979_v1  ;;  %v1003_v4 = vand.u32 4294901760, %v1002_v54  ;;  %v17807_v44 = vld [vmem:[#allocation103_spill] sm:$0xff] }
  0xf8   : > { %17784 = vst [vmem:[#allocation145_spill] sm:$0xff] %v12365_v49  ;;  %v12387_v59 = vpack.c.bf16 %v17790_v29, %v17789_v34  ;;  %9214 = vmatpush1.bf16.msra.mxu0 %v17795_v7  ;;  %v1015_v31 = vand.u32 4294901760, %v1014_v33  ;;  %v17798_v46 = vand.u32 4294901760, %v11992_v41  ;;  %v17799_v50 = vand.u32 4294901760, %v11994_v63  ;;  %v12406_v34 = vld [vmem:[#allocation6 + $0x8] sm:$0xff]  ;;  %v17867_v7 = vld [vmem:[#allocation70_spill] sm:$0xff] }
  0xf9   : > { %v12393_v58 = vpack.c.bf16 %v17793_v15, %v17792_v6  ;;  %9216 = vmatprep.subr.bf16.mxu0 %v17796_v5  ;;  %17797 = vst [vmem:[#allocation149_spill] sm:$0xff] %v12397_v45  ;;  %v17800_v29 = vand.u32 4294901760, %v11620_v57  ;;  %v17801_v6 = vand.u32 4294901760, %v11629_v62  ;;  %v17803_v55 = vand.u32 4294901760, %v11634_v2  ;;  %v17808_v57 = vld [vmem:[#allocation109_spill] sm:$0xff] }
  0xfa   : > { %17791 = vst [vmem:[#allocation147_spill] sm:$0xff] %v12387_v59  ;;  %9090 = vmatpush1.bf16.msra.mxu1 %v12350_v60  ;;  %v1026_v47 = vsub.f32 %v11992_v41, %v17798_v46  ;;  %v1038_v51 = vsub.f32 %v11994_v63, %v17799_v50  ;;  %v17804_v54 = vand.u32 4294901760, %v11636_v3  ;;  %v12421_v15 = vpack.c.bf16 %v1009_v53, %v997_v10  ;;  %v12423_v60 = vld [vmem:[#allocation6 + $0x18] sm:$0xff] }
  0xfb   : > { %17794 = vst [vmem:[#allocation148_spill] sm:$0xff] %v12393_v58  ;;  %v12412_v1 = vpack.c.bf16 %v17801_v6, %v17800_v29  ;;  %9092 = vmatprep.subr.bf16.mxu1 %v12352_v22  ;;  %v1021_v46 = vand.u32 4294901760, %v1020_v26  ;;  %v1033_v50 = vand.u32 4294901760, %v1032_v32  ;;  %v16917_v62 = vand.u32 4294901760, %v12406_v34 }
  0xfc   : > { %v12418_v33 = vpack.c.bf16 %v17804_v54, %v17803_v55  ;;  %17806 = vst [vmem:[#allocation152_spill] sm:$0xff] %v12421_v15  ;;  %9218 = vmatpush1.bf16.msra.mxu0 %v17807_v44  ;;  %v17809_v2 = vand.u32 4294901760, %v11643_v9  ;;  %v17810_v3 = vand.u32 4294901760, %v11648_v13  ;;  %v17812_v6 = vand.u32 4294901760, %v11655_v25  ;;  %v12447_v13 = vld [vmem:[#allocation6] sm:$0xff]  ;;  %v17817_v25 = vld [vmem:[#allocation112_spill] sm:$0xff] }
  0xfd   : > { %17802 = vst [vmem:[#allocation150_spill] sm:$0xff] %v12412_v1  ;;  %9220 = vmatprep.subr.bf16.mxu0 %v17808_v57  ;;  %v17813_v10 = vand.u32 4294901760, %v11657_v27  ;;  %v12441_v26 = vpack.c.bf16 %v1015_v31, %v1003_v4  ;;  %v1027_v32 = vand.u32 4294901760, %v1026_v47  ;;  %v1039_v55 = vand.u32 4294901760, %v1038_v51  ;;  %v12452_v27 = vld [vmem:[#allocation6 + $0x28] sm:$0xff] }
  0xfe   : > { %17805 = vst [vmem:[#allocation151_spill] sm:$0xff] %v12418_v33  ;;  %v12432_v29 = vpack.c.bf16 %v17810_v3, %v17809_v2  ;;  %9094 = vmatpush1.bf16.msra.mxu1 %v12397_v45  ;;  %v12445_v9 = vpack.c.bf16 %v1033_v50, %v1021_v46  ;;  %v12449_v2 = vld [vmem:[#allocation6 + $0x10] sm:$0xff]  ;;  %v12454_v3 = vld [vmem:[#allocation6 + $0x38] sm:$0xff]  ;;  %v17818_v4 = vand.u32 4294901760, %v11664_v39  ;;  %v17819_v31 = vand.u32 4294901760, %v11669_v43  ;;  %v17822_v46 = vld [vmem:[#allocation46_spill] sm:$0xff] }
  0xff   : > { %v12438_v53 = vpack.c.bf16 %v17813_v10, %v17812_v6  ;;  %17815 = vst [vmem:[#allocation155_spill] sm:$0xff] %v12441_v26  ;;  %9096 = vmatprep.subr.bf16.mxu1 %v12421_v15  ;;  %v17821_v51 = vand.u32 4294901760, %v17664_v23  ;;  %v17823_v50 = vand.u32 4294901760, %v17822_v46  ;;  %v17825_v10 = vld [vmem:[#allocation116_spill] sm:$0xff]  ;;  %v12470_v54 = vpack.c.bf16 %v1039_v55, %v1027_v32  ;;  %v17829_v55 = vld [vmem:[#allocation49_spill] sm:$0xff]  ;;  %v17836_v45 = vld [vmem:[#allocation55_spill] sm:$0xff] }
 0x100   : > { %17811 = vst [vmem:[#allocation153_spill] sm:$0xff] %v12432_v29  ;;  %17816 = vst [vmem:[#allocation156_spill] sm:$0xff] %v12445_v9  ;;  %9222 = vmatpush1.bf16.msra.mxu0 %v17817_v25  ;;  %v12460_v47 = vpack.c.bf16 %v17819_v31, %v17818_v4  ;;  %v17827_v39 = vand.u32 4294901760, %v12423_v60  ;;  %v12480_v4 = vld [vmem:[#allocation6 + $0x20] sm:$0xff]  ;;  %v12482_v31 = vld [vmem:[#allocation6 + $0x30] sm:$0xff]  ;;  %v17830_v46 = vand.u32 4294901760, %v17829_v55 }
 0x101   : > { %17814 = vst [vmem:[#allocation154_spill] sm:$0xff] %v12438_v53  ;;  %v12466_v6 = vpack.c.bf16 %v17823_v50, %v17821_v51  ;;  %9224 = vmatprep.subr.bf16.mxu0 %v17825_v10  ;;  %17826 = vst [vmem:[#allocation158_spill] sm:$0xff] %v12470_v54  ;;  %v17831_v50 = vld [vmem:[#allocation50_spill] sm:$0xff]  ;;  %v17837_v23 = vand.u32 4294901760, %v17836_v45  ;;  %v17842_v45 = vand.u32 4294901760, %v12449_v2  ;;  %v17846_v32 = vld [vmem:[#allocation57_spill] sm:$0xff] }
 0x102   : > { %17820 = vst [vmem:[#allocation157_spill] sm:$0xff] %v12460_v47  ;;  %9098 = vmatpush1.bf16.msra.mxu1 %v12441_v26  ;;  %v12476_v15 = vpack.c.bf16 %v17827_v39, %v16917_v62  ;;  %v17832_v26 = vand.u32 4294901760, %v17831_v50  ;;  %v17834_v62 = vld [vmem:[#allocation54_spill] sm:$0xff]  ;;  %v17868_v16 = vand.u32 4294901760, %v17867_v7 }
 0x103   : > { %17824 = vst [vmem:[#allocation46_spill] sm:$0xff] %v12466_v6  ;;  %9100 = vmatprep.subr.bf16.mxu1 %v12445_v9  ;;  %v17835_v43 = vand.u32 4294901760, %v17834_v62  ;;  %v12502_v9 = vld [vmem:[#allocation6 + $0x58] sm:$0xff]  ;;  %v17840_v51 = vld [vmem:[#allocation122_spill] sm:$0xff]  ;;  %v17841_v62 = vand.u32 4294901760, %v12447_v13 }
 0x104   : > { %17828 = vst [vmem:[#allocation159_spill] sm:$0xff] %v12476_v15  ;;  %v12491_v39 = vpack.c.bf16 %v17832_v26, %v17830_v46  ;;  %9226 = vmatpush1.bf16.msra.mxu0 %v17839_v40  ;;  %v17847_v40 = vand.u32 4294901760, %v17846_v32  ;;  %v17851_v25 = vld [vmem:[#allocation62_spill] sm:$0xff] }
 0x105   : > { %v12497_v22 = vpack.c.bf16 %v17837_v23, %v17835_v43  ;;  %9228 = vmatprep.subr.bf16.mxu0 %v17840_v51  ;;  %v12512_v26 = vpack.c.bf16 %v17842_v45, %v17841_v62  ;;  %v12514_v43 = vld [vmem:[#allocation6 + $0x40] sm:$0xff]  ;;  %v17844_v23 = vld [vmem:[#allocation56_spill] sm:$0xff]  ;;  %v17849_v51 = vld [vmem:[#allocation61_spill] sm:$0xff]  ;;  %v17852_v50 = vand.u32 4294901760, %v17851_v25  ;;  %v17855_v62 = vand.u32 4294901760, %v12454_v3 }
 0x106   : > { %17833 = vst [vmem:[#allocation49_spill] sm:$0xff] %v12491_v39  ;;  %9102 = vmatpush1.bf16.msra.mxu1 %v12470_v54  ;;  %v17845_v46 = vand.u32 4294901760, %v17844_v23  ;;  %v17850_v55 = vand.u32 4294901760, %v17849_v51  ;;  %v17854_v54 = vand.u32 4294901760, %v12452_v27  ;;  %v12541_v51 = vld [vmem:[#allocation6 + $0x78] sm:$0xff]  ;;  %v17857_v25 = vld [vmem:[#allocation127_spill] sm:$0xff] }
 0x107   : > { %17838 = vst [vmem:[#allocation50_spill] sm:$0xff] %v12497_v22  ;;  %17843 = vst [vmem:[#allocation54_spill] sm:$0xff] %v12512_v26  ;;  %9360 = vmatprep.subr.bf16.mxu1 %v12476_v15  ;;  %v17862_v23 = vld [vmem:[#allocation65_spill] sm:$0xff]  ;;  %v17864_v15 = vld [vmem:[#allocation66_spill] sm:$0xff] }
 0x108   : > { %v12520_v10 = vpack.c.bf16 %v17847_v40, %v17845_v46  ;;  %v12526_v57 = vpack.c.bf16 %v17852_v50, %v17850_v55  ;;  %v12533_v45 = vpack.c.bf16 %v17855_v62, %v17854_v54  ;;  %v12537_v40 = vld [vmem:[#allocation6 + $0x50] sm:$0xff]  ;;  %v12539_v46 = vld [vmem:[#allocation6 + $0x68] sm:$0xff]  ;;  %9230 = vmatpush1.bf16.msra.mxu0 %v17857_v25  ;;  %v17859_v50 = vand.u32 4294901760, %v12480_v4 }
 0x109   : > { %v17858_v55 = vld [vmem:[#allocation111_spill] sm:$0xff]  ;;  %9232 = vmatprep.subr.bf16.mxu0 %v12327_v12  ;;  %v17860_v54 = vand.u32 4294901760, %v12482_v31  ;;  %v17863_v32 = vand.u32 4294901760, %v17862_v23  ;;  %v17865_v44 = vand.u32 4294901760, %v17864_v15  ;;  %v17870_v25 = vand.u32 4294901760, %v17869_v42  ;;  %v12578_v15 = vld [vmem:[#allocation6 + $0x60] sm:$0xff] }
 0x10a   : > { %17848 = vst [vmem:[#allocation55_spill] sm:$0xff] %v12520_v10  ;;  %17853 = vst [vmem:[#allocation56_spill] sm:$0xff] %v12526_v57  ;;  %1044 = vmatmul.mubr.f32.vlgmr.msra.gmra.mrb[0].mxu1 %v17858_v55  ;;  %v17874_v42 = vand.u32 4294901760, %v12500_v19  ;;  %v12585_v23 = vld [vmem:[#allocation6 + $0x98] sm:$0xff]  ;;  %v17879_v12 = vld [vmem:[#allocation74_spill] sm:$0xff] }
 0x10b   : > { %17856 = vst [vmem:[#allocation57_spill] sm:$0xff] %v12533_v45  ;;  %v12550_v62 = vpack.c.bf16 %v17860_v54, %v17859_v50  ;;  %v12556_v5 = vpack.c.bf16 %v17865_v44, %v17863_v32  ;;  %v12562_v57 = vpack.c.bf16 %v17870_v25, %v17868_v16  ;;  %9362 = vmatpush1.bf16.msra.mxu1 %v12512_v26  ;;  %v17872_v54 = vld [vmem:[#allocation125_spill] sm:$0xff]  ;;  %v17873_v44 = vld [vmem:[#allocation124_spill] sm:$0xff]  ;;  %v17875_v16 = vand.u32 4294901760, %v12502_v9  ;;  %v12583_v25 = vld [vmem:[#allocation6 + $0x88] sm:$0xff] }
 0x10c   : > { %1993 = vmatprep.mubr.f32.mxu1 %v17872_v54  ;;  %1388 = vmatmul.mubr.f32.vlgmr.msra.gmra.mrb[0].mxu0 %v17873_v44  ;;  %v12580_v32 = vld [vmem:[#allocation6 + $0x70] sm:$0xff]  ;;  %v17877_v50 = vld [vmem:[#allocation73_spill] sm:$0xff]  ;;  %v17880_v44 = vand.u32 4294901760, %v17879_v12  ;;  %v17882_v26 = vand.u32 4294901760, %v17712_v56  ;;  %v17885_v54 = vld [vmem:[#allocation114_spill] sm:$0xff]  ;;  %v17889_v12 = vand.u32 4294901760, %v12539_v46 }
 0x10d   : > { %17861 = vst [vmem:[#allocation61_spill] sm:$0xff] %v12550_v62  ;;  %17866 = vst [vmem:[#allocation62_spill] sm:$0xff] %v12556_v5  ;;  %9364 = vmatprep.subr.bf16.mxu1 %v12533_v45  ;;  %v12576_v7 = vpack.c.bf16 %v17875_v16, %v17874_v42  ;;  %9234 = vmatpush1.bf16.msra.mxu0 %v12342_v38  ;;  %v17878_v55 = vand.u32 4294901760, %v17877_v50  ;;  %v17883_v42 = vand.u32 4294901760, %v17713_v61  ;;  %v17886_v38 = vand.u32 4294901760, %v12514_v43 }
 0x10e   : > { %17871 = vst [vmem:[#allocation65_spill] sm:$0xff] %v12562_v57  ;;  %1651 = vmatprep.mubr.f32.mxu0 %v17885_v54  ;;  %9236 = vmatprep.subr.bf16.mxu0 %v12365_v49  ;;  %v17887_v50 = vand.u32 4294901760, %v12537_v40  ;;  %v17890_v56 = vand.u32 4294901760, %v12541_v51  ;;  %v12636_v54 = vld [vmem:[#allocation6 + $0xa8] sm:$0xff] }
 0x10f   : > { %17876 = vst [vmem:[#allocation66_spill] sm:$0xff] %v12576_v7  ;;  %v12591_v45 = vpack.c.bf16 %v17880_v44, %v17878_v55  ;;  %v12597_v16 = vpack.c.bf16 %v17883_v42, %v17882_v26  ;;  %9366 = vmatpush1.bf16.msra.mxu1 %v12550_v62  ;;  %v12616_v44 = vld [vmem:[#allocation6 + $0x80] sm:$0xff]  ;;  %v12618_v42 = vld [vmem:[#allocation6 + $0x90] sm:$0xff]  ;;  %v17893_v62 = vand.u32 4294901760, %v17718_v14  ;;  %v17896_v26 = vand.u32 4294901760, %v17725_v37 }
 0x110   : > { %v12606_v57 = vpack.c.bf16 %v17887_v50, %v17886_v38  ;;  %v12612_v55 = vpack.c.bf16 %v17890_v56, %v17889_v12  ;;  %9368 = vmatprep.subr.bf16.mxu1 %v12576_v7  ;;  %v17892_v50 = vand.u32 4294901760, %v17716_v30  ;;  %v17895_v56 = vand.u32 4294901760, %v17724_v21  ;;  %v12638_v7 = vld [vmem:[#allocation6 + $0xb8] sm:$0xff] }
 0x111   : > { %17881 = vst [vmem:[#allocation70_spill] sm:$0xff] %v12591_v45  ;;  %17884 = vst [vmem:[#allocation71_spill] sm:$0xff] %v12597_v16  ;;  %9238 = vmatpush1.bf16.msra.mxu0 %v12371_v28  ;;  %v17898_v21 = vand.u32 4294901760, %v12578_v15  ;;  %v17899_v37 = vand.u32 4294901760, %v12580_v32  ;;  %v17903_v38 = vand.u32 4294901760, %v11843_v20  ;;  %v17905_v30 = vand.u32 4294901760, %v17735_v18 }
 0x112   : > { %17888 = vst [vmem:[#allocation73_spill] sm:$0xff] %v12606_v57  ;;  %17891 = vst [vmem:[#allocation74_spill] sm:$0xff] %v12612_v55  ;;  %v12627_v12 = vpack.c.bf16 %v17893_v62, %v17892_v50  ;;  %v12633_v61 = vpack.c.bf16 %v17896_v26, %v17895_v56  ;;  %9240 = vmatprep.subr.bf16.mxu0 %v12387_v59  ;;  %v12650_v26 = vld [vmem:[#allocation6 + $0xa0] sm:$0xff]  ;;  %v17906_v14 = vand.u32 4294901760, %v17738_v36  ;;  %v17908_v28 = vand.u32 4294901760, %v12583_v25  ;;  %v12677_v18 = vld [vmem:[#allocation6 + $0xd8] sm:$0xff] }
 0x113   : > { %9370 = vmatpush1.bf16.msra.mxu1 %v12606_v57  ;;  %v12648_v62 = vpack.c.bf16 %v17899_v37, %v17898_v21  ;;  %v17901_v50 = vld [vmem:[#allocation90_spill] sm:$0xff]  ;;  %v17909_v21 = vand.u32 4294901760, %v12585_v23  ;;  %v17911_v36 = vand.u32 4294901760, %v12616_v44  ;;  %v17919_v57 = vld [vmem:[#allocation96_spill] sm:$0xff] }
 0x114   : > { %17894 = vst [vmem:[#allocation160_spill] sm:$0xff] %v12627_v12  ;;  %17897 = vst [vmem:[#allocation161_spill] sm:$0xff] %v12633_v61  ;;  %v17902_v56 = vand.u32 4294901760, %v17901_v50  ;;  %v12662_v59 = vpack.c.bf16 %v17906_v14, %v17905_v30  ;;  %9372 = vmatprep.subr.bf16.mxu1 %v12612_v55  ;;  %v17912_v30 = vand.u32 4294901760, %v12618_v42  ;;  %v17914_v14 = vld [vmem:[#allocation94_spill] sm:$0xff]  ;;  %v17916_v50 = vld [vmem:[#allocation95_spill] sm:$0xff] }
 0x115   : > { %17900 = vst [vmem:[#allocation162_spill] sm:$0xff] %v12648_v62  ;;  %v12669_v37 = vpack.c.bf16 %v17909_v21, %v17908_v28  ;;  %9242 = vmatpush1.bf16.msra.mxu0 %v12393_v58  ;;  %v17915_v21 = vand.u32 4294901760, %v17914_v14  ;;  %v17917_v20 = vand.u32 4294901760, %v17916_v50  ;;  %v12704_v14 = vld [vmem:[#allocation6 + $0xc0] sm:$0xff]  ;;  %v12706_v50 = vld [vmem:[#allocation6 + $0xd0] sm:$0xff] }
 0x116   : > { %v12656_v49 = vpack.c.bf16 %v17903_v38, %v17902_v56  ;;  %17907 = vst [vmem:[#allocation163_spill] sm:$0xff] %v12662_v59  ;;  %v12673_v38 = vld [vmem:[#allocation6 + $0xb0] sm:$0xff]  ;;  %v12675_v56 = vld [vmem:[#allocation6 + $0xc8] sm:$0xff]  ;;  %9244 = vmatprep.subr.bf16.mxu0 %v12412_v1  ;;  %v12685_v28 = vpack.c.bf16 %v17912_v30, %v17911_v36  ;;  %v17920_v59 = vand.u32 4294901760, %v17919_v57  ;;  %v17929_v36 = vld [vmem:[#allocation105_spill] sm:$0xff] }
 0x117   : > { %17910 = vst [vmem:[#allocation164_spill] sm:$0xff] %v12669_v37  ;;  %v12691_v55 = vpack.c.bf16 %v17917_v20, %v17915_v21  ;;  %9374 = vmatpush1.bf16.msra.mxu1 %v12648_v62  ;;  %v12718_v20 = vld [vmem:[#allocation6 + $0xf8] sm:$0xff]  ;;  %v17927_v21 = vld [vmem:[#allocation104_spill] sm:$0xff]  ;;  %v17930_v58 = vand.u32 4294901760, %v17929_v36  ;;  %v17933_v62 = vand.u32 4294901760, %v17754_v24  ;;  %v17936_v36 = vand.u32 4294901760, %v12673_v38 }
 0x118   : > { %17904 = vst [vmem:[#allocation90_spill] sm:$0xff] %v12656_v49  ;;  %17913 = vst [vmem:[#allocation165_spill] sm:$0xff] %v12685_v28  ;;  %v17921_v49 = vld [vmem:[#allocation97_spill] sm:$0xff]  ;;  %9376 = vmatprep.subr.bf16.mxu1 %v12669_v37  ;;  %v17928_v30 = vand.u32 4294901760, %v17927_v21  ;;  %v17932_v37 = vand.u32 4294901760, %v11903_v8  ;;  %v17935_v21 = vand.u32 4294901760, %v12650_v26 }
 0x119   : > { %17918 = vst [vmem:[#allocation94_spill] sm:$0xff] %v12691_v55  ;;  %v17922_v61 = vand.u32 4294901760, %v17921_v49  ;;  %v17924_v49 = vand.u32 4294901760, %v12636_v54  ;;  %9246 = vmatpush1.bf16.msra.mxu0 %v12418_v33  ;;  %v17938_v8 = vand.u32 4294901760, %v12675_v56  ;;  %v17939_v24 = vand.u32 4294901760, %v12677_v18 }
 0x11a   : > { %v12724_v1 = vpack.c.bf16 %v17930_v58, %v17928_v30  ;;  %9248 = vmatprep.subr.bf16.mxu0 %v12432_v29  ;;  %v12740_v58 = vpack.c.bf16 %v17936_v36, %v17935_v21  ;;  %v17941_v29 = vand.u32 4294901760, %v11910_v11  ;;  %v17942_v21 = vand.u32 4294901760, %v11912_v52  ;;  %v12770_v30 = vld [vmem:[#allocation6 + $0x118] sm:$0xff] }
 0x11b   : > { %v12697_v12 = vpack.c.bf16 %v17922_v61, %v17920_v59  ;;  %v17925_v59 = vand.u32 4294901760, %v12638_v7  ;;  %v12716_v61 = vld [vmem:[#allocation6 + $0xe8] sm:$0xff]  ;;  %9378 = vmatpush1.bf16.msra.mxu1 %v12685_v28  ;;  %v17944_v33 = vand.u32 4294901760, %v11915_v0  ;;  %v17947_v11 = vand.u32 4294901760, %v12704_v14 }
 0x11c   : > { %17931 = vst [vmem:[#allocation97_spill] sm:$0xff] %v12724_v1  ;;  %17937 = vst [vmem:[#allocation105_spill] sm:$0xff] %v12740_v58  ;;  %v12759_v36 = vpack.c.bf16 %v17942_v21, %v17941_v29  ;;  %v17948_v52 = vand.u32 4294901760, %v12706_v50  ;;  %v17951_v21 = vand.u32 4294901760, %v11990_v17  ;;  %v17963_v17 = vand.u32 4294901760, %v12447_v13 }
 0x11d   : > { %17923 = vst [vmem:[#allocation95_spill] sm:$0xff] %v12697_v12  ;;  %v12713_v57 = vpack.c.bf16 %v17925_v59, %v17924_v49  ;;  %v12730_v12 = vpack.c.bf16 %v17933_v62, %v17932_v37  ;;  %v12746_v62 = vpack.c.bf16 %v17939_v24, %v17938_v8  ;;  %v12751_v59 = vld [vmem:[#allocation6 + $0xe0] sm:$0xff]  ;;  %v12753_v49 = vld [vmem:[#allocation6 + $0xf0] sm:$0xff]  ;;  %v17945_v8 = vand.u32 4294901760, %v17762_v35  ;;  %9250 = vmatpush1.bf16.msra.mxu0 %v12438_v53  ;;  %v12768_v37 = vld [vmem:[#allocation6 + $0x108] sm:$0xff] }
 0x11e   : > { %17943 = vst [vmem:[#allocation167_spill] sm:$0xff] %v12759_v36  ;;  %9252 = vmatprep.subr.bf16.mxu0 %v12460_v47  ;;  %v12777_v29 = vpack.c.bf16 %v17948_v52, %v17947_v11  ;;  %v17953_v47 = vand.u32 4294901760, %v11992_v41  ;;  %v17954_v53 = vand.u32 4294901760, %v11994_v63  ;;  %v17956_v11 = vand.u32 4294901760, %v12716_v61  ;;  %v12808_v63 = vld [vmem:[#allocation6 + $0x128] sm:$0xff]  ;;  %v12810_v41 = vld [vmem:[#allocation6 + $0x138] sm:$0xff] }
 0x11f   : > { %17926 = vst [vmem:[#allocation96_spill] sm:$0xff] %v12713_v57  ;;  %17934 = vst [vmem:[#allocation104_spill] sm:$0xff] %v12730_v12  ;;  %9380 = vmatprep.subr.bf16.mxu1 %v12713_v57  ;;  %v12765_v24 = vpack.c.bf16 %v17945_v8, %v17944_v33  ;;  %v17950_v33 = vand.u32 4294901760, %v11957_v48  ;;  %v17957_v52 = vand.u32 4294901760, %v12718_v20  ;;  %v12826_v48 = vsub.f32 %v12447_v13, %v17963_v17 }
 0x120   : > { %17940 = vst [vmem:[#allocation166_spill] sm:$0xff] %v12746_v62  ;;  %17949 = vst [vmem:[#allocation169_spill] sm:$0xff] %v12777_v29  ;;  %9382 = vmatpush1.bf16.msra.mxu1 %v12740_v58  ;;  %v12792_v57 = vpack.c.bf16 %v17954_v53, %v17953_v47  ;;  %v17959_v53 = vand.u32 4294901760, %v12406_v34  ;;  %v17965_v35 = vand.u32 4294901760, %v12751_v59  ;;  %v17970_v13 = vand.u32 4294901760, %v12768_v37  ;;  %v12876_v58 = vld [vmem:[#allocation6 + $0x148] sm:$0xff] }
 0x121   : > { %17946 = vst [vmem:[#allocation168_spill] sm:$0xff] %v12765_v24  ;;  %v12786_v8 = vpack.c.bf16 %v17951_v21, %v17950_v33  ;;  %9384 = vmatprep.subr.bf16.mxu1 %v12746_v62  ;;  %v12799_v0 = vpack.c.bf16 %v17957_v52, %v17956_v11  ;;  %v12803_v33 = vld [vmem:[#allocation6 + $0x100] sm:$0xff]  ;;  %v12805_v21 = vld [vmem:[#allocation6 + $0x110] sm:$0xff]  ;;  %9254 = vmatpush1.bf16.msra.mxu0 %v12466_v6  ;;  %v17961_v11 = vand.u32 4294901760, %v12423_v60  ;;  %17964 = vst [vmem:[#allocation175_spill] sm:$0xff] %v12826_v48 }
 0x122   : > { %17955 = vst [vmem:[#allocation171_spill] sm:$0xff] %v12792_v57  ;;  %v12815_v47 = vsub.f32 %v12406_v34, %v17959_v53  ;;  %9256 = vmatprep.subr.bf16.mxu0 %v12491_v39  ;;  %v17966_v6 = vand.u32 4294901760, %v12753_v49  ;;  %v17971_v17 = vand.u32 4294901760, %v12770_v30  ;;  %v12851_v53 = vld [vmem:[#allocation6 + $0x120] sm:$0xff]  ;;  %v17973_v62 = vand.u32 4294901760, %v12452_v27  ;;  %v18007_v24 = vld [vmem:[#allocation56_spill] sm:$0xff] }
 0x123   : > { %17952 = vst [vmem:[#allocation170_spill] sm:$0xff] %v12786_v8  ;;  %17958 = vst [vmem:[#allocation172_spill] sm:$0xff] %v12799_v0  ;;  %v12820_v52 = vsub.f32 %v12423_v60, %v17961_v11  ;;  %v17968_v11 = vand.u32 4294901760, %v12449_v2  ;;  %v12853_v60 = vld [vmem:[#allocation6 + $0x130] sm:$0xff]  ;;  %v17999_v28 = vand.u32 4294901760, %v12578_v15  ;;  %v18005_v57 = vand.u32 4294901760, %v12585_v23 }
 0x124   : > { %17960 = vst [vmem:[#allocation173_spill] sm:$0xff] %v12815_v47  ;;  %9386 = vmatpush1.bf16.msra.mxu1 %v12777_v29  ;;  %v12833_v34 = vpack.c.bf16 %v17966_v6, %v17965_v35  ;;  %v12847_v29 = vpack.c.bf16 %v17971_v17, %v17970_v13  ;;  %v17977_v13 = vand.u32 4294901760, %v12480_v4  ;;  %v17979_v35 = vand.u32 4294901760, %v12482_v31 }
 0x125   : > { %17962 = vst [vmem:[#allocation174_spill] sm:$0xff] %v12820_v52  ;;  %v12840_v39 = vsub.f32 %v12449_v2, %v17968_v11  ;;  %9388 = vmatprep.subr.bf16.mxu1 %v12799_v0  ;;  %v12858_v2 = vsub.f32 %v12452_v27, %v17973_v62  ;;  %v17975_v11 = vand.u32 4294901760, %v12454_v3  ;;  %9258 = vmatpush1.bf16.msra.mxu0 %v12497_v22  ;;  %v12878_v27 = vld [vmem:[#allocation6 + $0x158] sm:$0xff]  ;;  %v17981_v62 = vand.u32 4294901760, %v12500_v19 }
 0x126   : > { %17967 = vst [vmem:[#allocation176_spill] sm:$0xff] %v12833_v34  ;;  %17972 = vst [vmem:[#allocation178_spill] sm:$0xff] %v12847_v29  ;;  %v12868_v17 = vsub.f32 %v12480_v4, %v17977_v13  ;;  %v12873_v6 = vsub.f32 %v12482_v31, %v17979_v35  ;;  %v17985_v13 = vand.u32 4294901760, %v12514_v43  ;;  %v17987_v35 = vand.u32 4294901760, %v12537_v40  ;;  %9260 = vmatprep.subr.bf16.mxu0 %v12520_v10 }
 0x127   : > { %17969 = vst [vmem:[#allocation177_spill] sm:$0xff] %v12840_v39  ;;  %17974 = vst [vmem:[#allocation179_spill] sm:$0xff] %v12858_v2  ;;  %v12863_v0 = vsub.f32 %v12454_v3, %v17975_v11  ;;  %v12883_v3 = vsub.f32 %v12500_v19, %v17981_v62  ;;  %v17983_v11 = vand.u32 4294901760, %v12502_v9  ;;  %v17989_v19 = vand.u32 4294901760, %v12539_v46 }
 0x128   : > { %17978 = vst [vmem:[#allocation181_spill] sm:$0xff] %v12868_v17  ;;  %17980 = vst [vmem:[#allocation182_spill] sm:$0xff] %v12873_v6  ;;  %v12893_v31 = vsub.f32 %v12514_v43, %v17985_v13  ;;  %v12898_v22 = vsub.f32 %v12537_v40, %v17987_v35  ;;  %9390 = vmatpush1.bf16.msra.mxu1 %v12833_v34  ;;  %v17994_v35 = vand.u32 4294901760, %v12541_v51  ;;  %v12929_v13 = vld [vmem:[#allocation6 + $0x140] sm:$0xff]  ;;  %v12931_v40 = vld [vmem:[#allocation6 + $0x150] sm:$0xff] }
 0x129   : > { %17976 = vst [vmem:[#allocation180_spill] sm:$0xff] %v12863_v0  ;;  %17982 = vst [vmem:[#allocation183_spill] sm:$0xff] %v12883_v3  ;;  %v12888_v4 = vsub.f32 %v12502_v9, %v17983_v11  ;;  %v12904_v62 = vsub.f32 %v12539_v46, %v17989_v19  ;;  %v17991_v9 = vand.u32 4294901760, %v12803_v33  ;;  %v17992_v11 = vand.u32 4294901760, %v12805_v21  ;;  %9392 = vmatprep.subr.bf16.mxu1 %v12847_v29 }
 0x12a   : > { %17986 = vst [vmem:[#allocation185_spill] sm:$0xff] %v12893_v31  ;;  %17988 = vst [vmem:[#allocation186_spill] sm:$0xff] %v12898_v22  ;;  %v12918_v10 = vsub.f32 %v12541_v51, %v17994_v35  ;;  %v17996_v46 = vand.u32 4294901760, %v12808_v63  ;;  %v17997_v19 = vand.u32 4294901760, %v12810_v41  ;;  %v12936_v51 = vsub.f32 %v12578_v15, %v17999_v28  ;;  %9262 = vmatpush1.bf16.msra.mxu0 %v18007_v24  ;;  %v12956_v15 = vld [vmem:[#allocation6 + $0x178] sm:$0xff] }
 0x12b   : > { %17984 = vst [vmem:[#allocation184_spill] sm:$0xff] %v12888_v4  ;;  %17990 = vst [vmem:[#allocation187_spill] sm:$0xff] %v12904_v62  ;;  %v12911_v43 = vpack.c.bf16 %v17992_v11, %v17991_v9  ;;  %v1940_v9 = vand.u32 4294901760, %v12876_v58  ;;  %v1944_v11 = vand.u32 4294901760, %v12878_v27  ;;  %v18001_v35 = vand.u32 4294901760, %v12580_v32  ;;  %9264 = vmatprep.subr.bf16.mxu0 %v12556_v5 }
 0x12c   : > { %17995 = vst [vmem:[#allocation189_spill] sm:$0xff] %v12918_v10  ;;  %v12925_v34 = vpack.c.bf16 %v17997_v19, %v17996_v46  ;;  %18000 = vst [vmem:[#allocation191_spill] sm:$0xff] %v12936_v51  ;;  %v18003_v46 = vand.u32 4294901760, %v12583_v25  ;;  %v12951_v8 = vsub.f32 %v12585_v23, %v18005_v57  ;;  %v12954_v10 = vld [vmem:[#allocation6 + $0x168] sm:$0xff]  ;;  %v18008_v28 = vand.u32 4294901760, %v12616_v44 }
 0x12d   : > { %17993 = vst [vmem:[#allocation188_spill] sm:$0xff] %v12911_v43  ;;  %v12941_v29 = vsub.f32 %v12580_v32, %v18001_v35  ;;  %v18010_v35 = vand.u32 4294901760, %v12618_v42  ;;  %v18014_v57 = vand.u32 4294901760, %v12638_v7  ;;  %9394 = vmatpush1.bf16.msra.mxu1 %v12911_v43  ;;  %v1952_v43 = vand.u32 4294901760, %v12956_v15 }
 0x12e   : > { %17998 = vst [vmem:[#allocation190_spill] sm:$0xff] %v12925_v34  ;;  %v12946_v19 = vsub.f32 %v12583_v25, %v18003_v46  ;;  %18006 = vst [vmem:[#allocation194_spill] sm:$0xff] %v12951_v8  ;;  %v12961_v32 = vsub.f32 %v12616_v44, %v18008_v28  ;;  %v18012_v46 = vand.u32 4294901760, %v12636_v54  ;;  %v18016_v44 = vand.u32 4294901760, %v12650_v26  ;;  %9396 = vmatprep.subr.bf16.mxu1 %v12925_v34  ;;  %v1845_v8 = vld [vmem:[#allocation6 + $0x188] sm:$0xff] }
 0x12f   : > { %18002 = vst [vmem:[#allocation192_spill] sm:$0xff] %v12941_v29  ;;  %v12966_v25 = vsub.f32 %v12618_v42, %v18010_v35  ;;  %v12976_v24 = vsub.f32 %v12638_v7, %v18014_v57  ;;  %v18018_v42 = vand.u32 4294901760, %v12851_v53  ;;  %v18019_v35 = vand.u32 4294901760, %v12853_v60 }
 0x130   : > { %18004 = vst [vmem:[#allocation193_spill] sm:$0xff] %v12946_v19  ;;  %18009 = vst [vmem:[#allocation195_spill] sm:$0xff] %v12961_v32  ;;  %v12971_v23 = vsub.f32 %v12636_v54, %v18012_v46  ;;  %v12982_v28 = vsub.f32 %v12650_v26, %v18016_v44  ;;  %v1942_v46 = vand.u32 4294901760, %v12929_v13  ;;  %v1946_v7 = vand.u32 4294901760, %v12931_v40  ;;  %v18032_v32 = vld [vmem:[#allocation65_spill] sm:$0xff] }
 0x131   : > { %18011 = vst [vmem:[#allocation196_spill] sm:$0xff] %v12966_v25  ;;  %18015 = vst [vmem:[#allocation198_spill] sm:$0xff] %v12976_v24  ;;  %v12989_v54 = vpack.c.bf16 %v18019_v35, %v18018_v42  ;;  %v18021_v57 = vand.u32 4294901760, %v12673_v38  ;;  %v12999_v26 = vpack.c.bf16 %v1944_v11, %v1940_v9  ;;  %v1948_v44 = vand.u32 4294901760, %v12954_v10  ;;  %v1842_v42 = vld [vmem:[#allocation6 + $0x170] sm:$0xff]  ;;  %9266 = vmatpush1.bf16.msra.mxu0 %v18032_v32 }
 0x132   : > { %18013 = vst [vmem:[#allocation197_spill] sm:$0xff] %v12971_v23  ;;  %18017 = vst [vmem:[#allocation199_spill] sm:$0xff] %v12982_v28  ;;  %v1840_v28 = vld [vmem:[#allocation6 + $0x160] sm:$0xff]  ;;  %v18024_v35 = vand.u32 4294901760, %v12675_v56  ;;  %v18026_v23 = vand.u32 4294901760, %v12677_v18  ;;  %9268 = vmatprep.subr.bf16.mxu0 %v12591_v45  ;;  %v1954_v32 = vand.u32 4294901760, %v1842_v42 }
 0x133   : > { %18020 = vst [vmem:[#allocation200_spill] sm:$0xff] %v12989_v54  ;;  %v12996_v5 = vsub.f32 %v12673_v38, %v18021_v57  ;;  %18023 = vst [vmem:[#allocation202_spill] sm:$0xff] %v12999_v26  ;;  %v18028_v57 = vand.u32 4294901760, %v12704_v14  ;;  %9398 = vmatpush1.bf16.msra.mxu1 %v12989_v54 }
 0x134   : > { %v13006_v24 = vsub.f32 %v12675_v56, %v18024_v35  ;;  %v13011_v38 = vsub.f32 %v12677_v18, %v18026_v23  ;;  %v1847_v56 = vld [vmem:[#allocation6 + $0x198] sm:$0xff]  ;;  %v18033_v35 = vand.u32 4294901760, %v12716_v61  ;;  %v18035_v18 = vand.u32 4294901760, %v12718_v20  ;;  %9400 = vmatprep.subr.bf16.mxu1 %v12999_v26 }
 0x135   : > { %18022 = vst [vmem:[#allocation201_spill] sm:$0xff] %v12996_v5  ;;  %v13016_v34 = vsub.f32 %v12704_v14, %v18028_v57  ;;  %v18030_v5 = vand.u32 4294901760, %v12706_v50  ;;  %v18037_v14 = vand.u32 4294901760, %v12751_v59  ;;  %v1960_v45 = vand.u32 4294901760, %v1847_v56  ;;  %9270 = vmatpush1.bf16.msra.mxu0 %v12597_v16  ;;  %v1850_v16 = vld [vmem:[#allocation6 + $0x1b0] sm:$0xff] }
 0x136   : > { %18025 = vst [vmem:[#allocation203_spill] sm:$0xff] %v13006_v24  ;;  %18027 = vst [vmem:[#allocation204_spill] sm:$0xff] %v13011_v38  ;;  %v13027_v24 = vsub.f32 %v12716_v61, %v18033_v35  ;;  %v13032_v23 = vsub.f32 %v12718_v20, %v18035_v18  ;;  %v18041_v61 = vand.u32 4294901760, %v12768_v37  ;;  %v13051_v20 = vpack.c.bf16 %v1946_v7, %v1942_v46 }
 0x137   : > { %18029 = vst [vmem:[#allocation205_spill] sm:$0xff] %v13016_v34  ;;  %v13021_v25 = vsub.f32 %v12706_v50, %v18030_v5  ;;  %v13037_v57 = vsub.f32 %v12751_v59, %v18037_v14  ;;  %v18039_v5 = vand.u32 4294901760, %v12753_v49  ;;  %v1950_v18 = vand.u32 4294901760, %v1840_v28 }
 0x138   : > { %18034 = vst [vmem:[#allocation207_spill] sm:$0xff] %v13027_v24  ;;  %18036 = vst [vmem:[#allocation208_spill] sm:$0xff] %v13032_v23  ;;  %v13048_v35 = vsub.f32 %v12768_v37, %v18041_v61  ;;  %v18044_v59 = vand.u32 4294901760, %v12770_v30  ;;  %v1846_v37 = vld [vmem:[#allocation6 + $0x190] sm:$0xff]  ;;  %v18047_v61 = vand.u32 4294901760, %v12803_v33  ;;  %v18053_v26 = vand.u32 4294901760, %v12810_v41  ;;  %9402 = vmatpush1.bf16.msra.mxu1 %v13051_v20 }
 0x139   : > { %18031 = vst [vmem:[#allocation206_spill] sm:$0xff] %v13021_v25  ;;  %18038 = vst [vmem:[#allocation209_spill] sm:$0xff] %v13037_v57  ;;  %v13042_v50 = vsub.f32 %v12753_v49, %v18039_v5  ;;  %v13059_v49 = vpack.c.bf16 %v1952_v43, %v1948_v44  ;;  %v1956_v5 = vand.u32 4294901760, %v1845_v8  ;;  %v1849_v23 = vld [vmem:[#allocation6 + $0x1a8] sm:$0xff] }
 0x13a   : > { %18042 = vst [vmem:[#allocation211_spill] sm:$0xff] %v13048_v35  ;;  %18043 = vst [vmem:[#allocation212_spill] sm:$0xff] %v13051_v20  ;;  %v13056_v14 = vsub.f32 %v12770_v30, %v18044_v59  ;;  %v13064_v54 = vsub.f32 %v12803_v33, %v18047_v61  ;;  %v18049_v35 = vand.u32 4294901760, %v12805_v21  ;;  %v18051_v30 = vand.u32 4294901760, %v12808_v63  ;;  %v1851_v33 = vld [vmem:[#allocation6 + $0x1b8] sm:$0xff] }
 0x13b   : > { %18040 = vst [vmem:[#allocation210_spill] sm:$0xff] %v13042_v50  ;;  %18046 = vst [vmem:[#allocation214_spill] sm:$0xff] %v13059_v49  ;;  %v1844_v50 = vld [vmem:[#allocation6 + $0x180] sm:$0xff]  ;;  %v18055_v61 = vand.u32 4294901760, %v12851_v53  ;;  %9404 = vmatprep.subr.bf16.mxu1 %v13059_v49  ;;  %v1970_v20 = vand.u32 4294901760, %v1850_v16  ;;  %v13124_v49 = vsub.f32 %v1842_v42, %v1954_v32  ;;  %v13143_v42 = vld [vmem:[#allocation6 + $0x1f8] sm:$0xff] }
 0x13c   : > { %18045 = vst [vmem:[#allocation213_spill] sm:$0xff] %v13056_v14  ;;  %18048 = vst [vmem:[#allocation215_spill] sm:$0xff] %v13064_v54  ;;  %v13069_v57 = vsub.f32 %v12805_v21, %v18049_v35  ;;  %v13074_v59 = vsub.f32 %v12808_v63, %v18051_v30  ;;  %v13079_v14 = vsub.f32 %v12810_v41, %v18053_v26  ;;  %v18057_v21 = vand.u32 4294901760, %v12853_v60  ;;  %v18061_v26 = vld [vmem:[#allocation160_spill] sm:$0xff]  ;;  %v1848_v30 = vld [vmem:[#allocation6 + $0x1a0] sm:$0xff] }
 0x13d   : > { %v13085_v54 = vsub.f32 %v12851_v53, %v18055_v61  ;;  %v13093_v63 = vsub.f32 %v12876_v58, %v1940_v9  ;;  %v13096_v41 = vsub.f32 %v12878_v27, %v1944_v11  ;;  %9272 = vmatprep.subr.bf16.mxu0 %v18061_v26  ;;  %v13101_v53 = vsub.f32 %v12929_v13, %v1942_v46  ;;  %v18066_v11 = vld [vmem:[#allocation161_spill] sm:$0xff] }
 0x13e   : > { %18050 = vst [vmem:[#allocation216_spill] sm:$0xff] %v13069_v57  ;;  %18052 = vst [vmem:[#allocation217_spill] sm:$0xff] %v13074_v59  ;;  %v13090_v35 = vsub.f32 %v12853_v60, %v18057_v21  ;;  %v13103_v61 = vpack.c.bf16 %v1954_v32, %v1950_v18  ;;  %v1962_v60 = vand.u32 4294901760, %v1846_v37  ;;  %v13106_v21 = vsub.f32 %v12931_v40, %v1946_v7  ;;  %v13120_v40 = vld [vmem:[#allocation6 + $0x1d8] sm:$0xff]  ;;  %v13141_v32 = vld [vmem:[#allocation6 + $0x1e8] sm:$0xff] }
 0x13f   : > { %18054 = vst [vmem:[#allocation218_spill] sm:$0xff] %v13079_v14  ;;  %18056 = vst [vmem:[#allocation219_spill] sm:$0xff] %v13085_v54  ;;  %v1958_v54 = vand.u32 4294901760, %v1844_v50  ;;  %v13109_v58 = vpack.c.bf16 %v1960_v45, %v1956_v5  ;;  %v1964_v27 = vand.u32 4294901760, %v1849_v23  ;;  %v1968_v9 = vand.u32 4294901760, %v1851_v33  ;;  %9274 = vmatpush1.bf16.msra.mxu0 %v18066_v11  ;;  %v13129_v11 = vld [vmem:[#allocation6 + $0x1c0] sm:$0xff] }
 0x140   : > { %18058 = vst [vmem:[#allocation220_spill] sm:$0xff] %v13090_v35  ;;  %18059 = vst [vmem:[#allocation221_spill] sm:$0xff] %v13093_v63  ;;  %v13113_v26 = vsub.f32 %v12954_v10, %v1948_v44  ;;  %v13116_v13 = vsub.f32 %v12956_v15, %v1952_v43  ;;  %v1966_v46 = vand.u32 4294901760, %v1848_v30  ;;  %v13122_v7 = vsub.f32 %v1840_v28, %v1950_v18  ;;  %v13131_v10 = vld [vmem:[#allocation6 + $0x1d0] sm:$0xff] }
 0x141   : > { %18060 = vst [vmem:[#allocation222_spill] sm:$0xff] %v13096_v41  ;;  %18062 = vst [vmem:[#allocation223_spill] sm:$0xff] %v13101_v53  ;;  %v13118_v53 = vld [vmem:[#allocation6 + $0x1c8] sm:$0xff]  ;;  %v13127_v41 = vsub.f32 %v1845_v8, %v1956_v5  ;;  %9406 = vmatpush1.bf16.msra.mxu1 %v13103_v61  ;;  %v13135_v15 = vsub.f32 %v1847_v56, %v1960_v45  ;;  %v13137_v44 = vpack.c.bf16 %v1962_v60, %v1958_v54 }
 0x142   : > { %18063 = vst [vmem:[#allocation224_spill] sm:$0xff] %v13103_v61  ;;  %18064 = vst [vmem:[#allocation225_spill] sm:$0xff] %v13106_v21  ;;  %v18071_v21 = vld [vmem:[#allocation90_spill] sm:$0xff]  ;;  %v13139_v28 = vsub.f32 %v1844_v50, %v1958_v54  ;;  %9408 = vmatprep.subr.bf16.mxu1 %v13109_v58  ;;  %v13147_v18 = vsub.f32 %v1846_v37, %v1962_v60  ;;  %v13149_v5 = vpack.c.bf16 %v1968_v9, %v1964_v27  ;;  %v18078_v56 = vld [vmem:[#allocation163_spill] sm:$0xff] }
 0x143   : > { %18065 = vst [vmem:[#allocation226_spill] sm:$0xff] %v13109_v58  ;;  %18067 = vst [vmem:[#allocation227_spill] sm:$0xff] %v13113_v26  ;;  %9276 = vmatprep.subr.bf16.mxu0 %v18071_v21  ;;  %v1972_v43 = vand.u32 4294901760, %v13118_v53  ;;  %v1976_v45 = vand.u32 4294901760, %v13120_v40  ;;  %v13154_v54 = vsub.f32 %v1849_v23, %v1964_v27  ;;  %v13156_v50 = vpack.c.bf16 %v1970_v20, %v1966_v46  ;;  %v13163_v58 = vld [vmem:[#allocation6 + $0x1e0] sm:$0xff]  ;;  %v13170_v27 = vld [vmem:[#allocation6 + $0x1f0] sm:$0xff] }
 0x144   : > { %18068 = vst [vmem:[#allocation228_spill] sm:$0xff] %v13116_v13  ;;  %18069 = vst [vmem:[#allocation229_spill] sm:$0xff] %v13122_v7  ;;  %9278 = vmatpush1.bf16.msra.mxu0 %v18078_v56  ;;  %v18081_v61 = vand.u32 4294901760, %v12815_v47  ;;  %v18083_v8 = vand.u32 4294901760, %v12820_v52  ;;  %v18089_v60 = vand.u32 4294901760, %v13129_v11 }
 0x145   : > { %18070 = vst [vmem:[#allocation230_spill] sm:$0xff] %v13124_v49  ;;  %18072 = vst [vmem:[#allocation231_spill] sm:$0xff] %v13127_v41  ;;  %9280 = vmatprep.subr.bf16.mxu0 %v12691_v55  ;;  %9410 = vmatpush1.bf16.msra.mxu1 %v13137_v44  ;;  %v18090_v55 = vand.u32 4294901760, %v13131_v10 }
 0x146   : > { %18073 = vst [vmem:[#allocation232_spill] sm:$0xff] %v13135_v15  ;;  %18074 = vst [vmem:[#allocation233_spill] sm:$0xff] %v13137_v44  ;;  %v2008_v56 = vsub.f32 %v12815_v47, %v18081_v61  ;;  %v2020_v21 = vsub.f32 %v12820_v52, %v18083_v8  ;;  %9412 = vmatprep.subr.bf16.mxu1 %v13149_v5  ;;  %v13181_v61 = vpack.c.bf16 %v1976_v45, %v1972_v43  ;;  %v18163_v47 = vld [vmem:[#allocation40_spill] sm:$0xff] }
 0x147   : > { %18075 = vst [vmem:[#allocation234_spill] sm:$0xff] %v13139_v28  ;;  %18076 = vst [vmem:[#allocation235_spill] sm:$0xff] %v13147_v18  ;;  %v18086_v18 = vld [vmem:[#allocation95_spill] sm:$0xff]  ;;  %v13186_v28 = vsub.f32 %v1848_v30, %v1966_v46  ;;  %v13188_v8 = vsub.f32 %v1850_v16, %v1970_v20  ;;  %v13194_v37 = vpack.c.bf16 %v18090_v55, %v18089_v60  ;;  %v18093_v44 = vand.u32 4294901760, %v13143_v42 }
 0x148   : > { %18077 = vst [vmem:[#allocation236_spill] sm:$0xff] %v13149_v5  ;;  %18079 = vst [vmem:[#allocation237_spill] sm:$0xff] %v13154_v54  ;;  %v13179_v54 = vsub.f32 %v1851_v33, %v1968_v9  ;;  %9282 = vmatpush1.bf16.msra.mxu0 %v18086_v18  ;;  %v18092_v9 = vand.u32 4294901760, %v13141_v32  ;;  %v2009_v16 = vand.u32 4294901760, %v2008_v56  ;;  %v18095_v20 = vand.u32 4294901760, %v12826_v48 }
 0x149   : > { %18080 = vst [vmem:[#allocation238_spill] sm:$0xff] %v13156_v50  ;;  %18082 = vst [vmem:[#allocation239_spill] sm:$0xff] %v13170_v27  ;;  %9284 = vmatprep.subr.bf16.mxu0 %v12724_v1  ;;  %9414 = vmatpush1.bf16.msra.mxu1 %v13156_v50  ;;  %v2021_v55 = vand.u32 4294901760, %v2020_v21  ;;  %v18096_v60 = vand.u32 4294901760, %v12840_v39  ;;  %v18097_v1 = vand.u32 4294901760, %v12858_v2  ;;  %v18099_v56 = vand.u32 4294901760, %v12868_v17 }
 0x14a   : > { %18084 = vst [vmem:[#allocation240_spill] sm:$0xff] %v13179_v54  ;;  %18085 = vst [vmem:[#allocation241_spill] sm:$0xff] %v13181_v61  ;;  %v13202_v23 = vpack.c.bf16 %v18093_v44, %v18092_v9  ;;  %v2014_v46 = vsub.f32 %v12826_v48, %v18095_v20  ;;  %v18098_v44 = vand.u32 4294901760, %v12863_v0  ;;  %9416 = vmatprep.subr.bf16.mxu1 %v13181_v61  ;;  %v18100_v21 = vand.u32 4294901760, %v12873_v6 }
 0x14b   : > { %18087 = vst [vmem:[#allocation242_spill] sm:$0xff] %v13186_v28  ;;  %18088 = vst [vmem:[#allocation243_spill] sm:$0xff] %v13188_v8  ;;  %v2026_v33 = vsub.f32 %v12840_v39, %v18096_v60  ;;  %v2032_v18 = vsub.f32 %v12858_v2, %v18097_v1  ;;  %v2038_v20 = vsub.f32 %v12868_v17, %v18099_v56  ;;  %v18104_v50 = vand.u32 4294901760, %v13170_v27 }
 0x14c   : > { %18091 = vst [vmem:[#allocation244_spill] sm:$0xff] %v13194_v37  ;;  %18094 = vst [vmem:[#allocation245_spill] sm:$0xff] %v13202_v23  ;;  %v2044_v9 = vsub.f32 %v12863_v0, %v18098_v44  ;;  %v2050_v30 = vsub.f32 %v12873_v6, %v18100_v21  ;;  %9286 = vmatpush1.bf16.msra.mxu0 %v12730_v12  ;;  %v13229_v1 = vsub.f32 %v13118_v53, %v1972_v43  ;;  %v18106_v53 = vld [vmem:[#allocation189_spill] sm:$0xff] }
 0x14d   : > { %v13235_v56 = vsub.f32 %v13120_v40, %v1976_v45  ;;  %9288 = vmatprep.subr.bf16.mxu0 %v12759_v36  ;;  %v18103_v21 = vand.u32 4294901760, %v13163_v58  ;;  %v2015_v12 = vand.u32 4294901760, %v2014_v46  ;;  %9418 = vmatpush1.bf16.msra.mxu1 %v13194_v37  ;;  %v9423_v44 = vpack.c.bf16 %v2021_v55, %v2009_v16 }
 0x14e   : > { %18101 = vst [vmem:[#allocation246_spill] sm:$0xff] %v13229_v1  ;;  %v2027_v61 = vand.u32 4294901760, %v2026_v33  ;;  %v2033_v1 = vand.u32 4294901760, %v2032_v18  ;;  %v2045_v5 = vand.u32 4294901760, %v2044_v9  ;;  %9420 = vmatprep.subr.bf16.mxu1 %v13202_v23  ;;  %v2039_v40 = vand.u32 4294901760, %v2038_v20 }
 0x14f   : > { %18102 = vst [vmem:[#allocation247_spill] sm:$0xff] %v13235_v56  ;;  %v13242_v60 = vpack.c.bf16 %v18104_v50, %v18103_v21  ;;  %v2051_v45 = vand.u32 4294901760, %v2050_v30  ;;  %v18107_v36 = vand.u32 4294901760, %v12883_v3  ;;  %v18108_v50 = vand.u32 4294901760, %v12888_v4  ;;  %v18109_v21 = vld [vmem:[#allocation168_spill] sm:$0xff] }
 0x150   : > { %9290 = vmatpush1.bf16.msra.mxu0 %v18109_v21  ;;  %v18110_v43 = vand.u32 4294901760, %v12893_v31  ;;  %v18111_v18 = vand.u32 4294901760, %v12898_v22  ;;  %v18112_v30 = vand.u32 4294901760, %v12904_v62  ;;  %v18113_v9 = vand.u32 4294901760, %v13129_v11 }
 0x151   : > { %18105 = vst [vmem:[#allocation248_spill] sm:$0xff] %v13242_v60  ;;  %v2056_v56 = vsub.f32 %v12883_v3, %v18107_v36  ;;  %v2068_v46 = vsub.f32 %v12888_v4, %v18108_v50  ;;  %v18115_v50 = vand.u32 4294901760, %v13131_v10  ;;  %v18119_v36 = vand.u32 4294901760, %v13141_v32  ;;  %9422 = vmatpush1.bf16.msra.mxu1 %v13242_v60  ;;  %v18124_v60 = vld [vmem:[#allocation131_spill] sm:$0xff] }
 0x152   : > { %v2062_v33 = vsub.f32 %v12893_v31, %v18110_v43  ;;  %v2074_v16 = vsub.f32 %v12898_v22, %v18111_v18  ;;  %v2080_v55 = vsub.f32 %v12904_v62, %v18112_v30  ;;  %v13267_v20 = vsub.f32 %v13129_v11, %v18113_v9  ;;  %v18117_v43 = vld [vmem:[#allocation170_spill] sm:$0xff]  ;;  %9424 = vmatprep.subr.bf16.mxu1 %v9423_v44 }
 0x153   : > { %v13272_v21 = vsub.f32 %v13131_v10, %v18115_v50  ;;  %9292 = vmatprep.subr.bf16.mxu0 %v18117_v43  ;;  %v18118_v18 = vand.u32 4294901760, %v18106_v53  ;;  %v13282_v37 = vsub.f32 %v13141_v32, %v18119_v36  ;;  %v9425_v11 = vpack.c.bf16 %v2027_v61, %v2015_v12  ;;  %v18121_v10 = vld [vmem:[#allocation194_spill] sm:$0xff] }
 0x154   : > { %18114 = vst [vmem:[#allocation249_spill] sm:$0xff] %v13267_v20  ;;  %v17050_v9 = vand.u32 4294901760, %v12946_v19  ;;  %v17053_v50 = vand.u32 4294901760, %v18121_v10  ;;  %v9427_v43 = vpack.c.bf16 %v2045_v5, %v2033_v1  ;;  %v2057_v20 = vand.u32 4294901760, %v2056_v56  ;;  %1999 = vmatmul.mubr.f32.vlgmr.msra.gmra.mrb[2].mxu1 %v18124_v60  ;;  %v18125_v12 = vld [vmem:[#allocation22_spill] sm:$0xff]  ;;  %v18127_v1 = vld [vmem:[#allocation195_spill] sm:$0xff] }
 0x155   : > { %18116 = vst [vmem:[#allocation250_spill] sm:$0xff] %v13272_v21  ;;  %v2092_v23 = vsub.f32 %v18106_v53, %v18118_v18  ;;  %18120 = vst [vmem:[#allocation251_spill] sm:$0xff] %v13282_v37  ;;  %v9429_v21 = vpack.c.bf16 %v2051_v45, %v2039_v40  ;;  %v2069_v8 = vand.u32 4294901760, %v2068_v46  ;;  %v18122_v18 = vld [vmem:[#allocation171_spill] sm:$0xff]  ;;  %v2063_v30 = vand.u32 4294901760, %v2062_v33  ;;  %v18128_v40 = vld [vmem:[#allocation196_spill] sm:$0xff]  ;;  %9426 = vmatpush1.bf16.msra.mxu1 %v9425_v11 }
 0x156   : > { %9294 = vmatpush1.bf16.msra.mxu0 %v18122_v18  ;;  %v2075_v28 = vand.u32 4294901760, %v2074_v16  ;;  %v2081_v54 = vand.u32 4294901760, %v2080_v55  ;;  %v18123_v32 = vand.u32 4294901760, %v12936_v51  ;;  %v18126_v44 = vand.u32 4294901760, %v12941_v29  ;;  %v18129_v16 = vld [vmem:[#allocation197_spill] sm:$0xff]  ;;  %v18131_v18 = vld [vmem:[#allocation114_spill] sm:$0xff]  ;;  %9428 = vmatprep.subr.bf16.mxu1 %v9427_v43 }
 0x157   : > { %9296 = vmatprep.subr.bf16.mxu0 %v18125_v12  ;;  %v2093_v61 = vand.u32 4294901760, %v2092_v23  ;;  %v2104_v46 = vsub.f32 %v12946_v19, %v17050_v9  ;;  %v2116_v33 = vsub.f32 %v18121_v10, %v17053_v50  ;;  %v18130_v23 = vld [vmem:[#allocation198_spill] sm:$0xff]  ;;  %2390 = vmatprep.mubr.f32.mxu1 %v18131_v18  ;;  %v9431_v56 = vpack.c.bf16 %v2069_v8, %v2057_v20  ;;  %v18133_v45 = vld [vmem:[#allocation199_spill] sm:$0xff]  ;;  %v18134_v12 = vld [vmem:[#allocation201_spill] sm:$0xff] }
 0x158   : > { %v2086_v36 = vsub.f32 %v12936_v51, %v18123_v32  ;;  %v2098_v5 = vsub.f32 %v12941_v29, %v18126_v44  ;;  %v18132_v44 = vld [vmem:[#allocation111_spill] sm:$0xff]  ;;  %v18136_v27 = vand.u32 4294901760, %v13143_v42  ;;  %v18138_v55 = vld [vmem:[#allocation25_spill] sm:$0xff]  ;;  %v9433_v32 = vpack.c.bf16 %v2075_v28, %v2063_v30 }
 0x159   : > { %1653 = vmatmul.mubr.f32.vlgmr.msra.gmra.mrb[0].mxu0 %v18132_v44  ;;  %v18135_v37 = vld [vmem:[#allocation203_spill] sm:$0xff]  ;;  %v9435_v20 = vpack.c.bf16 %v2093_v61, %v2081_v54  ;;  %v18140_v60 = vand.u32 4294901760, %v18127_v1  ;;  %v18141_v11 = vand.u32 4294901760, %v18128_v40  ;;  %9430 = vmatpush1.bf16.msra.mxu1 %v9429_v21  ;;  %v2117_v28 = vand.u32 4294901760, %v2116_v33  ;;  %v18150_v44 = vld [vmem:[#allocation33_spill] sm:$0xff] }
 0x15a   : > { %v13314_v50 = vsub.f32 %v13143_v42, %v18136_v27  ;;  %9298 = vmatpush1.bf16.msra.mxu0 %v18138_v55  ;;  %v2087_v15 = vand.u32 4294901760, %v2086_v36  ;;  %1788 = vmatprep.mubr.f32.mxu0 %v18131_v18  ;;  %v18139_v8 = vld [vmem:[#allocation27_spill] sm:$0xff]  ;;  %v2099_v43 = vand.u32 4294901760, %v2098_v5  ;;  %v2105_v27 = vand.u32 4294901760, %v2104_v46  ;;  %v18149_v55 = vld [vmem:[#allocation208_spill] sm:$0xff] }
 0x15b   : > { %9300 = vmatprep.subr.bf16.mxu0 %v18139_v8  ;;  %v2110_v9 = vsub.f32 %v18127_v1, %v18140_v60  ;;  %v2122_v42 = vsub.f32 %v18128_v40, %v18141_v11  ;;  %v18142_v30 = vand.u32 4294901760, %v18129_v16  ;;  %v18143_v41 = vand.u32 4294901760, %v18130_v23  ;;  %9432 = vmatprep.subr.bf16.mxu1 %v9431_v56  ;;  %v18184_v51 = vld [vmem:[#allocation59_spill] sm:$0xff]  ;;  %v18200_v40 = vld [vmem:[#allocation234_spill] sm:$0xff] }
 0x15c   : > { %18137 = vst [vmem:[#allocation252_spill] sm:$0xff] %v13314_v50  ;;  %v18144_v61 = vand.u32 4294901760, %v18133_v45  ;;  %v18145_v5 = vand.u32 4294901760, %v18134_v12  ;;  %v18146_v21 = vand.u32 4294901760, %v18135_v37  ;;  %v18148_v8 = vand.u32 4294901760, %v13011_v38  ;;  %v18201_v1 = vld [vmem:[#allocation235_spill] sm:$0xff] }
 0x15d   : > { %v2128_v36 = vsub.f32 %v18129_v16, %v18142_v30  ;;  %v2140_v54 = vsub.f32 %v18130_v23, %v18143_v41  ;;  %v18147_v30 = vld [vmem:[#allocation30_spill] sm:$0xff]  ;;  %v2111_v50 = vand.u32 4294901760, %v2110_v9  ;;  %9434 = vmatpush1.bf16.msra.mxu1 %v9433_v32  ;;  %v9439_v33 = vpack.c.bf16 %v2117_v28, %v2105_v27  ;;  %v18158_v28 = vld [vmem:[#allocation37_spill] sm:$0xff] }
 0x15e   : > { %v2134_v60 = vsub.f32 %v18133_v45, %v18144_v61  ;;  %v2146_v11 = vsub.f32 %v18134_v12, %v18145_v5  ;;  %v2152_v46 = vsub.f32 %v18135_v37, %v18146_v21  ;;  %9302 = vmatpush1.bf16.msra.mxu0 %v18147_v30  ;;  %v2164_v41 = vsub.f32 %v13011_v38, %v18148_v8  ;;  %v18151_v21 = vld [vmem:[#allocation209_spill] sm:$0xff]  ;;  %v18152_v23 = vld [vmem:[#allocation210_spill] sm:$0xff] }
 0x15f   : > { %9304 = vmatprep.subr.bf16.mxu0 %v18150_v44  ;;  %v9437_v5 = vpack.c.bf16 %v2099_v43, %v2087_v15  ;;  %v2123_v12 = vand.u32 4294901760, %v2122_v42  ;;  %v17065_v37 = vand.u32 4294901760, %v18151_v21  ;;  %v2129_v30 = vand.u32 4294901760, %v2128_v36  ;;  %9436 = vmatprep.subr.bf16.mxu1 %v9435_v20  ;;  %v18154_v44 = vld [vmem:[#allocation34_spill] sm:$0xff] }
 0x160   : > { %v2141_v45 = vand.u32 4294901760, %v2140_v54  ;;  %v17069_v16 = vand.u32 4294901760, %v18152_v23  ;;  %v2135_v8 = vand.u32 4294901760, %v2134_v60  ;;  %v2147_v56 = vand.u32 4294901760, %v2146_v11  ;;  %v18159_v54 = vld [vmem:[#allocation211_spill] sm:$0xff]  ;;  %v18160_v11 = vld [vmem:[#allocation213_spill] sm:$0xff] }
 0x161   : > { %v2153_v38 = vand.u32 4294901760, %v2152_v46  ;;  %v18153_v61 = vand.u32 4294901760, %v13016_v34  ;;  %v2165_v15 = vand.u32 4294901760, %v2164_v41  ;;  %v18155_v9 = vand.u32 4294901760, %v13021_v25  ;;  %9438 = vmatpush1.bf16.msra.mxu1 %v9437_v5  ;;  %v18162_v60 = vld [vmem:[#allocation38_spill] sm:$0xff]  ;;  %v18172_v46 = vld [vmem:[#allocation44_spill] sm:$0xff] }
 0x162   : > { %9306 = vmatpush1.bf16.msra.mxu0 %v18154_v44  ;;  %v18156_v43 = vand.u32 4294901760, %v13027_v24  ;;  %v18157_v20 = vand.u32 4294901760, %v18149_v55  ;;  %v2182_v36 = vsub.f32 %v18151_v21, %v17065_v37  ;;  %9440 = vmatprep.subr.bf16.mxu1 %v9439_v33  ;;  %v9443_v44 = vpack.c.bf16 %v2141_v45, %v2129_v30 }
 0x163   : > { %v2158_v18 = vsub.f32 %v13016_v34, %v18153_v61  ;;  %v2170_v32 = vsub.f32 %v13021_v25, %v18155_v9  ;;  %9308 = vmatprep.subr.bf16.mxu0 %v18158_v28  ;;  %v9441_v61 = vpack.c.bf16 %v2123_v12, %v2111_v50  ;;  %v2194_v9 = vsub.f32 %v18152_v23, %v17069_v16  ;;  %v18213_v25 = vld [vmem:[#allocation78_spill] sm:$0xff] }
 0x164   : > { %v2176_v42 = vsub.f32 %v13027_v24, %v18156_v43  ;;  %v2188_v27 = vsub.f32 %v18149_v55, %v18157_v20  ;;  %v18161_v43 = vld [vmem:[#allocation215_spill] sm:$0xff]  ;;  %v9445_v37 = vpack.c.bf16 %v2147_v56, %v2135_v8  ;;  %v9447_v41 = vpack.c.bf16 %v2165_v15, %v2153_v38  ;;  %v18216_v24 = vld [vmem:[#allocation209_spill] sm:$0xff] }
 0x165   : > { %v2159_v21 = vand.u32 4294901760, %v2158_v18  ;;  %v2171_v5 = vand.u32 4294901760, %v2170_v32  ;;  %v2183_v16 = vand.u32 4294901760, %v2182_v36  ;;  %v18164_v20 = vand.u32 4294901760, %v18159_v54  ;;  %9442 = vmatpush1.bf16.msra.mxu1 %v9441_v61 }
 0x166   : > { %9310 = vmatpush1.bf16.msra.mxu0 %v18162_v60  ;;  %v2177_v50 = vand.u32 4294901760, %v2176_v42  ;;  %v2189_v12 = vand.u32 4294901760, %v2188_v27  ;;  %v18165_v45 = vand.u32 4294901760, %v18160_v11  ;;  %v2195_v30 = vand.u32 4294901760, %v2194_v9  ;;  %9444 = vmatprep.subr.bf16.mxu1 %v9443_v44  ;;  %v18168_v27 = vld [vmem:[#allocation219_spill] sm:$0xff]  ;;  %v18173_v42 = vld [vmem:[#allocation222_spill] sm:$0xff] }
 0x167   : > { %9312 = vmatprep.subr.bf16.mxu0 %v18163_v47  ;;  %v2200_v28 = vsub.f32 %v18159_v54, %v18164_v20  ;;  %v18166_v38 = vand.u32 4294901760, %v18161_v43  ;;  %v18167_v8 = vand.u32 4294901760, %v13069_v57  ;;  %v18169_v9 = vand.u32 4294901760, %v13163_v58 }
 0x168   : > { %v2212_v18 = vsub.f32 %v18160_v11, %v18165_v45  ;;  %v9453_v33 = vpack.c.bf16 %v2195_v30, %v2183_v16  ;;  %v18175_v44 = vand.u32 4294901760, %v13079_v14  ;;  %v18177_v61 = vand.u32 4294901760, %v13090_v35 }
 0x169   : > { %v2206_v56 = vsub.f32 %v18161_v43, %v18166_v38  ;;  %v2218_v15 = vsub.f32 %v13069_v57, %v18167_v8  ;;  %v13405_v45 = vsub.f32 %v13163_v58, %v18169_v9  ;;  %v18171_v38 = vld [vmem:[#allocation43_spill] sm:$0xff]  ;;  %v9449_v8 = vpack.c.bf16 %v2171_v5, %v2159_v21  ;;  %9446 = vmatpush1.bf16.msra.mxu1 %v9445_v37  ;;  %v18228_v43 = vld [vmem:[#allocation252_spill] sm:$0xff] }
 0x16a   : > { %9314 = vmatpush1.bf16.msra.mxu0 %v18171_v38  ;;  %v2201_v36 = vand.u32 4294901760, %v2200_v28  ;;  %v2213_v20 = vand.u32 4294901760, %v2212_v18  ;;  %v9451_v58 = vpack.c.bf16 %v2189_v12, %v2177_v50  ;;  %v18174_v21 = vand.u32 4294901760, %v13074_v59  ;;  %9448 = vmatprep.subr.bf16.mxu1 %v9447_v41  ;;  %v18178_v50 = vld [vmem:[#allocation51_spill] sm:$0xff] }
 0x16b   : > { %18170 = vst [vmem:[#allocation253_spill] sm:$0xff] %v13405_v45  ;;  %9316 = vmatprep.subr.bf16.mxu0 %v18172_v46  ;;  %v2207_v9 = vand.u32 4294901760, %v2206_v56  ;;  %v2219_v47 = vand.u32 4294901760, %v2218_v15  ;;  %v2236_v28 = vsub.f32 %v13079_v14, %v18175_v44  ;;  %v18176_v18 = vand.u32 4294901760, %v18168_v27  ;;  %v18180_v41 = vld [vmem:[#allocation223_spill] sm:$0xff]  ;;  %v18181_v44 = vld [vmem:[#allocation53_spill] sm:$0xff] }
 0x16c   : > { %v2224_v5 = vsub.f32 %v13074_v59, %v18174_v21  ;;  %v2242_v37 = vsub.f32 %v13090_v35, %v18177_v61  ;;  %v18179_v12 = vand.u32 4294901760, %v13093_v63  ;;  %v9455_v21 = vpack.c.bf16 %v2213_v20, %v2201_v36 }
 0x16d   : > { %v2230_v32 = vsub.f32 %v18168_v27, %v18176_v18  ;;  %v18182_v18 = vand.u32 4294901760, %v18173_v42  ;;  %v17077_v38 = vand.u32 4294901760, %v13113_v26  ;;  %9450 = vmatpush1.bf16.msra.mxu1 %v9449_v8  ;;  %v17078_v60 = vand.u32 4294901760, %v13116_v13 }
 0x16e   : > { %9318 = vmatpush1.bf16.msra.mxu0 %v18178_v50  ;;  %v2248_v56 = vsub.f32 %v13093_v63, %v18179_v12  ;;  %v18183_v50 = vld [vmem:[#allocation225_spill] sm:$0xff]  ;;  %v9457_v12 = vpack.c.bf16 %v2219_v47, %v2207_v9  ;;  %v2225_v16 = vand.u32 4294901760, %v2224_v5  ;;  %9452 = vmatprep.subr.bf16.mxu1 %v9451_v58  ;;  %v2237_v15 = vand.u32 4294901760, %v2236_v28  ;;  %v18186_v5 = vld [vmem:[#allocation60_spill] sm:$0xff]  ;;  %v18190_v9 = vld [vmem:[#allocation231_spill] sm:$0xff] }
 0x16f   : > { %9320 = vmatprep.subr.bf16.mxu0 %v18181_v44  ;;  %v2260_v61 = vsub.f32 %v18173_v42, %v18182_v18  ;;  %v2231_v44 = vand.u32 4294901760, %v2230_v32  ;;  %v2243_v36 = vand.u32 4294901760, %v2242_v37  ;;  %v18185_v46 = vand.u32 4294901760, %v18180_v41 }
 0x170   : > { %v2249_v18 = vand.u32 4294901760, %v2248_v56  ;;  %v18187_v32 = vand.u32 4294901760, %v18183_v50  ;;  %v2272_v37 = vsub.f32 %v13113_v26, %v17077_v38  ;;  %v9459_v38 = vpack.c.bf16 %v2237_v15, %v2225_v16 }
 0x171   : > { %v2254_v8 = vsub.f32 %v18180_v41, %v18185_v46  ;;  %v2261_v58 = vand.u32 4294901760, %v2260_v61  ;;  %9454 = vmatpush1.bf16.msra.mxu1 %v9453_v33  ;;  %v2284_v46 = vsub.f32 %v13116_v13, %v17078_v60  ;;  %v9461_v20 = vpack.c.bf16 %v2243_v36, %v2231_v44  ;;  %v18198_v60 = vld [vmem:[#allocation67_spill] sm:$0xff]  ;;  %v18215_v44 = vld [vmem:[#allocation246_spill] sm:$0xff] }
 0x172   : > { %9322 = vmatpush1.bf16.msra.mxu0 %v18184_v51  ;;  %v2266_v28 = vsub.f32 %v18183_v50, %v18187_v32  ;;  %v18194_v32 = vld [vmem:[#allocation239_spill] sm:$0xff]  ;;  %9456 = vmatprep.subr.bf16.mxu1 %v9455_v21  ;;  %v18197_v33 = vand.u32 4294901760, %v13122_v7  ;;  %v18199_v61 = vand.u32 4294901760, %v13124_v49  ;;  %v18211_v34 = vand.u32 4294901760, %v18201_v1 }
 0x173   : > { %9324 = vmatprep.subr.bf16.mxu0 %v18186_v5  ;;  %v18191_v5 = vld [vmem:[#allocation232_spill] sm:$0xff]  ;;  %v18195_v19 = vand.u32 4294901760, %v18194_v32  ;;  %v2255_v47 = vand.u32 4294901760, %v2254_v8  ;;  %v9463_v21 = vpack.c.bf16 %v2261_v58, %v2249_v18  ;;  %v2273_v8 = vand.u32 4294901760, %v2272_v37  ;;  %v18207_v58 = vld [vmem:[#allocation237_spill] sm:$0xff]  ;;  %v18214_v36 = vld [vmem:[#allocation243_spill] sm:$0xff] }
 0x174   : > { %v2278_v56 = vsub.f32 %v13122_v7, %v18197_v33  ;;  %v2290_v30 = vsub.f32 %v13124_v49, %v18199_v61  ;;  %v2267_v16 = vand.u32 4294901760, %v2266_v28  ;;  %v2285_v33 = vand.u32 4294901760, %v2284_v46 }
 0x175   : > { %v13472_v10 = vsub.f32 %v18194_v32, %v18195_v19  ;;  %v18202_v19 = vld [vmem:[#allocation69_spill] sm:$0xff]  ;;  %9458 = vmatpush1.bf16.msra.mxu1 %v9457_v12  ;;  %v18206_v51 = vand.u32 4294901760, %v18191_v5  ;;  %v18209_v12 = vld [vmem:[#allocation75_spill] sm:$0xff]  ;;  %v18210_v46 = vand.u32 4294901760, %v18200_v40  ;;  %v17091_v15 = vand.u32 4294901760, %v18214_v36 }
 0x176   : > { %9326 = vmatpush1.bf16.msra.mxu0 %v18198_v60  ;;  %v18205_v60 = vand.u32 4294901760, %v18190_v9  ;;  %9460 = vmatprep.subr.bf16.mxu1 %v9459_v38  ;;  %v2279_v18 = vand.u32 4294901760, %v2278_v56  ;;  %v2291_v37 = vand.u32 4294901760, %v2290_v30  ;;  %v18212_v38 = vld [vmem:[#allocation242_spill] sm:$0xff]  ;;  %v9465_v28 = vpack.c.bf16 %v2267_v16, %v2255_v47 }
 0x177   : > { %18196 = vst [vmem:[#allocation239_spill] sm:$0xff] %v13472_v10  ;;  %9328 = vmatprep.subr.bf16.mxu0 %v18202_v19  ;;  %v2308_v29 = vsub.f32 %v18191_v5, %v18206_v51  ;;  %v18208_v19 = vld [vmem:[#allocation240_spill] sm:$0xff]  ;;  %v2314_v51 = vsub.f32 %v18201_v1, %v18211_v34  ;;  %v9467_v56 = vpack.c.bf16 %v2285_v33, %v2273_v8  ;;  %v18221_v34 = vand.u32 4294901760, %v18212_v38  ;;  %v18222_v8 = vld [vmem:[#allocation85_spill] sm:$0xff]  ;;  %v18305_v5 = vld [vmem:[#allocation195_spill] sm:$0xff] }
 0x178   : > { %v2296_v61 = vsub.f32 %v18190_v9, %v18205_v60  ;;  %v2302_v60 = vsub.f32 %v18200_v40, %v18210_v46  ;;  %v18217_v46 = vld [vmem:[#allocation247_spill] sm:$0xff]  ;;  %v18219_v16 = vand.u32 4294901760, %v18208_v19  ;;  %v18223_v33 = vand.u32 4294901760, %v18215_v44  ;;  %v18304_v9 = vld [vmem:[#allocation196_spill] sm:$0xff] }
 0x179   : > { %9462 = vmatpush1.bf16.msra.mxu1 %v9461_v20  ;;  %v2309_v55 = vand.u32 4294901760, %v2308_v29  ;;  %v9469_v29 = vpack.c.bf16 %v2291_v37, %v2279_v18  ;;  %v2315_v62 = vand.u32 4294901760, %v2314_v51  ;;  %v18224_v20 = vld [vmem:[#allocation249_spill] sm:$0xff]  ;;  %v18229_v18 = vld [vmem:[#allocation86_spill] sm:$0xff]  ;;  %v18306_v7 = vpack.c.bf16 %v18304_v9, %v18305_v5 }
 0x17a   : > { %9330 = vmatpush1.bf16.msra.mxu0 %v18209_v12  ;;  %v2297_v12 = vand.u32 4294901760, %v2296_v61  ;;  %9464 = vmatprep.subr.bf16.mxu1 %v9463_v21  ;;  %v2332_v32 = vsub.f32 %v18208_v19, %v18219_v16  ;;  %v18220_v61 = vld [vmem:[#allocation83_spill] sm:$0xff]  ;;  %v2303_v30 = vand.u32 4294901760, %v2302_v60  ;;  %v2326_v21 = vsub.f32 %v18212_v38, %v18221_v34  ;;  %v18288_v38 = vld [vmem:[#allocation193_spill] sm:$0xff]  ;;  %v18315_v9 = vld [vmem:[#allocation198_spill] sm:$0xff] }
 0x17b   : > { %9332 = vmatprep.subr.bf16.mxu0 %v18213_v25  ;;  %v18218_v25 = vand.u32 4294901760, %v18207_v58  ;;  %v2344_v16 = vsub.f32 %v18215_v44, %v18223_v33  ;;  %v18226_v60 = vand.u32 4294901760, %v18217_v46  ;;  %v18227_v33 = vld [vmem:[#allocation251_spill] sm:$0xff]  ;;  %v18316_v5 = vld [vmem:[#allocation197_spill] sm:$0xff] }
 0x17c   : > { %v9471_v37 = vpack.c.bf16 %v2309_v55, %v2297_v12  ;;  %v2333_v57 = vand.u32 4294901760, %v2332_v32  ;;  %v17098_v54 = vand.u32 4294901760, %v18227_v33  ;;  %v9473_v55 = vpack.c.bf16 %v2315_v62, %v2303_v30  ;;  %v18235_v30 = vld [vmem:[#allocation102_spill] sm:$0xff] }
 0x17d   : > { %v2320_v47 = vsub.f32 %v18207_v58, %v18218_v25  ;;  %v2338_v25 = vsub.f32 %v18214_v36, %v17091_v15  ;;  %9466 = vmatpush1.bf16.msra.mxu1 %v9465_v28  ;;  %v2356_v51 = vsub.f32 %v18217_v46, %v18226_v60  ;;  %v2327_v28 = vand.u32 4294901760, %v2326_v21  ;;  %v18230_v60 = vld [vmem:[#allocation91_spill] sm:$0xff]  ;;  %v18287_v46 = vld [vmem:[#allocation194_spill] sm:$0xff] }
 0x17e   : > { %9334 = vmatpush1.bf16.msra.mxu0 %v18220_v61  ;;  %v18225_v61 = vld [vmem:[#allocation250_spill] sm:$0xff]  ;;  %9468 = vmatprep.subr.bf16.mxu1 %v9467_v56  ;;  %v2345_v59 = vand.u32 4294901760, %v2344_v16  ;;  %v18231_v15 = vand.u32 4294901760, %v18224_v20  ;;  %v17099_v62 = vand.u32 4294901760, %v13405_v45  ;;  %v2368_v16 = vsub.f32 %v18227_v33, %v17098_v54  ;;  %v18281_v33 = vld [vmem:[#allocation191_spill] sm:$0xff] }
 0x17f   : > { %9336 = vmatprep.subr.bf16.mxu0 %v18222_v8  ;;  %v2321_v8 = vand.u32 4294901760, %v2320_v47  ;;  %v2339_v34 = vand.u32 4294901760, %v2338_v25  ;;  %v18232_v32 = vand.u32 4294901760, %v18225_v61  ;;  %v2357_v11 = vand.u32 4294901760, %v2356_v51  ;;  %v18234_v51 = vld [vmem:[#allocation99_spill] sm:$0xff] }
 0x180   : > { %v2350_v56 = vsub.f32 %v18224_v20, %v18231_v15  ;;  %v18233_v15 = vand.u32 4294901760, %v18228_v43  ;;  %v2374_v54 = vsub.f32 %v13405_v45, %v17099_v62  ;;  %v18239_v62 = vld [vmem:[#allocation112_spill] sm:$0xff]  ;;  %v18289_v36 = vpack.c.bf16 %v18287_v46, %v18288_v38 }
 0x181   : > { %v2362_v47 = vsub.f32 %v18225_v61, %v18232_v32  ;;  %9470 = vmatpush1.bf16.msra.mxu1 %v9469_v29  ;;  %v9475_v25 = vpack.c.bf16 %v2333_v57, %v2321_v8  ;;  %v9479_v8 = vpack.c.bf16 %v2357_v11, %v2345_v59  ;;  %v18238_v59 = vld [vmem:[#allocation109_spill] sm:$0xff]  ;;  %v18240_v32 = vld [vmem:[#allocation116_spill] sm:$0xff] }
 0x182   : > { %9338 = vmatpush1.bf16.msra.mxu0 %v18229_v18  ;;  %9472 = vmatprep.subr.bf16.mxu1 %v9471_v37  ;;  %v2380_v12 = vsub.f32 %v18228_v43, %v18233_v15  ;;  %v9477_v37 = vpack.c.bf16 %v2339_v34, %v2327_v28  ;;  %v2351_v57 = vand.u32 4294901760, %v2350_v56  ;;  %v18236_v15 = vand.u32 4294901760, %v13472_v10  ;;  %v18241_v34 = vld [vmem:[#allocation117_spill] sm:$0xff]  ;;  %v13624_v11 = vld [vmem:[#allocation8 + $0x30] sm:$0xff] }
 0x183   : > { %9340 = vmatprep.subr.bf16.mxu0 %v18230_v60  ;;  %v2363_v21 = vand.u32 4294901760, %v2362_v47  ;;  %v2375_v56 = vand.u32 4294901760, %v2374_v54  ;;  %v13626_v54 = vld [vmem:[#allocation8 + $0x48] sm:$0xff]  ;;  %v18260_v18 = vand.u32 4294901760, %v13624_v11  ;;  %v18302_v40 = vand.u32 4294901760, %v13624_v11 }
 0x184   : > { %v2386_v29 = vsub.f32 %v13472_v10, %v18236_v15  ;;  %v2381_v60 = vand.u32 4294901760, %v2380_v12  ;;  %v13586_v12 = vld [vmem:[#allocation8 + $0x18] sm:$0xff]  ;;  %v18307_v49 = vand.u32 4294901760, %v13626_v54 }
 0x185   : > { %9474 = vmatpush1.bf16.msra.mxu1 %v9473_v55  ;;  %v18237_v55 = vld [vmem:[#allocation103_spill] sm:$0xff]  ;;  %v9481_v28 = vpack.c.bf16 %v2363_v21, %v2351_v57  ;;  %v13628_v21 = vld [vmem:[#allocation8 + $0x58] sm:$0xff]  ;;  %v18285_v61 = vand.u32 4294901760, %v13586_v12  ;;  %v13804_v1 = vsub.f32 %v13624_v11, %v18302_v40 }
 0x186   : > { %9342 = vmatpush1.bf16.msra.mxu0 %v18234_v51  ;;  %9476 = vmatprep.subr.bf16.mxu1 %v9475_v25  ;;  %v2369_v51 = vand.u32 4294901760, %v2368_v16  ;;  %v2387_v47 = vand.u32 4294901760, %v2386_v29  ;;  %v13584_v25 = vld [vmem:[#allocation8 + $0x8] sm:$0xff]  ;;  %v13596_v29 = vld [vmem:[#allocation8] sm:$0xff] }
 0x187   : > { %9344 = vmatprep.subr.bf16.mxu0 %v18235_v30  ;;  %v13602_v57 = vld [vmem:[#allocation8 + $0x28] sm:$0xff]  ;;  %v18283_v20 = vand.u32 4294901760, %v13584_v25  ;;  %v13762_v44 = vsub.f32 %v13586_v12, %v18285_v61  ;;  %18303 = vst [vmem:[#allocation272_spill] sm:$0xff] %v13804_v1  ;;  %v18317_v1 = vpack.c.bf16 %v18315_v9, %v18316_v5  ;;  %v3172_v9 = vld [vmem:[#allocation8 + $0xe0] sm:$0xff] }
 0x188   : > { %v9483_v16 = vpack.c.bf16 %v2381_v60, %v2369_v51  ;;  %v9485_v51 = vpack.c.bf16 %v2387_v47, %v2375_v56  ;;  %v18242_v60 = vld [vmem:[#allocation122_spill] sm:$0xff]  ;;  %v18244_v56 = vand.u32 4294901760, %v13586_v12  ;;  %v18296_v46 = vand.u32 4294901760, %v13602_v57 }
 0x189   : > { %9478 = vmatpush1.bf16.msra.mxu1 %v9477_v37  ;;  %v13598_v37 = vld [vmem:[#allocation8 + $0x10] sm:$0xff]  ;;  %18286 = vst [vmem:[#allocation264_spill] sm:$0xff] %v13762_v44 }
 0x18a   : > { %9346 = vmatpush1.bf16.msra.mxu0 %v18237_v55  ;;  %9480 = vmatprep.subr.bf16.mxu1 %v9479_v8  ;;  %v13604_v8 = vld [vmem:[#allocation8 + $0x38] sm:$0xff]  ;;  %v18253_v55 = vand.u32 4294901760, %v13602_v57  ;;  %v18293_v58 = vand.u32 4294901760, %v13598_v37  ;;  %v13789_v38 = vsub.f32 %v13602_v57, %v18296_v46  ;;  %v3173_v46 = vld [vmem:[#allocation8 + $0xe8] sm:$0xff] }
 0x18b   : > { %9348 = vmatprep.subr.bf16.mxu0 %v18238_v59  ;;  %v18252_v59 = vld [vmem:[#allocation111_spill] sm:$0xff]  ;;  %v18298_v19 = vand.u32 4294901760, %v13604_v8  ;;  %v3175_v57 = vld [vmem:[#allocation8 + $0xf8] sm:$0xff] }
 0x18c   : > { %v13779_v61 = vsub.f32 %v13598_v37, %v18293_v58  ;;  %18297 = vst [vmem:[#allocation269_spill] sm:$0xff] %v13789_v38 }
 0x18d   : > { %9482 = vmatpush1.bf16.msra.mxu1 %v9481_v28  ;;  %v18243_v28 = vand.u32 4294901760, %v13584_v25  ;;  %v13794_v58 = vsub.f32 %v13604_v8, %v18298_v19  ;;  %v13812_v19 = vsub.f32 %v13626_v54, %v18307_v49 }
 0x18e   : > { %9350 = vmatpush1.bf16.msra.mxu0 %v18239_v62  ;;  %9484 = vmatprep.subr.bf16.mxu1 %v9483_v16  ;;  %v18248_v62 = vld [vmem:[#allocation127_spill] sm:$0xff]  ;;  %18294 = vst [vmem:[#allocation267_spill] sm:$0xff] %v13779_v61 }
 0x18f   : > { %9352 = vmatprep.subr.bf16.mxu0 %v18240_v32  ;;  %v13618_v47 = vpack.c.bf16 %v18244_v56, %v18243_v28  ;;  %v18249_v28 = vand.u32 4294901760, %v13596_v29  ;;  %v18250_v56 = vand.u32 4294901760, %v13598_v37  ;;  %v13659_v16 = vld [vmem:[#allocation8 + $0x68] sm:$0xff]  ;;  %18299 = vst [vmem:[#allocation270_spill] sm:$0xff] %v13794_v58  ;;  %18308 = vst [vmem:[#allocation273_spill] sm:$0xff] %v13812_v19 }
 0x191   : > { %18245 = vst [vmem:[#allocation254_spill] sm:$0xff] %v13618_v47  ;;  %9486 = vmatpush1.bf16.msra.mxu1 %v9485_v51  ;;  %v13638_v15 = vpack.c.bf16 %v18250_v56, %v18249_v28  ;;  %v13652_v28 = vld [vmem:[#allocation8 + $0x40] sm:$0xff]  ;;  %v13654_v56 = vld [vmem:[#allocation8 + $0x50] sm:$0xff]  ;;  %v18256_v51 = vpack.c.bf16 %v12840_v39, %v12826_v48  ;;  %v18262_v48 = vld [vmem:[#allocation125_spill] sm:$0xff]  ;;  %v18266_v39 = vpack.c.bf16 %v12873_v6, %v12868_v17 }
 0x192   : > { %9354 = vmatpush1.bf16.msra.mxu0 %v18241_v34  ;;  %v13622_v34 = vld [vmem:[#allocation8 + $0x20] sm:$0xff]  ;;  %v18313_v11 = vand.u32 4294901760, %v13654_v56 }
 0x193   : > { %9356 = vmatprep.subr.bf16.mxu0 %v18242_v60  ;;  %v18246_v60 = vld [vmem:[#allocation173_spill] sm:$0xff]  ;;  %18251 = vst [vmem:[#allocation255_spill] sm:$0xff] %v13638_v15  ;;  %v18300_v37 = vand.u32 4294901760, %v13622_v34 }
 0x194   : > { %v18247_v32 = vpack.c.bf16 %v12820_v52, %v18246_v60  ;;  %2392 = vmatmul.mubr.f32.vlgmr.msra.gmra.mrb[2].mxu1 %v18252_v59  ;;  %v18257_v52 = vld [vmem:[#allocation119_spill] sm:$0xff] }
 0x195   : > { %2592 = vmatprep.mubr.f32.mxu1 %v18257_v52  ;;  %v18263_v52 = vand.u32 4294901760, %v13626_v54 }
 0x196   : > { %9488 = vmatprep.subr.bf16.mxu1 %v18247_v32  ;;  %9358 = vmatpush1.bf16.msra.mxu0 %v18248_v62  ;;  %v18254_v32 = vand.u32 4294901760, %v13604_v8  ;;  %v18309_v8 = vand.u32 4294901760, %v13628_v21 }
 0x197   : > { %9744 = vmatprep.subr.bf16.mxu0 %v13618_v47  ;;  %9490 = vmatpush1.bf16.msra.mxu1 %v18256_v51  ;;  %v13661_v47 = vld [vmem:[#allocation8 + $0x78] sm:$0xff]  ;;  %v13694_v51 = vld [vmem:[#allocation8 + $0x88] sm:$0xff] }
 0x198   : > { %v13648_v30 = vpack.c.bf16 %v18254_v32, %v18253_v55  ;;  %v18258_v55 = vpack.c.bf16 %v12863_v0, %v12858_v2  ;;  %v18259_v32 = vand.u32 4294901760, %v13622_v34  ;;  %v18269_v0 = vand.u32 4294901760, %v13654_v56  ;;  %v18274_v2 = vld [vmem:[#allocation187_spill] sm:$0xff] }
 0x199   : > { %1790 = vmatmul.mubr.f32.vlgmr.msra.gmra.mrb[0].mxu0 %v18252_v59  ;;  %v18271_v6 = vand.u32 4294901760, %v13661_v47 }
 0x19a   : > { %18255 = vst [vmem:[#allocation256_spill] sm:$0xff] %v13648_v30  ;;  %9492 = vmatprep.subr.bf16.mxu1 %v18258_v55  ;;  %9746 = vmatpush1.bf16.msra.mxu0 %v13638_v15  ;;  %v13673_v62 = vpack.c.bf16 %v18260_v18, %v18259_v32  ;;  %v18264_v55 = vand.u32 4294901760, %v13628_v21  ;;  %v3232_v15 = vand.u32 4294901760, %v13659_v16  ;;  %v13687_v18 = vld [vmem:[#allocation8 + $0x60] sm:$0xff]  ;;  %v13689_v32 = vld [vmem:[#allocation8 + $0x70] sm:$0xff] }
 0x19b   : > { %3341 = vmatprep.mubr.f32.mxu0 %v18262_v48  ;;  %9748 = vmatprep.subr.bf16.mxu0 %v13648_v30  ;;  %v13696_v48 = vld [vmem:[#allocation8 + $0x98] sm:$0xff]  ;;  %v18277_v60 = vand.u32 4294901760, %v13689_v32  ;;  %v18325_v5 = vand.u32 4294901760, %v13689_v32 }
 0x19c   : > { %18261 = vst [vmem:[#allocation257_spill] sm:$0xff] %v13673_v62  ;;  %v13683_v59 = vpack.c.bf16 %v18264_v55, %v18263_v52  ;;  %9494 = vmatpush1.bf16.msra.mxu1 %v18266_v39  ;;  %v18267_v52 = vpack.c.bf16 %v12888_v4, %v12883_v3  ;;  %v18268_v55 = vand.u32 4294901760, %v13652_v28  ;;  %v13713_v17 = vpack.c.bf16 %v18271_v6, %v3232_v15  ;;  %v13717_v4 = vld [vmem:[#allocation8 + $0x80] sm:$0xff]  ;;  %v13719_v3 = vld [vmem:[#allocation8 + $0x90] sm:$0xff]  ;;  %v13726_v39 = vld [vmem:[#allocation8 + $0xb8] sm:$0xff] }
 0x19d   : > { %v18275_v6 = vpack.c.bf16 %v18106_v53, %v18274_v2  ;;  %v3242_v10 = vand.u32 4294901760, %v13717_v4  ;;  %v3164_v53 = vld [vmem:[#allocation8 + $0xa0] sm:$0xff]  ;;  %v18280_v2 = vld [vmem:[#allocation192_spill] sm:$0xff]  ;;  %v13833_v49 = vsub.f32 %v13659_v16, %v3232_v15  ;;  %v18323_v16 = vand.u32 4294901760, %v13687_v18 }
 0x19e   : > { %18265 = vst [vmem:[#allocation258_spill] sm:$0xff] %v13683_v59  ;;  %9496 = vmatprep.subr.bf16.mxu1 %v18267_v52  ;;  %9750 = vmatpush1.bf16.msra.mxu0 %v13673_v62  ;;  %v13706_v30 = vpack.c.bf16 %v18269_v0, %v18268_v55  ;;  %18272 = vst [vmem:[#allocation260_spill] sm:$0xff] %v13713_v17  ;;  %v3240_v52 = vand.u32 4294901760, %v13694_v51  ;;  %v3244_v62 = vand.u32 4294901760, %v13696_v48  ;;  %v13724_v55 = vld [vmem:[#allocation8 + $0xa8] sm:$0xff]  ;;  %v3174_v15 = vld [vmem:[#allocation8 + $0xf0] sm:$0xff] }
 0x19f   : > { %9752 = vmatprep.subr.bf16.mxu0 %v13683_v59  ;;  %v18273_v0 = vpack.c.bf16 %v12898_v22, %v12893_v31  ;;  %v18276_v59 = vand.u32 4294901760, %v13687_v18  ;;  %v3248_v31 = vand.u32 4294901760, %v13724_v55  ;;  %v18282_v43 = vpack.c.bf16 %v18280_v2, %v18281_v33  ;;  %18318 = vst [vmem:[#allocation277_spill] sm:$0xff] %v13833_v49 }
 0x1a0   : > { %18270 = vst [vmem:[#allocation259_spill] sm:$0xff] %v13706_v30  ;;  %v13741_v22 = vpack.c.bf16 %v3244_v62, %v3240_v52  ;;  %v13854_v49 = vsub.f32 %v13689_v32, %v18325_v5 }
 0x1a1   : > { %9498 = vmatpush1.bf16.msra.mxu1 %v18273_v0  ;;  %v13736_v45 = vpack.c.bf16 %v18277_v60, %v18276_v59  ;;  %v3246_v0 = vand.u32 4294901760, %v13719_v3  ;;  %v13750_v59 = vld [vmem:[#allocation8 + $0xc8] sm:$0xff]  ;;  %v13752_v60 = vld [vmem:[#allocation8 + $0xd8] sm:$0xff]  ;;  %v13872_v5 = vsub.f32 %v13724_v55, %v3248_v31 }
 0x1a2   : > { %9500 = vmatprep.subr.bf16.mxu1 %v18275_v6  ;;  %9754 = vmatpush1.bf16.msra.mxu0 %v13706_v30  ;;  %18279 = vst [vmem:[#allocation262_spill] sm:$0xff] %v13741_v22  ;;  %v3252_v6 = vand.u32 4294901760, %v13726_v39  ;;  %v13745_v30 = vld [vmem:[#allocation8 + $0xb0] sm:$0xff]  ;;  %v3256_v12 = vand.u32 4294901760, %v13750_v59  ;;  %18326 = vst [vmem:[#allocation282_spill] sm:$0xff] %v13854_v49 }
 0x1a3   : > { %18278 = vst [vmem:[#allocation261_spill] sm:$0xff] %v13736_v45  ;;  %9756 = vmatprep.subr.bf16.mxu0 %v13713_v17  ;;  %v13757_v17 = vsub.f32 %v13584_v25, %v18283_v20  ;;  %v13773_v33 = vpack.c.bf16 %v3246_v0, %v3242_v10  ;;  %v3250_v20 = vand.u32 4294901760, %v3164_v53  ;;  %v3254_v25 = vand.u32 4294901760, %v13745_v30  ;;  %18334 = vst [vmem:[#allocation287_spill] sm:$0xff] %v13872_v5 }
 0x1a5   : > { %9502 = vmatpush1.bf16.msra.mxu1 %v18282_v43  ;;  %18284 = vst [vmem:[#allocation263_spill] sm:$0xff] %v13757_v17  ;;  %v18290_v43 = vand.u32 4294901760, %v13596_v29  ;;  %18292 = vst [vmem:[#allocation266_spill] sm:$0xff] %v13773_v33  ;;  %v13886_v55 = vsub.f32 %v13745_v30, %v3254_v25 }
 0x1a6   : > { %9504 = vmatprep.subr.bf16.mxu1 %v18289_v36  ;;  %9758 = vmatpush1.bf16.msra.mxu0 %v13736_v45  ;;  %v13782_v36 = vpack.c.bf16 %v3252_v6, %v3248_v31  ;;  %v3170_v45 = vld [vmem:[#allocation8 + $0xd0] sm:$0xff]  ;;  %v3183_v31 = vld [vmem:[#allocation8 + $0x138] sm:$0xff] }
 0x1a7   : > { %v13770_v2 = vsub.f32 %v13596_v29, %v18290_v43  ;;  %9760 = vmatprep.subr.bf16.mxu0 %v13741_v22  ;;  %v3260_v29 = vand.u32 4294901760, %v13752_v60  ;;  %v3168_v43 = vld [vmem:[#allocation8 + $0xc0] sm:$0xff]  ;;  %v13799_v22 = vsub.f32 %v13622_v34, %v18300_v37  ;;  %v13817_v34 = vsub.f32 %v13628_v21, %v18309_v8  ;;  %18341 = vst [vmem:[#allocation291_spill] sm:$0xff] %v13886_v55  ;;  %v18348_v55 = vld [vmem:[#allocation208_spill] sm:$0xff] }
 0x1a8   : > { %18295 = vst [vmem:[#allocation268_spill] sm:$0xff] %v13782_v36  ;;  %v18311_v37 = vand.u32 4294901760, %v13652_v28  ;;  %v13836_v21 = vpack.c.bf16 %v3254_v25, %v3250_v20  ;;  %v3258_v54 = vand.u32 4294901760, %v3168_v43  ;;  %v3262_v8 = vand.u32 4294901760, %v3170_v45  ;;  %v3180_v25 = vld [vmem:[#allocation8 + $0x120] sm:$0xff] }
 0x1a9   : > { %18291 = vst [vmem:[#allocation265_spill] sm:$0xff] %v13770_v2  ;;  %18301 = vst [vmem:[#allocation271_spill] sm:$0xff] %v13799_v22  ;;  %9506 = vmatpush1.bf16.msra.mxu1 %v18306_v7  ;;  %v13827_v7 = vsub.f32 %v13654_v56, %v18313_v11  ;;  %v13844_v56 = vpack.c.bf16 %v3260_v29, %v3256_v12  ;;  %v3264_v11 = vand.u32 4294901760, %v3173_v46 }
 0x1aa   : > { %18310 = vst [vmem:[#allocation274_spill] sm:$0xff] %v13817_v34  ;;  %v13822_v40 = vsub.f32 %v13652_v28, %v18311_v37  ;;  %9508 = vmatprep.subr.bf16.mxu1 %v18317_v1  ;;  %9762 = vmatpush1.bf16.msra.mxu0 %v13773_v33  ;;  %18319 = vst [vmem:[#allocation278_spill] sm:$0xff] %v13836_v21  ;;  %v18320_v28 = vand.u32 4294901760, %v13661_v47  ;;  %v3268_v1 = vand.u32 4294901760, %v3175_v57  ;;  %v3179_v34 = vld [vmem:[#allocation8 + $0x118] sm:$0xff] }
 0x1ab   : > { %18314 = vst [vmem:[#allocation276_spill] sm:$0xff] %v13827_v7  ;;  %9764 = vmatprep.subr.bf16.mxu0 %v13782_v36  ;;  %18322 = vst [vmem:[#allocation280_spill] sm:$0xff] %v13844_v56  ;;  %v13849_v33 = vsub.f32 %v13687_v18, %v18323_v16  ;;  %v18329_v36 = vld [vmem:[#allocation201_spill] sm:$0xff]  ;;  %v13866_v18 = vsub.f32 %v13717_v4, %v3242_v10  ;;  %v13869_v16 = vsub.f32 %v13719_v3, %v3246_v0  ;;  %v3178_v0 = vld [vmem:[#allocation8 + $0x110] sm:$0xff] }
 0x1ac   : > { %18312 = vst [vmem:[#allocation275_spill] sm:$0xff] %v13822_v40  ;;  %v13841_v37 = vsub.f32 %v13661_v47, %v18320_v28  ;;  %v13857_v47 = vsub.f32 %v13694_v51, %v3240_v52  ;;  %v13860_v28 = vsub.f32 %v13696_v48, %v3244_v62  ;;  %v3177_v40 = vld [vmem:[#allocation8 + $0x108] sm:$0xff]  ;;  %v13875_v51 = vsub.f32 %v13726_v39, %v3252_v6  ;;  %v18336_v48 = vld [vmem:[#allocation204_spill] sm:$0xff]  ;;  %v3176_v52 = vld [vmem:[#allocation8 + $0x100] sm:$0xff] }
 0x1ad   : > { %18324 = vst [vmem:[#allocation281_spill] sm:$0xff] %v13849_v33  ;;  %18332 = vst [vmem:[#allocation285_spill] sm:$0xff] %v13866_v18  ;;  %v18337_v62 = vld [vmem:[#allocation203_spill] sm:$0xff]  ;;  %v13883_v4 = vpack.c.bf16 %v3262_v8, %v3258_v54  ;;  %v3266_v10 = vand.u32 4294901760, %v3172_v9  ;;  %v3270_v3 = vand.u32 4294901760, %v3174_v15  ;;  %v13889_v39 = vpack.c.bf16 %v3268_v1, %v3264_v11 }
 0x1ae   : > { %18321 = vst [vmem:[#allocation279_spill] sm:$0xff] %v13841_v37  ;;  %18327 = vst [vmem:[#allocation283_spill] sm:$0xff] %v13857_v47  ;;  %v18330_v37 = vld [vmem:[#allocation199_spill] sm:$0xff]  ;;  %v18338_v32 = vpack.c.bf16 %v18336_v48, %v18337_v62  ;;  %9766 = vmatpush1.bf16.msra.mxu0 %v13836_v21  ;;  %v3272_v6 = vand.u32 4294901760, %v3177_v40  ;;  %v18343_v48 = vld [vmem:[#allocation206_spill] sm:$0xff]  ;;  %v13898_v62 = vsub.f32 %v13752_v60, %v3260_v29  ;;  %v3274_v5 = vand.u32 4294901760, %v3176_v52 }
 0x1af   : > { %18328 = vst [vmem:[#allocation284_spill] sm:$0xff] %v13860_v28  ;;  %v18331_v7 = vpack.c.bf16 %v18329_v36, %v18330_v37  ;;  %18333 = vst [vmem:[#allocation286_spill] sm:$0xff] %v13869_v16  ;;  %v3181_v36 = vld [vmem:[#allocation8 + $0x128] sm:$0xff]  ;;  %9768 = vmatprep.subr.bf16.mxu0 %v13844_v56  ;;  %v18344_v21 = vld [vmem:[#allocation205_spill] sm:$0xff]  ;;  %v13900_v37 = vsub.f32 %v3168_v43, %v3258_v54  ;;  %v13902_v30 = vsub.f32 %v3170_v45, %v3262_v8 }
 0x1b0   : > { %18335 = vst [vmem:[#allocation288_spill] sm:$0xff] %v13875_v51  ;;  %18340 = vst [vmem:[#allocation290_spill] sm:$0xff] %v13883_v4  ;;  %v3182_v56 = vld [vmem:[#allocation8 + $0x130] sm:$0xff]  ;;  %v3278_v16 = vand.u32 4294901760, %v3178_v0  ;;  %v13908_v60 = vsub.f32 %v3173_v46, %v3264_v11  ;;  %v13912_v45 = vpack.c.bf16 %v3270_v3, %v3266_v10  ;;  %v13914_v29 = vsub.f32 %v3172_v9, %v3266_v10  ;;  %v3184_v43 = vld [vmem:[#allocation8 + $0x140] sm:$0xff] }
 0x1b1   : > { %9510 = vmatpush1.bf16.msra.mxu1 %v18331_v7  ;;  %v13881_v7 = vsub.f32 %v3164_v53, %v3250_v20  ;;  %18342 = vst [vmem:[#allocation292_spill] sm:$0xff] %v13889_v39  ;;  %v18345_v53 = vpack.c.bf16 %v18343_v48, %v18344_v21  ;;  %v13895_v20 = vsub.f32 %v13750_v59, %v3256_v12  ;;  %18346 = vst [vmem:[#allocation293_spill] sm:$0xff] %v13900_v37  ;;  %v3185_v21 = vld [vmem:[#allocation8 + $0x148] sm:$0xff]  ;;  %v3187_v59 = vld [vmem:[#allocation8 + $0x158] sm:$0xff] }
 0x1b2   : > { %9512 = vmatprep.subr.bf16.mxu1 %v18338_v32  ;;  %v3276_v32 = vand.u32 4294901760, %v3179_v34  ;;  %18347 = vst [vmem:[#allocation294_spill] sm:$0xff] %v13902_v30  ;;  %v3280_v48 = vand.u32 4294901760, %v3181_v36  ;;  %9770 = vmatpush1.bf16.msra.mxu0 %v13883_v4  ;;  %v13910_v12 = vsub.f32 %v3175_v57, %v3268_v1  ;;  %18352 = vst [vmem:[#allocation296_spill] sm:$0xff] %v13912_v45  ;;  %v3189_v30 = vld [vmem:[#allocation8 + $0x168] sm:$0xff]  ;;  %v3191_v4 = vld [vmem:[#allocation8 + $0x178] sm:$0xff] }
 0x1b3   : > { %18339 = vst [vmem:[#allocation289_spill] sm:$0xff] %v13881_v7  ;;  %v18349_v7 = vld [vmem:[#allocation207_spill] sm:$0xff]  ;;  %18353 = vst [vmem:[#allocation297_spill] sm:$0xff] %v13914_v29  ;;  %9772 = vmatprep.subr.bf16.mxu0 %v13889_v39  ;;  %v13917_v54 = vsub.f32 %v3174_v15, %v3270_v3  ;;  %v18356_v46 = vpack.c.bf16 %v18152_v23, %v18216_v24  ;;  %v13924_v57 = vsub.f32 %v3177_v40, %v3272_v6  ;;  %v18359_v10 = vld [vmem:[#allocation213_spill] sm:$0xff] }
 0x1b4   : > { %v18350_v51 = vpack.c.bf16 %v18348_v55, %v18349_v7  ;;  %18351 = vst [vmem:[#allocation295_spill] sm:$0xff] %v13910_v12  ;;  %v13919_v8 = vpack.c.bf16 %v3276_v32, %v3272_v6  ;;  %v3286_v55 = vand.u32 4294901760, %v3182_v56  ;;  %v3186_v7 = vld [vmem:[#allocation8 + $0x150] sm:$0xff]  ;;  %v13926_v9 = vsub.f32 %v3179_v34, %v3276_v32  ;;  %v18360_v15 = vld [vmem:[#allocation211_spill] sm:$0xff]  ;;  %v3188_v23 = vld [vmem:[#allocation8 + $0x160] sm:$0xff] }
 0x1b5   : > { %9514 = vmatpush1.bf16.msra.mxu1 %v18345_v53  ;;  %v3284_v53 = vand.u32 4294901760, %v3183_v31  ;;  %18354 = vst [vmem:[#allocation298_spill] sm:$0xff] %v13917_v54  ;;  %18357 = vst [vmem:[#allocation300_spill] sm:$0xff] %v13924_v57  ;;  %v3288_v11 = vand.u32 4294901760, %v3185_v21  ;;  %v3292_v1 = vand.u32 4294901760, %v3187_v59  ;;  %v18361_v3 = vpack.c.bf16 %v18359_v10, %v18360_v15  ;;  %v3193_v24 = vld [vmem:[#allocation8 + $0x188] sm:$0xff] }
 0x1b6   : > { %9516 = vmatprep.subr.bf16.mxu1 %v18350_v51  ;;  %18355 = vst [vmem:[#allocation299_spill] sm:$0xff] %v13919_v8  ;;  %v3282_v51 = vand.u32 4294901760, %v3180_v25  ;;  %18358 = vst [vmem:[#allocation301_spill] sm:$0xff] %v13926_v9  ;;  %v13931_v39 = vpack.c.bf16 %v3278_v16, %v3274_v5  ;;  %v13933_v54 = vsub.f32 %v3176_v52, %v3274_v5  ;;  %9774 = vmatpush1.bf16.msra.mxu0 %v13912_v45  ;;  %v3195_v9 = vld [vmem:[#allocation8 + $0x198] sm:$0xff]  ;;  %v18370_v10 = vld [vmem:[#allocation216_spill] sm:$0xff] }
 0x1b7   : > { %v13935_v29 = vsub.f32 %v3178_v0, %v3278_v16  ;;  %v13937_v12 = vpack.c.bf16 %v3284_v53, %v3280_v48  ;;  %v3290_v34 = vand.u32 4294901760, %v3184_v43  ;;  %v3294_v40 = vand.u32 4294901760, %v3186_v7  ;;  %9776 = vmatprep.subr.bf16.mxu0 %v13919_v8  ;;  %v3192_v0 = vld [vmem:[#allocation8 + $0x180] sm:$0xff]  ;;  %v18371_v15 = vld [vmem:[#allocation215_spill] sm:$0xff] }
 0x1b8   : > { %18362 = vst [vmem:[#allocation302_spill] sm:$0xff] %v13931_v39  ;;  %18363 = vst [vmem:[#allocation303_spill] sm:$0xff] %v13933_v54  ;;  %v3296_v6 = vand.u32 4294901760, %v3189_v30  ;;  %v3300_v32 = vand.u32 4294901760, %v3191_v4  ;;  %v13943_v5 = vsub.f32 %v3183_v31, %v3284_v53  ;;  %v13945_v16 = vpack.c.bf16 %v3286_v55, %v3282_v51  ;;  %v3199_v31 = vld [vmem:[#allocation8 + $0x1b8] sm:$0xff] }
 0x1b9   : > { %9518 = vmatpush1.bf16.msra.mxu1 %v18356_v46  ;;  %18364 = vst [vmem:[#allocation304_spill] sm:$0xff] %v13935_v29  ;;  %18365 = vst [vmem:[#allocation305_spill] sm:$0xff] %v13937_v12  ;;  %v3190_v46 = vld [vmem:[#allocation8 + $0x170] sm:$0xff]  ;;  %v13947_v52 = vsub.f32 %v3180_v25, %v3282_v51  ;;  %v18372_v45 = vpack.c.bf16 %v18370_v10, %v18371_v15  ;;  %v13952_v29 = vsub.f32 %v3182_v56, %v3286_v55  ;;  %v18375_v53 = vld [vmem:[#allocation217_spill] sm:$0xff] }
 0x1ba   : > { %9520 = vmatprep.subr.bf16.mxu1 %v18361_v3  ;;  %v13941_v3 = vsub.f32 %v3181_v36, %v3280_v48  ;;  %18367 = vst [vmem:[#allocation307_spill] sm:$0xff] %v13943_v5  ;;  %18368 = vst [vmem:[#allocation308_spill] sm:$0xff] %v13945_v16  ;;  %v13954_v54 = vpack.c.bf16 %v3292_v1, %v3288_v11  ;;  %v13956_v57 = vsub.f32 %v3185_v21, %v3288_v11  ;;  %v3194_v36 = vld [vmem:[#allocation8 + $0x190] sm:$0xff]  ;;  %v3197_v48 = vld [vmem:[#allocation8 + $0x1a8] sm:$0xff] }
 0x1bb   : > { %18369 = vst [vmem:[#allocation309_spill] sm:$0xff] %v13947_v52  ;;  %v13958_v8 = vsub.f32 %v3187_v59, %v3292_v1  ;;  %v18376_v25 = vpack.c.bf16 %v13079_v14, %v18375_v53  ;;  %v3298_v51 = vand.u32 4294901760, %v3188_v23  ;;  %v3302_v52 = vand.u32 4294901760, %v3190_v46  ;;  %v3198_v56 = vld [vmem:[#allocation8 + $0x1b0] sm:$0xff]  ;;  %9778 = vmatpush1.bf16.msra.mxu0 %v13931_v39  ;;  %v3201_v15 = vld [vmem:[#allocation8 + $0x1c8] sm:$0xff] }
 0x1bc   : > { %18366 = vst [vmem:[#allocation306_spill] sm:$0xff] %v13941_v3  ;;  %18373 = vst [vmem:[#allocation310_spill] sm:$0xff] %v13954_v54  ;;  %v3304_v5 = vand.u32 4294901760, %v3193_v24  ;;  %v3308_v10 = vand.u32 4294901760, %v3195_v9  ;;  %v13964_v55 = vpack.c.bf16 %v3294_v40, %v3290_v34  ;;  %v13966_v21 = vsub.f32 %v3184_v43, %v3290_v34  ;;  %9780 = vmatprep.subr.bf16.mxu0 %v13937_v12 }
 0x1bd   : > { %9522 = vmatpush1.bf16.msra.mxu1 %v18372_v45  ;;  %18374 = vst [vmem:[#allocation311_spill] sm:$0xff] %v13958_v8  ;;  %v3196_v45 = vld [vmem:[#allocation8 + $0x1a0] sm:$0xff]  ;;  %v13968_v59 = vsub.f32 %v3186_v7, %v3294_v40  ;;  %v13970_v11 = vpack.c.bf16 %v3300_v32, %v3296_v6  ;;  %v13973_v1 = vsub.f32 %v3189_v30, %v3296_v6  ;;  %v3306_v14 = vand.u32 4294901760, %v3192_v0  ;;  %v3203_v8 = vld [vmem:[#allocation8 + $0x1d8] sm:$0xff] }
 0x1be   : > { %9524 = vmatprep.subr.bf16.mxu1 %v18376_v25  ;;  %18377 = vst [vmem:[#allocation312_spill] sm:$0xff] %v13964_v55  ;;  %18378 = vst [vmem:[#allocation313_spill] sm:$0xff] %v13966_v21  ;;  %v13975_v25 = vsub.f32 %v3191_v4, %v3300_v32  ;;  %v3310_v53 = vand.u32 4294901760, %v3194_v36  ;;  %v18383_v39 = vpack.c.bf16 %v13090_v35, %v18168_v27  ;;  %v3312_v43 = vand.u32 4294901760, %v3197_v48 }
 0x1bf   : > { %18379 = vst [vmem:[#allocation314_spill] sm:$0xff] %v13968_v59  ;;  %18380 = vst [vmem:[#allocation315_spill] sm:$0xff] %v13970_v11  ;;  %v3316_v34 = vand.u32 4294901760, %v3199_v31  ;;  %v3314_v7 = vand.u32 4294901760, %v3196_v45  ;;  %v3318_v40 = vand.u32 4294901760, %v3198_v56  ;;  %v18384_v59 = vpack.c.bf16 %v18173_v42, %v13093_v63  ;;  %9782 = vmatpush1.bf16.msra.mxu0 %v13945_v16  ;;  %v3204_v16 = vld [vmem:[#allocation8 + $0x1e0] sm:$0xff] }
 0x1c0   : > { %18381 = vst [vmem:[#allocation316_spill] sm:$0xff] %v13973_v1  ;;  %18382 = vst [vmem:[#allocation317_spill] sm:$0xff] %v13975_v25  ;;  %v13983_v30 = vpack.c.bf16 %v3302_v52, %v3298_v51  ;;  %v13985_v4 = vsub.f32 %v3188_v23, %v3298_v51  ;;  %v13987_v6 = vsub.f32 %v3190_v46, %v3302_v52  ;;  %v3320_v35 = vand.u32 4294901760, %v3201_v15  ;;  %v3200_v51 = vld [vmem:[#allocation8 + $0x1c0] sm:$0xff] }
 0x1c1   : > { %9526 = vmatpush1.bf16.msra.mxu1 %v18383_v39  ;;  %v13989_v32 = vpack.c.bf16 %v3308_v10, %v3304_v5  ;;  %v13992_v12 = vsub.f32 %v3193_v24, %v3304_v5  ;;  %v13994_v39 = vsub.f32 %v3195_v9, %v3308_v10  ;;  %v3324_v27 = vand.u32 4294901760, %v3203_v8  ;;  %9784 = vmatprep.subr.bf16.mxu0 %v13954_v54  ;;  %v3202_v54 = vld [vmem:[#allocation8 + $0x1d0] sm:$0xff] }
 0x1c2   : > { %9528 = vmatprep.subr.bf16.mxu1 %v18384_v59  ;;  %18385 = vst [vmem:[#allocation318_spill] sm:$0xff] %v13983_v30  ;;  %18386 = vst [vmem:[#allocation319_spill] sm:$0xff] %v13985_v4  ;;  %v13997_v42 = vpack.c.bf16 %v3310_v53, %v3306_v14  ;;  %v13999_v59 = vsub.f32 %v3192_v0, %v3306_v14  ;;  %v14001_v23 = vsub.f32 %v3194_v36, %v3310_v53  ;;  %v3205_v0 = vld [vmem:[#allocation8 + $0x1e8] sm:$0xff]  ;;  %v3207_v36 = vld [vmem:[#allocation8 + $0x1f8] sm:$0xff] }
 0x1c3   : > { %18387 = vst [vmem:[#allocation320_spill] sm:$0xff] %v13987_v6  ;;  %18388 = vst [vmem:[#allocation321_spill] sm:$0xff] %v13989_v32  ;;  %v14003_v46 = vsub.f32 %v3197_v48, %v3312_v43  ;;  %v18395_v52 = vpack.c.bf16 %v18183_v50, %v18180_v41  ;;  %v14008_v24 = vpack.c.bf16 %v3316_v34, %v3312_v43  ;;  %9786 = vmatpush1.bf16.msra.mxu0 %v13964_v55  ;;  %v18408_v50 = vld [vmem:[#allocation272_spill] sm:$0xff] }
 0x1c4   : > { %18389 = vst [vmem:[#allocation322_spill] sm:$0xff] %v13992_v12  ;;  %18390 = vst [vmem:[#allocation323_spill] sm:$0xff] %v13994_v39  ;;  %v14010_v9 = vsub.f32 %v3199_v31, %v3316_v34  ;;  %v14012_v10 = vpack.c.bf16 %v3318_v40, %v3314_v7  ;;  %v14014_v5 = vsub.f32 %v3196_v45, %v3314_v7  ;;  %9788 = vmatprep.subr.bf16.mxu0 %v13970_v11  ;;  %v18405_v31 = vld [vmem:[#allocation230_spill] sm:$0xff]  ;;  %v18409_v41 = vld [vmem:[#allocation232_spill] sm:$0xff] }
 0x1c5   : > { %18391 = vst [vmem:[#allocation324_spill] sm:$0xff] %v13997_v42  ;;  %18392 = vst [vmem:[#allocation325_spill] sm:$0xff] %v13999_v59  ;;  %9530 = vmatpush1.bf16.msra.mxu1 %v18395_v52  ;;  %v18400_v14 = vpack.c.bf16 %v13116_v13, %v13113_v26  ;;  %v14024_v45 = vsub.f32 %v3198_v56, %v3318_v40  ;;  %v14026_v34 = vpack.c.bf16 %v3324_v27, %v3320_v35  ;;  %v18406_v13 = vld [vmem:[#allocation229_spill] sm:$0xff]  ;;  %v3206_v26 = vld [vmem:[#allocation8 + $0x1f0] sm:$0xff] }
 0x1c6   : > { %18393 = vst [vmem:[#allocation326_spill] sm:$0xff] %v14001_v23  ;;  %18394 = vst [vmem:[#allocation327_spill] sm:$0xff] %v14003_v46  ;;  %v14033_v48 = vsub.f32 %v3203_v8, %v3324_v27  ;;  %v3322_v53 = vand.u32 4294901760, %v3200_v51  ;;  %v3326_v43 = vand.u32 4294901760, %v3202_v54  ;;  %v18407_v55 = vpack.c.bf16 %v18405_v31, %v18406_v13  ;;  %v18410_v11 = vld [vmem:[#allocation231_spill] sm:$0xff] }
 0x1c7   : > { %18396 = vst [vmem:[#allocation328_spill] sm:$0xff] %v14008_v24  ;;  %18397 = vst [vmem:[#allocation329_spill] sm:$0xff] %v14010_v9  ;;  %9532 = vmatprep.subr.bf16.mxu1 %v18400_v14  ;;  %v14031_v14 = vsub.f32 %v3201_v15, %v3320_v35  ;;  %v3328_v56 = vand.u32 4294901760, %v3205_v0  ;;  %v3332_v40 = vand.u32 4294901760, %v3207_v36  ;;  %v18411_v35 = vpack.c.bf16 %v18409_v41, %v18410_v11  ;;  %v18442_v23 = vld [vmem:[#allocation247_spill] sm:$0xff] }
 0x1c8   : > { %18398 = vst [vmem:[#allocation330_spill] sm:$0xff] %v14012_v10  ;;  %18399 = vst [vmem:[#allocation331_spill] sm:$0xff] %v14014_v5  ;;  %v18412_v27 = vand.u32 4294901760, %v13757_v17  ;;  %v18413_v15 = vand.u32 4294901760, %v13762_v44  ;;  %v18415_v7 = vand.u32 4294901760, %v13779_v61  ;;  %9790 = vmatpush1.bf16.msra.mxu0 %v13983_v30  ;;  %v3330_v41 = vand.u32 4294901760, %v3204_v16 }
 0x1c9   : > { %18401 = vst [vmem:[#allocation332_spill] sm:$0xff] %v14024_v45  ;;  %18402 = vst [vmem:[#allocation333_spill] sm:$0xff] %v14026_v34  ;;  %9534 = vmatpush1.bf16.msra.mxu1 %v18407_v55  ;;  %v18414_v55 = vand.u32 4294901760, %v13770_v2  ;;  %9792 = vmatprep.subr.bf16.mxu0 %v13989_v32  ;;  %v3334_v30 = vand.u32 4294901760, %v3206_v26  ;;  %v18422_v45 = vld [vmem:[#allocation234_spill] sm:$0xff]  ;;  %v14075_v9 = vsub.f32 %v3205_v0, %v3328_v56  ;;  %v18427_v32 = vand.u32 4294901760, %v18408_v50 }
 0x1ca   : > { %18403 = vst [vmem:[#allocation334_spill] sm:$0xff] %v14031_v14  ;;  %18404 = vst [vmem:[#allocation335_spill] sm:$0xff] %v14033_v48  ;;  %9536 = vmatprep.subr.bf16.mxu1 %v18411_v35  ;;  %v3356_v8 = vsub.f32 %v13757_v17, %v18412_v27  ;;  %v3368_v31 = vsub.f32 %v13762_v44, %v18413_v15  ;;  %v3374_v52 = vsub.f32 %v13779_v61, %v18415_v7  ;;  %v18421_v14 = vld [vmem:[#allocation235_spill] sm:$0xff] }
 0x1cb   : > { %v3362_v13 = vsub.f32 %v13770_v2, %v18414_v55  ;;  %v18416_v35 = vand.u32 4294901760, %v13789_v38  ;;  %v18417_v27 = vand.u32 4294901760, %v13794_v58  ;;  %v14064_v55 = vpack.c.bf16 %v3326_v43, %v3322_v53  ;;  %18425 = vst [vmem:[#allocation340_spill] sm:$0xff] %v14075_v9  ;;  %v18432_v9 = vld [vmem:[#allocation274_spill] sm:$0xff] }
 0x1cc   : > { %v14066_v48 = vsub.f32 %v3200_v51, %v3322_v53  ;;  %v14068_v7 = vsub.f32 %v3202_v54, %v3326_v43  ;;  %v18423_v5 = vpack.c.bf16 %v18421_v14, %v18422_v45  ;;  %v3398_v51 = vsub.f32 %v18408_v50, %v18427_v32  ;;  %v18428_v53 = vld [vmem:[#allocation240_spill] sm:$0xff]  ;;  %v18429_v54 = vld [vmem:[#allocation237_spill] sm:$0xff]  ;;  %9794 = vmatpush1.bf16.msra.mxu0 %v13997_v42 }
 0x1cd   : > { %v3380_v11 = vsub.f32 %v13789_v38, %v18416_v35  ;;  %v3392_v63 = vsub.f32 %v13794_v58, %v18417_v27  ;;  %18418 = vst [vmem:[#allocation336_spill] sm:$0xff] %v14064_v55  ;;  %v14073_v35 = vpack.c.bf16 %v3332_v40, %v3328_v56  ;;  %v18426_v27 = vand.u32 4294901760, %v13799_v22  ;;  %9796 = vmatprep.subr.bf16.mxu0 %v14008_v24  ;;  %v18443_v24 = vld [vmem:[#allocation246_spill] sm:$0xff] }
 0x1ce   : > { %18419 = vst [vmem:[#allocation337_spill] sm:$0xff] %v14066_v48  ;;  %18420 = vst [vmem:[#allocation338_spill] sm:$0xff] %v14068_v7  ;;  %9538 = vmatpush1.bf16.msra.mxu1 %v18423_v5  ;;  %v18430_v43 = vpack.c.bf16 %v18428_v53, %v18429_v54  ;;  %v3357_v7 = vand.u32 4294901760, %v3356_v8  ;;  %v3369_v48 = vand.u32 4294901760, %v3368_v31  ;;  %v3363_v14 = vand.u32 4294901760, %v3362_v13  ;;  %v18436_v13 = vld [vmem:[#allocation275_spill] sm:$0xff] }
 0x1cf   : > { %18424 = vst [vmem:[#allocation339_spill] sm:$0xff] %v14073_v35  ;;  %v3386_v15 = vsub.f32 %v13799_v22, %v18426_v27  ;;  %v3375_v5 = vand.u32 4294901760, %v3374_v52  ;;  %v3381_v0 = vand.u32 4294901760, %v3380_v11  ;;  %v3393_v56 = vand.u32 4294901760, %v3392_v63  ;;  %v18437_v8 = vld [vmem:[#allocation243_spill] sm:$0xff]  ;;  %v18438_v11 = vld [vmem:[#allocation242_spill] sm:$0xff] }
 0x1d0   : > { %9540 = vmatprep.subr.bf16.mxu1 %v18430_v43  ;;  %v18431_v45 = vand.u32 4294901760, %v13812_v19  ;;  %v14094_v32 = vsub.f32 %v3207_v36, %v3332_v40  ;;  %v14096_v43 = vpack.c.bf16 %v3334_v30, %v3330_v41  ;;  %v14098_v31 = vsub.f32 %v3204_v16, %v3330_v41  ;;  %v18441_v54 = vld [vmem:[#allocation276_spill] sm:$0xff]  ;;  %v18445_v41 = vld [vmem:[#allocation277_spill] sm:$0xff]  ;;  %9798 = vmatpush1.bf16.msra.mxu0 %v14012_v10  ;;  %v18497_v38 = vld [vmem:[#allocation331_spill] sm:$0xff] }
 0x1d1   : > { %v18439_v63 = vpack.c.bf16 %v18437_v8, %v18438_v11  ;;  %v14104_v42 = vsub.f32 %v3206_v26, %v3334_v30  ;;  %v3399_v53 = vand.u32 4294901760, %v3398_v51  ;;  %v17238_v46 = vand.u32 4294901760, %v18441_v54  ;;  %9800 = vmatprep.subr.bf16.mxu0 %v14026_v34  ;;  %v18452_v16 = vld [vmem:[#allocation252_spill] sm:$0xff]  ;;  %v18472_v11 = vld [vmem:[#allocation298_spill] sm:$0xff]  ;;  %v18500_v2 = vld [vmem:[#allocation335_spill] sm:$0xff] }
 0x1d2   : > { %v14090_v27 = vsub.f32 %v13812_v19, %v18431_v45  ;;  %18433 = vst [vmem:[#allocation341_spill] sm:$0xff] %v14094_v32  ;;  %18434 = vst [vmem:[#allocation342_spill] sm:$0xff] %v14096_v43  ;;  %v3387_v45 = vand.u32 4294901760, %v3386_v15  ;;  %v18444_v36 = vpack.c.bf16 %v18442_v23, %v18443_v24  ;;  %v9807_v40 = vpack.c.bf16 %v3369_v48, %v3357_v7  ;;  %v18465_v23 = vld [vmem:[#allocation291_spill] sm:$0xff]  ;;  %v18499_v58 = vld [vmem:[#allocation334_spill] sm:$0xff] }
 0x1d3   : > { %18435 = vst [vmem:[#allocation343_spill] sm:$0xff] %v14098_v31  ;;  %9542 = vmatpush1.bf16.msra.mxu1 %v18439_v63  ;;  %18440 = vst [vmem:[#allocation344_spill] sm:$0xff] %v14104_v42  ;;  %v14110_v32 = vpack.c.bf16 %v3375_v5, %v3363_v14  ;;  %v14116_v26 = vpack.c.bf16 %v3393_v56, %v3381_v0  ;;  %v18446_v15 = vand.u32 4294901760, %v18432_v9  ;;  %v18447_v14 = vand.u32 4294901760, %v18436_v13  ;;  %v18448_v5 = vld [vmem:[#allocation279_spill] sm:$0xff] }
 0x1d4   : > { %9544 = vmatprep.subr.bf16.mxu1 %v18444_v36  ;;  %v3405_v30 = vand.u32 4294901760, %v14090_v27  ;;  %v18449_v27 = vld [vmem:[#allocation250_spill] sm:$0xff]  ;;  %v18450_v36 = vld [vmem:[#allocation249_spill] sm:$0xff]  ;;  %v14136_v52 = vpack.c.bf16 %v3399_v53, %v3387_v45  ;;  %v3422_v48 = vsub.f32 %v18441_v54, %v17238_v46  ;;  %v18453_v0 = vld [vmem:[#allocation251_spill] sm:$0xff]  ;;  %v18455_v56 = vand.u32 4294901760, %v18445_v41  ;;  %9802 = vmatpush1.bf16.msra.mxu0 %v14064_v55 }
 0x1d5   : > { %v3416_v51 = vsub.f32 %v18432_v9, %v18446_v15  ;;  %v3410_v7 = vsub.f32 %v18436_v13, %v18447_v14  ;;  %v18451_v15 = vpack.c.bf16 %v18449_v27, %v18450_v36  ;;  %v18454_v34 = vpack.c.bf16 %v18452_v16, %v18453_v0  ;;  %9804 = vmatprep.subr.bf16.mxu0 %v14073_v35  ;;  %v18459_v16 = vld [vmem:[#allocation288_spill] sm:$0xff]  ;;  %v18460_v0 = vld [vmem:[#allocation239_spill] sm:$0xff]  ;;  %v18461_v27 = vld [vmem:[#allocation253_spill] sm:$0xff] }
 0x1d6   : > { %v14150_v10 = vsub.f32 %v18445_v41, %v18455_v56  ;;  %v18456_v14 = vand.u32 4294901760, %v18448_v5  ;;  %v3423_v36 = vand.u32 4294901760, %v3422_v48  ;;  %v18463_v56 = vand.u32 4294901760, %v13849_v33  ;;  %v18464_v35 = vld [vmem:[#allocation289_spill] sm:$0xff]  ;;  %v18466_v55 = vld [vmem:[#allocation159_spill] sm:$0xff]  ;;  %v18468_v48 = vld [vmem:[#allocation294_spill] sm:$0xff] }
 0x1d7   : > { %9546 = vmatpush1.bf16.msra.mxu1 %v18451_v15  ;;  %v3417_v46 = vand.u32 4294901760, %v3416_v51  ;;  %v3411_v53 = vand.u32 4294901760, %v3410_v7  ;;  %v18457_v15 = vld [vmem:[#allocation286_spill] sm:$0xff]  ;;  %v18458_v51 = vld [vmem:[#allocation287_spill] sm:$0xff]  ;;  %v18467_v8 = vand.u32 4294901760, %v13854_v49  ;;  %v18477_v54 = vld [vmem:[#allocation304_spill] sm:$0xff] }
 0x1d8   : > { %9548 = vmatprep.subr.bf16.mxu1 %v18454_v34  ;;  %v14167_v45 = vsub.f32 %v18448_v5, %v18456_v14  ;;  %v18462_v34 = vpack.c.bf16 %v18460_v0, %v18461_v27  ;;  %v14179_v7 = vsub.f32 %v13849_v33, %v18463_v56  ;;  %v3429_v63 = vand.u32 4294901760, %v14150_v10  ;;  %v18469_v56 = vld [vmem:[#allocation295_spill] sm:$0xff]  ;;  %9806 = vmatpush1.bf16.msra.mxu0 %v14096_v43  ;;  %v18475_v5 = vld [vmem:[#allocation120_spill] sm:$0xff]  ;;  %v18485_v33 = vld [vmem:[#allocation314_spill] sm:$0xff] }
 0x1d9   : > { %v18470_v14 = vand.u32 4294901760, %v13857_v47  ;;  %9808 = vmatprep.subr.bf16.mxu0 %v9807_v40  ;;  %v9815_v0 = vpack.c.bf16 %v3417_v46, %v3405_v30  ;;  %v18476_v13 = vld [vmem:[#allocation303_spill] sm:$0xff]  ;;  %v18481_v40 = vld [vmem:[#allocation309_spill] sm:$0xff]  ;;  %v18486_v46 = vand.u32 4294901760, %v13860_v28  ;;  %v18502_v61 = vld [vmem:[#allocation338_spill] sm:$0xff]  ;;  %v18509_v42 = vand.u32 4294901760, %v13895_v20 }
 0x1da   : > { %v3441_v27 = vand.u32 4294901760, %v14167_v45  ;;  %v18479_v19 = vld [vmem:[#allocation123_spill] sm:$0xff]  ;;  %v18483_v45 = vld [vmem:[#allocation57_spill] sm:$0xff] }
 0x1db   : > { %9550 = vmatpush1.bf16.msra.mxu1 %v18462_v34  ;;  %v14190_v34 = vsub.f32 %v13854_v49, %v18467_v8  ;;  %v14200_v24 = vsub.f32 %v13857_v47, %v18470_v14  ;;  %v18473_v8 = vld [vmem:[#allocation300_spill] sm:$0xff]  ;;  %v18474_v49 = vld [vmem:[#allocation301_spill] sm:$0xff]  ;;  %v18478_v47 = vld [vmem:[#allocation54_spill] sm:$0xff]  ;;  %v3435_v14 = vand.u32 4294901760, %v14179_v7 }
 0x1dc   : > { %9552 = vmatprep.subr.bf16.mxu1 %v18466_v55  ;;  %v18471_v55 = vld [vmem:[#allocation297_spill] sm:$0xff]  ;;  %v18480_v41 = vld [vmem:[#allocation307_spill] sm:$0xff] }
 0x1dd   : > { %v18482_v30 = vld [vmem:[#allocation131_spill] sm:$0xff]  ;;  %v3447_v9 = vand.u32 4294901760, %v14190_v34  ;;  %v18489_v34 = vld [vmem:[#allocation61_spill] sm:$0xff] }
 0x1de   : > { %2595 = vmatmul.mubr.f32.vlgmr.msra.gmra.mrb[2].mxu1 %v18475_v5  ;;  %3347 = vmatmul.mubr.f32.vlgmr.msra.gmra.mrb[2].mxu0 %v18482_v30  ;;  %v18484_v10 = vld [vmem:[#allocation311_spill] sm:$0xff]  ;;  %v9817_v5 = vpack.c.bf16 %v3423_v36, %v3411_v53  ;;  %v3464_v30 = vsub.f32 %v13860_v28, %v18486_v46  ;;  %v18490_v46 = vand.u32 4294901760, %v18457_v15  ;;  %v18494_v28 = vld [vmem:[#allocation329_spill] sm:$0xff]  ;;  %v18495_v36 = vld [vmem:[#allocation66_spill] sm:$0xff]  ;;  %v18496_v53 = vand.u32 4294901760, %v18459_v16 }
 0x1df   : > { %9554 = vmatpush1.bf16.msra.mxu1 %v18478_v47  ;;  %2732 = vmatprep.mubr.f32.mxu1 %v18479_v19  ;;  %v18488_v47 = vand.u32 4294901760, %v13866_v18  ;;  %v18501_v22 = vld [vmem:[#allocation337_spill] sm:$0xff] }
 0x1e0   : > { %9556 = vmatprep.subr.bf16.mxu1 %v18483_v45  ;;  %9810 = vmatpush1.bf16.msra.mxu0 %v14110_v32  ;;  %v18487_v45 = vld [vmem:[#allocation114_spill] sm:$0xff]  ;;  %v3470_v7 = vsub.f32 %v18457_v15, %v18490_v46  ;;  %v18493_v32 = vld [vmem:[#allocation327_spill] sm:$0xff]  ;;  %v18498_v46 = vld [vmem:[#allocation332_spill] sm:$0xff]  ;;  %v18508_v15 = vand.u32 4294901760, %v18465_v23 }
 0x1e1   : > { %3738 = vmatprep.mubr.f32.mxu0 %v18487_v45  ;;  %9812 = vmatprep.subr.bf16.mxu0 %v14116_v26  ;;  %v3458_v19 = vsub.f32 %v13866_v18, %v18488_v47  ;;  %v18491_v26 = vand.u32 4294901760, %v18458_v51  ;;  %v18492_v47 = vld [vmem:[#allocation326_spill] sm:$0xff]  ;;  %v3453_v18 = vand.u32 4294901760, %v14200_v24  ;;  %v18503_v45 = vld [vmem:[#allocation340_spill] sm:$0xff]  ;;  %v18504_v17 = vld [vmem:[#allocation341_spill] sm:$0xff]  ;;  %v18506_v24 = vand.u32 4294901760, %v18464_v35 }
 0x1e3   : > { %9558 = vmatpush1.bf16.msra.mxu1 %v18489_v34  ;;  %v3476_v43 = vsub.f32 %v18458_v51, %v18491_v26  ;;  %v3488_v34 = vsub.f32 %v18459_v16, %v18496_v53  ;;  %v3465_v51 = vand.u32 4294901760, %v3464_v30  ;;  %v9819_v53 = vpack.c.bf16 %v3441_v27, %v3429_v63  ;;  %v18505_v16 = vld [vmem:[#allocation73_spill] sm:$0xff] }
 0x1e4   : > { %9560 = vmatprep.subr.bf16.mxu1 %v18495_v36  ;;  %9814 = vmatpush1.bf16.msra.mxu0 %v14136_v52  ;;  %v3459_v52 = vand.u32 4294901760, %v3458_v19  ;;  %v3482_v30 = vsub.f32 %v18464_v35, %v18506_v24  ;;  %v3471_v63 = vand.u32 4294901760, %v3470_v7  ;;  %v3494_v26 = vsub.f32 %v18465_v23, %v18508_v15 }
 0x1e5   : > { %9816 = vmatprep.subr.bf16.mxu0 %v9815_v0  ;;  %v18507_v0 = vld [vmem:[#allocation74_spill] sm:$0xff]  ;;  %v3477_v27 = vand.u32 4294901760, %v3476_v43  ;;  %v3489_v50 = vand.u32 4294901760, %v3488_v34  ;;  %v9823_v19 = vpack.c.bf16 %v3465_v51, %v3453_v18  ;;  %v3500_v24 = vsub.f32 %v13895_v20, %v18509_v42  ;;  %v18514_v51 = vld [vmem:[#allocation164_spill] sm:$0xff] }
 0x1e6   : > { %v18510_v36 = vand.u32 4294901760, %v13898_v62  ;;  %v18511_v34 = vld [vmem:[#allocation162_spill] sm:$0xff]  ;;  %v18512_v15 = vand.u32 4294901760, %v13900_v37  ;;  %v18513_v18 = vand.u32 4294901760, %v18468_v48  ;;  %v9825_v42 = vpack.c.bf16 %v3471_v63, %v3459_v52  ;;  %v18522_v63 = vld [vmem:[#allocation105_spill] sm:$0xff] }
 0x1e7   : > { %9562 = vmatpush1.bf16.msra.mxu1 %v18505_v16  ;;  %v9821_v16 = vpack.c.bf16 %v3447_v9, %v3435_v14  ;;  %v9827_v14 = vpack.c.bf16 %v3489_v50, %v3477_v27  ;;  %v17284_v7 = vand.u32 4294901760, %v18471_v55  ;;  %v17285_v43 = vand.u32 4294901760, %v18472_v11 }
 0x1e8   : > { %9564 = vmatprep.subr.bf16.mxu1 %v18507_v0  ;;  %9818 = vmatpush1.bf16.msra.mxu0 %v9817_v5  ;;  %v3512_v44 = vsub.f32 %v13898_v62, %v18510_v36  ;;  %v3506_v9 = vsub.f32 %v13900_v37, %v18512_v15  ;;  %v3518_v5 = vsub.f32 %v18468_v48, %v18513_v18  ;;  %v3495_v36 = vand.u32 4294901760, %v3494_v26  ;;  %v18518_v0 = vld [vmem:[#allocation96_spill] sm:$0xff] }
 0x1e9   : > { %9820 = vmatprep.subr.bf16.mxu0 %v9819_v53  ;;  %v3483_v53 = vand.u32 4294901760, %v3482_v30  ;;  %v3501_v15 = vand.u32 4294901760, %v3500_v24  ;;  %v18515_v18 = vand.u32 4294901760, %v13908_v60  ;;  %v18516_v50 = vand.u32 4294901760, %v18469_v56 }
 0x1ea   : > { %v3513_v37 = vand.u32 4294901760, %v3512_v44  ;;  %v3507_v52 = vand.u32 4294901760, %v3506_v9  ;;  %v3519_v30 = vand.u32 4294901760, %v3518_v5  ;;  %v3542_v9 = vsub.f32 %v18472_v11, %v17285_v43 }
 0x1eb   : > { %9566 = vmatpush1.bf16.msra.mxu1 %v18511_v34  ;;  %v17286_v34 = vand.u32 4294901760, %v18473_v8  ;;  %v3536_v26 = vsub.f32 %v18469_v56, %v18516_v50  ;;  %v3530_v50 = vsub.f32 %v18471_v55, %v17284_v7 }
 0x1ec   : > { %9568 = vmatprep.subr.bf16.mxu1 %v18514_v51  ;;  %9822 = vmatpush1.bf16.msra.mxu0 %v9821_v16  ;;  %v3524_v51 = vsub.f32 %v13908_v60, %v18515_v18  ;;  %v18517_v16 = vld [vmem:[#allocation165_spill] sm:$0xff]  ;;  %v14317_v18 = vpop.f32.mrb[0].mxu1  ;;  %v9833_v7 = vpack.c.bf16 %v3519_v30, %v3507_v52  ;;  %v3543_v30 = vand.u32 4294901760, %v3542_v9  ;;  %v18530_v9 = vand.u32 4294901760, %v18481_v40 }
 0x1ed   : > { %9824 = vmatprep.subr.bf16.mxu0 %v9823_v19  ;;  %v9829_v19 = vpack.c.bf16 %v3495_v36, %v3483_v53  ;;  %18519 = vst [vmem:[#allocation289_spill] sm:$0xff] %v14317_v18  ;;  %v3548_v5 = vsub.f32 %v18473_v8, %v17286_v34  ;;  %v18520_v53 = vand.u32 4294901760, %v18474_v49  ;;  %v14331_v24 = vpop.f32.mrb[1].mxu1  ;;  %v3537_v27 = vand.u32 4294901760, %v3536_v26  ;;  %v18529_v26 = vld [vmem:[#allocation172_spill] sm:$0xff] }
 0x1ee   : > { %18521 = vst [vmem:[#allocation294_spill] sm:$0xff] %v14331_v24  ;;  %v3525_v44 = vand.u32 4294901760, %v3524_v51  ;;  %v18523_v18 = vand.u32 4294901760, %v18476_v13  ;;  %v3531_v52 = vand.u32 4294901760, %v3530_v50 }
 0x1ef   : > { %9570 = vmatpush1.bf16.msra.mxu1 %v18517_v16  ;;  %v3560_v36 = vsub.f32 %v18474_v49, %v18520_v53  ;;  %v18525_v16 = vld [vmem:[#allocation166_spill] sm:$0xff]  ;;  %v18526_v53 = vand.u32 4294901760, %v13941_v3 }
 0x1f0   : > { %9572 = vmatprep.subr.bf16.mxu1 %v18518_v0  ;;  %9826 = vmatpush1.bf16.msra.mxu0 %v9825_v42  ;;  %v9831_v42 = vpack.c.bf16 %v3513_v37, %v3501_v15  ;;  %v3554_v43 = vsub.f32 %v18476_v13, %v18523_v18  ;;  %v18524_v0 = vand.u32 4294901760, %v18477_v54  ;;  %v18527_v37 = vand.u32 4294901760, %v18480_v41 }
 0x1f1   : > { %9828 = vmatprep.subr.bf16.mxu0 %v9827_v14  ;;  %v3572_v14 = vsub.f32 %v13941_v3, %v18526_v53  ;;  %v3549_v18 = vand.u32 4294901760, %v3548_v5  ;;  %v3561_v24 = vand.u32 4294901760, %v3560_v36  ;;  %v18528_v53 = vld [vmem:[#allocation169_spill] sm:$0xff]  ;;  %v17293_v15 = vand.u32 4294901760, %v18485_v33 }
 0x1f2   : > { %v3566_v34 = vsub.f32 %v18477_v54, %v18524_v0  ;;  %v3584_v51 = vsub.f32 %v18480_v41, %v18527_v37  ;;  %v9835_v0 = vpack.c.bf16 %v3537_v27, %v3525_v44  ;;  %v3555_v3 = vand.u32 4294901760, %v3554_v43 }
 0x1f3   : > { %9574 = vmatpush1.bf16.msra.mxu1 %v18522_v63  ;;  %v17290_v63 = vand.u32 4294901760, %v18484_v10  ;;  %v17292_v37 = vand.u32 4294901760, %v13966_v21  ;;  %v3578_v27 = vsub.f32 %v18481_v40, %v18530_v9  ;;  %v18531_v44 = vand.u32 4294901760, %v13952_v29  ;;  %v18532_v9 = vld [vmem:[#allocation176_spill] sm:$0xff] }
 0x1f4   : > { %9576 = vmatprep.subr.bf16.mxu1 %v18525_v16  ;;  %9830 = vmatpush1.bf16.msra.mxu0 %v9829_v19  ;;  %v17291_v16 = vand.u32 4294901760, %v13956_v57  ;;  %v3567_v13 = vand.u32 4294901760, %v3566_v34  ;;  %v3573_v19 = vand.u32 4294901760, %v3572_v14  ;;  %v3585_v50 = vand.u32 4294901760, %v3584_v51  ;;  %v18537_v14 = vld [vmem:[#allocation190_spill] sm:$0xff] }
 0x1f5   : > { %9832 = vmatprep.subr.bf16.mxu0 %v9831_v42  ;;  %v3590_v5 = vsub.f32 %v13952_v29, %v18531_v44  ;;  %v9837_v36 = vpack.c.bf16 %v3543_v30, %v3531_v52  ;;  %v9839_v43 = vpack.c.bf16 %v3561_v24, %v3549_v18  ;;  %v3608_v42 = vsub.f32 %v18484_v10, %v17290_v63  ;;  %v18533_v52 = vld [vmem:[#allocation178_spill] sm:$0xff] }
 0x1f6   : > { %v3596_v34 = vsub.f32 %v13956_v57, %v17291_v16  ;;  %v3614_v24 = vsub.f32 %v18485_v33, %v17293_v15  ;;  %v9841_v30 = vpack.c.bf16 %v3567_v13, %v3555_v3  ;;  %v9843_v18 = vpack.c.bf16 %v3585_v50, %v3573_v19  ;;  %v18536_v19 = vld [vmem:[#allocation188_spill] sm:$0xff] }
 0x1f7   : > { %9578 = vmatpush1.bf16.msra.mxu1 %v18528_v53  ;;  %v3591_v44 = vand.u32 4294901760, %v3590_v5  ;;  %v17294_v63 = vand.u32 4294901760, %v13985_v4  ;;  %v17295_v16 = vand.u32 4294901760, %v13987_v6  ;;  %v17296_v51 = vand.u32 4294901760, %v13992_v12 }
 0x1f8   : > { %9580 = vmatprep.subr.bf16.mxu1 %v18529_v26  ;;  %9834 = vmatpush1.bf16.msra.mxu0 %v9833_v7  ;;  %v3602_v7 = vsub.f32 %v13966_v21, %v17292_v37  ;;  %v3597_v37 = vand.u32 4294901760, %v3596_v34  ;;  %v18534_v15 = vand.u32 4294901760, %v13973_v1  ;;  %v18535_v3 = vand.u32 4294901760, %v13975_v25  ;;  %v18539_v34 = vld [vmem:[#allocation200_spill] sm:$0xff] }
 0x1f9   : > { %9836 = vmatprep.subr.bf16.mxu0 %v9835_v0  ;;  %v3579_v0 = vand.u32 4294901760, %v3578_v27  ;;  %v3615_v27 = vand.u32 4294901760, %v3614_v24  ;;  %v17297_v5 = vand.u32 4294901760, %v13999_v59  ;;  %v3644_v24 = vsub.f32 %v13992_v12, %v17296_v51  ;;  %v18541_v51 = vld [vmem:[#allocation202_spill] sm:$0xff] }
 0x1fa   : > { %v3632_v13 = vsub.f32 %v13975_v25, %v18535_v3  ;;  %v3603_v50 = vand.u32 4294901760, %v3602_v7  ;;  %v3638_v7 = vsub.f32 %v13987_v6, %v17295_v16  ;;  %v18538_v3 = vand.u32 4294901760, %v13994_v39 }
 0x1fb   : > { %9582 = vmatpush1.bf16.msra.mxu1 %v18532_v9  ;;  %v3609_v9 = vand.u32 4294901760, %v3608_v42  ;;  %v18540_v16 = vand.u32 4294901760, %v18492_v47 }
 0x1fc   : > { %9584 = vmatprep.subr.bf16.mxu1 %v18533_v52  ;;  %9838 = vmatpush1.bf16.msra.mxu0 %v9837_v36  ;;  %v3620_v52 = vsub.f32 %v13973_v1, %v18534_v15  ;;  %v3626_v15 = vsub.f32 %v13985_v4, %v17294_v63  ;;  %v9849_v36 = vpack.c.bf16 %v3615_v27, %v3603_v50  ;;  %v3639_v27 = vand.u32 4294901760, %v3638_v7 }
 0x1fd   : > { %9840 = vmatprep.subr.bf16.mxu0 %v9839_v43  ;;  %v9845_v43 = vpack.c.bf16 %v3591_v44, %v3579_v0  ;;  %v3656_v0 = vsub.f32 %v13994_v39, %v18538_v3  ;;  %v9847_v44 = vpack.c.bf16 %v3609_v9, %v3597_v37  ;;  %v3650_v63 = vsub.f32 %v13999_v59, %v17297_v5 }
 0x1fe   : > { %v3621_v42 = vand.u32 4294901760, %v3620_v52  ;;  %v18543_v37 = vand.u32 4294901760, %v18494_v28  ;;  %v3627_v50 = vand.u32 4294901760, %v3626_v15  ;;  %v3645_v3 = vand.u32 4294901760, %v3644_v24 }
 0x1ff   : > { %9586 = vmatpush1.bf16.msra.mxu1 %v18536_v19  ;;  %v18542_v19 = vand.u32 4294901760, %v18493_v32  ;;  %v3657_v5 = vand.u32 4294901760, %v3656_v0  ;;  %v3651_v26 = vand.u32 4294901760, %v3650_v63  ;;  %v17303_v0 = vand.u32 4294901760, %v18501_v22 }
 0x200   : > { %9588 = vmatprep.subr.bf16.mxu1 %v18537_v14  ;;  %9842 = vmatpush1.bf16.msra.mxu0 %v9841_v30  ;;  %v3633_v30 = vand.u32 4294901760, %v3632_v13  ;;  %v3662_v14 = vsub.f32 %v18492_v47, %v18540_v16  ;;  %v3680_v9 = vsub.f32 %v18494_v28, %v18543_v37  ;;  %v17301_v13 = vand.u32 4294901760, %v18498_v46  ;;  %v18545_v37 = vld [vmem:[#allocation214_spill] sm:$0xff] }
 0x201   : > { %9844 = vmatprep.subr.bf16.mxu0 %v9843_v18  ;;  %v3668_v18 = vsub.f32 %v18493_v32, %v18542_v19  ;;  %v18544_v19 = vld [vmem:[#allocation212_spill] sm:$0xff]  ;;  %v9853_v7 = vpack.c.bf16 %v3639_v27, %v3627_v50  ;;  %v9855_v24 = vpack.c.bf16 %v3657_v5, %v3645_v3  ;;  %v17302_v63 = vand.u32 4294901760, %v18502_v61  ;;  %v18548_v5 = vld [vmem:[#allocation226_spill] sm:$0xff] }
 0x202   : > { %v9851_v16 = vpack.c.bf16 %v3633_v30, %v3621_v42  ;;  %v3663_v53 = vand.u32 4294901760, %v3662_v14  ;;  %v3681_v32 = vand.u32 4294901760, %v3680_v9  ;;  %v3686_v42 = vsub.f32 %v18498_v46, %v17301_v13 }
 0x203   : > { %9590 = vmatpush1.bf16.msra.mxu1 %v18539_v34  ;;  %v17299_v34 = vand.u32 4294901760, %v18500_v2  ;;  %v3669_v52 = vand.u32 4294901760, %v3668_v18 }
 0x204   : > { %9592 = vmatprep.subr.bf16.mxu1 %v18541_v51  ;;  %9846 = vmatpush1.bf16.msra.mxu0 %v9845_v43  ;;  %v17300_v51 = vand.u32 4294901760, %v18499_v58  ;;  %v18546_v43 = vand.u32 4294901760, %v18497_v38  ;;  %v9857_v9 = vpack.c.bf16 %v3663_v53, %v3651_v26  ;;  %v3687_v3 = vand.u32 4294901760, %v3686_v42  ;;  %v18553_v42 = vld [vmem:[#allocation236_spill] sm:$0xff] }
 0x205   : > { %9848 = vmatprep.subr.bf16.mxu0 %v9847_v44  ;;  %v3704_v44 = vsub.f32 %v18500_v2, %v17299_v34  ;;  %v9859_v50 = vpack.c.bf16 %v3681_v32, %v3669_v52  ;;  %v17304_v34 = vand.u32 4294901760, %v14098_v31  ;;  %v18550_v32 = vand.u32 4294901760, %v18503_v45 }
 0x206   : > { %v3674_v15 = vsub.f32 %v18497_v38, %v18546_v43  ;;  %v3692_v14 = vsub.f32 %v18499_v58, %v17300_v51  ;;  %v3710_v43 = vsub.f32 %v18502_v61, %v17302_v63  ;;  %v18549_v51 = vld [vmem:[#allocation344_spill] sm:$0xff]  ;;  %v18551_v53 = vand.u32 4294901760, %v18504_v17 }
 0x207   : > { %9594 = vmatpush1.bf16.msra.mxu1 %v18544_v19  ;;  %v17305_v13 = vand.u32 4294901760, %v18549_v51  ;;  %v3705_v30 = vand.u32 4294901760, %v3704_v44  ;;  %v3716_v26 = vsub.f32 %v18503_v45, %v18550_v32 }
 0x208   : > { %9596 = vmatprep.subr.bf16.mxu1 %v18545_v37  ;;  %9850 = vmatpush1.bf16.msra.mxu0 %v9849_v36  ;;  %v18547_v36 = vld [vmem:[#allocation224_spill] sm:$0xff]  ;;  %v3675_v27 = vand.u32 4294901760, %v3674_v15  ;;  %v3693_v18 = vand.u32 4294901760, %v3692_v14  ;;  %v3728_v52 = vsub.f32 %v18504_v17, %v18551_v53  ;;  %v18552_v15 = vld [vmem:[#allocation233_spill] sm:$0xff] }
 0x209   : > { %9852 = vmatprep.subr.bf16.mxu0 %v9851_v16  ;;  %v3698_v16 = vsub.f32 %v18501_v22, %v17303_v0  ;;  %v3711_v0 = vand.u32 4294901760, %v3710_v43  ;;  %v3734_v14 = vsub.f32 %v18549_v51, %v17305_v13  ;;  %v3717_v32 = vand.u32 4294901760, %v3716_v26  ;;  %v18556_v43 = vld [vmem:[#allocation244_spill] sm:$0xff] }
 0x20a   : > { %v9863_v44 = vpack.c.bf16 %v3705_v30, %v3693_v18  ;;  %v3729_v53 = vand.u32 4294901760, %v3728_v52  ;;  %v18562_v52 = vld [vmem:[#allocation248_spill] sm:$0xff] }
 0x20b   : > { %9598 = vmatpush1.bf16.msra.mxu1 %v18547_v36  ;;  %v3699_v63 = vand.u32 4294901760, %v3698_v16 }
 0x20c   : > { %9600 = vmatprep.subr.bf16.mxu1 %v18548_v5  ;;  %9854 = vmatpush1.bf16.msra.mxu0 %v9853_v7  ;;  %v9861_v7 = vpack.c.bf16 %v3687_v3, %v3675_v27  ;;  %v18554_v5 = vld [vmem:[#allocation238_spill] sm:$0xff]  ;;  %v3735_v3 = vand.u32 4294901760, %v3734_v14  ;;  %v9867_v16 = vpack.c.bf16 %v3729_v53, %v3717_v32  ;;  %v18569_v53 = vld [vmem:[#allocation180_spill] sm:$0xff] }
 0x20d   : > { %9856 = vmatprep.subr.bf16.mxu0 %v9855_v24  ;;  %v3722_v24 = vsub.f32 %v14098_v31, %v17304_v34  ;;  %v18557_v34 = vld [vmem:[#allocation245_spill] sm:$0xff] }
 0x20f   : > { %9602 = vmatpush1.bf16.msra.mxu1 %v18552_v15  ;;  %v18555_v15 = vld [vmem:[#allocation241_spill] sm:$0xff]  ;;  %v3723_v27 = vand.u32 4294901760, %v3722_v24 }
 0x210   : > { %9604 = vmatprep.subr.bf16.mxu1 %v18553_v42  ;;  %9858 = vmatpush1.bf16.msra.mxu0 %v9857_v9  ;;  %v9865_v9 = vpack.c.bf16 %v3711_v0, %v3699_v63  ;;  %v18558_v42 = vld [vmem:[#allocation173_spill] sm:$0xff] }
 0x211   : > { %9860 = vmatprep.subr.bf16.mxu0 %v9859_v50  ;;  %v18559_v13 = vand.u32 4294901760, %v18558_v42  ;;  %v18560_v50 = vld [vmem:[#allocation174_spill] sm:$0xff]  ;;  %v9869_v26 = vpack.c.bf16 %v3735_v3, %v3723_v27  ;;  %v18565_v63 = vld [vmem:[#allocation177_spill] sm:$0xff]  ;;  %v18571_v42 = vld [vmem:[#allocation124_spill] sm:$0xff] }
 0x212   : > { %v18561_v30 = vand.u32 4294901760, %v18560_v50  ;;  %v18566_v24 = vand.u32 4294901760, %v18565_v63  ;;  %v18575_v3 = vld [vmem:[#allocation181_spill] sm:$0xff]  ;;  %v18577_v50 = vld [vmem:[#allocation182_spill] sm:$0xff]  ;;  %v18581_v63 = vld [vmem:[#allocation183_spill] sm:$0xff] }
 0x213   : > { %9606 = vmatpush1.bf16.msra.mxu1 %v18554_v5 }
 0x214   : > { %9608 = vmatprep.subr.bf16.mxu1 %v18555_v15  ;;  %9862 = vmatpush1.bf16.msra.mxu0 %v9861_v7  ;;  %v9615_v18 = vpack.c.bf16 %v18561_v30, %v18559_v13  ;;  %v18563_v7 = vld [vmem:[#allocation175_spill] sm:$0xff]  ;;  %v18572_v13 = vld [vmem:[#allocation264_spill] sm:$0xff]  ;;  %v18578_v30 = vand.u32 4294901760, %v18577_v50  ;;  %v18604_v15 = vld [vmem:[#allocation273_spill] sm:$0xff] }
 0x215   : > { %9864 = vmatprep.subr.bf16.mxu0 %v9863_v44  ;;  %v18564_v0 = vand.u32 4294901760, %v18563_v7  ;;  %v18567_v44 = vld [vmem:[#allocation179_spill] sm:$0xff] }
 0x216   : > { %v18568_v32 = vand.u32 4294901760, %v18567_v44 }
 0x217   : > { %9610 = vmatpush1.bf16.msra.mxu1 %v18556_v43  ;;  %v9617_v14 = vpack.c.bf16 %v18566_v24, %v18564_v0  ;;  %v18579_v0 = vld [vmem:[#allocation114_spill] sm:$0xff] }
 0x218   : > { %9612 = vmatprep.subr.bf16.mxu1 %v18557_v34  ;;  %9866 = vmatpush1.bf16.msra.mxu0 %v9865_v9  ;;  %v18570_v34 = vand.u32 4294901760, %v18569_v53  ;;  %v18573_v9 = vld [vmem:[#allocation263_spill] sm:$0xff]  ;;  %v18586_v53 = vld [vmem:[#allocation265_spill] sm:$0xff] }
 0x219   : > { %9868 = vmatprep.subr.bf16.mxu0 %v9867_v16  ;;  %v18574_v27 = vpack.c.bf16 %v18572_v13, %v18573_v9  ;;  %v18576_v16 = vand.u32 4294901760, %v18575_v3  ;;  %v18590_v3 = vld [vmem:[#allocation269_spill] sm:$0xff] }
 0x21a   : > { %v9619_v43 = vpack.c.bf16 %v18570_v34, %v18568_v32  ;;  %v18582_v34 = vand.u32 4294901760, %v18581_v63  ;;  %v18585_v32 = vld [vmem:[#allocation267_spill] sm:$0xff] }
 0x21b   : > { %9614 = vmatpush1.bf16.msra.mxu1 %v18562_v52  ;;  %v9621_v7 = vpack.c.bf16 %v18578_v30, %v18576_v16  ;;  %v18592_v16 = vld [vmem:[#allocation185_spill] sm:$0xff]  ;;  %v18594_v52 = vld [vmem:[#allocation186_spill] sm:$0xff]  ;;  %v18596_v63 = vld [vmem:[#allocation187_spill] sm:$0xff] }
 0x21c   : > { %9616 = vmatprep.subr.bf16.mxu1 %v9615_v18  ;;  %9870 = vmatpush1.bf16.msra.mxu0 %v9869_v26  ;;  %v18580_v18 = vld [vmem:[#allocation111_spill] sm:$0xff]  ;;  %v18583_v26 = vld [vmem:[#allocation184_spill] sm:$0xff]  ;;  %v18593_v30 = vand.u32 4294901760, %v18592_v16 }
 0x21d   : > { %9872 = vmatprep.subr.bf16.mxu0 %v18574_v27  ;;  %v18584_v24 = vand.u32 4294901760, %v18583_v26  ;;  %v18589_v27 = vld [vmem:[#allocation270_spill] sm:$0xff]  ;;  %v18597_v26 = vand.u32 4294901760, %v18596_v63  ;;  %v18608_v16 = vld [vmem:[#allocation192_spill] sm:$0xff] }
 0x21e   : > { %2736 = vmatmul.mubr.f32.vlgmr.msra.gmra.mrb[2].mxu1 %v18571_v42  ;;  %v18587_v42 = vpack.c.bf16 %v18585_v32, %v18586_v53  ;;  %v18591_v50 = vpack.c.bf16 %v18589_v27, %v18590_v3  ;;  %v18600_v32 = vld [vmem:[#allocation272_spill] sm:$0xff]  ;;  %v18612_v63 = vld [vmem:[#allocation194_spill] sm:$0xff]  ;;  %v18615_v3 = vld [vmem:[#allocation275_spill] sm:$0xff] }
 0x21f   : > { %9618 = vmatpush1.bf16.msra.mxu1 %v9617_v14  ;;  %2999 = vmatprep.mubr.f32.mxu1 %v18579_v0  ;;  %v9623_v44 = vpack.c.bf16 %v18584_v24, %v18582_v34  ;;  %v18588_v14 = vld [vmem:[#allocation119_spill] sm:$0xff]  ;;  %v18598_v34 = vld [vmem:[#allocation189_spill] sm:$0xff] }
 0x220   : > { %3740 = vmatmul.mubr.f32.vlgmr.msra.gmra.mrb[2].mxu0 %v18580_v18  ;;  %9620 = vmatprep.subr.bf16.mxu1 %v9619_v43  ;;  %v18595_v43 = vand.u32 4294901760, %v18594_v52  ;;  %v18599_v24 = vand.u32 4294901760, %v18598_v34  ;;  %v18609_v52 = vand.u32 4294901760, %v18608_v16  ;;  %v18613_v34 = vand.u32 4294901760, %v18612_v63 }
 0x221   : > { %9874 = vmatpush1.bf16.msra.mxu0 %v18587_v42  ;;  %3940 = vmatprep.mubr.f32.mxu0 %v18588_v14  ;;  %v18601_v42 = vld [vmem:[#allocation271_spill] sm:$0xff]  ;;  %v18603_v14 = vld [vmem:[#allocation274_spill] sm:$0xff] }
 0x222   : > { %9876 = vmatprep.subr.bf16.mxu0 %v18591_v50  ;;  %v9625_v13 = vpack.c.bf16 %v18595_v43, %v18593_v30  ;;  %v9627_v9 = vpack.c.bf16 %v18599_v24, %v18597_v26  ;;  %v18602_v53 = vpack.c.bf16 %v18600_v32, %v18601_v42  ;;  %v18605_v27 = vpack.c.bf16 %v18603_v14, %v18604_v15  ;;  %v18614_v24 = vld [vmem:[#allocation276_spill] sm:$0xff]  ;;  %v18618_v42 = vld [vmem:[#allocation277_spill] sm:$0xff] }
 0x223   : > { %9622 = vmatpush1.bf16.msra.mxu1 %v9621_v7  ;;  %v18606_v7 = vld [vmem:[#allocation191_spill] sm:$0xff]  ;;  %v18616_v32 = vpack.c.bf16 %v18614_v24, %v18615_v3  ;;  %v18629_v15 = vld [vmem:[#allocation281_spill] sm:$0xff] }
 0x224   : > { %9624 = vmatprep.subr.bf16.mxu1 %v9623_v44  ;;  %v18607_v50 = vand.u32 4294901760, %v18606_v7  ;;  %v18610_v44 = vld [vmem:[#allocation193_spill] sm:$0xff]  ;;  %v18622_v7 = vld [vmem:[#allocation196_spill] sm:$0xff]  ;;  %v18632_v3 = vld [vmem:[#allocation283_spill] sm:$0xff] }
 0x225   : > { %9878 = vmatpush1.bf16.msra.mxu0 %v18602_v53  ;;  %v18611_v43 = vand.u32 4294901760, %v18610_v44  ;;  %v18617_v53 = vld [vmem:[#allocation279_spill] sm:$0xff]  ;;  %v18623_v16 = vand.u32 4294901760, %v18622_v7  ;;  %v18626_v44 = vld [vmem:[#allocation198_spill] sm:$0xff] }
 0x226   : > { %9880 = vmatprep.subr.bf16.mxu0 %v18605_v27  ;;  %v9629_v30 = vpack.c.bf16 %v18609_v52, %v18607_v50  ;;  %v18619_v14 = vpack.c.bf16 %v18617_v53, %v18618_v42  ;;  %v18627_v63 = vand.u32 4294901760, %v18626_v44  ;;  %v18643_v42 = vld [vmem:[#allocation285_spill] sm:$0xff] }
 0x227   : > { %9626 = vmatpush1.bf16.msra.mxu1 %v9625_v13  ;;  %v9631_v26 = vpack.c.bf16 %v18613_v34, %v18611_v43  ;;  %v18620_v13 = vld [vmem:[#allocation195_spill] sm:$0xff]  ;;  %v18628_v34 = vld [vmem:[#allocation282_spill] sm:$0xff] }
 0x228   : > { %9628 = vmatprep.subr.bf16.mxu1 %v9627_v9  ;;  %v18621_v27 = vand.u32 4294901760, %v18620_v13  ;;  %v18624_v9 = vld [vmem:[#allocation197_spill] sm:$0xff]  ;;  %v18630_v24 = vpack.c.bf16 %v18628_v34, %v18629_v15  ;;  %v18646_v15 = vld [vmem:[#allocation287_spill] sm:$0xff] }
 0x229   : > { %9882 = vmatpush1.bf16.msra.mxu0 %v18616_v32  ;;  %v18625_v52 = vand.u32 4294901760, %v18624_v9  ;;  %v18631_v32 = vld [vmem:[#allocation284_spill] sm:$0xff]  ;;  %v18636_v13 = vld [vmem:[#allocation201_spill] sm:$0xff] }
 0x22a   : > { %9884 = vmatprep.subr.bf16.mxu0 %v18619_v14  ;;  %v9633_v50 = vpack.c.bf16 %v18623_v16, %v18621_v27  ;;  %v18633_v53 = vpack.c.bf16 %v18631_v32, %v18632_v3  ;;  %v18634_v14 = vld [vmem:[#allocation199_spill] sm:$0xff]  ;;  %v18637_v7 = vand.u32 4294901760, %v18636_v13  ;;  %v18640_v9 = vld [vmem:[#allocation204_spill] sm:$0xff] }
 0x22b   : > { %9630 = vmatpush1.bf16.msra.mxu1 %v9629_v30  ;;  %v9635_v43 = vpack.c.bf16 %v18627_v63, %v18625_v52  ;;  %v18635_v30 = vand.u32 4294901760, %v18634_v14  ;;  %v18641_v44 = vand.u32 4294901760, %v18640_v9  ;;  %v18642_v63 = vld [vmem:[#allocation286_spill] sm:$0xff] }
 0x22c   : > { %9632 = vmatprep.subr.bf16.mxu1 %v9631_v26  ;;  %v18638_v26 = vld [vmem:[#allocation203_spill] sm:$0xff]  ;;  %v18644_v34 = vpack.c.bf16 %v18642_v63, %v18643_v42  ;;  %v18650_v14 = vld [vmem:[#allocation206_spill] sm:$0xff] }
 0x22d   : > { %9886 = vmatpush1.bf16.msra.mxu0 %v18630_v24  ;;  %v9637_v27 = vpack.c.bf16 %v18637_v7, %v18635_v30  ;;  %v18639_v16 = vand.u32 4294901760, %v18638_v26  ;;  %v18645_v24 = vld [vmem:[#allocation288_spill] sm:$0xff]  ;;  %v18651_v13 = vand.u32 4294901760, %v18650_v14 }
 0x22e   : > { %9888 = vmatprep.subr.bf16.mxu0 %v18633_v53  ;;  %v18647_v32 = vpack.c.bf16 %v18645_v24, %v18646_v15  ;;  %v18648_v53 = vld [vmem:[#allocation205_spill] sm:$0xff]  ;;  %v18654_v26 = vld [vmem:[#allocation208_spill] sm:$0xff] }
 0x22f   : > { %9634 = vmatpush1.bf16.msra.mxu1 %v9633_v50  ;;  %v9639_v52 = vpack.c.bf16 %v18641_v44, %v18639_v16  ;;  %v18649_v50 = vand.u32 4294901760, %v18648_v53  ;;  %v18655_v9 = vand.u32 4294901760, %v18654_v26  ;;  %v18656_v44 = vpack.c.bf16 %v18465_v23, %v18464_v35  ;;  %v18660_v53 = vld [vmem:[#allocation210_spill] sm:$0xff] }
 0x230   : > { %9636 = vmatprep.subr.bf16.mxu1 %v9635_v43  ;;  %v18652_v43 = vld [vmem:[#allocation207_spill] sm:$0xff]  ;;  %v18661_v14 = vand.u32 4294901760, %v18660_v53 }
 0x231   : > { %9890 = vmatpush1.bf16.msra.mxu0 %v18644_v34  ;;  %v9641_v30 = vpack.c.bf16 %v18651_v13, %v18649_v50  ;;  %v18653_v7 = vand.u32 4294901760, %v18652_v43  ;;  %v18657_v34 = vpack.c.bf16 %v13898_v62, %v13895_v20  ;;  %v18664_v43 = vld [vmem:[#allocation213_spill] sm:$0xff] }
 0x232   : > { %9892 = vmatprep.subr.bf16.mxu0 %v18647_v32  ;;  %v18658_v32 = vld [vmem:[#allocation209_spill] sm:$0xff]  ;;  %v18665_v26 = vand.u32 4294901760, %v18664_v43 }
 0x233   : > { %9638 = vmatpush1.bf16.msra.mxu1 %v9637_v27  ;;  %v9643_v16 = vpack.c.bf16 %v18655_v9, %v18653_v7  ;;  %v18659_v27 = vand.u32 4294901760, %v18658_v32  ;;  %v18666_v9 = vld [vmem:[#allocation293_spill] sm:$0xff]  ;;  %v18671_v32 = vld [vmem:[#allocation216_spill] sm:$0xff] }
 0x234   : > { %9640 = vmatprep.subr.bf16.mxu1 %v9639_v52  ;;  %v18662_v52 = vld [vmem:[#allocation211_spill] sm:$0xff]  ;;  %v18667_v23 = vpack.c.bf16 %v18468_v48, %v18666_v9  ;;  %v18672_v53 = vand.u32 4294901760, %v18671_v32 }
 0x235   : > { %9894 = vmatpush1.bf16.msra.mxu0 %v18656_v44  ;;  %v9645_v50 = vpack.c.bf16 %v18661_v14, %v18659_v27  ;;  %v18663_v13 = vand.u32 4294901760, %v18662_v52  ;;  %v18668_v44 = vpack.c.bf16 %v18469_v56, %v13908_v60  ;;  %v18675_v52 = vld [vmem:[#allocation218_spill] sm:$0xff] }
 0x236   : > { %9896 = vmatprep.subr.bf16.mxu0 %v18657_v34  ;;  %v18676_v43 = vand.u32 4294901760, %v18675_v52 }
 0x237   : > { %9642 = vmatpush1.bf16.msra.mxu1 %v9641_v30  ;;  %v9647_v7 = vpack.c.bf16 %v18665_v26, %v18663_v13  ;;  %v18669_v30 = vld [vmem:[#allocation215_spill] sm:$0xff]  ;;  %v18677_v26 = vpack.c.bf16 %v18472_v11, %v18471_v55 }
 0x238   : > { %9644 = vmatprep.subr.bf16.mxu1 %v9643_v16  ;;  %v18670_v34 = vand.u32 4294901760, %v18669_v30  ;;  %v18673_v16 = vld [vmem:[#allocation217_spill] sm:$0xff]  ;;  %v18681_v30 = vld [vmem:[#allocation220_spill] sm:$0xff] }
 0x239   : > { %9898 = vmatpush1.bf16.msra.mxu0 %v18667_v23  ;;  %v18674_v14 = vand.u32 4294901760, %v18673_v16  ;;  %v18678_v23 = vpack.c.bf16 %v18474_v49, %v18473_v8  ;;  %v18682_v32 = vand.u32 4294901760, %v18681_v30  ;;  %v18685_v16 = vld [vmem:[#allocation222_spill] sm:$0xff] }
 0x23a   : > { %9900 = vmatprep.subr.bf16.mxu0 %v18668_v44  ;;  %v9649_v27 = vpack.c.bf16 %v18672_v53, %v18670_v34  ;;  %v18686_v52 = vand.u32 4294901760, %v18685_v16 }
 0x23b   : > { %9646 = vmatpush1.bf16.msra.mxu1 %v9645_v50  ;;  %v9651_v13 = vpack.c.bf16 %v18676_v43, %v18674_v14  ;;  %v18679_v50 = vld [vmem:[#allocation219_spill] sm:$0xff] }
 0x23c   : > { %9648 = vmatprep.subr.bf16.mxu1 %v9647_v7  ;;  %v18680_v44 = vand.u32 4294901760, %v18679_v50  ;;  %v18683_v7 = vld [vmem:[#allocation221_spill] sm:$0xff]  ;;  %v18687_v43 = vld [vmem:[#allocation303_spill] sm:$0xff] }
 0x23d   : > { %9902 = vmatpush1.bf16.msra.mxu0 %v18677_v26  ;;  %v18684_v53 = vand.u32 4294901760, %v18683_v7  ;;  %v18688_v11 = vpack.c.bf16 %v18477_v54, %v18687_v43  ;;  %v18689_v26 = vld [vmem:[#allocation306_spill] sm:$0xff]  ;;  %v18693_v50 = vld [vmem:[#allocation225_spill] sm:$0xff]  ;;  %v18697_v7 = vld [vmem:[#allocation228_spill] sm:$0xff] }
 0x23e   : > { %9904 = vmatprep.subr.bf16.mxu0 %v18678_v23  ;;  %v9653_v34 = vpack.c.bf16 %v18682_v32, %v18680_v44  ;;  %v18690_v49 = vpack.c.bf16 %v18480_v41, %v18689_v26  ;;  %v18694_v30 = vand.u32 4294901760, %v18693_v50  ;;  %v18698_v16 = vand.u32 4294901760, %v18697_v7 }
 0x23f   : > { %9650 = vmatpush1.bf16.msra.mxu1 %v9649_v27  ;;  %v9655_v14 = vpack.c.bf16 %v18686_v52, %v18684_v53  ;;  %v18691_v27 = vld [vmem:[#allocation223_spill] sm:$0xff]  ;;  %v18699_v52 = vpack.c.bf16 %v13952_v29, %v18481_v40 }
 0x240   : > { %9652 = vmatprep.subr.bf16.mxu1 %v9651_v13  ;;  %v18692_v23 = vand.u32 4294901760, %v18691_v27  ;;  %v18695_v13 = vld [vmem:[#allocation227_spill] sm:$0xff]  ;;  %v18703_v27 = vld [vmem:[#allocation230_spill] sm:$0xff] }
 0x241   : > { %9906 = vmatpush1.bf16.msra.mxu0 %v18688_v11  ;;  %v18696_v32 = vand.u32 4294901760, %v18695_v13  ;;  %v18700_v11 = vpack.c.bf16 %v18484_v10, %v13956_v57  ;;  %v18704_v50 = vand.u32 4294901760, %v18703_v27  ;;  %v18707_v13 = vld [vmem:[#allocation232_spill] sm:$0xff] }
 0x242   : > { %9908 = vmatprep.subr.bf16.mxu0 %v18690_v49  ;;  %v9657_v44 = vpack.c.bf16 %v18694_v30, %v18692_v23  ;;  %v18701_v49 = vld [vmem:[#allocation229_spill] sm:$0xff]  ;;  %v18708_v7 = vand.u32 4294901760, %v18707_v13 }
 0x243   : > { %9654 = vmatpush1.bf16.msra.mxu1 %v9653_v34  ;;  %v9659_v53 = vpack.c.bf16 %v18698_v16, %v18696_v32  ;;  %v18702_v34 = vand.u32 4294901760, %v18701_v49  ;;  %v18709_v16 = vpack.c.bf16 %v18485_v33, %v13966_v21  ;;  %v18713_v49 = vld [vmem:[#allocation235_spill] sm:$0xff]  ;;  %v15009_v33 = vld [vmem:[#allocation9 + $0x118] sm:$0xff] }
 0x244   : > { %9656 = vmatprep.subr.bf16.mxu1 %v9655_v14  ;;  %v18705_v14 = vld [vmem:[#allocation231_spill] sm:$0xff]  ;;  %v18714_v27 = vand.u32 4294901760, %v18713_v49 }
 0x245   : > { %9910 = vmatpush1.bf16.msra.mxu0 %v18699_v52  ;;  %v9661_v23 = vpack.c.bf16 %v18704_v50, %v18702_v34  ;;  %v18706_v30 = vand.u32 4294901760, %v18705_v14  ;;  %v18710_v52 = vpack.c.bf16 %v13975_v25, %v13973_v1  ;;  %v18717_v14 = vld [vmem:[#allocation240_spill] sm:$0xff]  ;;  %v14941_v25 = vld [vmem:[#allocation9 + $0xd8] sm:$0xff] }
 0x246   : > { %9912 = vmatprep.subr.bf16.mxu0 %v18700_v11  ;;  %v18718_v13 = vand.u32 4294901760, %v18717_v14 }
 0x247   : > { %9658 = vmatpush1.bf16.msra.mxu1 %v9657_v44  ;;  %v9663_v32 = vpack.c.bf16 %v18708_v7, %v18706_v30  ;;  %v18711_v44 = vld [vmem:[#allocation234_spill] sm:$0xff]  ;;  %v18719_v7 = vpack.c.bf16 %v13987_v6, %v13985_v4  ;;  %v14939_v4 = vld [vmem:[#allocation9 + $0xc8] sm:$0xff] }
 0x248   : > { %9660 = vmatprep.subr.bf16.mxu1 %v9659_v53  ;;  %v18712_v11 = vand.u32 4294901760, %v18711_v44  ;;  %v18715_v53 = vld [vmem:[#allocation237_spill] sm:$0xff]  ;;  %v18723_v44 = vld [vmem:[#allocation243_spill] sm:$0xff] }
 0x249   : > { %9914 = vmatpush1.bf16.msra.mxu0 %v18709_v16  ;;  %v18716_v50 = vand.u32 4294901760, %v18715_v53  ;;  %v18720_v16 = vpack.c.bf16 %v13994_v39, %v13992_v12  ;;  %v18724_v49 = vand.u32 4294901760, %v18723_v44  ;;  %v18727_v53 = vld [vmem:[#allocation247_spill] sm:$0xff] }
 0x24a   : > { %9916 = vmatprep.subr.bf16.mxu0 %v18710_v52  ;;  %v9665_v34 = vpack.c.bf16 %v18714_v27, %v18712_v11  ;;  %v18728_v14 = vand.u32 4294901760, %v18727_v53 }
 0x24b   : > { %9662 = vmatpush1.bf16.msra.mxu1 %v9661_v23  ;;  %v9667_v30 = vpack.c.bf16 %v18718_v13, %v18716_v50  ;;  %v18721_v23 = vld [vmem:[#allocation242_spill] sm:$0xff]  ;;  %v18729_v13 = vpack.c.bf16 %v18492_v47, %v13999_v59  ;;  %v14905_v47 = vld [vmem:[#allocation9 + $0xa8] sm:$0xff]  ;;  %v14907_v59 = vld [vmem:[#allocation9 + $0xb8] sm:$0xff] }
 0x24c   : > { %9664 = vmatprep.subr.bf16.mxu1 %v9663_v32  ;;  %v18722_v52 = vand.u32 4294901760, %v18721_v23  ;;  %v18725_v32 = vld [vmem:[#allocation246_spill] sm:$0xff] }
 0x24d   : > { %9918 = vmatpush1.bf16.msra.mxu0 %v18719_v7  ;;  %v18726_v27 = vand.u32 4294901760, %v18725_v32  ;;  %v18730_v7 = vld [vmem:[#allocation327_spill] sm:$0xff]  ;;  %v18734_v23 = vld [vmem:[#allocation250_spill] sm:$0xff]  ;;  %v18738_v32 = vld [vmem:[#allocation252_spill] sm:$0xff] }
 0x24e   : > { %9920 = vmatprep.subr.bf16.mxu0 %v18720_v16  ;;  %v9669_v11 = vpack.c.bf16 %v18724_v49, %v18722_v52  ;;  %v18731_v39 = vpack.c.bf16 %v18494_v28, %v18730_v7  ;;  %v18735_v44 = vand.u32 4294901760, %v18734_v23  ;;  %v18739_v53 = vand.u32 4294901760, %v18738_v32  ;;  %v18751_v32 = vld [vmem:[#allocation54_spill] sm:$0xff]  ;;  %v14872_v28 = vld [vmem:[#allocation9 + $0x98] sm:$0xff] }
 0x24f   : > { %9666 = vmatpush1.bf16.msra.mxu1 %v9665_v34  ;;  %v9671_v50 = vpack.c.bf16 %v18728_v14, %v18726_v27  ;;  %v18732_v34 = vld [vmem:[#allocation249_spill] sm:$0xff]  ;;  %v18740_v14 = vpack.c.bf16 %v18498_v46, %v18497_v38 }
 0x250   : > { %9668 = vmatprep.subr.bf16.mxu1 %v9667_v30  ;;  %v18733_v16 = vand.u32 4294901760, %v18732_v34  ;;  %v18736_v30 = vld [vmem:[#allocation251_spill] sm:$0xff]  ;;  %v18839_v38 = vld [vmem:[#allocation125_spill] sm:$0xff] }
 0x251   : > { %9922 = vmatpush1.bf16.msra.mxu0 %v18729_v13  ;;  %v18737_v49 = vand.u32 4294901760, %v18736_v30  ;;  %v18741_v13 = vpack.c.bf16 %v18500_v2, %v18499_v58  ;;  %v18744_v34 = vld [vmem:[#allocation239_spill] sm:$0xff]  ;;  %v14835_v58 = vld [vmem:[#allocation9 + $0x78] sm:$0xff] }
 0x252   : > { %9924 = vmatprep.subr.bf16.mxu0 %v18731_v39  ;;  %v9673_v52 = vpack.c.bf16 %v18735_v44, %v18733_v16  ;;  %v18742_v39 = vld [vmem:[#allocation253_spill] sm:$0xff]  ;;  %v18745_v23 = vand.u32 4294901760, %v18744_v34  ;;  %v18747_v44 = vpack.c.bf16 %v18504_v17, %v18503_v45  ;;  %v18748_v30 = vld [vmem:[#allocation159_spill] sm:$0xff]  ;;  %v18758_v34 = vld [vmem:[#allocation66_spill] sm:$0xff] }
 0x253   : > { %9670 = vmatpush1.bf16.msra.mxu1 %v9669_v11  ;;  %v9675_v27 = vpack.c.bf16 %v18739_v53, %v18737_v49  ;;  %v18743_v11 = vand.u32 4294901760, %v18742_v39  ;;  %v18750_v49 = vld [vmem:[#allocation254_spill] sm:$0xff]  ;;  %v18752_v53 = vld [vmem:[#allocation120_spill] sm:$0xff]  ;;  %v14833_v2 = vld [vmem:[#allocation9 + $0x68] sm:$0xff] }
 0x254   : > { %9672 = vmatprep.subr.bf16.mxu1 %v9671_v50  ;;  %v18746_v50 = vpack.c.bf16 %v18502_v61, %v18501_v22  ;;  %v18756_v39 = vld [vmem:[#allocation256_spill] sm:$0xff]  ;;  %v18830_v61 = vld [vmem:[#allocation267_spill] sm:$0xff] }
 0x255   : > { %9926 = vmatpush1.bf16.msra.mxu0 %v18740_v14  ;;  %v9677_v16 = vpack.c.bf16 %v18745_v23, %v18743_v11  ;;  %v18754_v14 = vld [vmem:[#allocation255_spill] sm:$0xff]  ;;  %v18757_v11 = vld [vmem:[#allocation61_spill] sm:$0xff] }
 0x256   : > { %9928 = vmatprep.subr.bf16.mxu0 %v18741_v13  ;;  %v18755_v13 = vld [vmem:[#allocation123_spill] sm:$0xff]  ;;  %v18759_v23 = vld [vmem:[#allocation257_spill] sm:$0xff] }
 0x257   : > { %9674 = vmatpush1.bf16.msra.mxu1 %v9673_v52  ;;  %v18749_v52 = vpack.c.bf16 %v18549_v51, %v14098_v31 }
 0x258   : > { %9676 = vmatprep.subr.bf16.mxu1 %v9675_v27  ;;  %v18753_v27 = vld [vmem:[#allocation57_spill] sm:$0xff] }
 0x259   : > { %9930 = vmatpush1.bf16.msra.mxu0 %v18746_v50  ;;  %v18761_v50 = vld [vmem:[#allocation73_spill] sm:$0xff] }
 0x25a   : > { %9932 = vmatprep.subr.bf16.mxu0 %v18747_v44  ;;  %v18762_v44 = vld [vmem:[#allocation74_spill] sm:$0xff] }
 0x25b   : > { %9678 = vmatpush1.bf16.msra.mxu1 %v9677_v16  ;;  %v18760_v16 = vld [vmem:[#allocation258_spill] sm:$0xff] }
 0x25c   : > { %9680 = vmatprep.subr.bf16.mxu1 %v18748_v30  ;;  %v18763_v30 = vld [vmem:[#allocation259_spill] sm:$0xff] }
 0x25d   : > { %9934 = vmatpush1.bf16.msra.mxu0 %v18749_v52  ;;  %v18764_v52 = vld [vmem:[#allocation260_spill] sm:$0xff] }
 0x25e   : > { %3001 = vmatmul.mubr.f32.vlgmr.msra.gmra.mrb[2].mxu1 %v18580_v18  ;;  %9936 = vmatprep.subr.bf16.mxu0 %v18750_v49 }
 0x25f   : > { %9682 = vmatpush1.bf16.msra.mxu1 %v18751_v32  ;;  %3136 = vmatprep.mubr.f32.mxu1 %v18579_v0  ;;  %v18765_v32 = vld [vmem:[#allocation162_spill] sm:$0xff] }
 0x260   : > { %3943 = vmatmul.mubr.f32.vlgmr.msra.gmra.mrb[2].mxu0 %v18752_v53  ;;  %9684 = vmatprep.subr.bf16.mxu1 %v18753_v27  ;;  %v18766_v27 = vld [vmem:[#allocation164_spill] sm:$0xff] }
 0x261   : > { %9938 = vmatpush1.bf16.msra.mxu0 %v18754_v14  ;;  %4080 = vmatprep.mubr.f32.mxu0 %v18755_v13  ;;  %v18767_v13 = vld [vmem:[#allocation261_spill] sm:$0xff]  ;;  %v18770_v53 = vld [vmem:[#allocation96_spill] sm:$0xff]  ;;  %v18816_v14 = vld [vmem:[#allocation263_spill] sm:$0xff] }
 0x262   : > { %9940 = vmatprep.subr.bf16.mxu0 %v18756_v39  ;;  %v18817_v49 = vand.u32 4294901760, %v18816_v14 }
 0x263   : > { %9686 = vmatpush1.bf16.msra.mxu1 %v18757_v11  ;;  %v18768_v11 = vld [vmem:[#allocation262_spill] sm:$0xff] }
 0x264   : > { %9688 = vmatprep.subr.bf16.mxu1 %v18758_v34  ;;  %v18769_v34 = vld [vmem:[#allocation165_spill] sm:$0xff] }
 0x265   : > { %9942 = vmatpush1.bf16.msra.mxu0 %v18759_v23 }
 0x266   : > { %9944 = vmatprep.subr.bf16.mxu0 %v18760_v16  ;;  %v18771_v16 = vld [vmem:[#allocation266_spill] sm:$0xff] }
 0x267   : > { %9690 = vmatpush1.bf16.msra.mxu1 %v18761_v50  ;;  %v18772_v50 = vld [vmem:[#allocation268_spill] sm:$0xff] }
 0x268   : > { %9692 = vmatprep.subr.bf16.mxu1 %v18762_v44 }
 0x269   : > { %9946 = vmatpush1.bf16.msra.mxu0 %v18763_v30  ;;  %v18773_v30 = vld [vmem:[#allocation105_spill] sm:$0xff] }
 0x26a   : > { %9948 = vmatprep.subr.bf16.mxu0 %v18764_v52  ;;  %v18774_v52 = vld [vmem:[#allocation289_spill] sm:$0xff] }
 0x26b   : > { %9694 = vmatpush1.bf16.msra.mxu1 %v18765_v32 }
 0x26c   : > { %9696 = vmatprep.subr.bf16.mxu1 %v18766_v27  ;;  %v1791_v44 = vpop.f32.mrb[0].mxu0  ;;  %v18776_v27 = vld [vmem:[#allocation166_spill] sm:$0xff] }
 0x26d   : > { %9950 = vmatpush1.bf16.msra.mxu0 %v18767_v13  ;;  %v14726_v23 = vadd.f32 %v1791_v44, %v18774_v52  ;;  %v1793_v32 = vpop.f32.mrb[1].mxu0  ;;  %v18777_v13 = vld [vmem:[#allocation294_spill] sm:$0xff]  ;;  %v18785_v52 = vld [vmem:[#allocation176_spill] sm:$0xff] }
 0x26e   : > { %9952 = vmatprep.subr.bf16.mxu0 %v18768_v11  ;;  %v14730_v39 = vadd.f32 %v1793_v32, %v18777_v13  ;;  %v18779_v11 = vld [vmem:[#allocation278_spill] sm:$0xff]  ;;  %v18788_v13 = vld [vmem:[#allocation299_spill] sm:$0xff]  ;;  %v18789_v32 = vld [vmem:[#allocation188_spill] sm:$0xff] }
 0x26f   : > { %9698 = vmatpush1.bf16.msra.mxu1 %v18769_v34  ;;  %18775 = vst [vmem:[#allocation295_spill] sm:$0xff] %v14726_v23  ;;  %v18780_v34 = vld [vmem:[#allocation280_spill] sm:$0xff]  ;;  %v18786_v44 = vld [vmem:[#allocation178_spill] sm:$0xff] }
 0x270   : > { %9700 = vmatprep.subr.bf16.mxu1 %v18770_v53  ;;  %18778 = vst [vmem:[#allocation297_spill] sm:$0xff] %v14730_v39  ;;  %v18781_v53 = vld [vmem:[#allocation169_spill] sm:$0xff]  ;;  %v18790_v39 = vld [vmem:[#allocation190_spill] sm:$0xff] }
 0x271   : > { %9954 = vmatpush1.bf16.msra.mxu0 %v18771_v16  ;;  %v18782_v16 = vld [vmem:[#allocation172_spill] sm:$0xff]  ;;  %v18791_v23 = vld [vmem:[#allocation302_spill] sm:$0xff] }
 0x272   : > { %9956 = vmatprep.subr.bf16.mxu0 %v18772_v50  ;;  %v18783_v50 = vld [vmem:[#allocation290_spill] sm:$0xff] }
 0x273   : > { %9702 = vmatpush1.bf16.msra.mxu1 %v18773_v30  ;;  %v18784_v30 = vld [vmem:[#allocation292_spill] sm:$0xff] }
 0x274   : > { %9704 = vmatprep.subr.bf16.mxu1 %v18776_v27  ;;  %v18787_v27 = vld [vmem:[#allocation296_spill] sm:$0xff] }
 0x275   : > { %9958 = vmatpush1.bf16.msra.mxu0 %v18779_v11  ;;  %v14792_v11 = vld [vmem:[#allocation9 + $0x20] sm:$0xff] }
 0x276   : > { %9960 = vmatprep.subr.bf16.mxu0 %v18780_v34 }
 0x277   : > { %9706 = vmatpush1.bf16.msra.mxu1 %v18781_v53  ;;  %v18792_v53 = vld [vmem:[#allocation305_spill] sm:$0xff] }
 0x278   : > { %9708 = vmatprep.subr.bf16.mxu1 %v18782_v16  ;;  %v18793_v16 = vld [vmem:[#allocation200_spill] sm:$0xff] }
 0x279   : > { %9962 = vmatpush1.bf16.msra.mxu0 %v18783_v50  ;;  %v18794_v50 = vld [vmem:[#allocation202_spill] sm:$0xff] }
 0x27a   : > { %9964 = vmatprep.subr.bf16.mxu0 %v18784_v30  ;;  %v18795_v30 = vld [vmem:[#allocation308_spill] sm:$0xff] }
 0x27b   : > { %9710 = vmatpush1.bf16.msra.mxu1 %v18785_v52  ;;  %v18796_v52 = vld [vmem:[#allocation310_spill] sm:$0xff] }
 0x27c   : > { %9712 = vmatprep.subr.bf16.mxu1 %v18786_v44  ;;  %v18797_v44 = vld [vmem:[#allocation312_spill] sm:$0xff] }
 0x27d   : > { %9966 = vmatpush1.bf16.msra.mxu0 %v18787_v27 }
 0x27e   : > { %9968 = vmatprep.subr.bf16.mxu0 %v18788_v13 }
 0x27f   : > { %9714 = vmatpush1.bf16.msra.mxu1 %v18789_v32  ;;  %v18798_v32 = vld [vmem:[#allocation315_spill] sm:$0xff] }
 0x280   : > { %9716 = vmatprep.subr.bf16.mxu1 %v18790_v39  ;;  %v18799_v39 = vld [vmem:[#allocation226_spill] sm:$0xff] }
 0x281   : > { %9970 = vmatpush1.bf16.msra.mxu0 %v18791_v23  ;;  %v18808_v23 = vld [vmem:[#allocation333_spill] sm:$0xff] }
 0x282   : > { %9972 = vmatprep.subr.bf16.mxu0 %v18792_v53  ;;  %v18800_v53 = vld [vmem:[#allocation318_spill] sm:$0xff] }
 0x283   : > { %9718 = vmatpush1.bf16.msra.mxu1 %v18793_v16  ;;  %v18801_v16 = vld [vmem:[#allocation321_spill] sm:$0xff] }
 0x284   : > { %9720 = vmatprep.subr.bf16.mxu1 %v18794_v50  ;;  %v18802_v50 = vld [vmem:[#allocation233_spill] sm:$0xff] }
 0x285   : > { %9974 = vmatpush1.bf16.msra.mxu0 %v18795_v30  ;;  %v18803_v30 = vld [vmem:[#allocation236_spill] sm:$0xff] }
 0x286   : > { %9976 = vmatprep.subr.bf16.mxu0 %v18796_v52  ;;  %v18804_v52 = vld [vmem:[#allocation324_spill] sm:$0xff] }
 0x287   : > { %9722 = vmatpush1.bf16.msra.mxu1 %v18544_v19  ;;  %v14761_v19 = vld [vmem:[#allocation9 + $0x8] sm:$0xff] }
 0x288   : > { %9724 = vmatprep.subr.bf16.mxu1 %v18545_v37  ;;  %v14763_v37 = vld [vmem:[#allocation9 + $0x18] sm:$0xff] }
 0x289   : > { %9978 = vmatpush1.bf16.msra.mxu0 %v18797_v44  ;;  %v18805_v44 = vld [vmem:[#allocation328_spill] sm:$0xff]  ;;  %v18812_v13 = vand.u32 4294901760, %v14763_v37 }
 0x28a   : > { %9980 = vmatprep.subr.bf16.mxu0 %v18798_v32  ;;  %v14777_v32 = vld [vmem:[#allocation9 + $0x38] sm:$0xff] }
 0x28b   : > { %9726 = vmatpush1.bf16.msra.mxu1 %v18547_v36  ;;  %v18806_v36 = vld [vmem:[#allocation241_spill] sm:$0xff]  ;;  %v18825_v14 = vand.u32 4294901760, %v14777_v32 }
 0x28c   : > { %9728 = vmatprep.subr.bf16.mxu1 %v18799_v39  ;;  %v18810_v39 = vld [vmem:[#allocation245_spill] sm:$0xff] }
 0x28d   : > { %9982 = vmatpush1.bf16.msra.mxu0 %v18800_v53  ;;  %v14770_v53 = vld [vmem:[#allocation9] sm:$0xff] }
 0x28e   : > { %9984 = vmatprep.subr.bf16.mxu0 %v18801_v16  ;;  %v18811_v16 = vand.u32 4294901760, %v14761_v19  ;;  %v18821_v34 = vand.u32 4294901760, %v14770_v53 }
 0x28f   : > { %9730 = vmatpush1.bf16.msra.mxu1 %v18802_v50  ;;  %v14772_v50 = vld [vmem:[#allocation9 + $0x10] sm:$0xff] }
 0x290   : > { %9732 = vmatprep.subr.bf16.mxu1 %v18803_v30  ;;  %v18807_v30 = vld [vmem:[#allocation330_spill] sm:$0xff]  ;;  %v14788_v27 = vpack.c.bf16 %v18812_v13, %v18811_v16  ;;  %v18818_v13 = vld [vmem:[#allocation264_spill] sm:$0xff]  ;;  %v18822_v31 = vand.u32 4294901760, %v14772_v50 }
 0x291   : > { %9986 = vmatpush1.bf16.msra.mxu0 %v18804_v52  ;;  %v14775_v52 = vld [vmem:[#allocation9 + $0x28] sm:$0xff]  ;;  %v18819_v16 = vand.u32 4294901760, %v18818_v13 }
 0x292   : > { %9988 = vmatprep.subr.bf16.mxu0 %v18805_v44  ;;  %v18809_v44 = vld [vmem:[#allocation244_spill] sm:$0xff]  ;;  %18813 = vst [vmem:[#allocation300_spill] sm:$0xff] %v14788_v27  ;;  %v14811_v17 = vpack.c.bf16 %v18822_v31, %v18821_v34  ;;  %v18827_v34 = vld [vmem:[#allocation342_spill] sm:$0xff] }
 0x293   : > { %9734 = vmatpush1.bf16.msra.mxu1 %v18554_v5  ;;  %v14797_v5 = vld [vmem:[#allocation9 + $0x48] sm:$0xff]  ;;  %v9999_v51 = vpack.c.bf16 %v18819_v16, %v18817_v49  ;;  %v14824_v16 = vld [vmem:[#allocation9 + $0x40] sm:$0xff]  ;;  %v14826_v31 = vld [vmem:[#allocation9 + $0x50] sm:$0xff] }
 0x294   : > { %9736 = vmatprep.subr.bf16.mxu1 %v18806_v36  ;;  %v14799_v36 = vld [vmem:[#allocation9 + $0x58] sm:$0xff]  ;;  %18823 = vst [vmem:[#allocation304_spill] sm:$0xff] %v14811_v17 }
 0x295   : > { %9990 = vmatpush1.bf16.msra.mxu0 %v18807_v30  ;;  %v18820_v30 = vld [vmem:[#allocation248_spill] sm:$0xff] }
 0x296   : > { %9992 = vmatprep.subr.bf16.mxu0 %v18808_v23  ;;  %v14794_v23 = vld [vmem:[#allocation9 + $0x30] sm:$0xff] }
 0x297   : > { %9738 = vmatpush1.bf16.msra.mxu1 %v18809_v44  ;;  %v18814_v44 = vld [vmem:[#allocation336_spill] sm:$0xff] }
 0x298   : > { %9740 = vmatprep.subr.bf16.mxu1 %v18810_v39  ;;  %v18815_v39 = vld [vmem:[#allocation339_spill] sm:$0xff] }
 0x299   : > { %9994 = vmatpush1.bf16.msra.mxu0 %v18814_v44  ;;  %v18828_v44 = vld [vmem:[#allocation265_spill] sm:$0xff] }
 0x29a   : > { %9996 = vmatprep.subr.bf16.mxu0 %v18815_v39  ;;  %v18824_v39 = vand.u32 4294901760, %v14775_v52  ;;  %v18829_v45 = vand.u32 4294901760, %v18828_v44  ;;  %v18837_v44 = vand.u32 4294901760, %v14794_v23 }
 0x29b   : > { %9742 = vmatpush1.bf16.msra.mxu1 %v18820_v30  ;;  %v18834_v30 = vld [vmem:[#allocation270_spill] sm:$0xff] }
 0x29c   : > { %10128 = vmatprep.subr.bf16.mxu1 %v14788_v27  ;;  %v14820_v13 = vpack.c.bf16 %v18825_v14, %v18824_v39  ;;  %v18831_v27 = vand.u32 4294901760, %v18830_v61  ;;  %v18832_v39 = vld [vmem:[#allocation269_spill] sm:$0xff]  ;;  %v18835_v49 = vand.u32 4294901760, %v18834_v30  ;;  %v18842_v30 = vand.u32 4294901760, %v14799_v36 }
 0x29d   : > { %9998 = vmatpush1.bf16.msra.mxu0 %v18827_v34  ;;  %v18833_v14 = vand.u32 4294901760, %v18832_v39  ;;  %v18836_v34 = vand.u32 4294901760, %v14792_v11 }
 0x29e   : > { %18826 = vst [vmem:[#allocation307_spill] sm:$0xff] %v14820_v13  ;;  %v10001_v22 = vpack.c.bf16 %v18831_v27, %v18829_v45  ;;  %3138 = vmatmul.mubr.f32.vlgmr.msra.gmra.mrb[2].mxu1 %v18580_v18  ;;  %10000 = vmatprep.subr.bf16.mxu0 %v9999_v51  ;;  %v18840_v51 = vld [vmem:[#allocation124_spill] sm:$0xff]  ;;  %v14870_v18 = vld [vmem:[#allocation9 + $0x88] sm:$0xff] }
 0x29f   : > { %v10003_v46 = vpack.c.bf16 %v18835_v49, %v18833_v14  ;;  %10130 = vmatpush1.bf16.msra.mxu1 %v14811_v17  ;;  %v14847_v61 = vpack.c.bf16 %v18837_v44, %v18836_v34  ;;  %4689 = vmatprep.mubr.f32.mxu1 %v18839_v38  ;;  %v18841_v49 = vand.u32 4294901760, %v14797_v5  ;;  %v14862_v44 = vld [vmem:[#allocation9 + $0x60] sm:$0xff]  ;;  %v14864_v45 = vld [vmem:[#allocation9 + $0x70] sm:$0xff]  ;;  %v18844_v38 = vld [vmem:[#allocation271_spill] sm:$0xff] }
 0x2a0   : > { %4084 = vmatmul.mubr.f32.vlgmr.msra.gmra.mrb[2].mxu0 %v18840_v51  ;;  %10132 = vmatprep.subr.bf16.mxu1 %v14820_v13  ;;  %v18845_v27 = vand.u32 4294901760, %v18844_v38  ;;  %v18846_v51 = vld [vmem:[#allocation272_spill] sm:$0xff]  ;;  %v18850_v34 = vld [vmem:[#allocation274_spill] sm:$0xff]  ;;  %v18853_v38 = vand.u32 4294901760, %v14826_v31  ;;  %v18866_v6 = vand.u32 4294901760, %v14862_v44 }
 0x2a1   : > { %18838 = vst [vmem:[#allocation309_spill] sm:$0xff] %v14847_v61  ;;  %v14858_v39 = vpack.c.bf16 %v18842_v30, %v18841_v49  ;;  %10002 = vmatpush1.bf16.msra.mxu0 %v10001_v22  ;;  %v18847_v17 = vand.u32 4294901760, %v18846_v51  ;;  %4347 = vmatprep.mubr.f32.mxu0 %v18579_v0  ;;  %v18848_v49 = vld [vmem:[#allocation273_spill] sm:$0xff]  ;;  %v18851_v14 = vand.u32 4294901760, %v18850_v34  ;;  %v18852_v22 = vand.u32 4294901760, %v14824_v16 }
 0x2a2   : > { %10004 = vmatprep.subr.bf16.mxu0 %v10003_v46  ;;  %v18849_v30 = vand.u32 4294901760, %v18848_v49  ;;  %v18855_v46 = vand.u32 4294901760, %v14833_v2  ;;  %v18856_v49 = vand.u32 4294901760, %v14835_v58 }
 0x2a3   : > { %18843 = vst [vmem:[#allocation311_spill] sm:$0xff] %v14858_v39  ;;  %v10005_v13 = vpack.c.bf16 %v18847_v17, %v18845_v27  ;;  %10134 = vmatpush1.bf16.msra.mxu1 %v14847_v61  ;;  %v14884_v51 = vpack.c.bf16 %v18853_v38, %v18852_v22  ;;  %v14897_v61 = vld [vmem:[#allocation9 + $0x80] sm:$0xff]  ;;  %v14899_v22 = vld [vmem:[#allocation9 + $0x90] sm:$0xff]  ;;  %v18858_v38 = vld [vmem:[#allocation275_spill] sm:$0xff] }
 0x2a4   : > { %v10007_v7 = vpack.c.bf16 %v18851_v14, %v18849_v30  ;;  %10136 = vmatprep.subr.bf16.mxu1 %v14858_v39  ;;  %v14893_v34 = vpack.c.bf16 %v18856_v49, %v18855_v46  ;;  %v18859_v17 = vand.u32 4294901760, %v18858_v38  ;;  %v18860_v27 = vld [vmem:[#allocation276_spill] sm:$0xff]  ;;  %v18862_v46 = vld [vmem:[#allocation277_spill] sm:$0xff]  ;;  %v18864_v14 = vld [vmem:[#allocation279_spill] sm:$0xff]  ;;  %v18879_v1 = vand.u32 4294901760, %v14897_v61 }
 0x2a5   : > { %18854 = vst [vmem:[#allocation212_spill] sm:$0xff] %v14884_v51  ;;  %10006 = vmatpush1.bf16.msra.mxu0 %v10005_v13  ;;  %v18861_v0 = vand.u32 4294901760, %v18860_v27  ;;  %v18863_v49 = vand.u32 4294901760, %v18862_v46  ;;  %v18865_v12 = vand.u32 4294901760, %v18864_v14  ;;  %v18867_v13 = vand.u32 4294901760, %v14864_v45 }
 0x2a6   : > { %18857 = vst [vmem:[#allocation214_spill] sm:$0xff] %v14893_v34  ;;  %10008 = vmatprep.subr.bf16.mxu0 %v10007_v7  ;;  %v18869_v7 = vand.u32 4294901760, %v14870_v18  ;;  %v18870_v27 = vand.u32 4294901760, %v14872_v28 }
 0x2a7   : > { %v10009_v39 = vpack.c.bf16 %v18861_v0, %v18859_v17  ;;  %v10011_v30 = vpack.c.bf16 %v18865_v12, %v18863_v49  ;;  %10138 = vmatpush1.bf16.msra.mxu1 %v14884_v51  ;;  %v14918_v38 = vpack.c.bf16 %v18867_v13, %v18866_v6  ;;  %v14931_v49 = vld [vmem:[#allocation9 + $0xa0] sm:$0xff]  ;;  %v14933_v6 = vld [vmem:[#allocation9 + $0xb0] sm:$0xff]  ;;  %v18872_v13 = vld [vmem:[#allocation281_spill] sm:$0xff] }
 0x2a8   : > { %10140 = vmatprep.subr.bf16.mxu1 %v14893_v34  ;;  %v14927_v14 = vpack.c.bf16 %v18870_v27, %v18869_v7  ;;  %v18873_v0 = vand.u32 4294901760, %v18872_v13  ;;  %v18874_v17 = vld [vmem:[#allocation282_spill] sm:$0xff]  ;;  %v18876_v7 = vand.u32 4294901760, %v18632_v3  ;;  %v18877_v27 = vld [vmem:[#allocation284_spill] sm:$0xff]  ;;  %v18883_v3 = vand.u32 4294901760, %v14907_v59 }
 0x2a9   : > { %18868 = vst [vmem:[#allocation224_spill] sm:$0xff] %v14918_v38  ;;  %10010 = vmatpush1.bf16.msra.mxu0 %v10009_v39  ;;  %v18875_v51 = vand.u32 4294901760, %v18874_v17  ;;  %v18878_v12 = vand.u32 4294901760, %v18877_v27  ;;  %v18880_v39 = vand.u32 4294901760, %v14899_v22  ;;  %v14965_v27 = vld [vmem:[#allocation9 + $0xc0] sm:$0xff] }
 0x2aa   : > { %18871 = vst [vmem:[#allocation238_spill] sm:$0xff] %v14927_v14  ;;  %10012 = vmatprep.subr.bf16.mxu0 %v10011_v30  ;;  %v18882_v30 = vand.u32 4294901760, %v14905_v47 }
 0x2ab   : > { %v10013_v34 = vpack.c.bf16 %v18875_v51, %v18873_v0  ;;  %v10015_v46 = vpack.c.bf16 %v18878_v12, %v18876_v7  ;;  %10142 = vmatpush1.bf16.msra.mxu1 %v14918_v38  ;;  %v14952_v13 = vpack.c.bf16 %v18880_v39, %v18879_v1  ;;  %v14967_v1 = vld [vmem:[#allocation9 + $0xd0] sm:$0xff]  ;;  %v18885_v39 = vand.u32 4294901760, %v18643_v42  ;;  %v14975_v38 = vld [vmem:[#allocation9 + $0xf8] sm:$0xff] }
 0x2ac   : > { %10144 = vmatprep.subr.bf16.mxu1 %v14927_v14  ;;  %v14961_v17 = vpack.c.bf16 %v18883_v3, %v18882_v30  ;;  %v18886_v0 = vand.u32 4294901760, %v18642_v63  ;;  %v14973_v14 = vld [vmem:[#allocation9 + $0xe8] sm:$0xff]  ;;  %v18887_v30 = vand.u32 4294901760, %v18646_v15  ;;  %v18888_v3 = vand.u32 4294901760, %v18645_v24 }
 0x2ad   : > { %18881 = vst [vmem:[#allocation173_spill] sm:$0xff] %v14952_v13  ;;  %10014 = vmatpush1.bf16.msra.mxu0 %v10013_v34  ;;  %v18889_v12 = vand.u32 4294901760, %v14931_v49  ;;  %v18890_v34 = vand.u32 4294901760, %v14933_v6  ;;  %v18893_v15 = vand.u32 4294901760, %v14941_v25 }
 0x2ae   : > { %18884 = vst [vmem:[#allocation174_spill] sm:$0xff] %v14961_v17  ;;  %v10017_v51 = vpack.c.bf16 %v18886_v0, %v18885_v39  ;;  %10016 = vmatprep.subr.bf16.mxu0 %v10015_v46  ;;  %v10019_v7 = vpack.c.bf16 %v18888_v3, %v18887_v30  ;;  %v18892_v46 = vand.u32 4294901760, %v14939_v4  ;;  %v14999_v3 = vld [vmem:[#allocation9 + $0xe0] sm:$0xff]  ;;  %v18896_v0 = vld [vmem:[#allocation291_spill] sm:$0xff]  ;;  %v18900_v39 = vand.u32 4294901760, %v14965_v27 }
 0x2af   : > { %10146 = vmatpush1.bf16.msra.mxu1 %v14952_v13  ;;  %v14986_v42 = vpack.c.bf16 %v18890_v34, %v18889_v12  ;;  %v15001_v12 = vld [vmem:[#allocation9 + $0xf0] sm:$0xff]  ;;  %v18895_v34 = vand.u32 4294901760, %v18464_v35  ;;  %v18897_v63 = vand.u32 4294901760, %v18896_v0  ;;  %v15007_v13 = vld [vmem:[#allocation9 + $0x108] sm:$0xff]  ;;  %v18907_v0 = vand.u32 4294901760, %v18468_v48 }
 0x2b0   : > { %10148 = vmatprep.subr.bf16.mxu1 %v14961_v17  ;;  %v14995_v24 = vpack.c.bf16 %v18893_v15, %v18892_v46  ;;  %v18898_v46 = vand.u32 4294901760, %v13895_v20  ;;  %v18899_v15 = vand.u32 4294901760, %v13898_v62  ;;  %v18904_v20 = vand.u32 4294901760, %v14975_v38 }
 0x2b1   : > { %18891 = vst [vmem:[#allocation175_spill] sm:$0xff] %v14986_v42  ;;  %10018 = vmatpush1.bf16.msra.mxu0 %v10017_v51  ;;  %v10021_v17 = vpack.c.bf16 %v18897_v63, %v18895_v34  ;;  %v18901_v51 = vand.u32 4294901760, %v14967_v1  ;;  %v18911_v34 = vand.u32 4294901760, %v18469_v56  ;;  %v18917_v56 = vand.u32 4294901760, %v14770_v53 }
 0x2b2   : > { %18894 = vst [vmem:[#allocation177_spill] sm:$0xff] %v14995_v24  ;;  %10020 = vmatprep.subr.bf16.mxu0 %v10019_v7  ;;  %v10023_v30 = vpack.c.bf16 %v18899_v15, %v18898_v46  ;;  %v18903_v7 = vand.u32 4294901760, %v14973_v14  ;;  %v15033_v15 = vld [vmem:[#allocation9 + $0x100] sm:$0xff]  ;;  %v18910_v46 = vand.u32 4294901760, %v13908_v60  ;;  %v18922_v60 = vand.u32 4294901760, %v14772_v50 }
 0x2b3   : > { %10150 = vmatpush1.bf16.msra.mxu1 %v14986_v42  ;;  %v15020_v35 = vpack.c.bf16 %v18901_v51, %v18900_v39  ;;  %v15035_v39 = vld [vmem:[#allocation9 + $0x110] sm:$0xff]  ;;  %v18906_v51 = vand.u32 4294901760, %v18666_v9  ;;  %v15043_v42 = vld [vmem:[#allocation9 + $0x138] sm:$0xff]  ;;  %v18912_v9 = vand.u32 4294901760, %v14763_v37 }
 0x2b4   : > { %10152 = vmatprep.subr.bf16.mxu1 %v14995_v24  ;;  %v15029_v62 = vpack.c.bf16 %v18904_v20, %v18903_v7  ;;  %v15041_v24 = vld [vmem:[#allocation9 + $0x128] sm:$0xff]  ;;  %v18908_v7 = vand.u32 4294901760, %v14761_v19 }
 0x2b5   : > { %18902 = vst [vmem:[#allocation179_spill] sm:$0xff] %v15020_v35  ;;  %10022 = vmatpush1.bf16.msra.mxu0 %v10021_v17  ;;  %v10025_v63 = vpack.c.bf16 %v18907_v0, %v18906_v51  ;;  %v10027_v17 = vpack.c.bf16 %v18911_v34, %v18910_v46  ;;  %v15057_v48 = vsub.f32 %v14763_v37, %v18912_v9  ;;  %v18914_v0 = vand.u32 4294901760, %v14999_v3 }
 0x2b6   : > { %18905 = vst [vmem:[#allocation180_spill] sm:$0xff] %v15029_v62  ;;  %v15048_v20 = vsub.f32 %v14761_v19, %v18908_v7  ;;  %10024 = vmatprep.subr.bf16.mxu0 %v10023_v30  ;;  %v18915_v51 = vand.u32 4294901760, %v15001_v12  ;;  %v15071_v30 = vsub.f32 %v14770_v53, %v18917_v56  ;;  %v18919_v37 = vand.u32 4294901760, %v15007_v13  ;;  %v18929_v7 = vld [vmem:[#allocation298_spill] sm:$0xff] }
 0x2b7   : > { %18913 = vst [vmem:[#allocation182_spill] sm:$0xff] %v15057_v48  ;;  %10154 = vmatpush1.bf16.msra.mxu1 %v15020_v35  ;;  %v18920_v34 = vand.u32 4294901760, %v15009_v33  ;;  %v15089_v53 = vsub.f32 %v14772_v50, %v18922_v60  ;;  %v18924_v56 = vand.u32 4294901760, %v14775_v52  ;;  %v18928_v9 = vand.u32 4294901760, %v18471_v55  ;;  %v15107_v50 = vld [vmem:[#allocation9 + $0x158] sm:$0xff] }
 0x2b8   : > { %18909 = vst [vmem:[#allocation181_spill] sm:$0xff] %v15048_v20  ;;  %v15064_v21 = vpack.c.bf16 %v18915_v51, %v18914_v0  ;;  %18918 = vst [vmem:[#allocation184_spill] sm:$0xff] %v15071_v30  ;;  %10156 = vmatprep.subr.bf16.mxu1 %v15029_v62  ;;  %v15082_v0 = vld [vmem:[#allocation9 + $0x120] sm:$0xff]  ;;  %v15084_v51 = vld [vmem:[#allocation9 + $0x130] sm:$0xff]  ;;  %v18930_v62 = vand.u32 4294901760, %v18929_v7  ;;  %v18931_v60 = vand.u32 4294901760, %v14792_v11 }
 0x2b9   : > { %v15078_v46 = vpack.c.bf16 %v18920_v34, %v18919_v37  ;;  %18923 = vst [vmem:[#allocation186_spill] sm:$0xff] %v15089_v53  ;;  %v15094_v19 = vsub.f32 %v14775_v52, %v18924_v56  ;;  %v18926_v37 = vand.u32 4294901760, %v14777_v32  ;;  %10026 = vmatpush1.bf16.msra.mxu0 %v10025_v63  ;;  %v15105_v30 = vld [vmem:[#allocation9 + $0x148] sm:$0xff]  ;;  %v18932_v56 = vand.u32 4294901760, %v14794_v23  ;;  %v18935_v7 = vld [vmem:[#allocation301_spill] sm:$0xff] }
 0x2ba   : > { %18916 = vst [vmem:[#allocation183_spill] sm:$0xff] %v15064_v21  ;;  %v10029_v35 = vpack.c.bf16 %v18930_v62, %v18928_v9  ;;  %v15112_v52 = vsub.f32 %v14792_v11, %v18931_v60  ;;  %v18933_v63 = vand.u32 4294901760, %v14797_v5  ;;  %10028 = vmatprep.subr.bf16.mxu0 %v10027_v17  ;;  %v18934_v62 = vand.u32 4294901760, %v18473_v8 }
 0x2bb   : > { %18921 = vst [vmem:[#allocation185_spill] sm:$0xff] %v15078_v46  ;;  %18925 = vst [vmem:[#allocation187_spill] sm:$0xff] %v15094_v19  ;;  %v15099_v34 = vsub.f32 %v14777_v32, %v18926_v37  ;;  %v15117_v32 = vsub.f32 %v14794_v23, %v18932_v56  ;;  %v18936_v9 = vand.u32 4294901760, %v18935_v7  ;;  %10158 = vmatpush1.bf16.msra.mxu1 %v15064_v21  ;;  %v18939_v23 = vand.u32 4294901760, %v15033_v15  ;;  %v15179_v21 = vld [vmem:[#allocation9 + $0x168] sm:$0xff] }
 0x2bc   : > { %v15122_v55 = vsub.f32 %v14797_v5, %v18933_v63  ;;  %v18940_v60 = vand.u32 4294901760, %v15035_v39  ;;  %v18942_v17 = vand.u32 4294901760, %v14824_v16  ;;  %10160 = vmatprep.subr.bf16.mxu1 %v15078_v46  ;;  %v18946_v8 = vand.u32 4294901760, %v14826_v31 }
 0x2bd   : > { %18927 = vst [vmem:[#allocation189_spill] sm:$0xff] %v15099_v34  ;;  %v10031_v37 = vpack.c.bf16 %v18936_v9, %v18934_v62  ;;  %v18937_v34 = vand.u32 4294901760, %v14799_v36  ;;  %10030 = vmatpush1.bf16.msra.mxu0 %v10029_v35  ;;  %v18949_v9 = vand.u32 4294901760, %v18687_v43  ;;  %v18950_v7 = vand.u32 4294901760, %v18477_v54 }
 0x2be   : > { %v15138_v56 = vpack.c.bf16 %v18940_v60, %v18939_v23  ;;  %v15145_v63 = vsub.f32 %v14824_v16, %v18942_v17  ;;  %v15156_v23 = vld [vmem:[#allocation9 + $0x140] sm:$0xff]  ;;  %v15158_v60 = vld [vmem:[#allocation9 + $0x150] sm:$0xff]  ;;  %v15163_v16 = vsub.f32 %v14826_v31, %v18946_v8  ;;  %v18947_v17 = vand.u32 4294901760, %v14833_v2  ;;  %v15181_v31 = vld [vmem:[#allocation9 + $0x178] sm:$0xff] }
 0x2bf   : > { %v15131_v11 = vsub.f32 %v14799_v36, %v18937_v34  ;;  %v18943_v36 = vand.u32 4294901760, %v15041_v24  ;;  %v18944_v34 = vand.u32 4294901760, %v15043_v42  ;;  %v10033_v46 = vpack.c.bf16 %v18950_v7, %v18949_v9  ;;  %10032 = vmatprep.subr.bf16.mxu0 %v10031_v37 }
 0x2c0   : > { %18941 = vst [vmem:[#allocation192_spill] sm:$0xff] %v15138_v56  ;;  %v15168_v5 = vsub.f32 %v14833_v2, %v18947_v17  ;;  %v18951_v8 = vand.u32 4294901760, %v14862_v44  ;;  %v18952_v17 = vand.u32 4294901760, %v14864_v45  ;;  %v18953_v35 = vand.u32 4294901760, %v14870_v18  ;;  %10162 = vmatpush1.bf16.msra.mxu1 %v15138_v56  ;;  %v15253_v56 = vld [vmem:[#allocation9 + $0x188] sm:$0xff] }
 0x2c1   : > { %18938 = vst [vmem:[#allocation191_spill] sm:$0xff] %v15131_v11  ;;  %v15152_v62 = vpack.c.bf16 %v18944_v34, %v18943_v36  ;;  %v18948_v36 = vand.u32 4294901760, %v14835_v58  ;;  %v18954_v54 = vand.u32 4294901760, %v18689_v26  ;;  %v18955_v7 = vand.u32 4294901760, %v18480_v41  ;;  %10034 = vmatpush1.bf16.msra.mxu0 %v10033_v46 }
 0x2c2   : > { %v15186_v2 = vsub.f32 %v14862_v44, %v18951_v8  ;;  %v15196_v43 = vsub.f32 %v14870_v18, %v18953_v35  ;;  %v18958_v8 = vand.u32 4294901760, %v15084_v51  ;;  %v18960_v41 = vand.u32 4294901760, %v14897_v61 }
 0x2c3   : > { %18945 = vst [vmem:[#allocation193_spill] sm:$0xff] %v15152_v62  ;;  %v15173_v34 = vsub.f32 %v14835_v58, %v18948_v36  ;;  %v15191_v58 = vsub.f32 %v14864_v45, %v18952_v17  ;;  %v10035_v9 = vpack.c.bf16 %v18955_v7, %v18954_v54  ;;  %v18956_v36 = vand.u32 4294901760, %v14872_v28  ;;  %10164 = vmatprep.subr.bf16.mxu1 %v15152_v62 }
 0x2c4   : > { %v18957_v45 = vand.u32 4294901760, %v15082_v0  ;;  %v15219_v37 = vsub.f32 %v14897_v61, %v18960_v41  ;;  %v18962_v35 = vand.u32 4294901760, %v15107_v50  ;;  %v18964_v26 = vand.u32 4294901760, %v14899_v22 }
 0x2c5   : > { %v15205_v44 = vsub.f32 %v14872_v28, %v18956_v36  ;;  %v18961_v28 = vand.u32 4294901760, %v15105_v30  ;;  %v18965_v41 = vand.u32 4294901760, %v14905_v47  ;;  %v18969_v36 = vand.u32 4294901760, %v18481_v40  ;;  %10036 = vmatprep.subr.bf16.mxu0 %v10035_v9 }
 0x2c6   : > { %v15212_v17 = vpack.c.bf16 %v18958_v8, %v18957_v45  ;;  %v15230_v45 = vld [vmem:[#allocation9 + $0x160] sm:$0xff]  ;;  %v15232_v8 = vld [vmem:[#allocation9 + $0x170] sm:$0xff]  ;;  %v15237_v61 = vsub.f32 %v14899_v22, %v18964_v26  ;;  %v18970_v7 = vand.u32 4294901760, %v13952_v29  ;;  %v15255_v22 = vld [vmem:[#allocation9 + $0x198] sm:$0xff]  ;;  %v18971_v26 = vand.u32 4294901760, %v14931_v49 }
 0x2c7   : > { %v15226_v54 = vpack.c.bf16 %v18962_v35, %v18961_v28  ;;  %v15242_v18 = vsub.f32 %v14905_v47, %v18965_v41  ;;  %v18967_v28 = vand.u32 4294901760, %v14907_v59  ;;  %v18972_v41 = vand.u32 4294901760, %v14933_v6 }
 0x2c8   : > { %18959 = vst [vmem:[#allocation194_spill] sm:$0xff] %v15212_v17  ;;  %v10037_v62 = vpack.c.bf16 %v18970_v7, %v18969_v36  ;;  %v15260_v47 = vsub.f32 %v14931_v49, %v18971_v26  ;;  %v18973_v46 = vand.u32 4294901760, %v14939_v4  ;;  %v18974_v29 = vand.u32 4294901760, %v13956_v57  ;;  %10166 = vmatpush1.bf16.msra.mxu1 %v15212_v17 }
 0x2c9   : > { %18963 = vst [vmem:[#allocation195_spill] sm:$0xff] %v15226_v54  ;;  %18966 = vst [vmem:[#allocation196_spill] sm:$0xff] %v15242_v18  ;;  %v15247_v35 = vsub.f32 %v14907_v59, %v18967_v28  ;;  %v15265_v59 = vsub.f32 %v14933_v6, %v18972_v41  ;;  %v18975_v7 = vand.u32 4294901760, %v18484_v10  ;;  %v18976_v28 = vand.u32 4294901760, %v14941_v25  ;;  %10168 = vmatprep.subr.bf16.mxu1 %v15226_v54  ;;  %v18994_v54 = vld [vmem:[#allocation314_spill] sm:$0xff] }
 0x2ca   : > { %v15270_v40 = vsub.f32 %v14939_v4, %v18973_v46  ;;  %v18978_v6 = vand.u32 4294901760, %v15156_v23  ;;  %v18979_v26 = vand.u32 4294901760, %v15158_v60  ;;  %v18981_v10 = vand.u32 4294901760, %v14965_v27  ;;  %10038 = vmatpush1.bf16.msra.mxu0 %v10037_v62 }
 0x2cb   : > { %18968 = vst [vmem:[#allocation197_spill] sm:$0xff] %v15247_v35  ;;  %v10039_v36 = vpack.c.bf16 %v18975_v7, %v18974_v29  ;;  %v15279_v49 = vsub.f32 %v14941_v25, %v18976_v28  ;;  %v18983_v25 = vand.u32 4294901760, %v15179_v21  ;;  %v18984_v46 = vand.u32 4294901760, %v15181_v31  ;;  %v18992_v28 = vld [vmem:[#allocation313_spill] sm:$0xff] }
 0x2cc   : > { %v15286_v41 = vpack.c.bf16 %v18979_v26, %v18978_v6  ;;  %v15293_v9 = vsub.f32 %v14965_v27, %v18981_v10  ;;  %v15304_v6 = vld [vmem:[#allocation9 + $0x180] sm:$0xff]  ;;  %v15306_v26 = vld [vmem:[#allocation9 + $0x190] sm:$0xff]  ;;  %v18986_v57 = vand.u32 4294901760, %v14967_v1  ;;  %v18988_v10 = vand.u32 4294901760, %v14973_v14 }
 0x2cd   : > { %18977 = vst [vmem:[#allocation198_spill] sm:$0xff] %v15279_v49  ;;  %v15300_v29 = vpack.c.bf16 %v18984_v46, %v18983_v25  ;;  %v18990_v25 = vand.u32 4294901760, %v14975_v38  ;;  %v18993_v7 = vand.u32 4294901760, %v18992_v28  ;;  %v18995_v17 = vand.u32 4294901760, %v18994_v54  ;;  %v15327_v49 = vld [vmem:[#allocation9 + $0x1a8] sm:$0xff]  ;;  %10040 = vmatprep.subr.bf16.mxu0 %v10039_v36 }
 0x2ce   : > { %18980 = vst [vmem:[#allocation283_spill] sm:$0xff] %v15286_v41  ;;  %18982 = vst [vmem:[#allocation199_spill] sm:$0xff] %v15293_v9  ;;  %v15311_v27 = vsub.f32 %v14967_v1, %v18986_v57  ;;  %v15316_v4 = vsub.f32 %v14973_v14, %v18988_v10  ;;  %v15329_v1 = vld [vmem:[#allocation9 + $0x1b8] sm:$0xff]  ;;  %v18997_v57 = vand.u32 4294901760, %v14999_v3  ;;  %v18999_v10 = vand.u32 4294901760, %v15001_v12  ;;  %10170 = vmatpush1.bf16.msra.mxu1 %v15286_v41 }
 0x2cf   : > { %18985 = vst [vmem:[#allocation201_spill] sm:$0xff] %v15300_v29  ;;  %v15321_v46 = vsub.f32 %v14975_v38, %v18990_v25  ;;  %v10041_v9 = vpack.c.bf16 %v18995_v17, %v18993_v7  ;;  %18996 = vst [vmem:[#allocation285_spill] sm:$0xff] %v15329_v1  ;;  %v19001_v62 = vand.u32 4294901760, %v15007_v13  ;;  %v19003_v17 = vld [vmem:[#allocation316_spill] sm:$0xff]  ;;  %v19005_v7 = vld [vmem:[#allocation317_spill] sm:$0xff]  ;;  %10172 = vmatprep.subr.bf16.mxu1 %v15300_v29  ;;  %v19019_v36 = vand.u32 4294901760, %v15035_v39 }
 0x2d0   : > { %18987 = vst [vmem:[#allocation203_spill] sm:$0xff] %v15311_v27  ;;  %18989 = vst [vmem:[#allocation204_spill] sm:$0xff] %v15316_v4  ;;  %v15334_v14 = vsub.f32 %v14999_v3, %v18997_v57  ;;  %v15339_v38 = vsub.f32 %v15001_v12, %v18999_v10  ;;  %v19004_v54 = vand.u32 4294901760, %v19003_v17  ;;  %v19006_v25 = vand.u32 4294901760, %v19005_v7  ;;  %v15366_v17 = vld [vmem:[#allocation9 + $0x1b0] sm:$0xff] }
 0x2d1   : > { %18991 = vst [vmem:[#allocation286_spill] sm:$0xff] %v15321_v46  ;;  %v15344_v28 = vsub.f32 %v15007_v13, %v19001_v62  ;;  %v19007_v4 = vand.u32 4294901760, %v15009_v33  ;;  %v19009_v12 = vand.u32 4294901760, %v15230_v45  ;;  %v19010_v57 = vand.u32 4294901760, %v15232_v8  ;;  %v15364_v62 = vld [vmem:[#allocation9 + $0x1a0] sm:$0xff]  ;;  %19013 = vst [vmem:[#allocation209_spill] sm:$0xff] %v15366_v17  ;;  %10042 = vmatpush1.bf16.msra.mxu0 %v10041_v9 }
 0x2d2   : > { %18998 = vst [vmem:[#allocation288_spill] sm:$0xff] %v15334_v14  ;;  %19000 = vst [vmem:[#allocation287_spill] sm:$0xff] %v15339_v38  ;;  %v10043_v46 = vpack.c.bf16 %v19006_v25, %v19004_v54  ;;  %v19014_v54 = vand.u32 4294901760, %v15033_v15  ;;  %v19017_v7 = vand.u32 4294901760, %v15255_v22  ;;  %v15385_v13 = vsub.f32 %v15035_v39, %v19019_v36  ;;  %v15403_v39 = vld [vmem:[#allocation9 + $0x1d8] sm:$0xff] }
 0x2d3   : > { %19002 = vst [vmem:[#allocation205_spill] sm:$0xff] %v15344_v28  ;;  %v15353_v3 = vsub.f32 %v15009_v33, %v19007_v4  ;;  %v15360_v10 = vpack.c.bf16 %v19010_v57, %v19009_v12  ;;  %19012 = vst [vmem:[#allocation208_spill] sm:$0xff] %v15364_v62  ;;  %v19016_v4 = vand.u32 4294901760, %v15253_v56  ;;  %v19023_v29 = vand.u32 4294901760, %v15043_v42  ;;  %v19027_v12 = vld [vmem:[#allocation320_spill] sm:$0xff] }
 0x2d4   : > { %v15371_v33 = vsub.f32 %v15033_v15, %v19014_v54  ;;  %19020 = vst [vmem:[#allocation213_spill] sm:$0xff] %v15385_v13  ;;  %v19021_v15 = vand.u32 4294901760, %v15041_v24  ;;  %v19028_v57 = vand.u32 4294901760, %v19027_v12  ;;  %19030 = vst [vmem:[#allocation217_spill] sm:$0xff] %v15403_v39  ;;  %v19031_v36 = vand.u32 4294901760, %v15082_v0  ;;  %10044 = vmatprep.subr.bf16.mxu0 %v10043_v46 }
 0x2d5   : > { %19008 = vst [vmem:[#allocation206_spill] sm:$0xff] %v15353_v3  ;;  %19011 = vst [vmem:[#allocation207_spill] sm:$0xff] %v15360_v10  ;;  %v15378_v25 = vpack.c.bf16 %v19017_v7, %v19016_v4  ;;  %v15395_v41 = vsub.f32 %v15043_v42, %v19023_v29  ;;  %v19025_v4 = vld [vmem:[#allocation319_spill] sm:$0xff]  ;;  %10174 = vmatpush1.bf16.msra.mxu1 %v15360_v10  ;;  %v19040_v46 = vand.u32 4294901760, %v15306_v26 }
 0x2d6   : > { %19015 = vst [vmem:[#allocation210_spill] sm:$0xff] %v15371_v33  ;;  %v15390_v54 = vsub.f32 %v15041_v24, %v19021_v15  ;;  %v19026_v7 = vand.u32 4294901760, %v19025_v4  ;;  %v15401_v3 = vld [vmem:[#allocation9 + $0x1c8] sm:$0xff]  ;;  %v15408_v24 = vsub.f32 %v15082_v0, %v19031_v36  ;;  %v19033_v15 = vld [vmem:[#allocation322_spill] sm:$0xff]  ;;  %v19039_v0 = vand.u32 4294901760, %v15304_v6 }
 0x2d7   : > { %19018 = vst [vmem:[#allocation211_spill] sm:$0xff] %v15378_v25  ;;  %19024 = vst [vmem:[#allocation215_spill] sm:$0xff] %v15395_v41  ;;  %v19035_v42 = vld [vmem:[#allocation323_spill] sm:$0xff]  ;;  %v19037_v41 = vand.u32 4294901760, %v15084_v51  ;;  %10176 = vmatprep.subr.bf16.mxu1 %v15378_v25  ;;  %v19047_v36 = vand.u32 4294901760, %v15107_v50  ;;  %v19051_v4 = vld [vmem:[#allocation326_spill] sm:$0xff] }
 0x2d8   : > { %19022 = vst [vmem:[#allocation293_spill] sm:$0xff] %v15390_v54  ;;  %v10045_v33 = vpack.c.bf16 %v19028_v57, %v19026_v7  ;;  %19029 = vst [vmem:[#allocation216_spill] sm:$0xff] %v15401_v3  ;;  %v19034_v54 = vand.u32 4294901760, %v19033_v15  ;;  %v19036_v29 = vand.u32 4294901760, %v19035_v42  ;;  %v15416_v57 = vld [vmem:[#allocation9 + $0x1c0] sm:$0xff]  ;;  %v15418_v7 = vld [vmem:[#allocation9 + $0x1d0] sm:$0xff] }
 0x2d9   : > { %19032 = vst [vmem:[#allocation218_spill] sm:$0xff] %v15408_v24  ;;  %v15423_v13 = vsub.f32 %v15084_v51, %v19037_v41  ;;  %v19042_v42 = vand.u32 4294901760, %v15105_v30  ;;  %v19044_v51 = vand.u32 4294901760, %v15327_v49  ;;  %v19045_v41 = vand.u32 4294901760, %v15329_v1 }
 0x2da   : > { %v10047_v9 = vpack.c.bf16 %v19036_v29, %v19034_v54  ;;  %v15430_v54 = vpack.c.bf16 %v19040_v46, %v19039_v0  ;;  %v15451_v15 = vsub.f32 %v15107_v50, %v19047_v36  ;;  %10046 = vmatpush1.bf16.msra.mxu0 %v10045_v33  ;;  %v19052_v25 = vand.u32 4294901760, %v19051_v4  ;;  %v15461_v0 = vld [vmem:[#allocation9 + $0x1f8] sm:$0xff]  ;;  %v19058_v33 = vld [vmem:[#allocation327_spill] sm:$0xff] }
 0x2db   : > { %19038 = vst [vmem:[#allocation219_spill] sm:$0xff] %v15423_v13  ;;  %v15437_v29 = vsub.f32 %v15105_v30, %v19042_v42  ;;  %v15444_v12 = vpack.c.bf16 %v19045_v41, %v19044_v51  ;;  %v19049_v30 = vld [vmem:[#allocation325_spill] sm:$0xff]  ;;  %v15459_v41 = vld [vmem:[#allocation9 + $0x1e8] sm:$0xff]  ;;  %19054 = vst [vmem:[#allocation223_spill] sm:$0xff] %v15461_v0  ;;  %v19055_v46 = vand.u32 4294901760, %v15364_v62  ;;  %v19056_v50 = vand.u32 4294901760, %v15366_v17 }
 0x2dc   : > { %19041 = vst [vmem:[#allocation220_spill] sm:$0xff] %v15430_v54  ;;  %19048 = vst [vmem:[#allocation303_spill] sm:$0xff] %v15451_v15  ;;  %v19050_v42 = vand.u32 4294901760, %v19049_v30  ;;  %10048 = vmatprep.subr.bf16.mxu0 %v10047_v9  ;;  %v19059_v30 = vand.u32 4294901760, %v19058_v33  ;;  %v19060_v15 = vld [vmem:[#allocation329_spill] sm:$0xff]  ;;  %v19062_v51 = vld [vmem:[#allocation184_spill] sm:$0xff]  ;;  %10178 = vmatpush1.bf16.msra.mxu1 %v15430_v54 }
 0x2dd   : > { %19043 = vst [vmem:[#allocation221_spill] sm:$0xff] %v15437_v29  ;;  %19046 = vst [vmem:[#allocation222_spill] sm:$0xff] %v15444_v12  ;;  %v15467_v36 = vpack.c.bf16 %v19056_v50, %v19055_v46  ;;  %v19061_v4 = vand.u32 4294901760, %v19060_v15  ;;  %v15475_v29 = vld [vmem:[#allocation9 + $0x1f0] sm:$0xff]  ;;  %v19063_v9 = vld [vmem:[#allocation331_spill] sm:$0xff]  ;;  %v19067_v33 = vand.u32 4294901760, %v15048_v20  ;;  %10180 = vmatprep.subr.bf16.mxu1 %v15444_v12 }
 0x2de   : > { %v10049_v10 = vpack.c.bf16 %v19052_v25, %v19050_v42  ;;  %19053 = vst [vmem:[#allocation306_spill] sm:$0xff] %v15459_v41  ;;  %v15473_v42 = vld [vmem:[#allocation9 + $0x1e0] sm:$0xff]  ;;  %v19064_v62 = vand.u32 4294901760, %v19063_v9  ;;  %v19065_v17 = vld [vmem:[#allocation332_spill] sm:$0xff]  ;;  %v19069_v13 = vand.u32 4294901760, %v15401_v3  ;;  %v19070_v1 = vand.u32 4294901760, %v15403_v39 }
 0x2df   : > { %19057 = vst [vmem:[#allocation225_spill] sm:$0xff] %v15467_v36  ;;  %v10051_v25 = vpack.c.bf16 %v19061_v4, %v19059_v30  ;;  %v19066_v46 = vand.u32 4294901760, %v19065_v17  ;;  %v4704_v15 = vsub.f32 %v15048_v20, %v19067_v33  ;;  %v19068_v30 = vand.u32 4294901760, %v15057_v48  ;;  %v19076_v12 = vld [vmem:[#allocation334_spill] sm:$0xff]  ;;  %v19078_v20 = vld [vmem:[#allocation335_spill] sm:$0xff] }
 0x2e0   : > { %v15496_v9 = vpack.c.bf16 %v19070_v1, %v19069_v13  ;;  %10050 = vmatpush1.bf16.msra.mxu0 %v10049_v10  ;;  %v19073_v54 = vand.u32 4294901760, %v15416_v57  ;;  %v19079_v3 = vand.u32 4294901760, %v19078_v20  ;;  %v19080_v17 = vand.u32 4294901760, %v19062_v51  ;;  %10182 = vmatpush1.bf16.msra.mxu1 %v15467_v36  ;;  %v19091_v36 = vld [vmem:[#allocation338_spill] sm:$0xff] }
 0x2e1   : > { %v10053_v50 = vpack.c.bf16 %v19066_v46, %v19064_v62  ;;  %v4716_v4 = vsub.f32 %v15057_v48, %v19068_v30  ;;  %v19072_v46 = vld [vmem:[#allocation189_spill] sm:$0xff]  ;;  %v19074_v30 = vand.u32 4294901760, %v15418_v7  ;;  %v19077_v48 = vand.u32 4294901760, %v19076_v12  ;;  %10052 = vmatprep.subr.bf16.mxu0 %v10051_v25 }
 0x2e2   : > { %19071 = vst [vmem:[#allocation227_spill] sm:$0xff] %v15496_v9  ;;  %v4710_v10 = vsub.f32 %v19062_v51, %v19080_v17  ;;  %v19081_v33 = vand.u32 4294901760, %v15089_v53  ;;  %v4705_v20 = vand.u32 4294901760, %v4704_v15  ;;  %v19083_v17 = vand.u32 4294901760, %v15156_v23  ;;  %10184 = vmatprep.subr.bf16.mxu1 %v15496_v9 }
 0x2e3   : > { %v15505_v24 = vpack.c.bf16 %v19074_v30, %v19073_v54  ;;  %v10055_v39 = vpack.c.bf16 %v19079_v3, %v19077_v48  ;;  %v4717_v48 = vand.u32 4294901760, %v4716_v4  ;;  %v19082_v3 = vand.u32 4294901760, %v15094_v19  ;;  %v19089_v30 = vld [vmem:[#allocation337_spill] sm:$0xff] }
 0x2e4   : > { %v4722_v62 = vsub.f32 %v15089_v53, %v19081_v33  ;;  %v15529_v13 = vsub.f32 %v15156_v23, %v19083_v17  ;;  %v19085_v33 = vand.u32 4294901760, %v15459_v41  ;;  %v19086_v1 = vand.u32 4294901760, %v15461_v0  ;;  %10054 = vmatpush1.bf16.msra.mxu0 %v10053_v50  ;;  %v19095_v53 = vld [vmem:[#allocation341_spill] sm:$0xff] }
 0x2e5   : > { %19075 = vst [vmem:[#allocation228_spill] sm:$0xff] %v15505_v24  ;;  %v4728_v25 = vsub.f32 %v15094_v19, %v19082_v3  ;;  %v19088_v15 = vand.u32 4294901760, %v19072_v46  ;;  %v19090_v54 = vand.u32 4294901760, %v19089_v30  ;;  %v19092_v23 = vand.u32 4294901760, %v19091_v36  ;;  %v19093_v19 = vld [vmem:[#allocation340_spill] sm:$0xff]  ;;  %10056 = vmatprep.subr.bf16.mxu0 %v10055_v39  ;;  %10186 = vmatpush1.bf16.msra.mxu1 %v15505_v24 }
 0x2e6   : > { %19084 = vst [vmem:[#allocation229_spill] sm:$0xff] %v15529_v13  ;;  %v15536_v12 = vpack.c.bf16 %v19086_v1, %v19085_v33  ;;  %v19094_v9 = vand.u32 4294901760, %v19093_v19  ;;  %v19096_v51 = vand.u32 4294901760, %v19095_v53  ;;  %v4711_v0 = vand.u32 4294901760, %v4710_v10 }
 0x2e7   : > { %v4740_v4 = vsub.f32 %v19072_v46, %v19088_v15  ;;  %v10057_v17 = vpack.c.bf16 %v19092_v23, %v19090_v54  ;;  %v4723_v15 = vand.u32 4294901760, %v4722_v62  ;;  %v19097_v3 = vand.u32 4294901760, %v15112_v52 }
 0x2e8   : > { %19087 = vst [vmem:[#allocation230_spill] sm:$0xff] %v15536_v12  ;;  %v10059_v41 = vpack.c.bf16 %v19096_v51, %v19094_v9  ;;  %v19098_v30 = vand.u32 4294901760, %v15117_v32  ;;  %v19099_v19 = vand.u32 4294901760, %v15473_v42  ;;  %v19100_v53 = vand.u32 4294901760, %v15475_v29  ;;  %10188 = vmatprep.subr.bf16.mxu1 %v15536_v12 }
 0x2e9   : > { %v4734_v50 = vsub.f32 %v15112_v52, %v19097_v3  ;;  %v10191_v9 = vpack.c.bf16 %v4717_v48, %v4705_v20  ;;  %v4729_v39 = vand.u32 4294901760, %v4728_v25  ;;  %v19102_v62 = vand.u32 4294901760, %v15122_v55  ;;  %10058 = vmatpush1.bf16.msra.mxu0 %v10057_v17  ;;  %v19105_v48 = vld [vmem:[#allocation343_spill] sm:$0xff] }
 0x2ea   : > { %v4746_v36 = vsub.f32 %v15117_v32, %v19098_v30  ;;  %v15563_v51 = vpack.c.bf16 %v19100_v53, %v19099_v19  ;;  %v4741_v54 = vand.u32 4294901760, %v4740_v4  ;;  %v19103_v3 = vand.u32 4294901760, %v15131_v11  ;;  %v19107_v53 = vld [vmem:[#allocation344_spill] sm:$0xff]  ;;  %10060 = vmatprep.subr.bf16.mxu0 %v10059_v41 }
 0x2eb   : > { %v4752_v10 = vsub.f32 %v15122_v55, %v19102_v62  ;;  %v19104_v19 = vand.u32 4294901760, %v15158_v60  ;;  %v19106_v25 = vand.u32 4294901760, %v19105_v48  ;;  %v19108_v62 = vand.u32 4294901760, %v19107_v53  ;;  %v19113_v48 = vld [vmem:[#allocation131_spill] sm:$0xff] }
 0x2ec   : > { %19101 = vst [vmem:[#allocation231_spill] sm:$0xff] %v15563_v51  ;;  %v4764_v23 = vsub.f32 %v15131_v11, %v19103_v3  ;;  %v19109_v4 = vand.u32 4294901760, %v15145_v63  ;;  %v19110_v3 = vand.u32 4294901760, %v15163_v16  ;;  %v10193_v33 = vpack.c.bf16 %v4723_v15, %v4711_v0  ;;  %10190 = vmatpush1.bf16.msra.mxu1 %v15563_v51  ;;  %v19125_v51 = vld [vmem:[#allocation198_spill] sm:$0xff] }
 0x2ed   : > { %v15577_v20 = vsub.f32 %v15158_v60, %v19104_v19  ;;  %v10061_v1 = vpack.c.bf16 %v19108_v62, %v19106_v25  ;;  %v4735_v24 = vand.u32 4294901760, %v4734_v50  ;;  %v4747_v11 = vand.u32 4294901760, %v4746_v36  ;;  %10192 = vmatprep.subr.bf16.mxu1 %v10191_v9  ;;  %v19114_v9 = vld [vmem:[#allocation254_spill] sm:$0xff] }
 0x2ee   : > { %v4758_v12 = vsub.f32 %v15145_v63, %v19109_v4  ;;  %v4770_v30 = vsub.f32 %v15163_v16, %v19110_v3  ;;  %v17437_v60 = vand.u32 4294901760, %v15186_v2  ;;  %v4753_v17 = vand.u32 4294901760, %v4752_v10 }
 0x2ef   : > { %v17436_v19 = vand.u32 4294901760, %v15191_v58  ;;  %v17438_v25 = vand.u32 4294901760, %v15205_v44  ;;  %v10195_v53 = vpack.c.bf16 %v4741_v54, %v4729_v39  ;;  %v4765_v62 = vand.u32 4294901760, %v4764_v23  ;;  %10062 = vmatpush1.bf16.msra.mxu0 %v10061_v1  ;;  %4695 = vmatmul.mubr.f32.vlgmr.msra.gmra.mrb[4].mxu1 %v19113_v48 }
 0x2f0   : > { %v19111_v4 = vand.u32 4294901760, %v15168_v5  ;;  %v19112_v41 = vand.u32 4294901760, %v15173_v34  ;;  %v4759_v50 = vand.u32 4294901760, %v4758_v12  ;;  %v4771_v36 = vand.u32 4294901760, %v4770_v30  ;;  %10064 = vmatprep.subr.bf16.mxu0 %v19114_v9  ;;  %10194 = vmatpush1.bf16.msra.mxu1 %v10193_v33  ;;  %v19118_v33 = vld [vmem:[#allocation111_spill] sm:$0xff] }
 0x2f1   : > { %v17440_v10 = vand.u32 4294901760, %v15219_v37  ;;  %v17439_v3 = vand.u32 4294901760, %v15237_v61  ;;  %v10197_v39 = vpack.c.bf16 %v4747_v11, %v4735_v24  ;;  %v4782_v54 = vsub.f32 %v15186_v2, %v17437_v60  ;;  %v19116_v24 = vld [vmem:[#allocation114_spill] sm:$0xff]  ;;  %10196 = vmatprep.subr.bf16.mxu1 %v10195_v53 }
 0x2f2   : > { %v4776_v0 = vsub.f32 %v15168_v5, %v19111_v4  ;;  %v4788_v15 = vsub.f32 %v15173_v34, %v19112_v41  ;;  %v4794_v12 = vsub.f32 %v15191_v58, %v17436_v19  ;;  %v19115_v1 = vand.u32 4294901760, %v15196_v43  ;;  %5086 = vmatprep.mubr.f32.mxu1 %v19116_v24  ;;  %4349 = vmatmul.mubr.f32.vlgmr.msra.gmra.mrb[2].mxu0 %v19118_v33  ;;  %v19119_v4 = vld [vmem:[#allocation255_spill] sm:$0xff] }
 0x2f3   : > { %v4812_v11 = vsub.f32 %v15205_v44, %v17438_v25  ;;  %v19117_v48 = vand.u32 4294901760, %v15179_v21  ;;  %v10199_v9 = vpack.c.bf16 %v4765_v62, %v4753_v17  ;;  %10066 = vmatpush1.bf16.msra.mxu0 %v19119_v4  ;;  %v4806_v25 = vsub.f32 %v15219_v37, %v17440_v10  ;;  %4484 = vmatprep.mubr.f32.mxu0 %v19116_v24 }
 0x2f4   : > { %v4800_v30 = vsub.f32 %v15196_v43, %v19115_v1  ;;  %v4777_v19 = vand.u32 4294901760, %v4776_v0  ;;  %v4789_v60 = vand.u32 4294901760, %v4788_v15  ;;  %v10201_v1 = vpack.c.bf16 %v4771_v36, %v4759_v50  ;;  %10198 = vmatpush1.bf16.msra.mxu1 %v10197_v39  ;;  %v19127_v39 = vld [vmem:[#allocation199_spill] sm:$0xff] }
 0x2f5   : > { %v15622_v41 = vsub.f32 %v15179_v21, %v19117_v48  ;;  %v4818_v23 = vsub.f32 %v15237_v61, %v17439_v3  ;;  %v19120_v21 = vld [vmem:[#allocation256_spill] sm:$0xff]  ;;  %v19121_v53 = vand.u32 4294901760, %v15242_v18  ;;  %v19122_v62 = vand.u32 4294901760, %v15247_v35  ;;  %10200 = vmatprep.subr.bf16.mxu1 %v10199_v9 }
 0x2f6   : > { %10068 = vmatprep.subr.bf16.mxu0 %v19120_v21  ;;  %v4783_v36 = vand.u32 4294901760, %v4782_v54  ;;  %v4795_v4 = vand.u32 4294901760, %v4794_v12  ;;  %v4801_v48 = vand.u32 4294901760, %v4800_v30  ;;  %v4813_v3 = vand.u32 4294901760, %v4812_v11  ;;  %v19128_v30 = vld [vmem:[#allocation258_spill] sm:$0xff] }
 0x2f7   : > { %v4824_v17 = vsub.f32 %v15242_v18, %v19121_v53  ;;  %v4836_v0 = vsub.f32 %v15247_v35, %v19122_v62  ;;  %v19123_v10 = vand.u32 4294901760, %v15181_v31  ;;  %v10203_v53 = vpack.c.bf16 %v4789_v60, %v4777_v19  ;;  %v19126_v35 = vld [vmem:[#allocation257_spill] sm:$0xff] }
 0x2f8   : > { %v17449_v24 = vand.u32 4294901760, %v15270_v40  ;;  %v17448_v62 = vand.u32 4294901760, %v19125_v51  ;;  %10070 = vmatpush1.bf16.msra.mxu0 %v19126_v35  ;;  %v4807_v15 = vand.u32 4294901760, %v4806_v25  ;;  %v4819_v50 = vand.u32 4294901760, %v4818_v23  ;;  %10202 = vmatpush1.bf16.msra.mxu1 %v10201_v1 }
 0x2f9   : > { %v15645_v21 = vsub.f32 %v15181_v31, %v19123_v10  ;;  %10072 = vmatprep.subr.bf16.mxu0 %v19128_v30  ;;  %v4825_v11 = vand.u32 4294901760, %v4824_v17  ;;  %v4837_v18 = vand.u32 4294901760, %v4836_v0  ;;  %v19129_v31 = vand.u32 4294901760, %v15260_v47  ;;  %10204 = vmatprep.subr.bf16.mxu1 %v10203_v53 }
 0x2fa   : > { %v19130_v19 = vand.u32 4294901760, %v15265_v59  ;;  %v19131_v35 = vand.u32 4294901760, %v15230_v45  ;;  %v19132_v23 = vand.u32 4294901760, %v15232_v8  ;;  %v10205_v17 = vpack.c.bf16 %v4795_v4, %v4783_v36  ;;  %v19138_v36 = vld [vmem:[#allocation259_spill] sm:$0xff] }
 0x2fb   : > { %19124 = vst [vmem:[#allocation232_spill] sm:$0xff] %v15645_v21  ;;  %v4830_v60 = vsub.f32 %v15260_v47, %v19129_v31  ;;  %v10207_v0 = vpack.c.bf16 %v4813_v3, %v4801_v48  ;;  %v4848_v30 = vsub.f32 %v15270_v40, %v17449_v24  ;;  %v4860_v31 = vsub.f32 %v19125_v51, %v17448_v62  ;;  %v19141_v62 = vld [vmem:[#allocation260_spill] sm:$0xff]  ;;  %v19150_v51 = vld [vmem:[#allocation293_spill] sm:$0xff] }
 0x2fc   : > { %v4842_v10 = vsub.f32 %v15265_v59, %v19130_v19  ;;  %v15662_v25 = vsub.f32 %v15230_v45, %v19131_v35  ;;  %v15667_v9 = vsub.f32 %v15232_v8, %v19132_v23  ;;  %v19133_v19 = vld [vmem:[#allocation204_spill] sm:$0xff]  ;;  %v19134_v35 = vld [vmem:[#allocation286_spill] sm:$0xff]  ;;  %v19135_v54 = vand.u32 4294901760, %v15253_v56  ;;  %10074 = vmatpush1.bf16.msra.mxu0 %v19138_v36  ;;  %10206 = vmatpush1.bf16.msra.mxu1 %v10205_v17  ;;  %v19147_v36 = vld [vmem:[#allocation213_spill] sm:$0xff] }
 0x2fd   : > { %v19136_v3 = vand.u32 4294901760, %v15255_v22  ;;  %v19139_v4 = vand.u32 4294901760, %v19127_v39  ;;  %v19140_v53 = vand.u32 4294901760, %v15311_v27  ;;  %10076 = vmatprep.subr.bf16.mxu0 %v19141_v62  ;;  %v10209_v24 = vpack.c.bf16 %v4819_v50, %v4807_v15  ;;  %v19142_v45 = vld [vmem:[#allocation206_spill] sm:$0xff]  ;;  %10208 = vmatprep.subr.bf16.mxu1 %v10207_v0  ;;  %v19145_v50 = vld [vmem:[#allocation261_spill] sm:$0xff] }
 0x2fe   : > { %v15680_v8 = vsub.f32 %v15253_v56, %v19135_v54  ;;  %v10211_v56 = vpack.c.bf16 %v4837_v18, %v4825_v11  ;;  %v4831_v54 = vand.u32 4294901760, %v4830_v60  ;;  %v4843_v12 = vand.u32 4294901760, %v4842_v10  ;;  %v19146_v10 = vld [vmem:[#allocation210_spill] sm:$0xff] }
 0x2ff   : > { %v15685_v1 = vsub.f32 %v15255_v22, %v19136_v3  ;;  %v4854_v48 = vsub.f32 %v19127_v39, %v19139_v4  ;;  %v4866_v23 = vsub.f32 %v15311_v27, %v19140_v53  ;;  %v4849_v4 = vand.u32 4294901760, %v4848_v30 }
 0x300   : > { %v4861_v39 = vand.u32 4294901760, %v4860_v31  ;;  %v19143_v53 = vand.u32 4294901760, %v19133_v19  ;;  %v19144_v18 = vand.u32 4294901760, %v19134_v35  ;;  %10078 = vmatpush1.bf16.msra.mxu0 %v19145_v50  ;;  %v19148_v0 = vand.u32 4294901760, %v15304_v6  ;;  %v19149_v31 = vld [vmem:[#allocation262_spill] sm:$0xff]  ;;  %10210 = vmatpush1.bf16.msra.mxu1 %v10209_v24 }
 0x301   : > { %19137 = vst [vmem:[#allocation234_spill] sm:$0xff] %v15685_v1  ;;  %v4855_v11 = vand.u32 4294901760, %v4854_v48  ;;  %v4867_v60 = vand.u32 4294901760, %v4866_v23  ;;  %10080 = vmatprep.subr.bf16.mxu0 %v19149_v31  ;;  %v19152_v48 = vand.u32 4294901760, %v15334_v14  ;;  %v19153_v50 = vand.u32 4294901760, %v15339_v38  ;;  %10212 = vmatprep.subr.bf16.mxu1 %v10211_v56  ;;  %v19163_v56 = vld [vmem:[#allocation268_spill] sm:$0xff] }
 0x302   : > { %v4872_v62 = vsub.f32 %v19133_v19, %v19143_v53  ;;  %v4884_v15 = vsub.f32 %v19134_v35, %v19144_v18  ;;  %v15711_v30 = vsub.f32 %v15304_v6, %v19148_v0  ;;  %v10213_v53 = vpack.c.bf16 %v4843_v12, %v4831_v54  ;;  %v19151_v19 = vld [vmem:[#allocation215_spill] sm:$0xff] }
 0x303   : > { %v4878_v23 = vsub.f32 %v15334_v14, %v19152_v48  ;;  %v4890_v3 = vsub.f32 %v15339_v38, %v19153_v50  ;;  %v19154_v17 = vand.u32 4294901760, %v15344_v28  ;;  %v19155_v0 = vand.u32 4294901760, %v19142_v45  ;;  %v19160_v38 = vld [vmem:[#allocation266_spill] sm:$0xff]  ;;  %v19172_v35 = vld [vmem:[#allocation303_spill] sm:$0xff] }
 0x304   : > { %v19156_v54 = vand.u32 4294901760, %v15306_v26  ;;  %v10215_v31 = vpack.c.bf16 %v4861_v39, %v4849_v4  ;;  %v4873_v48 = vand.u32 4294901760, %v4872_v62  ;;  %v4885_v18 = vand.u32 4294901760, %v4884_v15  ;;  %10082 = vmatpush1.bf16.msra.mxu0 %v19160_v38  ;;  %v19166_v38 = vld [vmem:[#allocation218_spill] sm:$0xff]  ;;  %v19167_v15 = vld [vmem:[#allocation219_spill] sm:$0xff]  ;;  %10214 = vmatpush1.bf16.msra.mxu1 %v10213_v53 }
 0x305   : > { %v4896_v6 = vsub.f32 %v15344_v28, %v19154_v17  ;;  %v4908_v12 = vsub.f32 %v19142_v45, %v19155_v0  ;;  %v19158_v22 = vand.u32 4294901760, %v15327_v49  ;;  %v10217_v17 = vpack.c.bf16 %v4867_v60, %v4855_v11  ;;  %10084 = vmatprep.subr.bf16.mxu0 %v19163_v56 }
 0x306   : > { %v15731_v24 = vsub.f32 %v15306_v26, %v19156_v54  ;;  %v19161_v28 = vand.u32 4294901760, %v19146_v10  ;;  %v19162_v45 = vand.u32 4294901760, %v19147_v36  ;;  %v19164_v39 = vand.u32 4294901760, %v19150_v51  ;;  %10216 = vmatprep.subr.bf16.mxu1 %v10215_v31 }
 0x307   : > { %v15736_v50 = vsub.f32 %v15327_v49, %v19158_v22  ;;  %v19165_v49 = vand.u32 4294901760, %v19151_v19  ;;  %v4891_v60 = vand.u32 4294901760, %v4890_v3  ;;  %v4897_v54 = vand.u32 4294901760, %v4896_v6 }
 0x308   : > { %19157 = vst [vmem:[#allocation235_spill] sm:$0xff] %v15731_v24  ;;  %v4902_v0 = vsub.f32 %v19146_v10, %v19161_v28  ;;  %v4914_v26 = vsub.f32 %v19147_v36, %v19162_v45  ;;  %v4920_v4 = vsub.f32 %v19150_v51, %v19164_v39  ;;  %v4879_v28 = vand.u32 4294901760, %v4878_v23  ;;  %v19168_v45 = vld [vmem:[#allocation285_spill] sm:$0xff]  ;;  %v19174_v23 = vld [vmem:[#allocation280_spill] sm:$0xff]  ;;  %10218 = vmatpush1.bf16.msra.mxu1 %v10217_v17 }
 0x309   : > { %19159 = vst [vmem:[#allocation237_spill] sm:$0xff] %v15736_v50  ;;  %v4932_v22 = vsub.f32 %v19151_v19, %v19165_v49  ;;  %v4909_v10 = vand.u32 4294901760, %v4908_v12  ;;  %v19169_v36 = vand.u32 4294901760, %v19168_v45  ;;  %v10219_v39 = vpack.c.bf16 %v4885_v18, %v4873_v48  ;;  %v19171_v51 = vld [vmem:[#allocation221_spill] sm:$0xff]  ;;  %v19173_v19 = vld [vmem:[#allocation278_spill] sm:$0xff] }
 0x30a   : > { %v17467_v14 = vand.u32 4294901760, %v19171_v51  ;;  %v17466_v49 = vand.u32 4294901760, %v19172_v35  ;;  %10086 = vmatpush1.bf16.msra.mxu0 %v19173_v19  ;;  %v4903_v62 = vand.u32 4294901760, %v4902_v0  ;;  %v4915_v11 = vand.u32 4294901760, %v4914_v26  ;;  %v19180_v26 = vld [vmem:[#allocation209_spill] sm:$0xff] }
 0x30b   : > { %v15757_v56 = vsub.f32 %v19168_v45, %v19169_v36  ;;  %10088 = vmatprep.subr.bf16.mxu0 %v19174_v23  ;;  %v4921_v6 = vand.u32 4294901760, %v4920_v4  ;;  %v4933_v12 = vand.u32 4294901760, %v4932_v22  ;;  %v19175_v36 = vand.u32 4294901760, %v19166_v38  ;;  %v19177_v45 = vld [vmem:[#allocation208_spill] sm:$0xff]  ;;  %10220 = vmatprep.subr.bf16.mxu1 %v10219_v39  ;;  %v19186_v17 = vld [vmem:[#allocation217_spill] sm:$0xff] }
 0x30c   : > { %v19176_v31 = vand.u32 4294901760, %v19167_v15  ;;  %v19178_v19 = vand.u32 4294901760, %v19177_v45  ;;  %v19181_v53 = vand.u32 4294901760, %v19180_v26  ;;  %v10221_v4 = vpack.c.bf16 %v4891_v60, %v4879_v28  ;;  %v19189_v60 = vld [vmem:[#allocation290_spill] sm:$0xff] }
 0x30d   : > { %19170 = vst [vmem:[#allocation240_spill] sm:$0xff] %v15757_v56  ;;  %v4926_v18 = vsub.f32 %v19166_v38, %v19175_v36  ;;  %v10223_v22 = vpack.c.bf16 %v4909_v10, %v4897_v54  ;;  %v4944_v23 = vsub.f32 %v19171_v51, %v17467_v14  ;;  %v4956_v36 = vsub.f32 %v19172_v35, %v17466_v49  ;;  %v19192_v14 = vld [vmem:[#allocation292_spill] sm:$0xff] }
 0x30e   : > { %v4938_v48 = vsub.f32 %v19167_v15, %v19176_v31  ;;  %v15774_v0 = vsub.f32 %v19177_v45, %v19178_v19  ;;  %v15779_v3 = vsub.f32 %v19180_v26, %v19181_v53  ;;  %v19183_v19 = vld [vmem:[#allocation216_spill] sm:$0xff]  ;;  %v19187_v10 = vand.u32 4294901760, %v19186_v17  ;;  %10090 = vmatpush1.bf16.msra.mxu0 %v19189_v60  ;;  %10222 = vmatpush1.bf16.msra.mxu1 %v10221_v4  ;;  %v19205_v4 = vld [vmem:[#allocation302_spill] sm:$0xff] }
 0x30f   : > { %v19184_v15 = vand.u32 4294901760, %v19183_v19  ;;  %v19190_v54 = vand.u32 4294901760, %v15529_v13  ;;  %v19191_v26 = vand.u32 4294901760, %v15577_v20  ;;  %10092 = vmatprep.subr.bf16.mxu0 %v19192_v14  ;;  %v10225_v45 = vpack.c.bf16 %v4915_v11, %v4903_v62  ;;  %10224 = vmatprep.subr.bf16.mxu1 %v10223_v22 }
 0x310   : > { %19179 = vst [vmem:[#allocation242_spill] sm:$0xff] %v15774_v0  ;;  %19182 = vst [vmem:[#allocation243_spill] sm:$0xff] %v15779_v3  ;;  %v15797_v28 = vsub.f32 %v19186_v17, %v19187_v10  ;;  %v4939_v31 = vand.u32 4294901760, %v4938_v48  ;;  %v17471_v17 = vand.u32 4294901760, %v15662_v25  ;;  %v17472_v10 = vand.u32 4294901760, %v15667_v9 }
 0x311   : > { %v15792_v53 = vsub.f32 %v19183_v19, %v19184_v15  ;;  %v4950_v39 = vsub.f32 %v15529_v13, %v19190_v54  ;;  %v4962_v49 = vsub.f32 %v15577_v20, %v19191_v26  ;;  %v10227_v15 = vpack.c.bf16 %v4933_v12, %v4921_v6  ;;  %v19195_v6 = vld [vmem:[#allocation296_spill] sm:$0xff] }
 0x312   : > { %19188 = vst [vmem:[#allocation247_spill] sm:$0xff] %v15797_v28  ;;  %v4927_v19 = vand.u32 4294901760, %v4926_v18  ;;  %v17473_v60 = vand.u32 4294901760, %v15680_v8  ;;  %v4945_v54 = vand.u32 4294901760, %v4944_v23  ;;  %v4957_v13 = vand.u32 4294901760, %v4956_v36  ;;  %10094 = vmatpush1.bf16.msra.mxu0 %v19195_v6  ;;  %v19198_v36 = vld [vmem:[#allocation299_spill] sm:$0xff]  ;;  %10226 = vmatpush1.bf16.msra.mxu1 %v10225_v45 }
 0x313   : > { %19185 = vst [vmem:[#allocation246_spill] sm:$0xff] %v15792_v53  ;;  %v19193_v26 = vand.u32 4294901760, %v15622_v41  ;;  %v19194_v62 = vand.u32 4294901760, %v15645_v21  ;;  %v4951_v12 = vand.u32 4294901760, %v4950_v39  ;;  %v4963_v18 = vand.u32 4294901760, %v4962_v49  ;;  %10096 = vmatprep.subr.bf16.mxu0 %v19198_v36  ;;  %10228 = vmatprep.subr.bf16.mxu1 %v10227_v15  ;;  %v19207_v15 = vld [vmem:[#allocation305_spill] sm:$0xff] }
 0x314   : > { %v17476_v48 = vand.u32 4294901760, %v15711_v30  ;;  %v19196_v22 = vand.u32 4294901760, %v15416_v57  ;;  %v4974_v49 = vsub.f32 %v15662_v25, %v17471_v17  ;;  %v4986_v39 = vsub.f32 %v15667_v9, %v17472_v10 }
 0x315   : > { %v4968_v14 = vsub.f32 %v15622_v41, %v19193_v26  ;;  %v4980_v11 = vsub.f32 %v15645_v21, %v19194_v62  ;;  %v10229_v26 = vpack.c.bf16 %v4939_v31, %v4927_v19  ;;  %v19199_v6 = vand.u32 4294901760, %v15685_v1  ;;  %v19202_v62 = vld [vmem:[#allocation306_spill] sm:$0xff] }
 0x316   : > { %v15823_v23 = vsub.f32 %v15416_v57, %v19196_v22  ;;  %v4992_v57 = vsub.f32 %v15680_v8, %v17473_v60  ;;  %v19200_v19 = vand.u32 4294901760, %v15418_v7  ;;  %v10231_v22 = vpack.c.bf16 %v4957_v13, %v4945_v54  ;;  %10098 = vmatpush1.bf16.msra.mxu0 %v19205_v4 }
 0x317   : > { %v5004_v31 = vsub.f32 %v15685_v1, %v19199_v6  ;;  %v4969_v36 = vand.u32 4294901760, %v4968_v14  ;;  %v4981_v17 = vand.u32 4294901760, %v4980_v11  ;;  %v19203_v35 = vand.u32 4294901760, %v19202_v62  ;;  %10100 = vmatprep.subr.bf16.mxu0 %v19207_v15  ;;  %10230 = vmatpush1.bf16.msra.mxu1 %v10229_v26 }
 0x318   : > { %19197 = vst [vmem:[#allocation249_spill] sm:$0xff] %v15823_v23  ;;  %v15843_v45 = vsub.f32 %v15418_v7, %v19200_v19  ;;  %v10233_v60 = vpack.c.bf16 %v4963_v18, %v4951_v12  ;;  %v4998_v6 = vsub.f32 %v15711_v30, %v17476_v48  ;;  %v19206_v1 = vand.u32 4294901760, %v15731_v24  ;;  %10232 = vmatprep.subr.bf16.mxu1 %v10231_v22 }
 0x319   : > { %v15848_v10 = vsub.f32 %v19202_v62, %v19203_v35  ;;  %v19208_v13 = vand.u32 4294901760, %v15736_v50  ;;  %v19209_v35 = vand.u32 4294901760, %v15757_v56  ;;  %v4975_v18 = vand.u32 4294901760, %v4974_v49 }
 0x31a   : > { %19201 = vst [vmem:[#allocation250_spill] sm:$0xff] %v15843_v45  ;;  %v5010_v7 = vsub.f32 %v15731_v24, %v19206_v1  ;;  %v4987_v4 = vand.u32 4294901760, %v4986_v39  ;;  %v4993_v62 = vand.u32 4294901760, %v4992_v57  ;;  %v5005_v19 = vand.u32 4294901760, %v5004_v31  ;;  %v19210_v1 = vld [vmem:[#allocation223_spill] sm:$0xff]  ;;  %v19217_v39 = vld [vmem:[#allocation308_spill] sm:$0xff] }
 0x31b   : > { %19204 = vst [vmem:[#allocation251_spill] sm:$0xff] %v15848_v10  ;;  %v5016_v54 = vsub.f32 %v15736_v50, %v19208_v13  ;;  %v5028_v14 = vsub.f32 %v15757_v56, %v19209_v35  ;;  %v19211_v48 = vand.u32 4294901760, %v19210_v1  ;;  %v10235_v13 = vpack.c.bf16 %v4981_v17, %v4969_v36  ;;  %10102 = vmatpush1.bf16.msra.mxu0 %v19217_v39  ;;  %v19218_v31 = vld [vmem:[#allocation310_spill] sm:$0xff] }
 0x31c   : > { %v17479_v50 = vand.u32 4294901760, %v15792_v53  ;;  %v19213_v11 = vand.u32 4294901760, %v15473_v42  ;;  %v19215_v26 = vand.u32 4294901760, %v15475_v29  ;;  %v5011_v57 = vand.u32 4294901760, %v5010_v7  ;;  %10104 = vmatprep.subr.bf16.mxu0 %v19218_v31  ;;  %10234 = vmatpush1.bf16.msra.mxu1 %v10233_v60  ;;  %v19222_v60 = vld [vmem:[#allocation312_spill] sm:$0xff] }
 0x31d   : > { %v15869_v15 = vsub.f32 %v19210_v1, %v19211_v48  ;;  %v4999_v48 = vand.u32 4294901760, %v4998_v6  ;;  %v5017_v17 = vand.u32 4294901760, %v5016_v54  ;;  %v5029_v22 = vand.u32 4294901760, %v5028_v14  ;;  %10236 = vmatprep.subr.bf16.mxu1 %v10235_v13 }
 0x31e   : > { %v15876_v12 = vsub.f32 %v15473_v42, %v19213_v11  ;;  %v15881_v49 = vsub.f32 %v15475_v29, %v19215_v26  ;;  %v19219_v36 = vand.u32 4294901760, %v15774_v0  ;;  %v19220_v42 = vand.u32 4294901760, %v15779_v3 }
 0x31f   : > { %19212 = vst [vmem:[#allocation252_spill] sm:$0xff] %v15869_v15  ;;  %v10237_v35 = vpack.c.bf16 %v4987_v4, %v4975_v18  ;;  %v10239_v29 = vpack.c.bf16 %v5005_v19, %v4993_v62  ;;  %v17485_v26 = vand.u32 4294901760, %v15823_v23  ;;  %v17482_v6 = vand.u32 4294901760, %v15843_v45  ;;  %10106 = vmatpush1.bf16.msra.mxu0 %v19222_v60  ;;  %v19223_v18 = vld [vmem:[#allocation315_spill] sm:$0xff] }
 0x320   : > { %19214 = vst [vmem:[#allocation253_spill] sm:$0xff] %v15876_v12  ;;  %19216 = vst [vmem:[#allocation239_spill] sm:$0xff] %v15881_v49  ;;  %v5022_v1 = vsub.f32 %v15774_v0, %v19219_v36  ;;  %v5034_v11 = vsub.f32 %v15779_v3, %v19220_v42  ;;  %v5040_v7 = vsub.f32 %v15792_v53, %v17479_v50  ;;  %v19221_v54 = vand.u32 4294901760, %v15797_v28 }
 0x321   : > { %v17480_v39 = vand.u32 4294901760, %v15848_v10  ;;  %v17481_v31 = vand.u32 4294901760, %v15869_v15  ;;  %10108 = vmatprep.subr.bf16.mxu0 %v19223_v18  ;;  %v10241_v4 = vpack.c.bf16 %v5011_v57, %v4999_v48  ;;  %v10243_v62 = vpack.c.bf16 %v5029_v22, %v5017_v17  ;;  %10238 = vmatpush1.bf16.msra.mxu1 %v10237_v35  ;;  %v19224_v57 = vld [vmem:[#allocation318_spill] sm:$0xff]  ;;  %v19225_v17 = vld [vmem:[#allocation321_spill] sm:$0xff] }
 0x322   : > { %v5052_v14 = vsub.f32 %v15797_v28, %v19221_v54  ;;  %v5023_v19 = vand.u32 4294901760, %v5022_v1  ;;  %v5035_v13 = vand.u32 4294901760, %v5034_v11  ;;  %v5046_v36 = vsub.f32 %v15823_v23, %v17485_v26  ;;  %10240 = vmatprep.subr.bf16.mxu1 %v10239_v29 }
 0x323   : > { %v5058_v42 = vsub.f32 %v15843_v45, %v17482_v6  ;;  %v17484_v54 = vand.u32 4294901760, %v15876_v12  ;;  %v17483_v50 = vand.u32 4294901760, %v15881_v49  ;;  %v5041_v60 = vand.u32 4294901760, %v5040_v7  ;;  %10110 = vmatpush1.bf16.msra.mxu0 %v19224_v57  ;;  %v19226_v6 = vld [vmem:[#allocation324_spill] sm:$0xff] }
 0x324   : > { %v5053_v18 = vand.u32 4294901760, %v5052_v14  ;;  %v5064_v48 = vsub.f32 %v15848_v10, %v17480_v39  ;;  %v5076_v35 = vsub.f32 %v15869_v15, %v17481_v31  ;;  %10112 = vmatprep.subr.bf16.mxu0 %v19225_v17  ;;  %v10245_v22 = vpack.c.bf16 %v5035_v13, %v5023_v19  ;;  %v19227_v57 = vld [vmem:[#allocation328_spill] sm:$0xff]  ;;  %v19229_v17 = vld [vmem:[#allocation333_spill] sm:$0xff] }
 0x325   : > { %10242 = vmatpush1.bf16.msra.mxu1 %v10241_v4  ;;  %v5047_v1 = vand.u32 4294901760, %v5046_v36  ;;  %v5059_v11 = vand.u32 4294901760, %v5058_v42  ;;  %v5070_v29 = vsub.f32 %v15876_v12, %v17484_v54  ;;  %v5082_v7 = vsub.f32 %v15881_v49, %v17483_v50  ;;  %v19228_v42 = vld [vmem:[#allocation330_spill] sm:$0xff] }
 0x326   : > { %10244 = vmatprep.subr.bf16.mxu1 %v10243_v62  ;;  %v10247_v14 = vpack.c.bf16 %v5053_v18, %v5041_v60  ;;  %v5065_v39 = vand.u32 4294901760, %v5064_v48  ;;  %v5077_v31 = vand.u32 4294901760, %v5076_v35  ;;  %v19230_v62 = vld [vmem:[#allocation181_spill] sm:$0xff]  ;;  %v19231_v60 = vld [vmem:[#allocation182_spill] sm:$0xff]  ;;  %v19232_v48 = vld [vmem:[#allocation336_spill] sm:$0xff] }
 0x327   : > { %10114 = vmatpush1.bf16.msra.mxu0 %v19226_v6  ;;  %v10249_v4 = vpack.c.bf16 %v5059_v11, %v5047_v1  ;;  %v5071_v19 = vand.u32 4294901760, %v5070_v29  ;;  %v5083_v13 = vand.u32 4294901760, %v5082_v7  ;;  %v10255_v18 = vpack.c.bf16 %v19231_v60, %v19230_v62  ;;  %v19233_v6 = vld [vmem:[#allocation339_spill] sm:$0xff]  ;;  %v19234_v35 = vld [vmem:[#allocation184_spill] sm:$0xff]  ;;  %v19237_v11 = vld [vmem:[#allocation342_spill] sm:$0xff] }
 0x328   : > { %10116 = vmatprep.subr.bf16.mxu0 %v19227_v57  ;;  %v10251_v36 = vpack.c.bf16 %v5077_v31, %v5065_v39  ;;  %v19236_v39 = vld [vmem:[#allocation187_spill] sm:$0xff]  ;;  %v19238_v29 = vld [vmem:[#allocation22_spill] sm:$0xff]  ;;  %v10261_v7 = vpack.c.bf16 %v15117_v32, %v15112_v52 }
 0x329   : > { %10246 = vmatpush1.bf16.msra.mxu1 %v10245_v22  ;;  %v10253_v50 = vpack.c.bf16 %v5083_v13, %v5071_v19  ;;  %v19235_v22 = vld [vmem:[#allocation186_spill] sm:$0xff]  ;;  %v10259_v31 = vpack.c.bf16 %v19072_v46, %v19236_v39  ;;  %v19242_v19 = vld [vmem:[#allocation27_spill] sm:$0xff]  ;;  %v10265_v13 = vpack.c.bf16 %v15163_v16, %v15145_v63 }
 0x32a   : > { %10248 = vmatprep.subr.bf16.mxu1 %v10247_v14  ;;  %v10257_v1 = vpack.c.bf16 %v19235_v22, %v19234_v35  ;;  %v19239_v14 = vld [vmem:[#allocation119_spill] sm:$0xff]  ;;  %v19251_v54 = vld [vmem:[#allocation198_spill] sm:$0xff] }
 0x32b   : > { %10118 = vmatpush1.bf16.msra.mxu0 %v19228_v42  ;;  %v19243_v42 = vld [vmem:[#allocation30_spill] sm:$0xff]  ;;  %v10279_v26 = vpack.c.bf16 %v19251_v54, %v15270_v40 }
 0x32c   : > { %10120 = vmatprep.subr.bf16.mxu0 %v19229_v17  ;;  %v19244_v17 = vld [vmem:[#allocation33_spill] sm:$0xff] }
 0x32d   : > { %10250 = vmatpush1.bf16.msra.mxu1 %v10249_v4  ;;  %v19241_v4 = vld [vmem:[#allocation25_spill] sm:$0xff] }
 0x32e   : > { %10252 = vmatprep.subr.bf16.mxu1 %v10251_v36  ;;  %v10267_v36 = vpack.c.bf16 %v15173_v34, %v15168_v5 }
 0x32f   : > { %10122 = vmatpush1.bf16.msra.mxu0 %v19232_v48  ;;  %v10271_v48 = vpack.c.bf16 %v15205_v44, %v15196_v43 }
 0x330   : > { %10124 = vmatprep.subr.bf16.mxu0 %v19233_v6  ;;  %v19245_v6 = vld [vmem:[#allocation34_spill] sm:$0xff] }
 0x331   : > { %10254 = vmatpush1.bf16.msra.mxu1 %v10253_v50  ;;  %v19240_v50 = vld [vmem:[#allocation191_spill] sm:$0xff] }
 0x332   : > { %10256 = vmatprep.subr.bf16.mxu1 %v10255_v18  ;;  %v10263_v57 = vpack.c.bf16 %v19240_v50, %v15122_v55  ;;  %v10269_v18 = vpack.c.bf16 %v15191_v58, %v15186_v2 }
 0x333   : > { %10126 = vmatpush1.bf16.msra.mxu0 %v19237_v11  ;;  %v19247_v11 = vld [vmem:[#allocation196_spill] sm:$0xff] }
 0x334   : > { %5088 = vmatmul.mubr.f32.vlgmr.msra.gmra.mrb[4].mxu1 %v19118_v33  ;;  %10512 = vmatprep.subr.bf16.mxu0 %v19238_v29  ;;  %v19262_v29 = vld [vmem:[#allocation206_spill] sm:$0xff] }
 0x335   : > { %10258 = vmatpush1.bf16.msra.mxu1 %v10257_v1  ;;  %5288 = vmatprep.mubr.f32.mxu1 %v19239_v14  ;;  %v19246_v1 = vld [vmem:[#allocation37_spill] sm:$0xff] }
 0x336   : > { %4486 = vmatmul.mubr.f32.vlgmr.msra.gmra.mrb[2].mxu0 %v19118_v33  ;;  %10260 = vmatprep.subr.bf16.mxu1 %v10259_v31  ;;  %v10273_v31 = vpack.c.bf16 %v15237_v61, %v15219_v37  ;;  %v19264_v33 = vld [vmem:[#allocation60_spill] sm:$0xff] }
 0x337   : > { %10514 = vmatpush1.bf16.msra.mxu0 %v19241_v4 }
 0x338   : > { %10516 = vmatprep.subr.bf16.mxu0 %v19242_v19  ;;  %v19260_v19 = vld [vmem:[#allocation287_spill] sm:$0xff] }
 0x339   : > { %10262 = vmatpush1.bf16.msra.mxu1 %v10261_v7  ;;  %v19248_v7 = vld [vmem:[#allocation197_spill] sm:$0xff] }
 0x33a   : > { %10264 = vmatprep.subr.bf16.mxu1 %v10263_v57  ;;  %v10275_v14 = vpack.c.bf16 %v19248_v7, %v19247_v11  ;;  %v19249_v57 = vld [vmem:[#allocation38_spill] sm:$0xff] }
 0x33b   : > { %10518 = vmatpush1.bf16.msra.mxu0 %v19243_v42  ;;  %v19258_v42 = vld [vmem:[#allocation53_spill] sm:$0xff] }
 0x33c   : > { %10520 = vmatprep.subr.bf16.mxu0 %v19244_v17  ;;  %v19256_v17 = vld [vmem:[#allocation286_spill] sm:$0xff] }
 0x33d   : > { %10266 = vmatpush1.bf16.msra.mxu1 %v10265_v13  ;;  %v19250_v13 = vld [vmem:[#allocation40_spill] sm:$0xff] }
 0x33e   : > { %10268 = vmatprep.subr.bf16.mxu1 %v10267_v36  ;;  %v10277_v36 = vpack.c.bf16 %v15265_v59, %v15260_v47 }
 0x33f   : > { %10522 = vmatpush1.bf16.msra.mxu0 %v19245_v6 }
 0x340   : > { %10524 = vmatprep.subr.bf16.mxu0 %v19246_v1  ;;  %v19253_v1 = vld [vmem:[#allocation44_spill] sm:$0xff] }
 0x341   : > { %10270 = vmatpush1.bf16.msra.mxu1 %v10269_v18  ;;  %v19252_v18 = vld [vmem:[#allocation43_spill] sm:$0xff] }
 0x342   : > { %10272 = vmatprep.subr.bf16.mxu1 %v10271_v48  ;;  %v19254_v48 = vld [vmem:[#allocation199_spill] sm:$0xff] }
 0x343   : > { %10526 = vmatpush1.bf16.msra.mxu0 %v19249_v57  ;;  %v10281_v6 = vpack.c.bf16 %v15311_v27, %v19254_v48  ;;  %v19255_v57 = vld [vmem:[#allocation204_spill] sm:$0xff]  ;;  %v19266_v27 = vld [vmem:[#allocation213_spill] sm:$0xff] }
 0x344   : > { %10528 = vmatprep.subr.bf16.mxu0 %v19250_v13  ;;  %v10283_v13 = vpack.c.bf16 %v19256_v17, %v19255_v57  ;;  %v19268_v57 = vld [vmem:[#allocation215_spill] sm:$0xff]  ;;  %v19270_v48 = vld [vmem:[#allocation69_spill] sm:$0xff] }
 0x345   : > { %10274 = vmatpush1.bf16.msra.mxu1 %v10273_v31  ;;  %v19257_v31 = vld [vmem:[#allocation51_spill] sm:$0xff] }
 0x346   : > { %10276 = vmatprep.subr.bf16.mxu1 %v10275_v14  ;;  %v19259_v14 = vld [vmem:[#allocation288_spill] sm:$0xff] }
 0x347   : > { %10530 = vmatpush1.bf16.msra.mxu0 %v19252_v18  ;;  %v10285_v4 = vpack.c.bf16 %v19260_v19, %v19259_v14  ;;  %v19261_v18 = vld [vmem:[#allocation205_spill] sm:$0xff] }
 0x348   : > { %10532 = vmatprep.subr.bf16.mxu0 %v19253_v1  ;;  %v10287_v1 = vpack.c.bf16 %v19262_v29, %v19261_v18  ;;  %v19274_v18 = vld [vmem:[#allocation78_spill] sm:$0xff] }
 0x349   : > { %10278 = vmatpush1.bf16.msra.mxu1 %v10277_v36  ;;  %v19263_v36 = vld [vmem:[#allocation59_spill] sm:$0xff] }
 0x34a   : > { %10280 = vmatprep.subr.bf16.mxu1 %v10279_v26  ;;  %v19265_v26 = vld [vmem:[#allocation210_spill] sm:$0xff] }
 0x34b   : > { %10534 = vmatpush1.bf16.msra.mxu0 %v19257_v31  ;;  %v10289_v17 = vpack.c.bf16 %v19266_v27, %v19265_v26  ;;  %v19267_v31 = vld [vmem:[#allocation293_spill] sm:$0xff] }
 0x34c   : > { %10536 = vmatprep.subr.bf16.mxu0 %v19258_v42  ;;  %v10291_v42 = vpack.c.bf16 %v19268_v57, %v19267_v31 }
 0x34d   : > { %10282 = vmatpush1.bf16.msra.mxu1 %v10281_v6  ;;  %v19269_v6 = vld [vmem:[#allocation67_spill] sm:$0xff] }
 0x34e   : > { %10284 = vmatprep.subr.bf16.mxu1 %v10283_v13  ;;  %v19271_v13 = vld [vmem:[#allocation219_spill] sm:$0xff] }
 0x34f   : > { %10538 = vmatpush1.bf16.msra.mxu0 %v19263_v36  ;;  %v10293_v29 = vpack.c.bf16 %v19271_v13, %v19166_v38  ;;  %v19272_v36 = vld [vmem:[#allocation303_spill] sm:$0xff] }
 0x350   : > { %10540 = vmatprep.subr.bf16.mxu0 %v19264_v33  ;;  %v10295_v33 = vpack.c.bf16 %v19272_v36, %v19171_v51  ;;  %v19280_v36 = vld [vmem:[#allocation91_spill] sm:$0xff] }
 0x351   : > { %10286 = vmatpush1.bf16.msra.mxu1 %v10285_v4  ;;  %v19273_v4 = vld [vmem:[#allocation75_spill] sm:$0xff] }
 0x352   : > { %10288 = vmatprep.subr.bf16.mxu1 %v10287_v1  ;;  %v19275_v1 = vld [vmem:[#allocation229_spill] sm:$0xff] }
 0x353   : > { %10542 = vmatpush1.bf16.msra.mxu0 %v19269_v6  ;;  %v10297_v57 = vpack.c.bf16 %v15577_v20, %v19275_v1  ;;  %v19277_v6 = vld [vmem:[#allocation85_spill] sm:$0xff] }
 0x354   : > { %10544 = vmatprep.subr.bf16.mxu0 %v19270_v48  ;;  %v10299_v48 = vpack.c.bf16 %v15645_v21, %v15622_v41  ;;  %v19283_v21 = vld [vmem:[#allocation102_spill] sm:$0xff] }
 0x355   : > { %10290 = vmatpush1.bf16.msra.mxu1 %v10289_v17  ;;  %v19276_v17 = vld [vmem:[#allocation83_spill] sm:$0xff] }
 0x356   : > { %10292 = vmatprep.subr.bf16.mxu1 %v10291_v42  ;;  %v10301_v42 = vpack.c.bf16 %v15667_v9, %v15662_v25 }
 0x357   : > { %10546 = vmatpush1.bf16.msra.mxu0 %v19273_v4  ;;  %v19278_v4 = vld [vmem:[#allocation234_spill] sm:$0xff] }
 0x358   : > { %10548 = vmatprep.subr.bf16.mxu0 %v19274_v18  ;;  %v10303_v18 = vpack.c.bf16 %v19278_v4, %v15680_v8 }
 0x359   : > { %10294 = vmatpush1.bf16.msra.mxu1 %v10293_v29  ;;  %v19279_v29 = vld [vmem:[#allocation86_spill] sm:$0xff] }
 0x35a   : > { %10296 = vmatprep.subr.bf16.mxu1 %v10295_v33  ;;  %v10305_v33 = vpack.c.bf16 %v15731_v24, %v15711_v30 }
 0x35b   : > { %10550 = vmatpush1.bf16.msra.mxu0 %v19276_v17  ;;  %v19281_v17 = vld [vmem:[#allocation237_spill] sm:$0xff] }
 0x35c   : > { %10552 = vmatprep.subr.bf16.mxu0 %v19277_v6  ;;  %v10307_v6 = vpack.c.bf16 %v15757_v56, %v19281_v17 }
 0x35d   : > { %10298 = vmatpush1.bf16.msra.mxu1 %v10297_v57  ;;  %v19282_v57 = vld [vmem:[#allocation99_spill] sm:$0xff] }
 0x35e   : > { %10300 = vmatprep.subr.bf16.mxu1 %v10299_v48  ;;  %v10309_v48 = vpack.c.bf16 %v15779_v3, %v15774_v0  ;;  %v19312_v0 = vld [vmem:[#allocation177_spill] sm:$0xff] }
 0x35f   : > { %10554 = vmatpush1.bf16.msra.mxu0 %v19279_v29  ;;  %v19285_v29 = vld [vmem:[#allocation109_spill] sm:$0xff] }
 0x360   : > { %10556 = vmatprep.subr.bf16.mxu0 %v19280_v36  ;;  %v10311_v36 = vpack.c.bf16 %v15797_v28, %v15792_v53  ;;  %v19309_v28 = vld [vmem:[#allocation175_spill] sm:$0xff] }
 0x361   : > { %10302 = vmatpush1.bf16.msra.mxu1 %v10301_v42  ;;  %v19284_v42 = vld [vmem:[#allocation103_spill] sm:$0xff] }
 0x362   : > { %10304 = vmatprep.subr.bf16.mxu1 %v10303_v18  ;;  %v10313_v18 = vpack.c.bf16 %v15843_v45, %v15823_v23  ;;  %v19292_v45 = vld [vmem:[#allocation120_spill] sm:$0xff] }
 0x363   : > { %10558 = vmatpush1.bf16.msra.mxu0 %v19282_v57  ;;  %v19287_v57 = vld [vmem:[#allocation116_spill] sm:$0xff] }
 0x364   : > { %10560 = vmatprep.subr.bf16.mxu0 %v19283_v21  ;;  %v10315_v21 = vpack.c.bf16 %v15869_v15, %v15848_v10  ;;  %v19293_v15 = vld [vmem:[#allocation129_spill] sm:$0xff] }
 0x365   : > { %10306 = vmatpush1.bf16.msra.mxu1 %v10305_v33  ;;  %v19286_v33 = vld [vmem:[#allocation112_spill] sm:$0xff] }
 0x366   : > { %10308 = vmatprep.subr.bf16.mxu1 %v10307_v6  ;;  %v10317_v6 = vpack.c.bf16 %v15881_v49, %v15876_v12  ;;  %v19304_v49 = vld [vmem:[#allocation297_spill] sm:$0xff] }
 0x367   : > { %10562 = vmatpush1.bf16.msra.mxu0 %v19284_v42  ;;  %v19288_v42 = vld [vmem:[#allocation117_spill] sm:$0xff] }
 0x368   : > { %10564 = vmatprep.subr.bf16.mxu0 %v19285_v29  ;;  %v19289_v29 = vld [vmem:[#allocation122_spill] sm:$0xff]  ;;  %v19305_v12 = vld [vmem:[#allocation173_spill] sm:$0xff] }
 0x369   : > { %10310 = vmatpush1.bf16.msra.mxu1 %v10309_v48  ;;  %v19290_v48 = vld [vmem:[#allocation300_spill] sm:$0xff] }
 0x36a   : > { %10312 = vmatprep.subr.bf16.mxu1 %v10311_v36  ;;  %v19291_v36 = vld [vmem:[#allocation127_spill] sm:$0xff] }
 0x36b   : > { %10566 = vmatpush1.bf16.msra.mxu0 %v19286_v33  ;;  %v19294_v33 = vld [vmem:[#allocation304_spill] sm:$0xff] }
 0x36c   : > { %10568 = vmatprep.subr.bf16.mxu0 %v19287_v57  ;;  %v19296_v57 = vld [vmem:[#allocation307_spill] sm:$0xff] }
 0x36d   : > { %10314 = vmatpush1.bf16.msra.mxu1 %v10313_v18  ;;  %v19295_v18 = vld [vmem:[#allocation123_spill] sm:$0xff] }
 0x36e   : > { %10316 = vmatprep.subr.bf16.mxu1 %v10315_v21  ;;  %v19297_v21 = vld [vmem:[#allocation309_spill] sm:$0xff] }
 0x36f   : > { %10570 = vmatpush1.bf16.msra.mxu0 %v19288_v42  ;;  %v19298_v42 = vld [vmem:[#allocation311_spill] sm:$0xff] }
 0x370   : > { %10572 = vmatprep.subr.bf16.mxu0 %v19289_v29  ;;  %v19299_v29 = vld [vmem:[#allocation212_spill] sm:$0xff] }
 0x371   : > { %10318 = vmatpush1.bf16.msra.mxu1 %v10317_v6  ;;  %v19300_v6 = vld [vmem:[#allocation214_spill] sm:$0xff] }
 0x372   : > { %10320 = vmatprep.subr.bf16.mxu1 %v19290_v48  ;;  %v19301_v48 = vld [vmem:[#allocation224_spill] sm:$0xff] }
 0x373   : > { %10574 = vmatpush1.bf16.msra.mxu0 %v19291_v36  ;;  %v19302_v36 = vld [vmem:[#allocation238_spill] sm:$0xff] }
 0x374   : > { %5291 = vmatmul.mubr.f32.vlgmr.msra.gmra.mrb[4].mxu1 %v19292_v45  ;;  %10576 = vmatprep.subr.bf16.mxu0 %v19293_v15  ;;  %v19303_v45 = vld [vmem:[#allocation295_spill] sm:$0xff] }
 0x375   : > { %10322 = vmatpush1.bf16.msra.mxu1 %v19294_v33  ;;  %5428 = vmatprep.mubr.f32.mxu1 %v19295_v18  ;;  %v7164_v15 = vrot.slane %v19303_v45, 7  ;;  %v7165_v33 = vrot.slane %v19304_v49, 7  ;;  %v19306_v18 = vld [vmem:[#allocation174_spill] sm:$0xff] }
 0x376   : > { %10324 = vmatprep.subr.bf16.mxu1 %v19296_v57 }
 0x379   : > { %10326 = vmatpush1.bf16.msra.mxu1 %v19297_v21  ;;  %v16049_v21 = vmul.f32 %v19303_v45, %v19303_v45 }
 0x37a   : > { %10328 = vmatprep.subr.bf16.mxu1 %v19298_v42 }
 0x37d   : > { %10330 = vmatpush1.bf16.msra.mxu1 %v19299_v29  ;;  %v16053_v29 = vmul.f32 %v19304_v49, %v19304_v49 }
 0x37e   : > { %10332 = vmatprep.subr.bf16.mxu1 %v19300_v6  ;;  %v3139_v6 = vpop.f32.mrb[2].mxu1 }
 0x37f   : > { %v16057_v42 = vand.u32 4294901760, %v3139_v6  ;;  %v3141_v57 = vpop.f32.mrb[3].mxu1  ;;  %v16059_v10 = vmul.f32 %v3139_v6, %v3139_v6 }
 0x380   : > { %v16064_v23 = vand.u32 4294901760, %v3141_v57  ;;  %v16067_v53 = vmul.f32 %v3141_v57, %v3141_v57  ;;  %v16070_v3 = vmul.f32 %v19304_v49, %v3141_v57 }
 0x381   : > { %10334 = vmatpush1.bf16.msra.mxu1 %v19301_v48  ;;  %v7168_v48 = vmul.f32 %v19303_v45, %v7164_v15  ;;  %v7173_v15 = vrot.slane %v3141_v57, 7 }
 0x382   : > { %10336 = vmatprep.subr.bf16.mxu1 %v19302_v36  ;;  %v7169_v36 = vmul.f32 %v19304_v49, %v7165_v33  ;;  %19308 = vst [vmem:[#allocation54_spill] sm:$0xff] %v16064_v23  ;;  %19310 = vst [vmem:[#allocation57_spill] sm:$0xff] %v16070_v3  ;;  %v16073_v33 = vsub.f32 %v3139_v6, %v16057_v42  ;;  %v16089_v3 = vadd.f32 %v16067_v53, %v16053_v29 }
 0x383   : > { %v7177_v17 = vmul.f32 %v7173_v15, %v3141_v57  ;;  %v19319_v15 = vld [vmem:[#allocation183_spill] sm:$0xff] }
 0x384   : > { %19311 = vst [vmem:[#allocation61_spill] sm:$0xff] %v16073_v33  ;;  %19314 = vst [vmem:[#allocation73_spill] sm:$0xff] %v16089_v3  ;;  %v19325_v3 = vld [vmem:[#allocation133_spill] sm:$0xff] }
 0x385   : > { %10338 = vmatpush1.bf16.msra.mxu1 %v19305_v12  ;;  %v7172_v12 = vrot.slane %v3139_v6, 7 }
 0x386   : > { %10340 = vmatprep.subr.bf16.mxu1 %v19306_v18  ;;  %v16062_v18 = vmul.f32 %v19303_v45, %v3139_v6  ;;  %v19316_v45 = vld [vmem:[#allocation179_spill] sm:$0xff] }
 0x387   : > { %v7176_v56 = vmul.f32 %v7172_v12, %v3139_v6  ;;  %v16096_v12 = vadd.f32 %v7177_v17, %v7169_v36  ;;  %v19318_v6 = vld [vmem:[#allocation180_spill] sm:$0xff]  ;;  %v19321_v17 = vld [vmem:[#allocation130_spill] sm:$0xff] }
 0x388   : > { %19307 = vst [vmem:[#allocation159_spill] sm:$0xff] %v16062_v18  ;;  %v16080_v18 = vadd.f32 %v16059_v10, %v16049_v21  ;;  %v19322_v36 = vld [vmem:[#allocation192_spill] sm:$0xff] }
 0x389   : > { %10342 = vmatpush1.bf16.msra.mxu1 %v19309_v28  ;;  %v16083_v28 = vsub.f32 %v3141_v57, %v16064_v23  ;;  %v16092_v24 = vadd.f32 %v7176_v56, %v7168_v48  ;;  %19317 = vst [vmem:[#allocation162_spill] sm:$0xff] %v16096_v12  ;;  %v19320_v48 = vld [vmem:[#allocation185_spill] sm:$0xff]  ;;  %v19323_v12 = vld [vmem:[#allocation132_spill] sm:$0xff] }
 0x38a   : > { %10344 = vmatprep.subr.bf16.mxu1 %v19312_v0  ;;  %19313 = vst [vmem:[#allocation66_spill] sm:$0xff] %v16080_v18  ;;  %v17506_v0 = vand.u32 4294901760, %v16073_v33 }
 0x38b   : > { %19315 = vst [vmem:[#allocation74_spill] sm:$0xff] %v16092_v24  ;;  %v17508_v18 = vand.u32 4294901760, %v16083_v28 }
 0x38c   : > { %v5977_v49 = vsub.f32 %v16073_v33, %v17506_v0  ;;  %v19324_v0 = vld [vmem:[#allocation193_spill] sm:$0xff]  ;;  %v19328_v33 = vld [vmem:[#allocation195_spill] sm:$0xff] }
 0x38d   : > { %10346 = vmatpush1.bf16.msra.mxu1 %v19316_v45  ;;  %v5971_v57 = vsub.f32 %v16083_v28, %v17508_v18  ;;  %v19326_v18 = vld [vmem:[#allocation194_spill] sm:$0xff] }
 0x38e   : > { %10348 = vmatprep.subr.bf16.mxu1 %v19318_v6  ;;  %v5978_v24 = vand.u32 4294901760, %v5977_v49  ;;  %v19329_v49 = vld [vmem:[#allocation45_spill] sm:$0xff] }
 0x38f   : > { %v5972_v56 = vand.u32 4294901760, %v5971_v57  ;;  %v19327_v57 = vld [vmem:[#allocation134_spill] sm:$0xff] }
 0x391   : > { %10350 = vmatpush1.bf16.msra.mxu1 %v19319_v15  ;;  %5973 = vmatprep.mubr.f32.mxu0 %v5972_v56  ;;  %v19331_v56 = vld [vmem:[#allocation135_spill] sm:$0xff] }
 0x392   : > { %10352 = vmatprep.subr.bf16.mxu1 %v19320_v48  ;;  %5979 = vmatmul.mubr.f32.vlgmr.msra.gmra.mrb[4].mxu0 %v5978_v24  ;;  %v19330_v24 = vld [vmem:[#allocation283_spill] sm:$0xff] }
 0x393   : > { %10578 = vmatpush1.bf16.msra.mxu0 %v19321_v17  ;;  %6370 = vmatprep.mubr.f32.mxu0 %v16064_v23  ;;  %v19332_v17 = vld [vmem:[#allocation201_spill] sm:$0xff]  ;;  %v19333_v23 = vld [vmem:[#allocation136_spill] sm:$0xff] }
 0x394   : > { %10580 = vmatprep.subr.bf16.mxu0 %v19323_v12  ;;  %v19334_v12 = vld [vmem:[#allocation207_spill] sm:$0xff] }
 0x395   : > { %10354 = vmatpush1.bf16.msra.mxu1 %v19322_v36  ;;  %v19355_v36 = vld [vmem:[#allocation81_spill] sm:$0xff] }
 0x396   : > { %10356 = vmatprep.subr.bf16.mxu1 %v19324_v0  ;;  %v19335_v0 = vld [vmem:[#allocation137_spill] sm:$0xff] }
 0x397   : > { %10582 = vmatpush1.bf16.msra.mxu0 %v19325_v3  ;;  %v19336_v3 = vld [vmem:[#allocation211_spill] sm:$0xff] }
 0x398   : > { %10584 = vmatprep.subr.bf16.mxu0 %v19327_v57  ;;  %v19338_v57 = vld [vmem:[#allocation220_spill] sm:$0xff] }
 0x399   : > { %10358 = vmatpush1.bf16.msra.mxu1 %v19326_v18  ;;  %v19337_v18 = vld [vmem:[#allocation138_spill] sm:$0xff] }
 0x39a   : > { %10360 = vmatprep.subr.bf16.mxu1 %v19328_v33  ;;  %v19339_v33 = vld [vmem:[#allocation139_spill] sm:$0xff] }
 0x39b   : > { %10586 = vmatpush1.bf16.msra.mxu0 %v19329_v49  ;;  %v19340_v49 = vld [vmem:[#allocation222_spill] sm:$0xff] }
 0x39c   : > { %10588 = vmatprep.subr.bf16.mxu0 %v19331_v56  ;;  %v19342_v56 = vld [vmem:[#allocation225_spill] sm:$0xff] }
 0x39d   : > { %10362 = vmatpush1.bf16.msra.mxu1 %v19330_v24  ;;  %v19341_v24 = vld [vmem:[#allocation140_spill] sm:$0xff] }
 0x39e   : > { %10364 = vmatprep.subr.bf16.mxu1 %v19332_v17  ;;  %v19343_v17 = vld [vmem:[#allocation141_spill] sm:$0xff] }
 0x39f   : > { %10590 = vmatpush1.bf16.msra.mxu0 %v19333_v23  ;;  %v19344_v23 = vld [vmem:[#allocation227_spill] sm:$0xff] }
 0x3a0   : > { %10592 = vmatprep.subr.bf16.mxu0 %v19335_v0  ;;  %v19346_v0 = vld [vmem:[#allocation228_spill] sm:$0xff] }
 0x3a1   : > { %10366 = vmatpush1.bf16.msra.mxu1 %v19334_v12  ;;  %v19345_v12 = vld [vmem:[#allocation76_spill] sm:$0xff] }
 0x3a2   : > { %10368 = vmatprep.subr.bf16.mxu1 %v19336_v3  ;;  %v19347_v3 = vld [vmem:[#allocation77_spill] sm:$0xff] }
 0x3a3   : > { %10594 = vmatpush1.bf16.msra.mxu0 %v19337_v18  ;;  %v19348_v18 = vld [vmem:[#allocation230_spill] sm:$0xff] }
 0x3a4   : > { %10596 = vmatprep.subr.bf16.mxu0 %v19339_v33  ;;  %v19349_v33 = vand.u32 4294901760, %v19230_v62 }
 0x3a5   : > { %10370 = vmatpush1.bf16.msra.mxu1 %v19338_v57 }
 0x3a6   : > { %10372 = vmatprep.subr.bf16.mxu1 %v19340_v49  ;;  %v19350_v49 = vand.u32 4294901760, %v19231_v60  ;;  %v19359_v60 = vld [vmem:[#allocation88_spill] sm:$0xff] }
 0x3a7   : > { %10598 = vmatpush1.bf16.msra.mxu0 %v19341_v24  ;;  %v19351_v24 = vld [vmem:[#allocation80_spill] sm:$0xff] }
 0x3a8   : > { %10600 = vmatprep.subr.bf16.mxu0 %v19343_v17  ;;  %v10383_v57 = vpack.c.bf16 %v19350_v49, %v19349_v33  ;;  %v19353_v17 = vand.u32 4294901760, %v19234_v35  ;;  %v19360_v49 = vand.u32 4294901760, %v15112_v52  ;;  %v19361_v35 = vand.u32 4294901760, %v15117_v32  ;;  %v19369_v32 = vld [vmem:[#allocation93_spill] sm:$0xff] }
 0x3a9   : > { %10374 = vmatpush1.bf16.msra.mxu1 %v19342_v56  ;;  %v19352_v56 = vld [vmem:[#allocation231_spill] sm:$0xff]  ;;  %v19368_v52 = vand.u32 4294901760, %v15163_v16  ;;  %v19376_v16 = vand.u32 4294901760, %v15196_v43 }
 0x3aa   : > { %10376 = vmatprep.subr.bf16.mxu1 %v19344_v23  ;;  %v19354_v23 = vand.u32 4294901760, %v19235_v22  ;;  %v10389_v33 = vpack.c.bf16 %v19361_v35, %v19360_v49  ;;  %v19362_v22 = vld [vmem:[#allocation89_spill] sm:$0xff]  ;;  %v19380_v35 = vand.u32 4294901760, %v15237_v61  ;;  %v19384_v43 = vld [vmem:[#allocation143_spill] sm:$0xff]  ;;  %v19388_v61 = vand.u32 4294901760, %v15270_v40 }
 0x3ab   : > { %10602 = vmatpush1.bf16.msra.mxu0 %v19345_v12  ;;  %v19400_v40 = vld [vmem:[#allocation155_spill] sm:$0xff] }
 0x3ac   : > { %10604 = vmatprep.subr.bf16.mxu0 %v19347_v3  ;;  %v10385_v12 = vpack.c.bf16 %v19354_v23, %v19353_v17  ;;  %v19356_v3 = vand.u32 4294901760, %v19236_v39  ;;  %v19364_v39 = vand.u32 4294901760, %v19240_v50  ;;  %v19366_v23 = vld [vmem:[#allocation92_spill] sm:$0xff] }
 0x3ad   : > { %10378 = vmatpush1.bf16.msra.mxu1 %v19346_v0  ;;  %v19358_v0 = vld [vmem:[#allocation124_spill] sm:$0xff] }
 0x3ae   : > { %10380 = vmatprep.subr.bf16.mxu1 %v19348_v18  ;;  %v19357_v18 = vand.u32 4294901760, %v19072_v46  ;;  %v19365_v46 = vld [vmem:[#allocation114_spill] sm:$0xff]  ;;  %v19372_v50 = vld [vmem:[#allocation108_spill] sm:$0xff] }
 0x3af   : > { %10606 = vmatpush1.bf16.msra.mxu0 %v19351_v24  ;;  %v19370_v24 = vand.u32 4294901760, %v15168_v5  ;;  %v19378_v5 = vld [vmem:[#allocation23_spill] sm:$0xff] }
 0x3b0   : > { %10608 = vmatprep.subr.bf16.mxu0 %v19355_v36  ;;  %v10387_v62 = vpack.c.bf16 %v19357_v18, %v19356_v3  ;;  %v19363_v36 = vand.u32 4294901760, %v15122_v55  ;;  %v19371_v55 = vand.u32 4294901760, %v15173_v34  ;;  %v19374_v3 = vand.u32 4294901760, %v15191_v58 }
 0x3b1   : > { %10382 = vmatpush1.bf16.msra.mxu1 %v19352_v56  ;;  %v19379_v34 = vand.u32 4294901760, %v15219_v37  ;;  %v19382_v58 = vand.u32 4294901760, %v19247_v11  ;;  %v19387_v37 = vld [vmem:[#allocation144_spill] sm:$0xff]  ;;  %v19390_v11 = vld [vmem:[#allocation149_spill] sm:$0xff] }
 0x3b2   : > { %10384 = vmatprep.subr.bf16.mxu1 %v10383_v57  ;;  %v10391_v57 = vpack.c.bf16 %v19364_v39, %v19363_v36  ;;  %v10395_v17 = vpack.c.bf16 %v19371_v55, %v19370_v24  ;;  %v19386_v39 = vand.u32 4294901760, %v15265_v59  ;;  %v19396_v59 = vld [vmem:[#allocation204_spill] sm:$0xff] }
 0x3b3   : > { %10610 = vmatpush1.bf16.msra.mxu0 %v19359_v60  ;;  %v19377_v60 = vand.u32 4294901760, %v15205_v44  ;;  %v19385_v44 = vand.u32 4294901760, %v15260_v47  ;;  %v19395_v47 = vld [vmem:[#allocation152_spill] sm:$0xff]  ;;  %v19397_v55 = vand.u32 4294901760, %v19396_v59  ;;  %v19431_v59 = vand.u32 4294901760, %v15662_v25  ;;  %v19440_v25 = vld [vmem:[#allocation237_spill] sm:$0xff] }
 0x3b4   : > { %5432 = vmatmul.mubr.f32.vlgmr.msra.gmra.mrb[4].mxu1 %v19358_v0  ;;  %10612 = vmatprep.subr.bf16.mxu0 %v19362_v22  ;;  %v19367_v0 = vand.u32 4294901760, %v15145_v63  ;;  %v19375_v63 = vld [vmem:[#allocation142_spill] sm:$0xff]  ;;  %v19383_v22 = vand.u32 4294901760, %v19248_v7  ;;  %v19391_v7 = vld [vmem:[#allocation199_spill] sm:$0xff] }
 0x3b5   : > { %10386 = vmatpush1.bf16.msra.mxu1 %v10385_v12  ;;  %5695 = vmatprep.mubr.f32.mxu1 %v19365_v46  ;;  %v19373_v12 = vand.u32 4294901760, %v15186_v2  ;;  %v10399_v49 = vpack.c.bf16 %v19377_v60, %v19376_v16  ;;  %v19381_v2 = vld [vmem:[#allocation26_spill] sm:$0xff]  ;;  %v19404_v16 = vld [vmem:[#allocation205_spill] sm:$0xff] }
 0x3b6   : > { %10388 = vmatprep.subr.bf16.mxu1 %v10387_v62  ;;  %v10393_v18 = vpack.c.bf16 %v19368_v52, %v19367_v0  ;;  %v10403_v36 = vpack.c.bf16 %v19383_v22, %v19382_v58  ;;  %v19392_v52 = vand.u32 4294901760, %v19391_v7  ;;  %v19405_v60 = vand.u32 4294901760, %v19404_v16  ;;  %v19413_v22 = vld [vmem:[#allocation215_spill] sm:$0xff] }
 0x3b7   : > { %10614 = vmatpush1.bf16.msra.mxu0 %v19366_v23  ;;  %v10397_v62 = vpack.c.bf16 %v19374_v3, %v19373_v12  ;;  %v19389_v23 = vand.u32 4294901760, %v19251_v54  ;;  %v19401_v54 = vand.u32 4294901760, %v19259_v14  ;;  %v19402_v3 = vand.u32 4294901760, %v19260_v19 }
 0x3b8   : > { %10616 = vmatprep.subr.bf16.mxu0 %v19369_v32  ;;  %v19411_v14 = vand.u32 4294901760, %v19266_v27  ;;  %v19412_v58 = vand.u32 4294901760, %v19267_v31  ;;  %v19419_v31 = vand.u32 4294901760, %v19171_v51  ;;  %v19424_v7 = vand.u32 4294901760, %v19275_v1  ;;  %v19429_v51 = vld [vmem:[#allocation36_spill] sm:$0xff] }
 0x3b9   : > { %10390 = vmatpush1.bf16.msra.mxu1 %v10389_v33  ;;  %v10401_v33 = vpack.c.bf16 %v19380_v35, %v19379_v34  ;;  %v10407_v0 = vpack.c.bf16 %v19389_v23, %v19388_v61  ;;  %v19408_v35 = vld [vmem:[#allocation158_spill] sm:$0xff]  ;;  %v19434_v1 = vand.u32 4294901760, %v19278_v4  ;;  %v19445_v4 = vld [vmem:[#allocation48_spill] sm:$0xff] }
 0x3ba   : > { %10392 = vmatprep.subr.bf16.mxu1 %v10391_v57  ;;  %v10405_v57 = vpack.c.bf16 %v19386_v39, %v19385_v44  ;;  %v19415_v44 = vld [vmem:[#allocation29_spill] sm:$0xff]  ;;  %v19416_v39 = vld [vmem:[#allocation31_spill] sm:$0xff] }
 0x3bb   : > { %10618 = vmatpush1.bf16.msra.mxu0 %v19372_v50 }
 0x3bc   : > { %10620 = vmatprep.subr.bf16.mxu0 %v19375_v63  ;;  %v19403_v63 = vld [vmem:[#allocation156_spill] sm:$0xff] }
 0x3bd   : > { %10394 = vmatpush1.bf16.msra.mxu1 %v10393_v18  ;;  %v19393_v18 = vld [vmem:[#allocation203_spill] sm:$0xff] }
 0x3be   : > { %10396 = vmatprep.subr.bf16.mxu1 %v10395_v17  ;;  %v19394_v32 = vand.u32 4294901760, %v19393_v18  ;;  %v19398_v17 = vld [vmem:[#allocation286_spill] sm:$0xff] }
 0x3bf   : > { %10622 = vmatpush1.bf16.msra.mxu0 %v19378_v5  ;;  %v19399_v50 = vand.u32 4294901760, %v19398_v17 }
 0x3c0   : > { %10624 = vmatprep.subr.bf16.mxu0 %v19381_v2  ;;  %v10409_v24 = vpack.c.bf16 %v19394_v32, %v19392_v52  ;;  %v19410_v2 = vand.u32 4294901760, %v19265_v26  ;;  %v19418_v26 = vand.u32 4294901760, %v19271_v13  ;;  %v19425_v52 = vand.u32 4294901760, %v15577_v20  ;;  %v19427_v13 = vld [vmem:[#allocation232_spill] sm:$0xff] }
 0x3c1   : > { %10398 = vmatpush1.bf16.msra.mxu1 %v10397_v62  ;;  %v10411_v12 = vpack.c.bf16 %v19399_v50, %v19397_v55  ;;  %v10413_v62 = vpack.c.bf16 %v19402_v3, %v19401_v54  ;;  %v19428_v32 = vand.u32 4294901760, %v19427_v13  ;;  %v19432_v55 = vand.u32 4294901760, %v15667_v9  ;;  %v19438_v54 = vld [vmem:[#allocation235_spill] sm:$0xff] }
 0x3c2   : > { %10400 = vmatprep.subr.bf16.mxu1 %v10399_v49  ;;  %v19406_v49 = vld [vmem:[#allocation206_spill] sm:$0xff]  ;;  %v10417_v19 = vpack.c.bf16 %v19411_v14, %v19410_v2  ;;  %v10425_v18 = vpack.c.bf16 %v19425_v52, %v19424_v7  ;;  %v19433_v20 = vand.u32 4294901760, %v15680_v8  ;;  %v19439_v3 = vand.u32 4294901760, %v19438_v54  ;;  %v19444_v8 = vld [vmem:[#allocation47_spill] sm:$0xff]  ;;  %v19466_v7 = vld [vmem:[#allocation253_spill] sm:$0xff] }
 0x3c3   : > { %10626 = vmatpush1.bf16.msra.mxu0 %v19384_v43  ;;  %v19407_v5 = vand.u32 4294901760, %v19406_v49  ;;  %v10429_v17 = vpack.c.bf16 %v19432_v55, %v19431_v59  ;;  %v19441_v9 = vand.u32 4294901760, %v19440_v25  ;;  %v19446_v49 = vld [vmem:[#allocation242_spill] sm:$0xff]  ;;  %v19452_v14 = vld [vmem:[#allocation247_spill] sm:$0xff]  ;;  %v19467_v52 = vand.u32 4294901760, %v19466_v7  ;;  %v19475_v55 = vld [vmem:[#allocation304_spill] sm:$0xff] }
 0x3c4   : > { %10628 = vmatprep.subr.bf16.mxu0 %v19387_v37  ;;  %v19420_v37 = vld [vmem:[#allocation303_spill] sm:$0xff]  ;;  %v10431_v50 = vpack.c.bf16 %v19434_v1, %v19433_v20  ;;  %v19478_v1 = vld [vmem:[#allocation84_spill] sm:$0xff]  ;;  %v19486_v25 = vld [vmem:[#allocation101_spill] sm:$0xff] }
 0x3c5   : > { %10402 = vmatpush1.bf16.msra.mxu1 %v10401_v33  ;;  %v10415_v34 = vpack.c.bf16 %v19407_v5, %v19405_v60  ;;  %v19409_v33 = vld [vmem:[#allocation28_spill] sm:$0xff]  ;;  %v19421_v61 = vand.u32 4294901760, %v19420_v37  ;;  %v19447_v5 = vand.u32 4294901760, %v19446_v49  ;;  %v19474_v59 = vld [vmem:[#allocation111_spill] sm:$0xff] }
 0x3c6   : > { %10404 = vmatprep.subr.bf16.mxu1 %v10403_v36  ;;  %v19414_v36 = vand.u32 4294901760, %v19413_v22  ;;  %v19454_v22 = vld [vmem:[#allocation52_spill] sm:$0xff]  ;;  %v19477_v20 = vld [vmem:[#allocation307_spill] sm:$0xff] }
 0x3c7   : > { %10630 = vmatpush1.bf16.msra.mxu0 %v19390_v11  ;;  %v10423_v23 = vpack.c.bf16 %v19421_v61, %v19419_v31  ;;  %v19423_v11 = vld [vmem:[#allocation35_spill] sm:$0xff]  ;;  %v19462_v37 = vld [vmem:[#allocation252_spill] sm:$0xff] }
 0x3c8   : > { %10632 = vmatprep.subr.bf16.mxu0 %v19395_v47  ;;  %v10419_v43 = vpack.c.bf16 %v19414_v36, %v19412_v58  ;;  %v19430_v47 = vld [vmem:[#allocation39_spill] sm:$0xff]  ;;  %v19455_v36 = vld [vmem:[#allocation58_spill] sm:$0xff]  ;;  %v19463_v61 = vand.u32 4294901760, %v19462_v37  ;;  %v19483_v54 = vld [vmem:[#allocation212_spill] sm:$0xff] }
 0x3c9   : > { %10406 = vmatpush1.bf16.msra.mxu1 %v10405_v57  ;;  %v19417_v57 = vand.u32 4294901760, %v19166_v38  ;;  %v19426_v38 = vand.u32 4294901760, %v15622_v41  ;;  %v19435_v41 = vld [vmem:[#allocation41_spill] sm:$0xff]  ;;  %v19494_v49 = vld [vmem:[#allocation115_spill] sm:$0xff] }
 0x3ca   : > { %10408 = vmatprep.subr.bf16.mxu1 %v10407_v0  ;;  %v19422_v0 = vld [vmem:[#allocation32_spill] sm:$0xff]  ;;  %v19510_v37 = vld [vmem:[#allocation33_spill] sm:$0xff]  ;;  %v19517_v7 = vld [vmem:[#allocation207_spill] sm:$0xff] }
 0x3cb   : > { %10634 = vmatpush1.bf16.msra.mxu0 %v19400_v40  ;;  %v10421_v27 = vpack.c.bf16 %v19418_v26, %v19417_v57  ;;  %v19437_v40 = vand.u32 4294901760, %v15711_v30  ;;  %v19450_v30 = vld [vmem:[#allocation246_spill] sm:$0xff] }
 0x3cc   : > { %10636 = vmatprep.subr.bf16.mxu0 %v19403_v63  ;;  %v19442_v63 = vld [vmem:[#allocation240_spill] sm:$0xff]  ;;  %v19451_v2 = vand.u32 4294901760, %v19450_v30 }
 0x3cd   : > { %10410 = vmatpush1.bf16.msra.mxu1 %v10409_v24  ;;  %v10427_v24 = vpack.c.bf16 %v19428_v32, %v19426_v38  ;;  %v19443_v16 = vand.u32 4294901760, %v19442_v63  ;;  %v19470_v32 = vld [vmem:[#allocation68_spill] sm:$0xff]  ;;  %v19489_v63 = vld [vmem:[#allocation238_spill] sm:$0xff] }
 0x3ce   : > { %10412 = vmatprep.subr.bf16.mxu1 %v10411_v12  ;;  %v19436_v12 = vld [vmem:[#allocation42_spill] sm:$0xff] }
 0x3cf   : > { %10638 = vmatpush1.bf16.msra.mxu0 %v19408_v35  ;;  %v10435_v60 = vpack.c.bf16 %v19443_v16, %v19441_v9  ;;  %v19487_v9 = vld [vmem:[#allocation224_spill] sm:$0xff]  ;;  %v19490_v16 = vld [vmem:[#allocation107_spill] sm:$0xff] }
 0x3d0   : > { %10640 = vmatprep.subr.bf16.mxu0 %v19409_v33 }
 0x3d1   : > { %10414 = vmatpush1.bf16.msra.mxu1 %v10413_v62  ;;  %v10433_v62 = vpack.c.bf16 %v19439_v3, %v19437_v40  ;;  %v19482_v40 = vld [vmem:[#allocation98_spill] sm:$0xff]  ;;  %v19484_v3 = vld [vmem:[#allocation100_spill] sm:$0xff] }
 0x3d2   : > { %10416 = vmatprep.subr.bf16.mxu1 %v10415_v34  ;;  %6372 = vmatmul.mubr.f32.vlgmr.msra.gmra.mrb[4].mxu0 %v16057_v42  ;;  %v19448_v34 = vld [vmem:[#allocation243_spill] sm:$0xff] }
 0x3d3   : > { %10642 = vmatpush1.bf16.msra.mxu0 %v19415_v44  ;;  %6572 = vmatprep.mubr.f32.mxu0 %v16083_v28  ;;  %v19449_v35 = vand.u32 4294901760, %v19448_v34 }
 0x3d4   : > { %10644 = vmatprep.subr.bf16.mxu0 %v19416_v39  ;;  %v19458_v39 = vld [vmem:[#allocation250_spill] sm:$0xff] }
 0x3d5   : > { %10418 = vmatpush1.bf16.msra.mxu1 %v10417_v19  ;;  %v10437_v33 = vpack.c.bf16 %v19449_v35, %v19447_v5  ;;  %v19453_v19 = vand.u32 4294901760, %v19452_v14  ;;  %v19459_v57 = vand.u32 4294901760, %v19458_v39  ;;  %v19502_v39 = vld [vmem:[#allocation61_spill] sm:$0xff] }
 0x3d6   : > { %10420 = vmatprep.subr.bf16.mxu1 %v10419_v43  ;;  %v19456_v43 = vld [vmem:[#allocation249_spill] sm:$0xff] }
 0x3d7   : > { %10646 = vmatpush1.bf16.msra.mxu0 %v19422_v0  ;;  %v10439_v58 = vpack.c.bf16 %v19453_v19, %v19451_v2  ;;  %v19457_v44 = vand.u32 4294901760, %v19456_v43  ;;  %v19464_v0 = vld [vmem:[#allocation63_spill] sm:$0xff]  ;;  %v19496_v2 = vld [vmem:[#allocation118_spill] sm:$0xff]  ;;  %v19500_v43 = vld [vmem:[#allocation128_spill] sm:$0xff] }
 0x3d8   : > { %10648 = vmatprep.subr.bf16.mxu0 %v19423_v11  ;;  %v19465_v11 = vld [vmem:[#allocation64_spill] sm:$0xff] }
 0x3d9   : > { %10422 = vmatpush1.bf16.msra.mxu1 %v10421_v27  ;;  %v10441_v26 = vpack.c.bf16 %v19459_v57, %v19457_v44  ;;  %v19460_v27 = vld [vmem:[#allocation251_spill] sm:$0xff]  ;;  %v19501_v44 = vld [vmem:[#allocation22_spill] sm:$0xff]  ;;  %v19503_v57 = vld [vmem:[#allocation25_spill] sm:$0xff] }
 0x3da   : > { %10424 = vmatprep.subr.bf16.mxu1 %v10423_v23  ;;  %v19461_v31 = vand.u32 4294901760, %v19460_v27  ;;  %v19506_v27 = vld [vmem:[#allocation27_spill] sm:$0xff] }
 0x3db   : > { %10650 = vmatpush1.bf16.msra.mxu0 %v19429_v51  ;;  %v19472_v51 = vld [vmem:[#allocation300_spill] sm:$0xff] }
 0x3dc   : > { %10652 = vmatprep.subr.bf16.mxu0 %v19430_v47  ;;  %v10443_v23 = vpack.c.bf16 %v19463_v61, %v19461_v31  ;;  %v19473_v47 = vld [vmem:[#allocation79_spill] sm:$0xff]  ;;  %v19508_v31 = vld [vmem:[#allocation30_spill] sm:$0xff] }
 0x3dd   : > { %10426 = vmatpush1.bf16.msra.mxu1 %v10425_v18  ;;  %v19468_v18 = vld [vmem:[#allocation239_spill] sm:$0xff]  ;;  %v19512_v61 = vld [vmem:[#allocation34_spill] sm:$0xff] }
 0x3de   : > { %10428 = vmatprep.subr.bf16.mxu1 %v10427_v24  ;;  %v19469_v38 = vand.u32 4294901760, %v19468_v18  ;;  %v19471_v24 = vld [vmem:[#allocation72_spill] sm:$0xff]  ;;  %v19519_v18 = vld [vmem:[#allocation211_spill] sm:$0xff] }
 0x3df   : > { %10654 = vmatpush1.bf16.msra.mxu0 %v19435_v41  ;;  %v19480_v41 = vld [vmem:[#allocation87_spill] sm:$0xff] }
 0x3e0   : > { %10656 = vmatprep.subr.bf16.mxu0 %v19436_v12  ;;  %v10445_v13 = vpack.c.bf16 %v19469_v38, %v19467_v52  ;;  %v19481_v12 = vld [vmem:[#allocation311_spill] sm:$0xff]  ;;  %v19518_v52 = vld [vmem:[#allocation40_spill] sm:$0xff] }
 0x3e1   : > { %10430 = vmatpush1.bf16.msra.mxu1 %v10429_v17  ;;  %v19476_v17 = vld [vmem:[#allocation82_spill] sm:$0xff]  ;;  %v19520_v38 = vld [vmem:[#allocation43_spill] sm:$0xff] }
 0x3e2   : > { %10432 = vmatprep.subr.bf16.mxu1 %v10431_v50  ;;  %v19479_v50 = vld [vmem:[#allocation309_spill] sm:$0xff] }
 0x3e3   : > { %10658 = vmatpush1.bf16.msra.mxu0 %v19444_v8  ;;  %v19492_v8 = vld [vmem:[#allocation113_spill] sm:$0xff] }
 0x3e4   : > { %10660 = vmatprep.subr.bf16.mxu0 %v19445_v4  ;;  %v19493_v4 = vld [vmem:[#allocation174_spill] sm:$0xff] }
 0x3e5   : > { %10434 = vmatpush1.bf16.msra.mxu1 %v10433_v62  ;;  %v19485_v62 = vld [vmem:[#allocation214_spill] sm:$0xff] }
 0x3e6   : > { %10436 = vmatprep.subr.bf16.mxu1 %v10435_v60  ;;  %v19491_v60 = vld [vmem:[#allocation173_spill] sm:$0xff] }
 0x3e7   : > { %10662 = vmatpush1.bf16.msra.mxu0 %v19454_v22  ;;  %v19498_v22 = vld [vmem:[#allocation121_spill] sm:$0xff] }
 0x3e8   : > { %10664 = vmatprep.subr.bf16.mxu0 %v19455_v36  ;;  %v19499_v36 = vld [vmem:[#allocation126_spill] sm:$0xff] }
 0x3e9   : > { %10438 = vmatpush1.bf16.msra.mxu1 %v10437_v33  ;;  %v19495_v33 = vld [vmem:[#allocation175_spill] sm:$0xff] }
 0x3ea   : > { %10440 = vmatprep.subr.bf16.mxu1 %v10439_v58  ;;  %v19497_v58 = vld [vmem:[#allocation177_spill] sm:$0xff] }
 0x3eb   : > { %10666 = vmatpush1.bf16.msra.mxu0 %v19464_v0  ;;  %v19515_v0 = vld [vmem:[#allocation201_spill] sm:$0xff] }
 0x3ec   : > { %10668 = vmatprep.subr.bf16.mxu0 %v19465_v11  ;;  %v19516_v11 = vld [vmem:[#allocation38_spill] sm:$0xff] }
 0x3ed   : > { %10442 = vmatpush1.bf16.msra.mxu1 %v10441_v26  ;;  %v19504_v26 = vand.u32 4294901760, %v16083_v28  ;;  %v19514_v28 = vld [vmem:[#allocation37_spill] sm:$0xff] }
 0x3ee   : > { %10444 = vmatprep.subr.bf16.mxu1 %v10443_v23  ;;  %v19513_v23 = vld [vmem:[#allocation283_spill] sm:$0xff] }
 0x3ef   : > { %10670 = vmatpush1.bf16.msra.mxu0 %v19470_v32  ;;  %v19522_v32 = vld [vmem:[#allocation44_spill] sm:$0xff] }
 0x3f0   : > { %10672 = vmatprep.subr.bf16.mxu0 %v19471_v24  ;;  %v19523_v24 = vld [vmem:[#allocation222_spill] sm:$0xff] }
 0x3f1   : > { %10446 = vmatpush1.bf16.msra.mxu1 %v10445_v13  ;;  %v19521_v13 = vld [vmem:[#allocation220_spill] sm:$0xff] }
 0x3f2   : > { %10448 = vmatprep.subr.bf16.mxu1 %v19472_v51  ;;  %v19524_v51 = vld [vmem:[#allocation51_spill] sm:$0xff] }
 0x3f3   : > { %10674 = vmatpush1.bf16.msra.mxu0 %v19473_v47  ;;  %v19525_v47 = vld [vmem:[#allocation225_spill] sm:$0xff] }
 0x3f4   : > { %5697 = vmatmul.mubr.f32.vlgmr.msra.gmra.mrb[4].mxu1 %v19474_v59  ;;  %10676 = vmatprep.subr.bf16.mxu0 %v19476_v17  ;;  %v19527_v17 = vld [vmem:[#allocation227_spill] sm:$0xff] }
 0x3f5   : > { %10450 = vmatpush1.bf16.msra.mxu1 %v19475_v55  ;;  %5832 = vmatprep.mubr.f32.mxu1 %v19365_v46  ;;  %v19488_v46 = vld [vmem:[#allocation106_spill] sm:$0xff]  ;;  %v19526_v55 = vld [vmem:[#allocation53_spill] sm:$0xff] }
 0x3f6   : > { %10452 = vmatprep.subr.bf16.mxu1 %v19477_v20  ;;  %v19528_v20 = vld [vmem:[#allocation59_spill] sm:$0xff] }
 0x3f7   : > { %10678 = vmatpush1.bf16.msra.mxu0 %v19478_v1  ;;  %v19529_v1 = vld [vmem:[#allocation228_spill] sm:$0xff] }
 0x3f8   : > { %10680 = vmatprep.subr.bf16.mxu0 %v19480_v41  ;;  %v19531_v41 = vld [vmem:[#allocation230_spill] sm:$0xff] }
 0x3f9   : > { %10454 = vmatpush1.bf16.msra.mxu1 %v19479_v50  ;;  %v19530_v50 = vld [vmem:[#allocation60_spill] sm:$0xff] }
 0x3fa   : > { %10456 = vmatprep.subr.bf16.mxu1 %v19481_v12  ;;  %v19532_v12 = vld [vmem:[#allocation67_spill] sm:$0xff] }
 0x3fb   : > { %10682 = vmatpush1.bf16.msra.mxu0 %v19482_v40  ;;  %v19533_v40 = vld [vmem:[#allocation69_spill] sm:$0xff] }
 0x3fc   : > { %10684 = vmatprep.subr.bf16.mxu0 %v19484_v3  ;;  %v19535_v3 = vld [vmem:[#allocation78_spill] sm:$0xff] }
 0x3fd   : > { %10458 = vmatpush1.bf16.msra.mxu1 %v19483_v54  ;;  %v19534_v54 = vld [vmem:[#allocation75_spill] sm:$0xff] }
 0x3fe   : > { %10460 = vmatprep.subr.bf16.mxu1 %v19485_v62  ;;  %v19536_v62 = vld [vmem:[#allocation83_spill] sm:$0xff] }
 0x3ff   : > { %10686 = vmatpush1.bf16.msra.mxu0 %v19486_v25  ;;  %v19537_v25 = vld [vmem:[#allocation85_spill] sm:$0xff] }
 0x400   : > { %10688 = vmatprep.subr.bf16.mxu0 %v19488_v46  ;;  %v19539_v46 = vld [vmem:[#allocation91_spill] sm:$0xff] }
 0x401   : > { %10462 = vmatpush1.bf16.msra.mxu1 %v19487_v9  ;;  %v19538_v9 = vld [vmem:[#allocation86_spill] sm:$0xff] }
 0x402   : > { %10464 = vmatprep.subr.bf16.mxu1 %v19489_v63  ;;  %v19540_v63 = vld [vmem:[#allocation99_spill] sm:$0xff] }
 0x403   : > { %10690 = vmatpush1.bf16.msra.mxu0 %v19490_v16  ;;  %v19541_v16 = vld [vmem:[#allocation102_spill] sm:$0xff] }
 0x404   : > { %10692 = vmatprep.subr.bf16.mxu0 %v19492_v8  ;;  %v19545_v8 = vld [vmem:[#allocation116_spill] sm:$0xff] }
 0x405   : > { %10466 = vmatpush1.bf16.msra.mxu1 %v19491_v60  ;;  %v19543_v60 = vld [vmem:[#allocation109_spill] sm:$0xff] }
 0x406   : > { %10468 = vmatprep.subr.bf16.mxu1 %v19493_v4  ;;  %v19546_v4 = vld [vmem:[#allocation117_spill] sm:$0xff] }
 0x407   : > { %10694 = vmatpush1.bf16.msra.mxu0 %v19494_v49  ;;  %v19547_v49 = vld [vmem:[#allocation122_spill] sm:$0xff] }
 0x408   : > { %10696 = vmatprep.subr.bf16.mxu0 %v19496_v2  ;;  %v19549_v2 = vld [vmem:[#allocation110_spill] sm:$0xff] }
 0x409   : > { %v16327_v5 = vpop.f32.mrb[2].mxu0  ;;  %10470 = vmatpush1.bf16.msra.mxu1 %v19495_v33  ;;  %v19548_v33 = vld [vmem:[#allocation127_spill] sm:$0xff] }
 0x40a   : > { %v16331_v34 = vmul.f32 %v16049_v21, %v16327_v5  ;;  %v16335_v35 = vmul.f32 %v16059_v10, %v16327_v5  ;;  %v16338_v30 = vpop.f32.mrb[3].mxu0  ;;  %10472 = vmatprep.subr.bf16.mxu1 %v19497_v58  ;;  %v19550_v58 = vand.u32 4294901760, %v19502_v39 }
 0x40b   : > { %v16343_v14 = vmul.f32 %v16053_v29, %v16338_v30  ;;  %v16347_v19 = vmul.f32 %v16067_v53, %v16338_v30  ;;  %10698 = vmatpush1.bf16.msra.mxu0 %v19498_v22  ;;  %v19551_v22 = vld [vmem:[#allocation24_spill] sm:$0xff] }
 0x40c   : > { %10700 = vmatprep.subr.bf16.mxu0 %v19499_v36  ;;  %v19552_v36 = vld [vmem:[#allocation54_spill] sm:$0xff] }
 0x40d   : > { %10474 = vmatpush1.bf16.msra.mxu1 %v19316_v45  ;;  %v19505_v45 = vld [vmem:[#allocation192_spill] sm:$0xff] }
 0x40e   : > { %10476 = vmatprep.subr.bf16.mxu1 %v19318_v6  ;;  %v19507_v6 = vld [vmem:[#allocation193_spill] sm:$0xff] }
 0x40f   : > { %10702 = vmatpush1.bf16.msra.mxu0 %v19500_v43  ;;  %v19553_v43 = vld [vmem:[#allocation145_spill] sm:$0xff] }
 0x410   : > { %10704 = vmatprep.subr.bf16.mxu0 %v19501_v44 }
 0x411   : > { %10478 = vmatpush1.bf16.msra.mxu1 %v19319_v15  ;;  %v19509_v15 = vld [vmem:[#allocation194_spill] sm:$0xff] }
 0x412   : > { %10480 = vmatprep.subr.bf16.mxu1 %v19320_v48  ;;  %6575 = vmatmul.mubr.f32.vlgmr.msra.gmra.mrb[4].mxu0 %v19502_v39  ;;  %v19511_v48 = vld [vmem:[#allocation195_spill] sm:$0xff]  ;;  %v19560_v39 = vld [vmem:[#allocation154_spill] sm:$0xff] }
 0x413   : > { %10706 = vmatpush1.bf16.msra.mxu0 %v19503_v57  ;;  %6712 = vmatprep.mubr.f32.mxu0 %v19504_v26  ;;  %v19554_v26 = vld [vmem:[#allocation146_spill] sm:$0xff] }
 0x414   : > { %10708 = vmatprep.subr.bf16.mxu0 %v19506_v27 }
 0x415   : > { %10482 = vmatpush1.bf16.msra.mxu1 %v19505_v45  ;;  %v19555_v45 = vld [vmem:[#allocation147_spill] sm:$0xff] }
 0x416   : > { %10484 = vmatprep.subr.bf16.mxu1 %v19507_v6  ;;  %v19556_v6 = vld [vmem:[#allocation148_spill] sm:$0xff] }
 0x417   : > { %10710 = vmatpush1.bf16.msra.mxu0 %v19508_v31 }
 0x418   : > { %10712 = vmatprep.subr.bf16.mxu0 %v19510_v37 }
 0x419   : > { %10486 = vmatpush1.bf16.msra.mxu1 %v19509_v15  ;;  %v19557_v15 = vld [vmem:[#allocation150_spill] sm:$0xff] }
 0x41a   : > { %10488 = vmatprep.subr.bf16.mxu1 %v19511_v48  ;;  %v19558_v48 = vld [vmem:[#allocation151_spill] sm:$0xff] }
 0x41b   : > { %10714 = vmatpush1.bf16.msra.mxu0 %v19512_v61 }
 0x41c   : > { %10716 = vmatprep.subr.bf16.mxu0 %v19514_v28 }
 0x41d   : > { %10490 = vmatpush1.bf16.msra.mxu1 %v19513_v23  ;;  %v19559_v23 = vld [vmem:[#allocation153_spill] sm:$0xff] }
 0x41e   : > { %10492 = vmatprep.subr.bf16.mxu1 %v19515_v0  ;;  %v19561_v0 = vld [vmem:[#allocation157_spill] sm:$0xff] }
 0x41f   : > { %10718 = vmatpush1.bf16.msra.mxu0 %v19516_v11 }
 0x420   : > { %10720 = vmatprep.subr.bf16.mxu0 %v19518_v52 }
 0x421   : > { %10494 = vmatpush1.bf16.msra.mxu1 %v19517_v7  ;;  %v19562_v7 = vld [vmem:[#allocation46_spill] sm:$0xff] }
 0x422   : > { %10496 = vmatprep.subr.bf16.mxu1 %v19519_v18  ;;  %v19563_v18 = vld [vmem:[#allocation49_spill] sm:$0xff] }
 0x423   : > { %10722 = vmatpush1.bf16.msra.mxu0 %v19520_v38 }
 0x424   : > { %10724 = vmatprep.subr.bf16.mxu0 %v19522_v32 }
 0x425   : > { %10498 = vmatpush1.bf16.msra.mxu1 %v19521_v13  ;;  %v19564_v13 = vld [vmem:[#allocation50_spill] sm:$0xff] }
 0x426   : > { %10500 = vmatprep.subr.bf16.mxu1 %v19523_v24  ;;  %v19565_v24 = vld [vmem:[#allocation55_spill] sm:$0xff] }
 0x427   : > { %10726 = vmatpush1.bf16.msra.mxu0 %v19524_v51 }
 0x428   : > { %10728 = vmatprep.subr.bf16.mxu0 %v19526_v55 }
 0x429   : > { %10502 = vmatpush1.bf16.msra.mxu1 %v19525_v47  ;;  %v19566_v47 = vld [vmem:[#allocation56_spill] sm:$0xff] }
 0x42a   : > { %10504 = vmatprep.subr.bf16.mxu1 %v19527_v17  ;;  %v19567_v17 = vld [vmem:[#allocation62_spill] sm:$0xff] }
 0x42b   : > { %10730 = vmatpush1.bf16.msra.mxu0 %v19528_v20 }
 0x42c   : > { %10732 = vmatprep.subr.bf16.mxu0 %v19530_v50 }
 0x42d   : > { %10506 = vmatpush1.bf16.msra.mxu1 %v19529_v1  ;;  %v19568_v1 = vld [vmem:[#allocation65_spill] sm:$0xff] }
 0x42e   : > { %10508 = vmatprep.subr.bf16.mxu1 %v19531_v41  ;;  %v19569_v41 = vld [vmem:[#allocation70_spill] sm:$0xff] }
 0x42f   : > { %10734 = vmatpush1.bf16.msra.mxu0 %v19532_v12 }
 0x430   : > { %10736 = vmatprep.subr.bf16.mxu0 %v19533_v40 }
 0x431   : > { %10510 = vmatpush1.bf16.msra.mxu1 %v19352_v56  ;;  %v19542_v56 = vld [vmem:[#allocation103_spill] sm:$0xff] }
 0x433   : > { %10738 = vmatpush1.bf16.msra.mxu0 %v19534_v54 }
 0x434   : > { %5834 = vmatmul.mubr.f32.vlgmr.msra.gmra.mrb[4].mxu1 %v19474_v59  ;;  %10740 = vmatprep.subr.bf16.mxu0 %v19535_v3  ;;  %v19544_v59 = vld [vmem:[#allocation112_spill] sm:$0xff] }
 0x437   : > { %10742 = vmatpush1.bf16.msra.mxu0 %v19536_v62 }
 0x438   : > { %10744 = vmatprep.subr.bf16.mxu0 %v19537_v25 }
 0x43b   : > { %10746 = vmatpush1.bf16.msra.mxu0 %v19538_v9 }
 0x43c   : > { %10748 = vmatprep.subr.bf16.mxu0 %v19539_v46 }
 0x43f   : > { %10750 = vmatpush1.bf16.msra.mxu0 %v19540_v63 }
 0x440   : > { %10752 = vmatprep.subr.bf16.mxu0 %v19541_v16 }
 0x443   : > { %10754 = vmatpush1.bf16.msra.mxu0 %v19542_v56 }
 0x444   : > { %10756 = vmatprep.subr.bf16.mxu0 %v19543_v60 }
 0x447   : > { %10758 = vmatpush1.bf16.msra.mxu0 %v19544_v59 }
 0x448   : > { %10760 = vmatprep.subr.bf16.mxu0 %v19545_v8 }
 0x44b   : > { %10762 = vmatpush1.bf16.msra.mxu0 %v19546_v4 }
 0x44c   : > { %10764 = vmatprep.subr.bf16.mxu0 %v19547_v49 }
 0x44f   : > { %10766 = vmatpush1.bf16.msra.mxu0 %v19548_v33 }
 0x450   : > { %10768 = vmatprep.subr.bf16.mxu0 %v19549_v2  ;;  %v19570_v2 = vld [vmem:[#allocation71_spill] sm:$0xff] }
 0x452   : > { %6716 = vmatmul.mubr.f32.vlgmr.msra.gmra.mrb[4].mxu0 %v19550_v58  ;;  %v19571_v58 = vld [vmem:[#allocation160_spill] sm:$0xff] }
 0x453   : > { %10770 = vmatpush1.bf16.msra.mxu0 %v19551_v22  ;;  %6979 = vmatprep.mubr.f32.mxu0 %v19552_v36  ;;  %v19572_v22 = vld [vmem:[#allocation161_spill] sm:$0xff] }
 0x454   : > { %10772 = vmatprep.subr.bf16.mxu0 %v19553_v43  ;;  %v19573_v43 = vld [vmem:[#allocation90_spill] sm:$0xff] }
 0x457   : > { %10774 = vmatpush1.bf16.msra.mxu0 %v19554_v26  ;;  %v19574_v26 = vld [vmem:[#allocation163_spill] sm:$0xff] }
 0x458   : > { %10776 = vmatprep.subr.bf16.mxu0 %v19555_v45  ;;  %v19575_v45 = vld [vmem:[#allocation94_spill] sm:$0xff] }
 0x45b   : > { %10778 = vmatpush1.bf16.msra.mxu0 %v19556_v6  ;;  %v19576_v6 = vld [vmem:[#allocation95_spill] sm:$0xff] }
 0x45c   : > { %10780 = vmatprep.subr.bf16.mxu0 %v19557_v15  ;;  %v19577_v15 = vld [vmem:[#allocation97_spill] sm:$0xff] }
 0x45f   : > { %10782 = vmatpush1.bf16.msra.mxu0 %v19558_v48  ;;  %v19578_v48 = vld [vmem:[#allocation104_spill] sm:$0xff] }
 0x460   : > { %10784 = vmatprep.subr.bf16.mxu0 %v19559_v23  ;;  %v19579_v23 = vld [vmem:[#allocation167_spill] sm:$0xff] }
 0x463   : > { %10786 = vmatpush1.bf16.msra.mxu0 %v19560_v39  ;;  %v16441_v39 = vld [vmem:[%s11861_s26] sm:$0xff]  ;;  %s8839_s26 = scalar_lea.sflag [#allocation5], %s436_s19 }
 0x464   : > { %10788 = vmatprep.subr.bf16.mxu0 %v19561_v0  ;;  %v7180_v0 = vand.u32 2147483647, %v16441_v39 }
 0x467   : > { %10790 = vmatpush1.bf16.msra.mxu0 %v19562_v7  ;;  %v7182_v7 = vcombine.high %v7180_v0, %v7180_v0 }
 0x468   : > { %10792 = vmatprep.subr.bf16.mxu0 %v19563_v18  ;;  %v7185_v18 = vsel %vm7184_vm0, %v7180_v0, -inf }
 0x46b   : > { %10794 = vmatpush1.bf16.msra.mxu0 %v19564_v13  ;;  %v19580_v13 = vld [vmem:[#allocation168_spill] sm:$0xff] }
 0x46c   : > { %10796 = vmatprep.subr.bf16.mxu0 %v19565_v24  ;;  %v19581_v24 = vld [vmem:[#allocation170_spill] sm:$0xff] }
 0x46f   : > { %10798 = vmatpush1.bf16.msra.mxu0 %v19566_v47  ;;  %v7186_v47 = vsel %vm7184_vm0, %v7182_v7, -inf }
 0x470   : > { %10800 = vmatprep.subr.bf16.mxu0 %v19567_v17  ;;  %v7187_v17 = vmax.f32 %v7185_v18, %v7186_v47 }
 0x472   : > { %7188 = vmax.xlane.f32.xlu0 %v7187_v17 }
 0x473   : > { %10802 = vmatpush1.bf16.msra.mxu0 %v19568_v1  ;;  %v19582_v1 = vld [vmem:[#allocation171_spill] sm:$0xff] }
 0x474   : > { %10804 = vmatprep.subr.bf16.mxu0 %v19569_v41 }
 0x477   : > { %10806 = vmatpush1.bf16.msra.mxu0 %v19570_v2  ;;  %v19587_v2 = vld [vmem:[#allocation66_spill] sm:$0xff] }
 0x478   : > { %10808 = vmatprep.subr.bf16.mxu0 %v19571_v58  ;;  %v7247_v58 = vand.u32 2147483647, %v19587_v2 }
 0x47a   : > { %v7249_v18 = vsel %vm7184_vm0, %v7247_v58, -inf }
 0x47b   : > { %10810 = vmatpush1.bf16.msra.mxu0 %v19572_v22  ;;  %v19588_v22 = vld [vmem:[#allocation73_spill] sm:$0xff] }
 0x47c   : > { %10812 = vmatprep.subr.bf16.mxu0 %v19573_v43  ;;  %v7248_v43 = vand.u32 2147483647, %v19588_v22 }
 0x47f   : > { %10814 = vmatpush1.bf16.msra.mxu0 %v19574_v26 }
 0x480   : > { %10816 = vmatprep.subr.bf16.mxu0 %v19575_v45 }
 0x483   : > { %10818 = vmatpush1.bf16.msra.mxu0 %v19576_v6 }
 0x484   : > { %10820 = vmatprep.subr.bf16.mxu0 %v19577_v15 }
 0x487   : > { %10822 = vmatpush1.bf16.msra.mxu0 %v19578_v48 }
 0x488   : > { %10824 = vmatprep.subr.bf16.mxu0 %v19579_v23 }
 0x48b   : > { %10826 = vmatpush1.bf16.msra.mxu0 %v19580_v13  ;;  %v19589_v13 = vld [vmem:[#allocation74_spill] sm:$0xff] }
 0x48c   : > { %10828 = vmatprep.subr.bf16.mxu0 %v19581_v24  ;;  %v7261_v24 = vand.u32 2147483647, %v19589_v13 }
 0x48f   : > { %10830 = vmatpush1.bf16.msra.mxu0 %v19582_v1  ;;  %v7250_v1 = vsel %vm7184_vm0, %v7248_v43, -inf }
 0x490   : > { %10832 = vmatprep.subr.bf16.mxu0 %v19501_v44 }
 0x492   : > { %6981 = vmatmul.mubr.f32.vlgmr.msra.gmra.mrb[4].mxu0 %v16057_v42 }
 0x493   : > { %10834 = vmatpush1.bf16.msra.mxu0 %v19503_v57  ;;  %7116 = vmatprep.mubr.f32.mxu0 %v19552_v36 }
 0x494   : > { %10836 = vmatprep.subr.bf16.mxu0 %v19506_v27 }
 0x497   : > { %10838 = vmatpush1.bf16.msra.mxu0 %v19508_v31 }
 0x498   : > { %10840 = vmatprep.subr.bf16.mxu0 %v19510_v37 }
 0x49b   : > { %10842 = vmatpush1.bf16.msra.mxu0 %v19512_v61 }
 0x49c   : > { %10844 = vmatprep.subr.bf16.mxu0 %v19514_v28 }
 0x49f   : > { %10846 = vmatpush1.bf16.msra.mxu0 %v19516_v11 }
 0x4a0   : > { %10848 = vmatprep.subr.bf16.mxu0 %v19518_v52  ;;  %v19583_v52 = vld [vmem:[#allocation159_spill] sm:$0xff] }
 0x4a3   : > { %10850 = vmatpush1.bf16.msra.mxu0 %v19520_v38 }
 0x4a4   : > { %10852 = vmatprep.subr.bf16.mxu0 %v19522_v32  ;;  %v19584_v32 = vld [vmem:[#allocation57_spill] sm:$0xff] }
 0x4a7   : > { %10854 = vmatpush1.bf16.msra.mxu0 %v19524_v51 }
 0x4a8   : > { %10856 = vmatprep.subr.bf16.mxu0 %v19526_v55 }
 0x4ab   : > { %10858 = vmatpush1.bf16.msra.mxu0 %v19528_v20 }
 0x4ac   : > { %10860 = vmatprep.subr.bf16.mxu0 %v19530_v50 }
 0x4af   : > { %10862 = vmatpush1.bf16.msra.mxu0 %v19532_v12 }
 0x4b0   : > { %10864 = vmatprep.subr.bf16.mxu0 %v19533_v40 }
 0x4b3   : > { %10866 = vmatpush1.bf16.msra.mxu0 %v19534_v54 }
 0x4b4   : > { %10868 = vmatprep.subr.bf16.mxu0 %v19535_v3 }
 0x4b7   : > { %10870 = vmatpush1.bf16.msra.mxu0 %v19536_v62 }
 0x4b8   : > { %10872 = vmatprep.subr.bf16.mxu0 %v19537_v25  ;;  %v19585_v25 = vsub.f32 %v16049_v21, %v16059_v10 }
 0x4bb   : > { %10874 = vmatpush1.bf16.msra.mxu0 %v19538_v9 }
 0x4bc   : > { %10876 = vmatprep.subr.bf16.mxu0 %v19539_v46 }
 0x4bf   : > { %10878 = vmatpush1.bf16.msra.mxu0 %v19540_v63 }
 0x4c0   : > { %10880 = vmatprep.subr.bf16.mxu0 %v19541_v16  ;;  %v19586_v16 = vsub.f32 %v16053_v29, %v16067_v53 }
 0x4c3   : > { %10882 = vmatpush1.bf16.msra.mxu0 %v19542_v56 }
 0x4c4   : > { %10884 = vmatprep.subr.bf16.mxu0 %v19543_v60 }
 0x4c7   : > { %10886 = vmatpush1.bf16.msra.mxu0 %v19544_v59 }
 0x4c8   : > { %10888 = vmatprep.subr.bf16.mxu0 %v19545_v8 }
 0x4cb   : > { %10890 = vmatpush1.bf16.msra.mxu0 %v19546_v4 }
 0x4cc   : > { %10892 = vmatprep.subr.bf16.mxu0 %v19547_v49 }
 0x4cf   : > { %10894 = vmatpush1.bf16.msra.mxu0 %v19548_v33 }
 0x4d2   : > { %7118 = vmatmul.mubr.f32.vlgmr.msra.gmra.mrb[4].mxu0 %v16057_v42 }
 0x4ff   : > { %v7189_v55 = vpop.xlane.xlu0 %7188 }
 0x500   : > { %v7190_v42 = vrot.slane %v7189_v55, 4 }
 0x502   : > { %v7191_v20 = vmax.f32 %v7189_v55, %v7190_v42 }
 0x504   : > { %v7192_v50 = vrot.slane %v7191_v20, 2 }
 0x506   : > { %v7193_v12 = vmax.f32 %v7191_v20, %v7192_v50 }
 0x507   : > { %v5835_v44 = vpop.f32.mrb[4].mxu1 }
 0x508   : > { %v7140_v57 = vmul.f32 %v16059_v10, %v5835_v44  ;;  %v7148_v27 = vmul.f32 %v16049_v21, %v5835_v44  ;;  %v7152_v31 = vsub.f32 %v5835_v44, %v16327_v5  ;;  %v5837_v37 = vpop.f32.mrb[5].mxu1  ;;  %v7194_v40 = vrot.slane %v7193_v12, 1  ;;  %v19590_v44 = vld [vmem:[#allocation162_spill] sm:$0xff] }
 0x509   : > { %v7141_v61 = vmul.f32 %v16067_v53, %v5837_v37  ;;  %v7149_v28 = vmul.f32 %v16053_v29, %v5837_v37  ;;  %v7153_v11 = vsub.f32 %v5837_v37, %v16338_v30  ;;  %v7264_v37 = vsel %vm7263_vm1, %v7261_v24, -inf }
 0x50a   : > { %v7154_v38 = vmul.f32 %v7152_v31, %v19583_v52  ;;  %v7195_v54 = vmax.f32 %v7193_v12, %v7194_v40  ;;  %v7251_v31 = vmax.f32 %v7249_v18, %v7250_v1  ;;  %v11312_v18 = vmov 0  }
 0x50b   : > { %v7155_v51 = vmul.f32 %v7153_v11, %v19584_v32  ;;  %11107 = vset.pattern.permute.xlu0 %v11312_v18  ;;  %11108 = vset.pattern.permute.xlu1 %v11312_v18 }
 0x50c   : > { %11005 = vpush %v7195_v54 }
 0x53d   : > { %s11006_s17 = spop %11005 }
 0x53e   : > { %v7197_v5 = vstv %s11006_s17 }
 0x53f   : > { %11110 = vrcp.f32 %v7197_v5 }
 0x549   : > { %v11111_v3 = vpop.eup %11110 }
 0x54a   : > { %11007 = vpush %v11111_v3 }
 0x57b   : > { %s11008_s20 = spop %11007 }
 0x57c   : > { %v7280_v11 = vstv %s11008_s20 }
 0x5a5   : > { %v7119_v62 = vpop.f32.mrb[4].mxu0 }
 0x5a6   : > { %v7130_v30 = vmul.f32 %v19583_v52, %v7119_v62  ;;  %v7158_v9 = vmul.f32 %v19585_v25, %v7119_v62  ;;  %v7121_v46 = vpop.f32.mrb[5].mxu0  ;;  %v7281_v52 = vmul.f32 %v16441_v39, %v7280_v11 }
 0x5a7   : > { %v7131_v63 = vmul.f32 %v19584_v32, %v7121_v46  ;;  %v7159_v56 = vmul.f32 %v19586_v16, %v7121_v46 }
 0x5a8   : > { %v7136_v60 = vmul.f32 2.0, %v7130_v30  ;;  %v16500_v59 = vadd.f32 %v7158_v9, %v7154_v38  ;;  %v7283_v38 = vcombine.high %v7281_v52, %v7281_v52  ;;  %7285 = vst [vmem:[#allocation2] sm:$0xf] %v7281_v52 }
 0x5a9   : > { %v7137_v8 = vmul.f32 2.0, %v7131_v63  ;;  %v16502_v4 = vadd.f32 %v7159_v56, %v7155_v51 }
 0x5aa   : > { %v7138_v49 = vadd.f32 %v7136_v60, %v16331_v34  ;;  %v7146_v33 = vsub.f32 %v16335_v35, %v7136_v60  ;;  %7286 = vst [vmem:[#allocation2 + $0x8] sm:$0xf] %v7283_v38 }
 0x5ab   : > { %v7139_v10 = vadd.f32 %v7137_v8, %v16343_v14  ;;  %v7147_v21 = vsub.f32 %v16347_v19, %v7137_v8  ;;  %v7228_v14 = vand.u32 2147483647, %v16500_v59  ;;  %v7229_v45 = vand.u32 2147483647, %v16502_v4 }
 0x5ac   : > { %v16508_v36 = vadd.f32 %v7140_v57, %v7138_v49  ;;  %v16510_v41 = vadd.f32 %v7148_v27, %v7146_v33  ;;  %v7262_v57 = vand.u32 2147483647, %v19590_v44 }
 0x5ad   : > { %v16512_v53 = vadd.f32 %v7141_v61, %v7139_v10  ;;  %v16514_v29 = vadd.f32 %v7149_v28, %v7147_v21  ;;  %v7230_v47 = vsel %vm7184_vm0, %v7228_v14, -inf  ;;  %v7231_v17 = vsel %vm7184_vm0, %v7229_v45, -inf }
 0x5ae   : > { %v7214_v34 = vand.u32 2147483647, %v16510_v41  ;;  %v7200_v35 = vand.u32 2147483647, %v16508_v36  ;;  %v7232_v27 = vmax.f32 %v7230_v47, %v7231_v17  ;;  %v7265_v61 = vsel %vm7263_vm1, %v7262_v57, -inf }
 0x5af   : > { %v7215_v19 = vand.u32 2147483647, %v16514_v29  ;;  %v7201_v26 = vand.u32 2147483647, %v16512_v53  ;;  %v7266_v28 = vmax.f32 %v7264_v37, %v7265_v61 }
 0x5b0   : > { %v7216_v6 = vsel %vm7184_vm0, %v7214_v34, -inf  ;;  %v7202_v15 = vsel %vm7184_vm0, %v7200_v35, -inf }
 0x5b1   : > { %v7217_v48 = vsel %vm7184_vm0, %v7215_v19, -inf  ;;  %v7203_v23 = vsel %vm7184_vm0, %v7201_v26, -inf }
 0x5b2   : > { %v7218_v0 = vmax.f32 %v7216_v6, %v7217_v48  ;;  %v7204_v7 = vmax.f32 %v7202_v15, %v7203_v23 }
 0x5b4   : > { %7219 = vmax.xlane.f32.xlu1 %v7218_v0  ;;  %7205 = vmax.xlane.f32.xlu0 %v7204_v7  ;;  %v11311_v0 = vmov 0.0   ;;  %v7334_v7 = vld [vmem:[%s16678_s6] sm:$0xff] }
 0x5b5   : > { %7421 = vmatprep.mubr.f32.mxu1 %v11311_v0 }
 0x5b8   : > { %7233 = vmax.xlane.f32.xlu1 %v7232_v27  ;;  %7252 = vmax.xlane.f32.xlu0 %v7251_v31 }
 0x5bc   : > { %7267 = vmax.xlane.f32.xlu1 %v7266_v28 }
 0x5ce   : > { %7337 = vperm.xlu0 %11107, %v7334_v7  }
 0x641   : > { %v7220_v32 = vpop.xlane.xlu1 %7219  ;;  %v7206_v51 = vpop.xlane.xlu0 %7205 }
 0x642   : > { %v7221_v55 = vrot.slane %v7220_v32, 4  ;;  %v7207_v42 = vrot.slane %v7206_v51, 4 }
 0x644   : > { %v7222_v20 = vmax.f32 %v7220_v32, %v7221_v55  ;;  %v7208_v50 = vmax.f32 %v7206_v51, %v7207_v42 }
 0x645   : > { %v7234_v12 = vpop.xlane.xlu1 %7233  ;;  %v7253_v49 = vpop.xlane.xlu0 %7252 }
 0x646   : > { %v7223_v40 = vrot.slane %v7222_v20, 2  ;;  %v7209_v54 = vrot.slane %v7208_v50, 2  ;;  %v7235_v5 = vrot.slane %v7234_v12, 4  ;;  %v7254_v10 = vrot.slane %v7253_v49, 4 }
 0x648   : > { %v7236_v3 = vmax.f32 %v7234_v12, %v7235_v5  ;;  %v7210_v62 = vmax.f32 %v7208_v50, %v7209_v54  ;;  %v7224_v30 = vmax.f32 %v7222_v20, %v7223_v40  ;;  %v7255_v58 = vmax.f32 %v7253_v49, %v7254_v10  ;;  %v7327_v20 = vld [vmem:[%s16677_s5] sm:$0xff] }
 0x649   : > { %v7268_v33 = vpop.xlane.xlu1 %7267  ;;  %v7342_v50 = vsel %vm7340_vm2, %v7327_v20, 0 }
 0x64a   : > { %v7237_v25 = vrot.slane %v7236_v3, 2  ;;  %v7211_v9 = vrot.slane %v7210_v62, 1  ;;  %v7225_v46 = vrot.slane %v7224_v30, 1  ;;  %v7269_v21 = vrot.slane %v7268_v33, 4 }
 0x64b   : > { %v7256_v34 = vrot.slane %v7255_v58, 2  ;;  %v16554_v12 = vand.u32 4294901760, %v7342_v50 }
 0x64c   : > { %v7212_v63 = vmax.f32 %v7210_v62, %v7211_v9  ;;  %v7238_v16 = vmax.f32 %v7236_v3, %v7237_v25  ;;  %v7226_v56 = vmax.f32 %v7224_v30, %v7225_v46  ;;  %v7270_v43 = vmax.f32 %v7268_v33, %v7269_v21 }
 0x64d   : > { %v7257_v19 = vmax.f32 %v7255_v58, %v7256_v34 }
 0x64e   : > { %11009 = vpush %v7212_v63  ;;  %v7239_v60 = vrot.slane %v7238_v16, 1  ;;  %v7271_v35 = vrot.slane %v7270_v43, 2  ;;  %v16569_v63 = vsub.f32 %v7342_v50, %v16554_v12 }
 0x64f   : > { %11011 = vpush %v7226_v56  ;;  %v7258_v45 = vrot.slane %v7257_v19, 1 }
 0x650   : > { %v7240_v8 = vmax.f32 %v7238_v16, %v7239_v60  ;;  %v7272_v26 = vmax.f32 %v7270_v43, %v7271_v35 }
 0x651   : > { %v7259_v48 = vmax.f32 %v7257_v19, %v7258_v45 }
 0x652   : > { %11013 = vpush %v7240_v8  ;;  %v7273_v6 = vrot.slane %v7272_v26, 1 }
 0x654   : > { %v7274_v23 = vmax.f32 %v7272_v26, %v7273_v6 }
 0x67f   : > { %s11010_s28 = spop %11009 }
 0x680   : > { %s11012_s25 = spop %11011 }
 0x683   : > { %s11014_s30 = spop %11013 }
 0x684   : > { %s7242_s14 = smax.f32 %s11014_s30, %s11012_s25 }
 0x685   : > { %s7243_s16 = smax.f32 %s11010_s28, %s7242_s14 }
 0x686   : > { %v7244_v14 = vstv %s7243_s16 }
 0x687   : > { %11112 = vrcp.f32 %v7244_v14 }
 0x691   : > { %v11113_v15 = vpop.eup %11112 }
 0x692   : > { %11015 = vpush %v11113_v15 }
 0x693   : > { %11017 = vpush %v7259_v48 }
 0x694   : > { %11019 = vpush %v7274_v23 }
 0x6c3   : > { %s11016_s22 = spop %11015 }
 0x6c4   : > { %v7287_v24 = vstv %s11016_s22  ;;  %s11018_s15 = spop %11017  ;;  %s8974_s22 = sshll.u32 %s11395_s21, 8 }
 0x6c5   : > { %v7288_v47 = vmul.f32 %v7287_v24, %v16508_v36  ;;  %v7289_v17 = vmul.f32 %v7287_v24, %v16512_v53  ;;  %v7298_v1 = vmul.f32 %v7287_v24, %v16510_v41  ;;  %v7299_v57 = vmul.f32 %v7287_v24, %v16514_v29  ;;  %s11020_s11 = spop %11019  ;;  %s11313_s21 = smov [#allocation11]  }
 0x6c6   : > { %v7302_v27 = vmul.f32 %v7287_v24, %v16500_v59  ;;  %v7303_v31 = vmul.f32 %v7287_v24, %v16502_v4  ;;  %s7276_s23 = smax.f32 %s11020_s11, %s11018_s15  ;;  %s438_s15 = scalar_lea.vmem [#allocation11], %s8965_s12 }
 0x6c7   : > { %v7292_v37 = vrot.slane %v7288_v47, 4  ;;  %v7293_v61 = vrot.slane %v7289_v17, 4  ;;  %7300 = vst [vmem:[#allocation2 + $0x10] sm:$0xf] %v7298_v1  ;;  %7301 = vst [vmem:[#allocation2 + $0x18] sm:$0xf] %v7299_v57  ;;  %v7277_v28 = vstv %s7276_s23 }
 0x6c8   : > { %v7306_v11 = vrot.slane %v7302_v27, 4  ;;  %v7307_v52 = vrot.slane %v7303_v31, 4  ;;  %11114 = vrcp.f32 %v7277_v28  ;;  %s8853_s11 = sshll.u32 %s438_s15, 4  ;;  %s11233_s20 = sshll.u32 %s11313_s21, 4  ;;  %s16632_s11 = int_to_ptr.vmem [resolvable:$true] %s8853_s11  ;;  %s11234_s20 = int_to_ptr.vmem [resolvable:$false] %s11233_s20 }
 0x6c9   : > { %7296 = vst [vmem:[#allocation2] sm:$0xf0] %v7292_v37  ;;  %7297 = vst [vmem:[#allocation2 + $0x8] sm:$0xf0] %v7293_v61  ;;  %s11229_s17 = scalar_lea.vmem %s16632_s11, 256  ;;  %s11235_s28 = scalar_lea.vmem %s11234_s20, 512 }
 0x6ca   : > { %7310 = vst [vmem:[#allocation2 + $0x10] sm:$0xf0] %v7306_v11  ;;  %7311 = vst [vmem:[#allocation2 + $0x18] sm:$0xf0] %v7307_v52  ;;  %v7871_v52 = vld [vmem:[%s16680_s8] sm:$0xf]  ;;  %p11230_p8 = scmp.ne.s32.totalorder %s16632_s11, %s11229_s17  ;;  %p11236_p6 = scmp.lt.s32.totalorder %s16632_s11, %s11234_s20 }
 0x6cb   : > { %7874 = vperm.xlu1 %11108, %v7871_v52   ;;  %p11237_p9 = scmp.lt.s32.totalorder %s11235_s28, %s11229_s17 }
 0x6cc   : > { %p11231_p13 = pnand %p11230_p8, %p19592_p11 }
 0x6cd   : > { %p11238_p5 = por %p11237_p9, %p11236_p6 }
 0x6ce   : > { %p11232_p1 = pneg %p11231_p13 }
 0x6d0   : > { %v7329_v36 = vld [vmem:[#allocation2 + $0x8] sm:$0xff]  ;;  %v7328_v41 = vld [vmem:[#allocation2] sm:$0xff]  ;;  %p11239_p0 = pnand %p11238_p5, %p11232_p1 }
 0x6d1   : > { %v7331_v53 = vld [vmem:[#allocation2 + $0x18] sm:$0xff]  ;;  %v7351_v29 = vand.u32 4294901760, %v7329_v36  ;;  %v7330_v59 = vld [vmem:[#allocation2 + $0x10] sm:$0xff]  ;;  %v7353_v38 = vand.u32 4294901760, %v7328_v41 }
 0x6d2   : > { %v11115_v4 = vpop.eup %11114  ;;  %v7355_v32 = vand.u32 4294901760, %v7331_v53  ;;  %v7357_v51 = vand.u32 4294901760, %v7330_v59 }
 0x6d3   : > { %11021 = vpush %v11115_v4  ;;  %v16556_v40 = vsub.f32 %v7329_v36, %v7351_v29  ;;  %v16560_v5 = vsub.f32 %v7328_v41, %v7353_v38  ;;  %v8353_v36 = vld [vmem:[%s16682_s10] sm:$0xff] }
 0x6d4   : > { %v16545_v55 = vpack.c.bf16 %v7355_v32, %v7351_v29  ;;  %v16547_v42 = vpack.c.bf16 %v7357_v51, %v7353_v38  ;;  %v16558_v54 = vsub.f32 %v7331_v53, %v7355_v32  ;;  %v16562_v3 = vsub.f32 %v7330_v59, %v7357_v51  ;;  %8356 = vperm.xlu1 %11108, %v8353_v36   ;;  %v7870_v41 = vld [vmem:[%s16679_s7] sm:$0xf]  ;;  %v7338_v38 = vpop.permute.xlu0 %7337 }
 0x6d5   : > { %v7435_v60 = vand.u32 4294901760, %v16556_v40  ;;  %v7879_v53 = vsel %vm7877_vm4, %v7870_v41, 0 }
 0x6d6   : > { %10896 = vmatprep.subr.bf16.mxu1 %v16545_v55  ;;  %v7447_v8 = vand.u32 4294901760, %v16558_v54  ;;  %v10903_v37 = vpack.c.bf16 %v16558_v54, %v16556_v40  ;;  %v10905_v61 = vpack.c.bf16 %v16562_v3, %v16560_v5  ;;  %v7948_v29 = vand.u32 4294901760, %v7879_v53 }
 0x6d7   : > { %10898 = vmatpush1.bf16.msra.mxu1 %v16547_v42 }
 0x6d8   : > { %v7448_v49 = vsub.f32 %v16558_v54, %v7447_v8  ;;  %v10911_v28 = vpack.c.bf16 %v7447_v8, %v7435_v60  ;;  %v7949_v59 = vsub.f32 %v7879_v53, %v7948_v29 }
 0x6da   : > { %v7449_v35 = vand.u32 4294901760, %v7448_v49  ;;  %v7950_v4 = vand.u32 4294901760, %v7949_v59 }
 0x6dc   : > { %v7951_v20 = vsub.f32 %v7949_v59, %v7950_v4 }
 0x704   : > { %s11022_s24 = spop %11021 }
 0x705   : > { %v7312_v62 = vstv %s11022_s24  ;;  %s16630_s24 = scalar_lea.hbm %s19591_s13, %s8974_s22 }
 0x706   : > { %v7313_v30 = vmul.f32 %v7312_v62, %v19587_v2  ;;  %v7314_v25 = vmul.f32 %v7312_v62, %v19588_v22  ;;  %v7317_v9 = vmul.f32 %v7312_v62, %v19589_v13  ;;  %v7318_v46 = vmul.f32 %v7312_v62, %v19590_v44 }
 0x707   : > { %v7441_v2 = vand.u32 4294901760, %v16560_v5  ;;  %v7453_v22 = vand.u32 4294901760, %v16562_v3  ;;  %v7424_v13 = vand.u32 4294901760, %v16569_v63  ;;  %v7436_v44 = vsub.f32 %v16556_v40, %v7435_v60 }
 0x708   : > { %7315 = vst [vmem:[#allocation2 + $0x20] sm:$0xf] %v7313_v30  ;;  %7316 = vst [vmem:[#allocation2 + $0x28] sm:$0xf] %v7314_v25  ;;  %v7321_v16 = vrot.slane %v7317_v9, 5  ;;  %v7322_v56 = vrot.slane %v7318_v46, 5 }
 0x709   : > { %v7442_v33 = vsub.f32 %v16560_v5, %v7441_v2  ;;  %v7454_v10 = vsub.f32 %v16562_v3, %v7453_v22  ;;  %v7425_v21 = vsub.f32 %v16569_v63, %v7424_v13  ;;  %v7437_v34 = vand.u32 4294901760, %v7436_v44 }
 0x70a   : > { %7325 = vst [vmem:[#allocation2 + $0x20] sm:$0x70] %v7321_v16  ;;  %7326 = vst [vmem:[#allocation2 + $0x28] sm:$0x70] %v7322_v56  ;;  %v10913_v11 = vpack.c.bf16 %v7453_v22, %v7441_v2  ;;  %v7952_v5 = vand.u32 4294901760, %v7951_v20  ;;  %v8352_v56 = vld [vmem:[%s16681_s9] sm:$0xff] }
 0x70b   : > { %v7443_v26 = vand.u32 4294901760, %v7442_v33  ;;  %v7455_v45 = vand.u32 4294901760, %v7454_v10  ;;  %v7426_v48 = vand.u32 4294901760, %v7425_v21  ;;  %v10899_v7 = vpack.c.bf16 %v7449_v35, %v7437_v34 }
 0x70c   : > { %v8363_v60 = vsel %vm8361_vm5, %v8352_v56, 0 }
 0x70d   : > { %v10901_v24 = vpack.c.bf16 %v7455_v45, %v7443_v26  ;;  %v8436_v8 = vand.u32 4294901760, %v8363_v60 }
 0x70f   : > { %v8437_v49 = vsub.f32 %v8363_v60, %v8436_v8 }
 0x711   : > { %v7333_v58 = vld [vmem:[#allocation2 + $0x28] sm:$0x7f]  ;;  %v7332_v43 = vld [vmem:[#allocation2 + $0x20] sm:$0x7f]  ;;  %v8438_v21 = vand.u32 4294901760, %v8437_v49 }
 0x712   : > { %v7349_v14 = vsel %vm7344_vm3, %v7333_v58, 0  ;;  %v7346_v19 = vsel %vm7344_vm3, %v7332_v43, 0 }
 0x713   : > { %v7359_v6 = vand.u32 4294901760, %v7349_v14  ;;  %v7361_v15 = vand.u32 4294901760, %v7346_v19  ;;  %v8439_v34 = vsub.f32 %v8437_v49, %v8438_v21 }
 0x715   : > { %7360 = vmatprep.subr.mxu1 %v7359_v6  ;;  %v7464_v23 = vsub.f32 %v7346_v19, %v7361_v15  ;;  %v7458_v18 = vsub.f32 %v7349_v14, %v7359_v6 }
 0x716   : > { %7362 = vmatpush1.msra.mxu1 %v7361_v15 }
 0x717   : > { %7427 = vmatmul.mubr.f32.vlgmr.msra.gmra.mrb[6].mxu1 %v7426_v48  ;;  %10900 = vmatprep.subr.bf16.mxu1 %v10899_v7  ;;  %v7459_v47 = vand.u32 4294901760, %v7458_v18  ;;  %v7465_v17 = vand.u32 4294901760, %v7464_v23 }
 0x718   : > { %10902 = vmatpush1.bf16.msra.mxu1 %v10901_v24  ;;  %7527 = vmatprep.mubr.f32.mxu1 %v11311_v0 }
 0x719   : > { %v7460_v1 = vsub.f32 %v7458_v18, %v7459_v47  ;;  %v7466_v57 = vsub.f32 %v7464_v23, %v7465_v17 }
 0x71b   : > { %v7461_v27 = vand.u32 4294901760, %v7460_v1  ;;  %v7467_v31 = vand.u32 4294901760, %v7466_v57 }
 0x71d   : > { %7462 = vmatprep.subr.mxu1 %v7461_v27 }
 0x71e   : > { %7468 = vmatpush1.msra.mxu1 %v7467_v31 }
 0x71f   : > { %7529 = vmatmul.mubr.f32.vlgmr.msra.gmra.mrb[6].mxu1 %v16554_v12  ;;  %10904 = vmatprep.subr.bf16.mxu1 %v10903_v37 }
 0x720   : > { %10906 = vmatpush1.bf16.msra.mxu1 %v10905_v61  ;;  %7611 = vmatprep.mubr.f32.mxu1 %v11311_v0 }
 0x721   : > { %7549 = vmatprep.subr.mxu1 %v7458_v18 }
 0x724   : > { %7552 = vmatpush1.msra.mxu1 %v7464_v23 }
 0x725   : > { %10908 = vmatprep.subr.bf16.mxu1 %v16545_v55 }
 0x727   : > { %7614 = vmatmul.mubr.f32.vlgmr.msra.gmra.mrb[6].mxu1 %v16569_v63 }
 0x728   : > { %10910 = vmatpush1.bf16.msra.mxu1 %v16547_v42  ;;  %7690 = vmatprep.mubr.f32.mxu1 %v11311_v0 }
 0x729   : > { %7629 = vmatprep.subr.mxu1 %v7359_v6 }
 0x72c   : > { %7631 = vmatpush1.msra.mxu1 %v7361_v15 }
 0x72d   : > { %10912 = vmatprep.subr.bf16.mxu1 %v10911_v28 }
 0x72f   : > { %7694 = vmatmul.mubr.f32.vlgmr.msra.gmra.mrb[6].mxu1 %v7424_v13 }
 0x730   : > { %10914 = vmatpush1.bf16.msra.mxu1 %v10913_v11  ;;  %7782 = vmatprep.mubr.f32.mxu1 %v11311_v0 }
 0x731   : > { %7719 = vmatprep.subr.mxu1 %v7459_v47 }
 0x734   : > { %7723 = vmatpush1.msra.mxu1 %v7465_v17 }
 0x735   : > { %10916 = vmatprep.subr.bf16.mxu1 %v16545_v55 }
 0x737   : > { %7784 = vmatmul.mubr.f32.vlgmr.msra.gmra.mrb[6].mxu1 %v16554_v12 }
 0x738   : > { %10918 = vmatpush1.bf16.msra.mxu1 %v16547_v42  ;;  %7860 = vmatprep.mubr.f32.mxu1 %v11311_v0 }
 0x739   : > { %7799 = vmatprep.subr.mxu1 %v7359_v6  ;;  %v8440_v6 = vand.u32 4294901760, %v8439_v34 }
 0x73c   : > { %7801 = vmatpush1.msra.mxu1 %v7361_v15 }
 0x73f   : > { %7862 = vmatmul.mubr.f32.vlgmr.msra.gmra.mrb[6].mxu1 %v16554_v12 }
 0x740   : > { %7947 = vmatprep.mubr.f32.mxu1 %v11311_v0 }
 0x74a   : > { %v7875_v2 = vpop.permute.xlu1 %7874 }
 0x753   : > { %v8357_v17 = vpop.permute.xlu1 %8356 }
 0x812   : > { %v7863_v32 = vpop.f32.mrb[6].mxu1 }
 0x813   : > { %v10921_v51 = vadd.f32 %v7863_v32, %v7338_v38  ;;  %v7865_v55 = vpop.f32.mrb[7].mxu1 }
 0x814   : > { %v10922_v42 = vadd.f32 %v7865_v55, %v7338_v38 }
 0x815   : > { %v7868_v50 = vmax.f32 %v10921_v51, 0.0 }
 0x816   : > { %v7869_v12 = vmax.f32 %v10922_v42, 0.0 }
 0x817   : > { %v7883_v40 = vand.u32 4294901760, %v7868_v50 }
 0x818   : > { %v7881_v54 = vand.u32 4294901760, %v7869_v12 }
 0x819   : > { %v7966_v3 = vsub.f32 %v7868_v50, %v7883_v40 }
 0x81a   : > { %v7960_v62 = vsub.f32 %v7869_v12, %v7881_v54  ;;  %7882 = vmatprep.subr.mxu1 %v7881_v54 }
 0x81b   : > { %v7967_v30 = vand.u32 4294901760, %v7966_v3  ;;  %7884 = vmatpush1.msra.mxu1 %v7883_v40 }
 0x81c   : > { %7953 = vmatmul.mubr.f32.vlgmr.msra.gmra.mrb[8].mxu1 %v7952_v5  ;;  %v7961_v25 = vand.u32 4294901760, %v7960_v62 }
 0x81d   : > { %v7968_v9 = vsub.f32 %v7966_v3, %v7967_v30  ;;  %8033 = vmatprep.mubr.f32.mxu1 %v11311_v0 }
 0x81e   : > { %v7962_v46 = vsub.f32 %v7960_v62, %v7961_v25 }
 0x81f   : > { %v7969_v16 = vand.u32 4294901760, %v7968_v9 }
 0x820   : > { %v7963_v63 = vand.u32 4294901760, %v7962_v46 }
 0x822   : > { %7964 = vmatprep.subr.mxu1 %v7963_v63 }
 0x823   : > { %7970 = vmatpush1.msra.mxu1 %v7969_v16 }
 0x824   : > { %8035 = vmatmul.mubr.f32.vlgmr.msra.gmra.mrb[8].mxu1 %v7948_v29  ;;  %8043 = vmatprep.subr.mxu1 %v7960_v62 }
 0x825   : > { %8046 = vmatpush1.msra.mxu1 %v7966_v3  ;;  %8109 = vmatprep.mubr.f32.mxu1 %v11311_v0 }
 0x826   : > { %8119 = vmatprep.subr.mxu1 %v7881_v54 }
 0x82c   : > { %8112 = vmatmul.mubr.f32.vlgmr.msra.gmra.mrb[8].mxu1 %v7949_v59 }
 0x82d   : > { %8121 = vmatpush1.msra.mxu1 %v7883_v40  ;;  %8184 = vmatprep.mubr.f32.mxu1 %v11311_v0 }
 0x82e   : > { %8197 = vmatprep.subr.mxu1 %v7961_v25 }
 0x834   : > { %8188 = vmatmul.mubr.f32.vlgmr.msra.gmra.mrb[8].mxu1 %v7950_v4 }
 0x835   : > { %8201 = vmatpush1.msra.mxu1 %v7967_v30  ;;  %8264 = vmatprep.mubr.f32.mxu1 %v11311_v0 }
 0x836   : > { %8273 = vmatprep.subr.mxu1 %v7881_v54 }
 0x83c   : > { %8266 = vmatmul.mubr.f32.vlgmr.msra.gmra.mrb[8].mxu1 %v7948_v29 }
 0x83d   : > { %8275 = vmatpush1.msra.mxu1 %v7883_v40  ;;  %8338 = vmatprep.mubr.f32.mxu1 %v11311_v0 }
 0x844   : > { %8340 = vmatmul.mubr.f32.vlgmr.msra.gmra.mrb[8].mxu1 %v7948_v29 }
 0x845   : > { %8435 = vmatprep.mubr.f32.mxu1 %v11311_v0 }
 0x917   : > { %v8341_v22 = vpop.f32.mrb[8].mxu1 }
 0x918   : > { %v10923_v13 = vadd.f32 %v8341_v22, %v7875_v2  ;;  %v8343_v44 = vpop.f32.mrb[9].mxu1 }
 0x919   : > { %v10924_v33 = vadd.f32 %v8343_v44, %v7875_v2 }
 0x91b   : > { %v8348_v10 = vcombine.low %v10923_v13, %v10924_v33 }
 0x91d   : > { %v8350_v58 = vadd.f32 %v16441_v39, %v8348_v10 }
 0x91f   : > { %v8351_v43 = vmax.f32 %v8350_v58, 0.0 }
 0x921   : > { %v8360_v35 = vcombine.high %v8351_v43, %v8351_v43  ;;  %v8365_v14 = vsel %vm7184_vm0, %v8351_v43, 0 }
 0x922   : > { %v8371_v19 = vand.u32 4294901760, %v8365_v14 }
 0x923   : > { %v8367_v26 = vsel %vm7184_vm0, %v8360_v35, 0 }
 0x924   : > { %v8369_v45 = vand.u32 4294901760, %v8367_v26  ;;  %v8454_v15 = vsub.f32 %v8365_v14, %v8371_v19 }
 0x926   : > { %8370 = vmatprep.subr.mxu1 %v8369_v45  ;;  %v8448_v48 = vsub.f32 %v8367_v26, %v8369_v45  ;;  %v8455_v23 = vand.u32 4294901760, %v8454_v15 }
 0x927   : > { %8372 = vmatpush1.msra.mxu1 %v8371_v19 }
 0x928   : > { %8441 = vmatmul.mubr.f32.vlgmr.msra.gmra.mrb[10].mxu1 %v8440_v6  ;;  %v8449_v7 = vand.u32 4294901760, %v8448_v48  ;;  %v8456_v18 = vsub.f32 %v8454_v15, %v8455_v23 }
 0x929   : > { %8521 = vmatprep.mubr.f32.mxu1 %v11311_v0 }
 0x92a   : > { %v8450_v39 = vsub.f32 %v8448_v48, %v8449_v7  ;;  %v8457_v47 = vand.u32 4294901760, %v8456_v18 }
 0x92c   : > { %v8451_v24 = vand.u32 4294901760, %v8450_v39 }
 0x92e   : > { %8452 = vmatprep.subr.mxu1 %v8451_v24 }
 0x92f   : > { %8458 = vmatpush1.msra.mxu1 %v8457_v47 }
 0x930   : > { %8523 = vmatmul.mubr.f32.vlgmr.msra.gmra.mrb[10].mxu1 %v8436_v8  ;;  %8531 = vmatprep.subr.mxu1 %v8448_v48 }
 0x931   : > { %8534 = vmatpush1.msra.mxu1 %v8454_v15  ;;  %8597 = vmatprep.mubr.f32.mxu1 %v11311_v0 }
 0x932   : > { %8607 = vmatprep.subr.mxu1 %v8369_v45 }
 0x938   : > { %8600 = vmatmul.mubr.f32.vlgmr.msra.gmra.mrb[10].mxu1 %v8437_v49 }
 0x939   : > { %8609 = vmatpush1.msra.mxu1 %v8371_v19  ;;  %8672 = vmatprep.mubr.f32.mxu1 %v11311_v0 }
 0x93a   : > { %8685 = vmatprep.subr.mxu1 %v8449_v7 }
 0x940   : > { %8676 = vmatmul.mubr.f32.vlgmr.msra.gmra.mrb[10].mxu1 %v8438_v21 }
 0x941   : > { %8689 = vmatpush1.msra.mxu1 %v8455_v23  ;;  %8752 = vmatprep.mubr.f32.mxu1 %v11311_v0 }
 0x942   : > { %8761 = vmatprep.subr.mxu1 %v8369_v45 }
 0x948   : > { %8754 = vmatmul.mubr.f32.vlgmr.msra.gmra.mrb[10].mxu1 %v8436_v8 }
 0x949   : > { %8763 = vmatpush1.msra.mxu1 %v8371_v19  ;;  %8826 = vmatprep.mubr.f32.mxu1 %v11311_v0 }
 0x950   : > { %8828 = vmatmul.mubr.f32.vlgmr.msra.gmra.mrb[10].mxu1 %v8436_v8 }
 0xa23   : > { %v8829_v1 = vpop.f32.mrb[10].mxu1 }
 0xa24   : > { %v10925_v57 = vadd.f32 %v8829_v1, %v8357_v17  ;;  %v8831_v27 = vpop.f32.mrb[11].mxu1 }
 0xa25   : > { %v10926_v31 = vadd.f32 %v8831_v27, %v8357_v17 }
 0xa26   : > { %v8834_v37 = vmax.f32 %v10925_v57, 0.0 }
 0xa27   : > { %v8835_v61 = vmax.f32 %v10926_v31, 0.0 }
 0xa28   : > { %8836 = vst [vmem:[%s438_s15] sm:$0xff] %v8834_v37 }
 0xa29   : > { %8837 = vst [vmem:[%s438_s15 + $0x8] sm:$0xff] %v8835_v61 }
 0xa2a   : > { %11242 = shalt.err (!%p11239_p0)
}
 0xa2b   : > { %s11243_s25 = scalar_lea.hbm %s16630_s24, 256  ;;  %s11247_s16 = scalar_lea.hbm %s19591_s13, 512 }
 0xa2c   : > { %p11244_p10 = scmp.ne.s32.totalorder %s16630_s24, %s11243_s25  ;;  %p11248_p4 = scmp.lt.u32.totalorder %s16630_s24, %s19591_s13 }
 0xa2d   : > { %p11249_p12 = scmp.lt.u32.totalorder %s11247_s16, %s11243_s25  ;;  %p11251_p8 = scmp.lt.u32.totalorder %s11243_s25, %s16630_s24 }
 0xa2e   : > { %p11245_p2 = pnand %p11244_p10, %p19592_p11 }
 0xa2f   : > { %p11250_p7 = por %p11249_p12, %p11248_p4 }
 0xa30   : > { %p11246_p3 = pneg %p11245_p2 }
 0xa31   : > { %p11252_p13 = por %p11251_p8, %p11250_p7 }
 0xa33   : > { %p11253_p1 = pnand %p11252_p13, %p11246_p3 }
 0xa35   : > { %11256 = shalt.err (!%p11253_p1)
}
 0xa36   : > { %11039 = dma.vmem_to_hbm [thread:$0]  (%p19592_p11), %s16632_s11, 256, %s16630_s24, %s8839_s26  }
 0xa37 PF: > { %s19593_s22 = sld [smem:[#allocation18_spill]]  ;;  %s19594_s15 = sld [smem:[#allocation16_spill]] }
 0xa38   : > { %s19595_s23 = sld [smem:[#allocation21_spill]] }
 0xa3d   : > { %p11066_p6 = scmp.ge.s32.totalorder %s19593_s22, 2  ;;  %s8865_s29 = sand.u32 1, %s19594_s15  }
 0xa3e   : > { %p19596_p9 = scmp.ne.s32.totalorder %s19595_s23, 0  ;;  %s8866_s17 = scalar_lea.sflag [#allocation5], %s8865_s29 }
 0xa40   : > { %p11055_p5 = pnand %p11066_p6, %p19596_p9 }
 0xa42   : > { %11286 = dma.done.wait (!%p11055_p5), %s8866_s17, 256  }
 0xa43   : > { %11288 = vsyncadd (!%p11055_p5), %s8866_s17, 4294967040  ;;  %s19597_s20 = sld [smem:[#allocation19_spill]]  ;;  %s19598_s21 = sld [smem:[#allocation17_spill]] }
 0xa44   : > { %s19599_s19 = sld [smem:[#allocation20_spill]]  ;;  %s19600_s17 = smov %s11295_s18 }
 0xa49   : > { %p24_p0 = scmp.ge.s32.totalorder %s19597_s20, 4   ;;  %s19601_s18 = smov %s19598_s21 }
 0xa4b   :  { %26 = sbr.rel (!%p24_p0) target bundleno = 8 (0x8), region = 116 }
 0xa52   :  { %8871 = vsyncpa [#allocation4], 1 }
 0xa53   :  { %8873 = vsyncpa [#allocation4 + $0x1], 1 }
 0xa54   :  { %8874 = vsyncpa [#allocation7], 1 }
 0xa55   :  { %8875 = vsyncpa [#allocation10], 1 }
 0xa56   :  { %8876 = vsyncpa [#allocation5], 1 }
 0xa57   :  { %8878 = vsyncpa [#allocation5 + $0x1], 1 }

</bundles_post_ra>
